<compile_context>
chip_gen: v7x
topology: tpu7x:2x2x1
jax: 0.10.0
libtpu: 0.0.40
codegen_flags: <defaults>
</compile_context>

<pallas_src>
import jax
import jax.numpy as jnp
from jax.experimental import pallas as pl
from jax.experimental.pallas import tpu as pltpu

EPS = 1e-5
TM = 256  # rows of the im2col matrix per tile; 256 fills the v6e/v7x 256x256 MXU.


# ---------------------------------------------------------------------------
# Pass 1: conv tile (bf16 MXU matmul, f32 accumulate) + per-channel sum / sumsq
# ---------------------------------------------------------------------------
def _matmul_stats_kernel(p_ref, w_ref, y_ref, stats_ref):
    y = jnp.dot(p_ref[...], w_ref[...], preferred_element_type=jnp.float32)
    y_ref[...] = y.astype(y_ref.dtype)

    # Single-pass BN statistics on the f32 accumulator (padded rows are all-zero
    # and contribute nothing). Row 0 = sum, row 1 = sum of squares.
    s = jnp.sum(y, axis=0, keepdims=True)          # (1, Cout)
    ss = jnp.sum(y * y, axis=0, keepdims=True)     # (1, Cout)
    row = jax.lax.broadcasted_iota(jnp.int32, (8, s.shape[1]), 0)
    stats_ref[...] = jnp.where(row == 0, s, jnp.where(row == 1, ss, 0.0))


# ---------------------------------------------------------------------------
# Pass 2: folded BN (single scale/shift) + ReLU
# ---------------------------------------------------------------------------
def _bn_relu_kernel(y_ref, scale_ref, shift_ref, o_ref):
    y = y_ref[...].astype(jnp.float32)
    o = jnp.maximum(y * scale_ref[...] + shift_ref[...], 0.0)
    o_ref[...] = o.astype(o_ref.dtype)


def conv_bn_relu(patches, w, gamma, beta, m_true, out_dtype):
    """ReLU(BN(patches @ w)) with training-mode batch statistics.

    patches: [M_pad, K] bf16 (rows >= m_true are zero padding)
    w:       [K, Cout] bf16 (Cout lane-dense, padded channels have gamma=0)
    gamma/beta: [Cout] f32
    """
    m_pad, k = patches.shape
    cout = w.shape[1]
    grid_m = m_pad // TM

    y, stats = pl.pallas_call(
        _matmul_stats_kernel,
        out_shape=(
            jax.ShapeDtypeStruct((m_pad, cout), jnp.bfloat16),
            jax.ShapeDtypeStruct((grid_m * 8, cout), jnp.float32),
        ),
        grid=(grid_m,),
        in_specs=[
            pl.BlockSpec((TM, k), lambda i: (i, 0)),
            pl.BlockSpec((k, cout), lambda i: (0, 0)),   # weights stay resident
        ],
        out_specs=(
            pl.BlockSpec((TM, cout), lambda i: (i, 0)),
            pl.BlockSpec((8, cout), lambda i: (i, 0)),
        ),
        compiler_params=pltpu.CompilerParams(dimension_semantics=("parallel",)),
    )(patches, w)

    # Combine the tiny per-tile stats and fold BN into a single scale/shift.
    stats = stats.reshape(grid_m, 8, cout)
    total = jnp.sum(stats[:, 0, :], axis=0)
    total_sq = jnp.sum(stats[:, 1, :], axis=0)
    mean = total / m_true
    var = jnp.maximum(total_sq / m_true - mean * mean, 0.0)   # biased variance
    scale = gamma * jax.lax.rsqrt(var + EPS)
    shift = beta - mean * scale

    out = pl.pallas_call(
        _bn_relu_kernel,
        out_shape=jax.ShapeDtypeStruct((m_pad, cout), out_dtype),
        grid=(grid_m,),
        in_specs=[
            pl.BlockSpec((TM, cout), lambda i: (i, 0)),
            pl.BlockSpec((1, cout), lambda i: (0, 0)),
            pl.BlockSpec((1, cout), lambda i: (0, 0)),
        ],
        out_specs=pl.BlockSpec((TM, cout), lambda i: (i, 0)),
        compiler_params=pltpu.CompilerParams(dimension_semantics=("parallel",)),
    )(y, scale[None, :], shift[None, :])
    return out


# ---------------------------------------------------------------------------
# Host-side glue
# ---------------------------------------------------------------------------
def im2col(x_nhwc, kh, kw, pad):
    x = jnp.pad(x_nhwc, ((0, 0), (pad, pad), (pad, pad), (0, 0)))
    n, h, w, c = x.shape
    oh, ow = h - kh + 1, w - kw + 1
    cols = []
    for i in range(kh):
        for j in range(kw):
            cols.append(x[:, i:i + oh, j:j + ow, :])
    # feature order (kh, kw, cin) -> matches the weight transpose in init_params
    p = jnp.concatenate(cols, axis=-1)
    return p.reshape(n * oh * ow, kh * kw * c), (n, oh, ow)


def _pad_rows(p, multiple):
    m = p.shape[0]
    m_pad = ((m + multiple - 1) // multiple) * multiple
    if m_pad != m:
        p = jnp.pad(p, ((0, m_pad - m), (0, 0)))
    return p


def init_params(key):
    k0, k1 = jax.random.split(key, 2)

    def xavier_w(k, cout, cin, kh, kw, cout_pad):
        fan_in, fan_out = cin * kh * kw, cout * kh * kw
        std = (2.0 / (fan_in + fan_out)) ** 0.5
        w = jax.random.normal(k, (cout, cin, kh, kw), jnp.float32) * std
        # [Cout, Cin, KH, KW] -> [KH*KW*Cin, Cout] to match im2col feature order.
        w = jnp.transpose(w, (2, 3, 1, 0)).reshape(kh * kw * cin, cout)
        if cout_pad != cout:
            w = jnp.pad(w, ((0, 0), (0, cout_pad - cout)))
        return w.astype(jnp.bfloat16)

    def bn_params(cout, cout_pad):
        g = jnp.pad(jnp.ones((cout,), jnp.float32), (0, cout_pad - cout))
        b = jnp.zeros((cout_pad,), jnp.float32)
        return g, b

    g1, be1 = bn_params(192, 256)   # conv3 Cout padded 192 -> 256 (lane-dense)
    g2, be2 = bn_params(384, 384)
    return dict(
        # Conv biases omitted: cancelled exactly by training-mode BatchNorm.
        w3=xavier_w(k0, 192, 96, 4, 4, 256),
        g1=g1, be1=be1,
        w4=xavier_w(k1, 384, 192, 4, 4, 384),
        g2=g2, be2=be2,
    )


@jax.jit
def cnn_block2(x_nchw, params):
    x = jnp.transpose(x_nchw, (0, 2, 3, 1)).astype(jnp.bfloat16)  # NCHW -> NHWC bf16

    # conv3(96->192, k=4, pad=1) + BN1 + ReLU   (Cout padded to 256, sliced after)
    p1, (n, oh1, ow1) = im2col(x, 4, 4, 1)
    m1 = p1.shape[0]
    y1 = conv_bn_relu(_pad_rows(p1, TM), params["w3"], params["g1"], params["be1"],
                      m1, jnp.bfloat16)
    y1 = y1[:m1, :192].reshape(n, oh1, ow1, 192)

    # conv4(192->384, k=4, pad=1) + BN2 + ReLU (ReLU commutes with max-pool)
    p2, (_, oh2, ow2) = im2col(y1, 4, 4, 1)
    m2 = p2.shape[0]
    y2 = conv_bn_relu(_pad_rows(p2, TM), params["w4"], params["g2"], params["be2"],
                      m2, jnp.float32)
    y2 = y2[:m2].reshape(n, oh2, ow2, 384)

    # F.relu(F.max_pool2d(x, 2)) == max_pool2d(relu(x), 2); ReLU already fused.
    ph, pw = oh2 // 2, ow2 // 2
    y2 = y2[:, :ph * 2, :pw * 2, :].reshape(n, ph, 2, pw, 2, 384).max(axis=(2, 4))

    return jnp.transpose(y2, (0, 3, 1, 2))  # NHWC -> NCHW


if __name__ == "__main__":
    key = jax.random.PRNGKey(0)
    kx, kp = jax.random.split(key)
    # Small input consistent with the module: Cin must be 96.
    x = jax.random.normal(kx, (2, 96, 10, 10), jnp.float32)
    params = init_params(kp)

    out = cnn_block2(x, params)
    out = jax.block_until_ready(out)

    # conv3: 10 -> 9, conv4: 9 -> 8, maxpool2: 8 -> 4
    assert out.shape == (2, 384, 4, 4), out.shape
    assert out.dtype == jnp.float32
    assert bool(jnp.all(jnp.isfinite(out)))
    assert bool(jnp.all(out >= 0.0))  # ReLU output
    print("KERNEL_OK")
</pallas_src>

<mosaic_0001>
module attributes {stable_mosaic.version = 11 : i64} {
  func.func @_matmul_stats_kernel(%arg0: i32, %arg1: memref<256x1536xbf16, #tpu.memory_space<vmem>>, %arg2: memref<1536x256xbf16, #tpu.memory_space<vmem>>, %arg3: memref<256x256xbf16, #tpu.memory_space<vmem>>, %arg4: memref<8x256xf32, #tpu.memory_space<vmem>>) attributes {dimension_semantics = [#tpu.dimension_semantics<parallel>], iteration_bounds = array<i64: 1>, scalar_prefetch = 0 : i64, scratch_operands = 0 : i64, tpu.core_type = #tpu.core_type<tc>, window_params = [{transform_indices = @transform_0, window_bounds = array<i64: 256, 1536>}, {pipeline_mode = #tpu.pipeline_mode<synchronous>, transform_indices = @transform_1, window_bounds = array<i64: 1536, 256>}, {transform_indices = @transform_2, window_bounds = array<i64: 256, 256>}, {transform_indices = @transform_3, window_bounds = array<i64: 8, 256>}]} {
    %c0 = arith.constant 0 : index
    %c0_0 = arith.constant 0 : index
    %0 = vector.load %arg1[%c0, %c0_0] : memref<256x1536xbf16, #tpu.memory_space<vmem>>, vector<256x1536xbf16>
    %c0_1 = arith.constant 0 : index
    %c0_2 = arith.constant 0 : index
    %1 = vector.load %arg2[%c0_1, %c0_2] : memref<1536x256xbf16, #tpu.memory_space<vmem>>, vector<1536x256xbf16>
    %cst = arith.constant dense<0.000000e+00> : vector<256x256xf32>
    %2 = tpu.matmul %0, %1, %cst {dimension_numbers = #tpu.dot_dimension_numbers<[1], [0], [0], [1], [0, 0, 1, 1], [], []>} : vector<256x1536xbf16>, vector<1536x256xbf16>, vector<256x256xf32> -> vector<256x256xf32>
    %3 = arith.truncf %2 : vector<256x256xf32> to vector<256x256xbf16>
    %c0_3 = arith.constant 0 : index
    %c0_4 = arith.constant 0 : index
    %4 = vector.load %arg3[%c0_3, %c0_4] : memref<256x256xbf16, #tpu.memory_space<vmem>>, vector<256x256xbf16>
    tpu.vector_store %arg3[%c0_3, %c0_4], %3 {strides = array<i32>} : memref<256x256xbf16, #tpu.memory_space<vmem>>, vector<256x256xbf16>,
    %cst_5 = arith.constant dense<0.000000e+00> : vector<256xf32>
    %5 = vector.multi_reduction <add>, %2, %cst_5 [0] : vector<256x256xf32> to vector<256xf32>
    %6 = vector.shape_cast %5 : vector<256xf32> to vector<1x256xf32>
    %7 = arith.mulf %2, %2 : vector<256x256xf32>
    %cst_6 = arith.constant dense<0.000000e+00> : vector<256xf32>
    %8 = vector.multi_reduction <add>, %7, %cst_6 [0] : vector<256x256xf32> to vector<256xf32>
    %9 = vector.shape_cast %8 : vector<256xf32> to vector<1x256xf32>
    %10 = tpu.iota {dimensions = array<i32: 0>} : vector<8x256xi32>
    %c0_i32 = arith.constant 0 : i32
    %11 = vector.broadcast %c0_i32 : i32 to vector<8x256xi32>
    %12 = arith.cmpi eq, %10, %11 : vector<8x256xi32>
    %c1_i32 = arith.constant 1 : i32
    %13 = vector.broadcast %c1_i32 : i32 to vector<8x256xi32>
    %14 = arith.cmpi eq, %10, %13 : vector<8x256xi32>
    %cst_7 = arith.constant 0.000000e+00 : f32
    %15 = vector.shape_cast %9 : vector<1x256xf32> to vector<1x256xf32>
    %16 = vector.broadcast %15 : vector<1x256xf32> to vector<8x256xf32>
    %17 = vector.broadcast %cst_7 : f32 to vector<8x256xf32>
    %18 = arith.select %14, %16, %17 : vector<8x256xi1>, vector<8x256xf32>
    %19 = vector.shape_cast %6 : vector<1x256xf32> to vector<1x256xf32>
    %20 = vector.broadcast %19 : vector<1x256xf32> to vector<8x256xf32>
    %21 = arith.select %12, %20, %18 : vector<8x256xi1>, vector<8x256xf32>
    %c0_8 = arith.constant 0 : index
    %c0_9 = arith.constant 0 : index
    %22 = vector.load %arg4[%c0_8, %c0_9] : memref<8x256xf32, #tpu.memory_space<vmem>>, vector<8x256xf32>
    tpu.vector_store %arg4[%c0_8, %c0_9], %21 {strides = array<i32>} : memref<8x256xf32, #tpu.memory_space<vmem>>, vector<8x256xf32>,
    return
  }
  func.func @transform_0(%arg0: i32) -> (i32, i32) {
    %c0_i32 = arith.constant 0 : i32
    %c0_i32_0 = arith.constant 0 : i32
    return %arg0, %c0_i32 : i32, i32
  }
  func.func @transform_1(%arg0: i32) -> (i32, i32) {
    %c0_i32 = arith.constant 0 : i32
    %c0_i32_0 = arith.constant 0 : i32
    %c0_i32_1 = arith.constant 0 : i32
    return %c0_i32, %c0_i32_0 : i32, i32
  }
  func.func @transform_2(%arg0: i32) -> (i32, i32) {
    %c0_i32 = arith.constant 0 : i32
    %c0_i32_0 = arith.constant 0 : i32
    return %arg0, %c0_i32 : i32, i32
  }
  func.func @transform_3(%arg0: i32) -> (i32, i32) {
    %c0_i32 = arith.constant 0 : i32
    %c0_i32_0 = arith.constant 0 : i32
    return %arg0, %c0_i32 : i32, i32
  }
}

module attributes {stable_mosaic.version = 11 : i64} {
  func.func @_bn_relu_kernel(%arg0: i32, %arg1: memref<256x256xbf16, #tpu.memory_space<vmem>>, %arg2: memref<1x256xf32, #tpu.memory_space<vmem>>, %arg3: memref<1x256xf32, #tpu.memory_space<vmem>>, %arg4: memref<256x256xbf16, #tpu.memory_space<vmem>>) attributes {dimension_semantics = [#tpu.dimension_semantics<parallel>], iteration_bounds = array<i64: 1>, scalar_prefetch = 0 : i64, scratch_operands = 0 : i64, tpu.core_type = #tpu.core_type<tc>, window_params = [{transform_indices = @transform_0, window_bounds = array<i64: 256, 256>}, {pipeline_mode = #tpu.pipeline_mode<synchronous>, transform_indices = @transform_1, window_bounds = array<i64: 1, 256>}, {pipeline_mode = #tpu.pipeline_mode<synchronous>, transform_indices = @transform_2, window_bounds = array<i64: 1, 256>}, {transform_indices = @transform_3, window_bounds = array<i64: 256, 256>}]} {
    %c0 = arith.constant 0 : index
    %c0_0 = arith.constant 0 : index
    %0 = vector.load %arg1[%c0, %c0_0] : memref<256x256xbf16, #tpu.memory_space<vmem>>, vector<256x256xbf16>
    %1 = arith.extf %0 : vector<256x256xbf16> to vector<256x256xf32>
    %c0_1 = arith.constant 0 : index
    %c0_2 = arith.constant 0 : index
    %2 = vector.load %arg2[%c0_1, %c0_2] : memref<1x256xf32, #tpu.memory_space<vmem>>, vector<1x256xf32>
    %3 = vector.broadcast %2 : vector<1x256xf32> to vector<256x256xf32>
    %4 = arith.mulf %1, %3 : vector<256x256xf32>
    %c0_3 = arith.constant 0 : index
    %c0_4 = arith.constant 0 : index
    %5 = vector.load %arg3[%c0_3, %c0_4] : memref<1x256xf32, #tpu.memory_space<vmem>>, vector<1x256xf32>
    %6 = vector.broadcast %5 : vector<1x256xf32> to vector<256x256xf32>
    %7 = arith.addf %4, %6 : vector<256x256xf32>
    %cst = arith.constant 0.000000e+00 : f32
    %8 = vector.broadcast %cst : f32 to vector<256x256xf32>
    %9 = arith.maximumf %7, %8 : vector<256x256xf32>
    %10 = arith.truncf %9 : vector<256x256xf32> to vector<256x256xbf16>
    %c0_5 = arith.constant 0 : index
    %c0_6 = arith.constant 0 : index
    %11 = vector.load %arg4[%c0_5, %c0_6] : memref<256x256xbf16, #tpu.memory_space<vmem>>, vector<256x256xbf16>
    tpu.vector_store %arg4[%c0_5, %c0_6], %10 {strides = array<i32>} : memref<256x256xbf16, #tpu.memory_space<vmem>>, vector<256x256xbf16>,
    return
  }
  func.func @transform_0(%arg0: i32) -> (i32, i32) {
    %c0_i32 = arith.constant 0 : i32
    %c0_i32_0 = arith.constant 0 : i32
    return %arg0, %c0_i32 : i32, i32
  }
  func.func @transform_1(%arg0: i32) -> (i32, i32) {
    %c0_i32 = arith.constant 0 : i32
    %c0_i32_0 = arith.constant 0 : i32
    %c0_i32_1 = arith.constant 0 : i32
    return %c0_i32, %c0_i32_0 : i32, i32
  }
  func.func @transform_2(%arg0: i32) -> (i32, i32) {
    %c0_i32 = arith.constant 0 : i32
    %c0_i32_0 = arith.constant 0 : i32
    %c0_i32_1 = arith.constant 0 : i32
    return %c0_i32, %c0_i32_0 : i32, i32
  }
  func.func @transform_3(%arg0: i32) -> (i32, i32) {
    %c0_i32 = arith.constant 0 : i32
    %c0_i32_0 = arith.constant 0 : i32
    return %arg0, %c0_i32 : i32, i32
  }
}

module attributes {stable_mosaic.version = 11 : i64} {
  func.func @_matmul_stats_kernel(%arg0: i32, %arg1: memref<256x3072xbf16, #tpu.memory_space<vmem>>, %arg2: memref<3072x384xbf16, #tpu.memory_space<vmem>>, %arg3: memref<256x384xbf16, #tpu.memory_space<vmem>>, %arg4: memref<8x384xf32, #tpu.memory_space<vmem>>) attributes {dimension_semantics = [#tpu.dimension_semantics<parallel>], iteration_bounds = array<i64: 1>, scalar_prefetch = 0 : i64, scratch_operands = 0 : i64, tpu.core_type = #tpu.core_type<tc>, window_params = [{transform_indices = @transform_0, window_bounds = array<i64: 256, 3072>}, {pipeline_mode = #tpu.pipeline_mode<synchronous>, transform_indices = @transform_1, window_bounds = array<i64: 3072, 384>}, {transform_indices = @transform_2, window_bounds = array<i64: 256, 384>}, {transform_indices = @transform_3, window_bounds = array<i64: 8, 384>}]} {
    %c0 = arith.constant 0 : index
    %c0_0 = arith.constant 0 : index
    %0 = vector.load %arg1[%c0, %c0_0] : memref<256x3072xbf16, #tpu.memory_space<vmem>>, vector<256x3072xbf16>
    %c0_1 = arith.constant 0 : index
    %c0_2 = arith.constant 0 : index
    %1 = vector.load %arg2[%c0_1, %c0_2] : memref<3072x384xbf16, #tpu.memory_space<vmem>>, vector<3072x384xbf16>
    %cst = arith.constant dense<0.000000e+00> : vector<256x384xf32>
    %2 = tpu.matmul %0, %1, %cst {dimension_numbers = #tpu.dot_dimension_numbers<[1], [0], [0], [1], [0, 0, 1, 1], [], []>} : vector<256x3072xbf16>, vector<3072x384xbf16>, vector<256x384xf32> -> vector<256x384xf32>
    %3 = arith.truncf %2 : vector<256x384xf32> to vector<256x384xbf16>
    %c0_3 = arith.constant 0 : index
    %c0_4 = arith.constant 0 : index
    %4 = vector.load %arg3[%c0_3, %c0_4] : memref<256x384xbf16, #tpu.memory_space<vmem>>, vector<256x384xbf16>
    tpu.vector_store %arg3[%c0_3, %c0_4], %3 {strides = array<i32>} : memref<256x384xbf16, #tpu.memory_space<vmem>>, vector<256x384xbf16>,
    %cst_5 = arith.constant dense<0.000000e+00> : vector<384xf32>
    %5 = vector.multi_reduction <add>, %2, %cst_5 [0] : vector<256x384xf32> to vector<384xf32>
    %6 = vector.shape_cast %5 : vector<384xf32> to vector<1x384xf32>
    %7 = arith.mulf %2, %2 : vector<256x384xf32>
    %cst_6 = arith.constant dense<0.000000e+00> : vector<384xf32>
    %8 = vector.multi_reduction <add>, %7, %cst_6 [0] : vector<256x384xf32> to vector<384xf32>
    %9 = vector.shape_cast %8 : vector<384xf32> to vector<1x384xf32>
    %10 = tpu.iota {dimensions = array<i32: 0>} : vector<8x384xi32>
    %c0_i32 = arith.constant 0 : i32
    %11 = vector.broadcast %c0_i32 : i32 to vector<8x384xi32>
    %12 = arith.cmpi eq, %10, %11 : vector<8x384xi32>
    %c1_i32 = arith.constant 1 : i32
    %13 = vector.broadcast %c1_i32 : i32 to vector<8x384xi32>
    %14 = arith.cmpi eq, %10, %13 : vector<8x384xi32>
    %cst_7 = arith.constant 0.000000e+00 : f32
    %15 = vector.shape_cast %9 : vector<1x384xf32> to vector<1x384xf32>
    %16 = vector.broadcast %15 : vector<1x384xf32> to vector<8x384xf32>
    %17 = vector.broadcast %cst_7 : f32 to vector<8x384xf32>
    %18 = arith.select %14, %16, %17 : vector<8x384xi1>, vector<8x384xf32>
    %19 = vector.shape_cast %6 : vector<1x384xf32> to vector<1x384xf32>
    %20 = vector.broadcast %19 : vector<1x384xf32> to vector<8x384xf32>
    %21 = arith.select %12, %20, %18 : vector<8x384xi1>, vector<8x384xf32>
    %c0_8 = arith.constant 0 : index
    %c0_9 = arith.constant 0 : index
    %22 = vector.load %arg4[%c0_8, %c0_9] : memref<8x384xf32, #tpu.memory_space<vmem>>, vector<8x384xf32>
    tpu.vector_store %arg4[%c0_8, %c0_9], %21 {strides = array<i32>} : memref<8x384xf32, #tpu.memory_space<vmem>>, vector<8x384xf32>,
    return
  }
  func.func @transform_0(%arg0: i32) -> (i32, i32) {
    %c0_i32 = arith.constant 0 : i32
    %c0_i32_0 = arith.constant 0 : i32
    return %arg0, %c0_i32 : i32, i32
  }
  func.func @transform_1(%arg0: i32) -> (i32, i32) {
    %c0_i32 = arith.constant 0 : i32
    %c0_i32_0 = arith.constant 0 : i32
    %c0_i32_1 = arith.constant 0 : i32
    return %c0_i32, %c0_i32_0 : i32, i32
  }
  func.func @transform_2(%arg0: i32) -> (i32, i32) {
    %c0_i32 = arith.constant 0 : i32
    %c0_i32_0 = arith.constant 0 : i32
    return %arg0, %c0_i32 : i32, i32
  }
  func.func @transform_3(%arg0: i32) -> (i32, i32) {
    %c0_i32 = arith.constant 0 : i32
    %c0_i32_0 = arith.constant 0 : i32
    return %arg0, %c0_i32 : i32, i32
  }
}

module attributes {stable_mosaic.version = 11 : i64} {
  func.func @_bn_relu_kernel(%arg0: i32, %arg1: memref<256x384xbf16, #tpu.memory_space<vmem>>, %arg2: memref<1x384xf32, #tpu.memory_space<vmem>>, %arg3: memref<1x384xf32, #tpu.memory_space<vmem>>, %arg4: memref<256x384xf32, #tpu.memory_space<vmem>>) attributes {dimension_semantics = [#tpu.dimension_semantics<parallel>], iteration_bounds = array<i64: 1>, scalar_prefetch = 0 : i64, scratch_operands = 0 : i64, tpu.core_type = #tpu.core_type<tc>, window_params = [{transform_indices = @transform_0, window_bounds = array<i64: 256, 384>}, {pipeline_mode = #tpu.pipeline_mode<synchronous>, transform_indices = @transform_1, window_bounds = array<i64: 1, 384>}, {pipeline_mode = #tpu.pipeline_mode<synchronous>, transform_indices = @transform_2, window_bounds = array<i64: 1, 384>}, {transform_indices = @transform_3, window_bounds = array<i64: 256, 384>}]} {
    %c0 = arith.constant 0 : index
    %c0_0 = arith.constant 0 : index
    %0 = vector.load %arg1[%c0, %c0_0] : memref<256x384xbf16, #tpu.memory_space<vmem>>, vector<256x384xbf16>
    %1 = arith.extf %0 : vector<256x384xbf16> to vector<256x384xf32>
    %c0_1 = arith.constant 0 : index
    %c0_2 = arith.constant 0 : index
    %2 = vector.load %arg2[%c0_1, %c0_2] : memref<1x384xf32, #tpu.memory_space<vmem>>, vector<1x384xf32>
    %3 = vector.broadcast %2 : vector<1x384xf32> to vector<256x384xf32>
    %4 = arith.mulf %1, %3 : vector<256x384xf32>
    %c0_3 = arith.constant 0 : index
    %c0_4 = arith.constant 0 : index
    %5 = vector.load %arg3[%c0_3, %c0_4] : memref<1x384xf32, #tpu.memory_space<vmem>>, vector<1x384xf32>
    %6 = vector.broadcast %5 : vector<1x384xf32> to vector<256x384xf32>
    %7 = arith.addf %4, %6 : vector<256x384xf32>
    %cst = arith.constant 0.000000e+00 : f32
    %8 = vector.broadcast %cst : f32 to vector<256x384xf32>
    %9 = arith.maximumf %7, %8 : vector<256x384xf32>
    %c0_5 = arith.constant 0 : index
    %c0_6 = arith.constant 0 : index
    %10 = vector.load %arg4[%c0_5, %c0_6] : memref<256x384xf32, #tpu.memory_space<vmem>>, vector<256x384xf32>
    tpu.vector_store %arg4[%c0_5, %c0_6], %9 {strides = array<i32>} : memref<256x384xf32, #tpu.memory_space<vmem>>, vector<256x384xf32>,
    return
  }
  func.func @transform_0(%arg0: i32) -> (i32, i32) {
    %c0_i32 = arith.constant 0 : i32
    %c0_i32_0 = arith.constant 0 : i32
    return %arg0, %c0_i32 : i32, i32
  }
  func.func @transform_1(%arg0: i32) -> (i32, i32) {
    %c0_i32 = arith.constant 0 : i32
    %c0_i32_0 = arith.constant 0 : i32
    %c0_i32_1 = arith.constant 0 : i32
    return %c0_i32, %c0_i32_0 : i32, i32
  }
  func.func @transform_2(%arg0: i32) -> (i32, i32) {
    %c0_i32 = arith.constant 0 : i32
    %c0_i32_0 = arith.constant 0 : i32
    %c0_i32_1 = arith.constant 0 : i32
    return %c0_i32, %c0_i32_0 : i32, i32
  }
  func.func @transform_3(%arg0: i32) -> (i32, i32) {
    %c0_i32 = arith.constant 0 : i32
    %c0_i32_0 = arith.constant 0 : i32
    return %arg0, %c0_i32 : i32, i32
  }
}

</mosaic_0001>

<bundles_post_ra>
// kernel: cnn_block2.5
= control target key start
LH: loop header
LB: loop body
LE: loop exit
PB: predicated region body
PF: predicated region fallthrough
CT: control target
= control target key end

     0   :  { %v112_v0 = vlaneseq  ;;  %s972_s0 = inlined_call_operand.vmem [shape: bf16[256,256], index: 0, kind: input, shape index: {}]   ;;  %s973_s1 = inlined_call_operand.vmem [shape: f32[1,256], index: 1, kind: input, shape index: {}]   ;;  %s974_s2 = inlined_call_operand.vmem [shape: f32[1,256], index: 2, kind: input, shape index: {}]   ;;  %s975_s3 = inlined_call_operand.vmem [shape: bf16[256,256], index: 3, kind: output, shape index: {}]  }
   0x1   :  { %v14_v1 = vld [vmem:[%s972_s0] sm:$0xff]  ;;  %v15_v6 = vld [vmem:[%s972_s0 + $0x8] sm:$0xff]  ;;  %v16_v7 = vld [vmem:[%s972_s0 + $0x10] sm:$0xff] }
   0x2   :  { %v110_v2 = vld [vmem:[%s973_s1] sm:$0x3]  ;;  %v46_v3 = vunpack.c.l.bf16 %v14_v1  ;;  %v47_v4 = vunpack.c.h.bf16 %v14_v1  ;;  %v113_v5 = vshrl.u32 %v112_v0, 7  ;;  %v17_v8 = vld [vmem:[%s972_s0 + $0x18] sm:$0xff]  ;;  %v48_v10 = vunpack.c.l.bf16 %v15_v6  ;;  %v19_v15 = vld [vmem:[%s972_s0 + $0x28] sm:$0xff] }
   0x3   :  { %v186_v9 = vld [vmem:[%s974_s2] sm:$0x3]  ;;  %v49_v11 = vunpack.c.h.bf16 %v15_v6  ;;  %v50_v12 = vunpack.c.l.bf16 %v16_v7  ;;  %v51_v13 = vunpack.c.h.bf16 %v16_v7  ;;  %v52_v18 = vunpack.c.l.bf16 %v17_v8  ;;  %v20_v20 = vld [vmem:[%s972_s0 + $0x30] sm:$0xff]  ;;  %v21_v21 = vld [vmem:[%s972_s0 + $0x38] sm:$0xff] }
   0x4   :  { %v18_v14 = vld [vmem:[%s972_s0 + $0x20] sm:$0xff]  ;;  %v114_v16 = vsub.s32 0, %v113_v5  ;;  %v118_v17 = vsub.s32 1, %v113_v5  ;;  %v53_v19 = vunpack.c.h.bf16 %v17_v8  ;;  %v56_v24 = vunpack.c.l.bf16 %v19_v15 }
   0x5   :  { %v54_v22 = vunpack.c.l.bf16 %v18_v14  ;;  %v55_v23 = vunpack.c.h.bf16 %v18_v14  ;;  %v57_v25 = vunpack.c.h.bf16 %v19_v15  ;;  %v58_v30 = vunpack.c.l.bf16 %v20_v20 }
   0x6   :  { %v668_v26 = vrot.slane %v110_v2, %v114_v16  ;;  %v670_v27 = vrot.slane %v110_v2, %v118_v17  ;;  %v672_v28 = vrot.slane %v186_v9, %v114_v16  ;;  %v674_v29 = vrot.slane %v186_v9, %v118_v17 }
   0x7   :  { %v59_v31 = vunpack.c.h.bf16 %v20_v20  ;;  %v60_v32 = vunpack.c.l.bf16 %v21_v21  ;;  %v61_v33 = vunpack.c.h.bf16 %v21_v21 }
   0x8   :  { %v122_v34 = vmul.f32 %v668_v26, %v46_v3  ;;  %v123_v35 = vmul.f32 %v670_v27, %v47_v4  ;;  %v124_v36 = vmul.f32 %v668_v26, %v48_v10  ;;  %v125_v37 = vmul.f32 %v670_v27, %v49_v11  ;;  %v22_v10 = vld [vmem:[%s972_s0 + $0x40] sm:$0xff] }
   0x9   :  { %v126_v38 = vmul.f32 %v668_v26, %v50_v12  ;;  %v127_v39 = vmul.f32 %v670_v27, %v51_v13  ;;  %v128_v40 = vmul.f32 %v668_v26, %v52_v18  ;;  %v129_v41 = vmul.f32 %v670_v27, %v53_v19  ;;  %v23_v19 = vld [vmem:[%s972_s0 + $0x48] sm:$0xff] }
   0xa   :  { %v198_v42 = vadd.f32 %v672_v28, %v122_v34  ;;  %v199_v43 = vadd.f32 %v674_v29, %v123_v35  ;;  %v200_v44 = vadd.f32 %v672_v28, %v124_v36  ;;  %v201_v45 = vadd.f32 %v674_v29, %v125_v37 }
   0xb   :  { %v202_v46 = vadd.f32 %v672_v28, %v126_v38  ;;  %v203_v47 = vadd.f32 %v674_v29, %v127_v39  ;;  %v204_v48 = vadd.f32 %v672_v28, %v128_v40  ;;  %v205_v49 = vadd.f32 %v674_v29, %v129_v41 }
   0xc   :  { %v262_v50 = vmax.f32 %v198_v42, 0.0  ;;  %v263_v51 = vmax.f32 %v199_v43, 0.0  ;;  %v264_v52 = vmax.f32 %v200_v44, 0.0  ;;  %v265_v53 = vmax.f32 %v201_v45, 0.0 }
   0xd   :  { %v266_v54 = vmax.f32 %v202_v46, 0.0  ;;  %v267_v55 = vmax.f32 %v203_v47, 0.0  ;;  %v268_v56 = vmax.f32 %v204_v48, 0.0  ;;  %v269_v57 = vmax.f32 %v205_v49, 0.0 }
   0xe   :  { %v586_v58 = vpack.c.bf16 %v263_v51, %v262_v50  ;;  %v587_v59 = vpack.c.bf16 %v265_v53, %v264_v52  ;;  %v130_v60 = vmul.f32 %v668_v26, %v54_v22  ;;  %v131_v61 = vmul.f32 %v670_v27, %v55_v23  ;;  %v26_v50 = vld [vmem:[%s972_s0 + $0x60] sm:$0xff] }
   0xf   :  { %v588_v62 = vpack.c.bf16 %v267_v55, %v266_v54  ;;  %v589_v63 = vpack.c.bf16 %v269_v57, %v268_v56  ;;  %v132_v0 = vmul.f32 %v668_v26, %v56_v24  ;;  %v133_v1 = vmul.f32 %v670_v27, %v57_v25  ;;  %v24_v24 = vld [vmem:[%s972_s0 + $0x50] sm:$0xff] }
  0x10   :  { %518 = vst [vmem:[%s975_s3] sm:$0xff] %v586_v58  ;;  %519 = vst [vmem:[%s975_s3 + $0x8] sm:$0xff] %v587_v59  ;;  %v206_v2 = vadd.f32 %v672_v28, %v130_v60  ;;  %v207_v3 = vadd.f32 %v674_v29, %v131_v61  ;;  %v134_v4 = vmul.f32 %v668_v26, %v58_v30  ;;  %v62_v23 = vunpack.c.l.bf16 %v22_v10 }
  0x11   :  { %v135_v5 = vmul.f32 %v670_v27, %v59_v31  ;;  %520 = vst [vmem:[%s975_s3 + $0x10] sm:$0xff] %v588_v62  ;;  %521 = vst [vmem:[%s975_s3 + $0x18] sm:$0xff] %v589_v63  ;;  %v208_v6 = vadd.f32 %v672_v28, %v132_v0  ;;  %v209_v7 = vadd.f32 %v674_v29, %v133_v1  ;;  %v64_v36 = vunpack.c.l.bf16 %v23_v19  ;;  %v27_v63 = vld [vmem:[%s972_s0 + $0x68] sm:$0xff] }
  0x12   :  { %v136_v8 = vmul.f32 %v668_v26, %v60_v32  ;;  %v137_v9 = vmul.f32 %v670_v27, %v61_v33  ;;  %v270_v11 = vmax.f32 %v206_v2, 0.0  ;;  %v271_v12 = vmax.f32 %v207_v3, 0.0  ;;  %v25_v33 = vld [vmem:[%s972_s0 + $0x58] sm:$0xff] }
  0x13   :  { %v210_v13 = vadd.f32 %v672_v28, %v134_v4  ;;  %v211_v14 = vadd.f32 %v674_v29, %v135_v5  ;;  %v272_v15 = vmax.f32 %v208_v6, 0.0  ;;  %v273_v16 = vmax.f32 %v209_v7, 0.0  ;;  %v28_v4 = vld [vmem:[%s972_s0 + $0x70] sm:$0xff] }
  0x14   :  { %v212_v17 = vadd.f32 %v672_v28, %v136_v8  ;;  %v213_v18 = vadd.f32 %v674_v29, %v137_v9  ;;  %v590_v20 = vpack.c.bf16 %v271_v12, %v270_v11  ;;  %v63_v32 = vunpack.c.h.bf16 %v22_v10  ;;  %v29_v9 = vld [vmem:[%s972_s0 + $0x78] sm:$0xff] }
  0x15   :  { %v274_v21 = vmax.f32 %v210_v13, 0.0  ;;  %v275_v22 = vmax.f32 %v211_v14, 0.0  ;;  %v591_v25 = vpack.c.bf16 %v273_v16, %v272_v15  ;;  %v138_v35 = vmul.f32 %v668_v26, %v62_v23 }
  0x16   :  { %v276_v30 = vmax.f32 %v212_v17, 0.0  ;;  %v277_v31 = vmax.f32 %v213_v18, 0.0  ;;  %522 = vst [vmem:[%s975_s3 + $0x20] sm:$0xff] %v590_v20  ;;  %v65_v37 = vunpack.c.h.bf16 %v23_v19  ;;  %v139_v39 = vmul.f32 %v670_v27, %v63_v32 }
  0x17   :  { %v592_v34 = vpack.c.bf16 %v275_v22, %v274_v21  ;;  %523 = vst [vmem:[%s975_s3 + $0x28] sm:$0xff] %v591_v25  ;;  %v66_v40 = vunpack.c.l.bf16 %v24_v24  ;;  %v67_v41 = vunpack.c.h.bf16 %v24_v24  ;;  %v214_v42 = vadd.f32 %v672_v28, %v138_v35  ;;  %v30_v22 = vld [vmem:[%s972_s0 + $0x80] sm:$0xff] }
  0x18   :  { %v593_v38 = vpack.c.bf16 %v277_v31, %v276_v30  ;;  %v140_v43 = vmul.f32 %v668_v26, %v64_v36  ;;  %v141_v44 = vmul.f32 %v670_v27, %v65_v37  ;;  %v68_v45 = vunpack.c.l.bf16 %v25_v33 }
  0x19   :  { %524 = vst [vmem:[%s975_s3 + $0x30] sm:$0xff] %v592_v34  ;;  %v215_v46 = vadd.f32 %v674_v29, %v139_v39  ;;  %v142_v47 = vmul.f32 %v668_v26, %v66_v40  ;;  %v143_v48 = vmul.f32 %v670_v27, %v67_v41  ;;  %v69_v49 = vunpack.c.h.bf16 %v25_v33 }
  0x1a   :  { %525 = vst [vmem:[%s975_s3 + $0x38] sm:$0xff] %v593_v38  ;;  %v278_v51 = vmax.f32 %v214_v42, 0.0  ;;  %v216_v52 = vadd.f32 %v672_v28, %v140_v43  ;;  %v217_v53 = vadd.f32 %v674_v29, %v141_v44  ;;  %v144_v54 = vmul.f32 %v668_v26, %v68_v45  ;;  %v31_v43 = vld [vmem:[%s972_s0 + $0x88] sm:$0xff] }
  0x1b   :  { %v279_v55 = vmax.f32 %v215_v46, 0.0  ;;  %v218_v56 = vadd.f32 %v672_v28, %v142_v47  ;;  %v219_v57 = vadd.f32 %v674_v29, %v143_v48  ;;  %v145_v58 = vmul.f32 %v670_v27, %v69_v49  ;;  %v32_v48 = vld [vmem:[%s972_s0 + $0x90] sm:$0xff] }
  0x1c   :  { %v280_v59 = vmax.f32 %v216_v52, 0.0  ;;  %v281_v60 = vmax.f32 %v217_v53, 0.0  ;;  %v220_v61 = vadd.f32 %v672_v28, %v144_v54  ;;  %v70_v62 = vunpack.c.l.bf16 %v26_v50  ;;  %v33_v53 = vld [vmem:[%s972_s0 + $0x98] sm:$0xff] }
  0x1d   :  { %v594_v0 = vpack.c.bf16 %v279_v55, %v278_v51  ;;  %v282_v1 = vmax.f32 %v218_v56, 0.0  ;;  %v283_v2 = vmax.f32 %v219_v57, 0.0  ;;  %v221_v3 = vadd.f32 %v674_v29, %v145_v58 }
  0x1e   :  { %v595_v5 = vpack.c.bf16 %v281_v60, %v280_v59  ;;  %v284_v6 = vmax.f32 %v220_v61, 0.0  ;;  %v71_v7 = vunpack.c.h.bf16 %v26_v50  ;;  %v146_v8 = vmul.f32 %v668_v26, %v70_v62 }
  0x1f   :  { %526 = vst [vmem:[%s975_s3 + $0x40] sm:$0xff] %v594_v0  ;;  %v596_v10 = vpack.c.bf16 %v283_v2, %v282_v1  ;;  %v285_v11 = vmax.f32 %v221_v3, 0.0  ;;  %v72_v12 = vunpack.c.l.bf16 %v27_v63  ;;  %v73_v13 = vunpack.c.h.bf16 %v27_v63  ;;  %v34_v2 = vld [vmem:[%s972_s0 + $0xa0] sm:$0xff] }
  0x20   :  { %527 = vst [vmem:[%s975_s3 + $0x48] sm:$0xff] %v595_v5  ;;  %v147_v14 = vmul.f32 %v670_v27, %v71_v7  ;;  %v222_v15 = vadd.f32 %v672_v28, %v146_v8  ;;  %v74_v16 = vunpack.c.l.bf16 %v28_v4  ;;  %v75_v17 = vunpack.c.h.bf16 %v28_v4 }
  0x21   :  { %528 = vst [vmem:[%s975_s3 + $0x50] sm:$0xff] %v596_v10  ;;  %v597_v18 = vpack.c.bf16 %v285_v11, %v284_v6  ;;  %v148_v19 = vmul.f32 %v668_v26, %v72_v12  ;;  %v149_v20 = vmul.f32 %v670_v27, %v73_v13  ;;  %v76_v21 = vunpack.c.l.bf16 %v29_v9 }
  0x22   :  { %v223_v23 = vadd.f32 %v674_v29, %v147_v14  ;;  %v286_v24 = vmax.f32 %v222_v15, 0.0  ;;  %v150_v25 = vmul.f32 %v668_v26, %v74_v16  ;;  %v151_v30 = vmul.f32 %v670_v27, %v75_v17  ;;  %v35_v15 = vld [vmem:[%s972_s0 + $0xa8] sm:$0xff] }
  0x23   :  { %529 = vst [vmem:[%s975_s3 + $0x58] sm:$0xff] %v597_v18  ;;  %v224_v31 = vadd.f32 %v672_v28, %v148_v19  ;;  %v225_v32 = vadd.f32 %v674_v29, %v149_v20  ;;  %v77_v33 = vunpack.c.h.bf16 %v29_v9  ;;  %v152_v34 = vmul.f32 %v668_v26, %v76_v21 }
  0x24   :  { %v287_v35 = vmax.f32 %v223_v23, 0.0  ;;  %v226_v36 = vadd.f32 %v672_v28, %v150_v25  ;;  %v227_v37 = vadd.f32 %v674_v29, %v151_v30  ;;  %v78_v38 = vunpack.c.l.bf16 %v30_v22 }
  0x25   :  { %v288_v39 = vmax.f32 %v224_v31, 0.0  ;;  %v289_v40 = vmax.f32 %v225_v32, 0.0  ;;  %v153_v41 = vmul.f32 %v670_v27, %v77_v33  ;;  %v228_v42 = vadd.f32 %v672_v28, %v152_v34  ;;  %v37_v33 = vld [vmem:[%s972_s0 + $0xb8] sm:$0xff] }
  0x26   :  { %v598_v44 = vpack.c.bf16 %v287_v35, %v286_v24  ;;  %v290_v45 = vmax.f32 %v226_v36, 0.0  ;;  %v291_v46 = vmax.f32 %v227_v37, 0.0  ;;  %v79_v47 = vunpack.c.h.bf16 %v30_v22  ;;  %v36_v24 = vld [vmem:[%s972_s0 + $0xb0] sm:$0xff] }
  0x27   :  { %v599_v49 = vpack.c.bf16 %v289_v40, %v288_v39  ;;  %v229_v50 = vadd.f32 %v674_v29, %v153_v41  ;;  %v292_v51 = vmax.f32 %v228_v42, 0.0  ;;  %v154_v52 = vmul.f32 %v668_v26, %v78_v38 }
  0x28   :  { %530 = vst [vmem:[%s975_s3 + $0x60] sm:$0xff] %v598_v44  ;;  %v600_v54 = vpack.c.bf16 %v291_v46, %v290_v45  ;;  %v155_v55 = vmul.f32 %v670_v27, %v79_v47  ;;  %v80_v56 = vunpack.c.l.bf16 %v31_v43  ;;  %v81_v57 = vunpack.c.h.bf16 %v31_v43  ;;  %v38_v46 = vld [vmem:[%s972_s0 + $0xc0] sm:$0xff] }
  0x29   :  { %531 = vst [vmem:[%s975_s3 + $0x68] sm:$0xff] %v599_v49  ;;  %v293_v58 = vmax.f32 %v229_v50, 0.0  ;;  %v230_v59 = vadd.f32 %v672_v28, %v154_v52  ;;  %v82_v60 = vunpack.c.l.bf16 %v32_v48  ;;  %v83_v61 = vunpack.c.h.bf16 %v32_v48 }
  0x2a   :  { %532 = vst [vmem:[%s975_s3 + $0x70] sm:$0xff] %v600_v54  ;;  %v231_v62 = vadd.f32 %v674_v29, %v155_v55  ;;  %v156_v63 = vmul.f32 %v668_v26, %v80_v56  ;;  %v157_v0 = vmul.f32 %v670_v27, %v81_v57  ;;  %v84_v1 = vunpack.c.l.bf16 %v33_v53 }
  0x2b   :  { %v601_v3 = vpack.c.bf16 %v293_v58, %v292_v51  ;;  %v294_v4 = vmax.f32 %v230_v59, 0.0  ;;  %v158_v5 = vmul.f32 %v668_v26, %v82_v60  ;;  %v159_v6 = vmul.f32 %v670_v27, %v83_v61  ;;  %v39_v59 = vld [vmem:[%s972_s0 + $0xc8] sm:$0xff] }
  0x2c   :  { %v295_v7 = vmax.f32 %v231_v62, 0.0  ;;  %v232_v8 = vadd.f32 %v672_v28, %v156_v63  ;;  %v233_v9 = vadd.f32 %v674_v29, %v157_v0  ;;  %v85_v10 = vunpack.c.h.bf16 %v33_v53 }
  0x2d   :  { %533 = vst [vmem:[%s975_s3 + $0x78] sm:$0xff] %v601_v3  ;;  %v234_v11 = vadd.f32 %v672_v28, %v158_v5  ;;  %v235_v12 = vadd.f32 %v674_v29, %v159_v6  ;;  %v160_v13 = vmul.f32 %v668_v26, %v84_v1  ;;  %v86_v14 = vunpack.c.l.bf16 %v34_v2 }
  0x2e   :  { %v602_v16 = vpack.c.bf16 %v295_v7, %v294_v4  ;;  %v296_v17 = vmax.f32 %v232_v8, 0.0  ;;  %v297_v18 = vmax.f32 %v233_v9, 0.0  ;;  %v161_v19 = vmul.f32 %v670_v27, %v85_v10  ;;  %v40_v4 = vld [vmem:[%s972_s0 + $0xd0] sm:$0xff] }
  0x2f   :  { %v298_v20 = vmax.f32 %v234_v11, 0.0  ;;  %v299_v21 = vmax.f32 %v235_v12, 0.0  ;;  %v236_v22 = vadd.f32 %v672_v28, %v160_v13  ;;  %v87_v23 = vunpack.c.h.bf16 %v34_v2  ;;  %v41_v13 = vld [vmem:[%s972_s0 + $0xd8] sm:$0xff] }
  0x30   :  { %534 = vst [vmem:[%s975_s3 + $0x80] sm:$0xff] %v602_v16  ;;  %v603_v25 = vpack.c.bf16 %v297_v18, %v296_v17  ;;  %v237_v30 = vadd.f32 %v674_v29, %v161_v19  ;;  %v162_v31 = vmul.f32 %v668_v26, %v86_v14  ;;  %v88_v32 = vunpack.c.l.bf16 %v35_v15 }
  0x31   :  { %v604_v34 = vpack.c.bf16 %v299_v21, %v298_v20  ;;  %v300_v35 = vmax.f32 %v236_v22, 0.0  ;;  %v163_v36 = vmul.f32 %v670_v27, %v87_v23  ;;  %v89_v37 = vunpack.c.h.bf16 %v35_v15  ;;  %v42_v22 = vld [vmem:[%s972_s0 + $0xe0] sm:$0xff] }
  0x32   :  { %535 = vst [vmem:[%s975_s3 + $0x88] sm:$0xff] %v603_v25  ;;  %v301_v38 = vmax.f32 %v237_v30, 0.0  ;;  %v238_v39 = vadd.f32 %v672_v28, %v162_v31  ;;  %v164_v40 = vmul.f32 %v668_v26, %v88_v32  ;;  %v90_v41 = vunpack.c.l.bf16 %v36_v24 }
  0x33   :  { %536 = vst [vmem:[%s975_s3 + $0x90] sm:$0xff] %v604_v34  ;;  %v239_v42 = vadd.f32 %v674_v29, %v163_v36  ;;  %v165_v43 = vmul.f32 %v670_v27, %v89_v37  ;;  %v91_v44 = vunpack.c.h.bf16 %v36_v24  ;;  %v92_v45 = vunpack.c.l.bf16 %v37_v33 }
  0x34   :  { %v605_v47 = vpack.c.bf16 %v301_v38, %v300_v35  ;;  %v302_v48 = vmax.f32 %v238_v39, 0.0  ;;  %v240_v49 = vadd.f32 %v672_v28, %v164_v40  ;;  %v166_v50 = vmul.f32 %v668_v26, %v90_v41  ;;  %v43_v39 = vld [vmem:[%s972_s0 + $0xe8] sm:$0xff] }
  0x35   :  { %v303_v51 = vmax.f32 %v239_v42, 0.0  ;;  %v241_v52 = vadd.f32 %v674_v29, %v165_v43  ;;  %v167_v53 = vmul.f32 %v670_v27, %v91_v44  ;;  %v93_v54 = vunpack.c.h.bf16 %v37_v33 }
  0x36   :  { %537 = vst [vmem:[%s975_s3 + $0x98] sm:$0xff] %v605_v47  ;;  %v304_v55 = vmax.f32 %v240_v49, 0.0  ;;  %v242_v56 = vadd.f32 %v672_v28, %v166_v50  ;;  %v168_v57 = vmul.f32 %v668_v26, %v92_v45  ;;  %v94_v58 = vunpack.c.l.bf16 %v38_v46 }
  0x37   :  { %v606_v60 = vpack.c.bf16 %v303_v51, %v302_v48  ;;  %v305_v61 = vmax.f32 %v241_v52, 0.0  ;;  %v243_v62 = vadd.f32 %v674_v29, %v167_v53  ;;  %v169_v63 = vmul.f32 %v670_v27, %v93_v54  ;;  %v44_v48 = vld [vmem:[%s972_s0 + $0xf0] sm:$0xff] }
  0x38   :  { %v306_v0 = vmax.f32 %v242_v56, 0.0  ;;  %v244_v1 = vadd.f32 %v672_v28, %v168_v57  ;;  %v95_v2 = vunpack.c.h.bf16 %v38_v46  ;;  %v170_v3 = vmul.f32 %v668_v26, %v94_v58  ;;  %v45_v57 = vld [vmem:[%s972_s0 + $0xf8] sm:$0xff] }
  0x39   :  { %538 = vst [vmem:[%s975_s3 + $0xa0] sm:$0xff] %v606_v60  ;;  %v607_v5 = vpack.c.bf16 %v305_v61, %v304_v55  ;;  %v307_v6 = vmax.f32 %v243_v62, 0.0  ;;  %v245_v7 = vadd.f32 %v674_v29, %v169_v63  ;;  %v96_v8 = vunpack.c.l.bf16 %v39_v59 }
  0x3a   :  { %v308_v9 = vmax.f32 %v244_v1, 0.0  ;;  %v171_v10 = vmul.f32 %v670_v27, %v95_v2  ;;  %v246_v11 = vadd.f32 %v672_v28, %v170_v3  ;;  %v97_v12 = vunpack.c.h.bf16 %v39_v59 }
  0x3b   :  { %539 = vst [vmem:[%s975_s3 + $0xa8] sm:$0xff] %v607_v5  ;;  %v608_v14 = vpack.c.bf16 %v307_v6, %v306_v0  ;;  %v309_v15 = vmax.f32 %v245_v7, 0.0  ;;  %v172_v16 = vmul.f32 %v668_v26, %v96_v8  ;;  %v98_v17 = vunpack.c.l.bf16 %v40_v4 }
  0x3c   :  { %v247_v18 = vadd.f32 %v674_v29, %v171_v10  ;;  %v310_v19 = vmax.f32 %v246_v11, 0.0  ;;  %v173_v20 = vmul.f32 %v670_v27, %v97_v12  ;;  %v99_v21 = vunpack.c.h.bf16 %v40_v4 }
  0x3d   :  { %540 = vst [vmem:[%s975_s3 + $0xb0] sm:$0xff] %v608_v14  ;;  %v609_v23 = vpack.c.bf16 %v309_v15, %v308_v9  ;;  %v248_v24 = vadd.f32 %v672_v28, %v172_v16  ;;  %v174_v25 = vmul.f32 %v668_v26, %v98_v17  ;;  %v100_v30 = vunpack.c.l.bf16 %v41_v13 }
  0x3e   :  { %v311_v31 = vmax.f32 %v247_v18, 0.0  ;;  %v249_v32 = vadd.f32 %v674_v29, %v173_v20  ;;  %v175_v33 = vmul.f32 %v670_v27, %v99_v21  ;;  %v101_v34 = vunpack.c.h.bf16 %v41_v13 }
  0x3f   :  { %541 = vst [vmem:[%s975_s3 + $0xb8] sm:$0xff] %v609_v23  ;;  %v312_v35 = vmax.f32 %v248_v24, 0.0  ;;  %v250_v36 = vadd.f32 %v672_v28, %v174_v25  ;;  %v176_v37 = vmul.f32 %v668_v26, %v100_v30  ;;  %v102_v38 = vunpack.c.l.bf16 %v42_v22 }
  0x40   :  { %v610_v40 = vpack.c.bf16 %v311_v31, %v310_v19  ;;  %v313_v41 = vmax.f32 %v249_v32, 0.0  ;;  %v251_v42 = vadd.f32 %v674_v29, %v175_v33  ;;  %v177_v43 = vmul.f32 %v670_v27, %v101_v34 }
  0x41   :  { %v314_v44 = vmax.f32 %v250_v36, 0.0  ;;  %v252_v45 = vadd.f32 %v672_v28, %v176_v37  ;;  %v103_v46 = vunpack.c.h.bf16 %v42_v22  ;;  %v178_v47 = vmul.f32 %v668_v26, %v102_v38 }
  0x42   :  { %542 = vst [vmem:[%s975_s3 + $0xc0] sm:$0xff] %v610_v40  ;;  %v611_v49 = vpack.c.bf16 %v313_v41, %v312_v35  ;;  %v315_v50 = vmax.f32 %v251_v42, 0.0  ;;  %v253_v51 = vadd.f32 %v674_v29, %v177_v43  ;;  %v104_v52 = vunpack.c.l.bf16 %v43_v39 }
  0x43   :  { %v316_v53 = vmax.f32 %v252_v45, 0.0  ;;  %v179_v54 = vmul.f32 %v670_v27, %v103_v46  ;;  %v254_v55 = vadd.f32 %v672_v28, %v178_v47  ;;  %v105_v56 = vunpack.c.h.bf16 %v43_v39 }
  0x44   :  { %543 = vst [vmem:[%s975_s3 + $0xc8] sm:$0xff] %v611_v49  ;;  %v612_v58 = vpack.c.bf16 %v315_v50, %v314_v44  ;;  %v317_v59 = vmax.f32 %v253_v51, 0.0  ;;  %v180_v60 = vmul.f32 %v668_v26, %v104_v52  ;;  %v106_v61 = vunpack.c.l.bf16 %v44_v48 }
  0x45   :  { %v255_v62 = vadd.f32 %v674_v29, %v179_v54  ;;  %v318_v63 = vmax.f32 %v254_v55, 0.0  ;;  %v181_v0 = vmul.f32 %v670_v27, %v105_v56  ;;  %v107_v1 = vunpack.c.h.bf16 %v44_v48 }
  0x46   :  { %544 = vst [vmem:[%s975_s3 + $0xd0] sm:$0xff] %v612_v58  ;;  %v613_v2 = vpack.c.bf16 %v317_v59, %v316_v53  ;;  %v256_v3 = vadd.f32 %v672_v28, %v180_v60  ;;  %v182_v4 = vmul.f32 %v668_v26, %v106_v61  ;;  %v108_v5 = vunpack.c.l.bf16 %v45_v57 }
  0x47   :  { %v319_v6 = vmax.f32 %v255_v62, 0.0  ;;  %v257_v7 = vadd.f32 %v674_v29, %v181_v0  ;;  %v183_v8 = vmul.f32 %v670_v27, %v107_v1  ;;  %v109_v9 = vunpack.c.h.bf16 %v45_v57 }
  0x48   :  { %545 = vst [vmem:[%s975_s3 + $0xd8] sm:$0xff] %v613_v2  ;;  %v320_v10 = vmax.f32 %v256_v3, 0.0  ;;  %v258_v11 = vadd.f32 %v672_v28, %v182_v4  ;;  %v184_v12 = vmul.f32 %v668_v26, %v108_v5 }
  0x49   :  { %v614_v13 = vpack.c.bf16 %v319_v6, %v318_v63  ;;  %v321_v14 = vmax.f32 %v257_v7, 0.0  ;;  %v259_v15 = vadd.f32 %v674_v29, %v183_v8  ;;  %v185_v16 = vmul.f32 %v670_v27, %v109_v9 }
  0x4a   :  { %v322_v17 = vmax.f32 %v258_v11, 0.0  ;;  %v260_v18 = vadd.f32 %v672_v28, %v184_v12 }
  0x4b   :  { %546 = vst [vmem:[%s975_s3 + $0xe0] sm:$0xff] %v614_v13  ;;  %v615_v19 = vpack.c.bf16 %v321_v14, %v320_v10  ;;  %v323_v20 = vmax.f32 %v259_v15, 0.0  ;;  %v261_v21 = vadd.f32 %v674_v29, %v185_v16 }
  0x4c   :  { %v324_v22 = vmax.f32 %v260_v18, 0.0 }
  0x4d   :  { %547 = vst [vmem:[%s975_s3 + $0xe8] sm:$0xff] %v615_v19  ;;  %v616_v26 = vpack.c.bf16 %v323_v20, %v322_v17  ;;  %v325_v23 = vmax.f32 %v261_v21, 0.0 }
  0x4f   :  { %548 = vst [vmem:[%s975_s3 + $0xf0] sm:$0xff] %v616_v26  ;;  %v617_v27 = vpack.c.bf16 %v325_v23, %v324_v22 }
  0x51   :  { %549 = vst [vmem:[%s975_s3 + $0xf8] sm:$0xff] %v617_v27 }

// kernel: cnn_block2.4
= control target key start
LH: loop header
LB: loop body
LE: loop exit
PB: predicated region body
PF: predicated region fallthrough
CT: control target
= control target key end

     0   :  { %s6547_s1 = inlined_call_operand.vmem [shape: bf16[1536,256], index: 1, kind: input, shape index: {}]   ;;  %s6548_s0 = inlined_call_operand.vmem [shape: bf16[256,1536], index: 0, kind: input, shape index: {}]   ;;  %s6549_s2 = inlined_call_operand.vmem [shape: bf16[256,256], index: 2, kind: output, shape index: {0}]   ;;  %s6550_s3 = inlined_call_operand.vmem [shape: f32[8,256], index: 3, kind: output, shape index: {1}]  }
   0x1   :  { %v4697_v0 = vld [vmem:[%s6547_s1 + $0x4] ss:$8 sps:$4 sm:$0xff]   ;;  %v4701_v2 = vld [vmem:[%s6547_s1] ss:$8 sps:$4 sm:$0xff]   ;;  %v4703_v4 = vld [vmem:[%s6547_s1 + $0x14] ss:$8 sps:$4 sm:$0xff]  }
   0x2   :  { %v4699_v1 = vld [vmem:[%s6547_s1 + $0x304] ss:$8 sps:$4 sm:$0xff]   ;;  %2317 = vmatprep.subr.bf16.mxu1 %v4697_v0  ;;  %v4702_v3 = vld [vmem:[%s6547_s1 + $0x300] ss:$8 sps:$4 sm:$0xff]   ;;  %v4705_v5 = vld [vmem:[%s6547_s1 + $0x314] ss:$8 sps:$4 sm:$0xff]  }
   0x3   :  { %2896 = vmatprep.subr.bf16.mxu0 %v4699_v1  ;;  %2318 = vmatpush1.bf16.msra.mxu1 %v4701_v2  ;;  %v4707_v6 = vld [vmem:[%s6547_s1 + $0x10] ss:$8 sps:$4 sm:$0xff]   ;;  %v4709_v8 = vld [vmem:[%s6547_s1 + $0x24] ss:$8 sps:$4 sm:$0xff]   ;;  %v4713_v10 = vld [vmem:[%s6547_s1 + $0x20] ss:$8 sps:$4 sm:$0xff]  }
   0x4   :  { %2897 = vmatpush1.bf16.msra.mxu0 %v4702_v3  ;;  %2319 = vmatprep.subr.bf16.mxu1 %v4703_v4  ;;  %v4708_v7 = vld [vmem:[%s6547_s1 + $0x310] ss:$8 sps:$4 sm:$0xff]   ;;  %v4711_v9 = vld [vmem:[%s6547_s1 + $0x324] ss:$8 sps:$4 sm:$0xff]   ;;  %v4714_v11 = vld [vmem:[%s6547_s1 + $0x320] ss:$8 sps:$4 sm:$0xff]  }
   0x5   :  { %2898 = vmatprep.subr.bf16.mxu0 %v4705_v5  ;;  %v4715_v12 = vld [vmem:[%s6547_s1 + $0x34] ss:$8 sps:$4 sm:$0xff]   ;;  %v4719_v14 = vld [vmem:[%s6547_s1 + $0x30] ss:$8 sps:$4 sm:$0xff]   ;;  %v4721_v16 = vld [vmem:[%s6547_s1 + $0x44] ss:$8 sps:$4 sm:$0xff]  }
   0x6   :  { %v4717_v13 = vld [vmem:[%s6547_s1 + $0x334] ss:$8 sps:$4 sm:$0xff]   ;;  %v4720_v15 = vld [vmem:[%s6547_s1 + $0x330] ss:$8 sps:$4 sm:$0xff]   ;;  %v4723_v17 = vld [vmem:[%s6547_s1 + $0x344] ss:$8 sps:$4 sm:$0xff]  }
   0x7   :  { %2320 = vmatpush1.bf16.msra.mxu1 %v4707_v6  ;;  %v4725_v18 = vld [vmem:[%s6547_s1 + $0x40] ss:$8 sps:$4 sm:$0xff]   ;;  %v4727_v20 = vld [vmem:[%s6547_s1 + $0x54] ss:$8 sps:$4 sm:$0xff]   ;;  %v4731_v22 = vld [vmem:[%s6547_s1 + $0x50] ss:$8 sps:$4 sm:$0xff]  }
   0x8   :  { %2899 = vmatpush1.bf16.msra.mxu0 %v4708_v7  ;;  %2321 = vmatprep.subr.bf16.mxu1 %v4709_v8  ;;  %v4726_v19 = vld [vmem:[%s6547_s1 + $0x340] ss:$8 sps:$4 sm:$0xff]   ;;  %v4729_v21 = vld [vmem:[%s6547_s1 + $0x354] ss:$8 sps:$4 sm:$0xff]   ;;  %v4732_v23 = vld [vmem:[%s6547_s1 + $0x350] ss:$8 sps:$4 sm:$0xff]  }
   0x9   :  { %2900 = vmatprep.subr.bf16.mxu0 %v4711_v9  ;;  %v4733_v24 = vld [vmem:[%s6547_s1 + $0x64] ss:$8 sps:$4 sm:$0xff]   ;;  %v4737_v26 = vld [vmem:[%s6547_s1 + $0x60] ss:$8 sps:$4 sm:$0xff]   ;;  %v4739_v28 = vld [vmem:[%s6547_s1 + $0x74] ss:$8 sps:$4 sm:$0xff]  }
   0xa   :  { %v4735_v25 = vld [vmem:[%s6547_s1 + $0x364] ss:$8 sps:$4 sm:$0xff]   ;;  %v4738_v27 = vld [vmem:[%s6547_s1 + $0x360] ss:$8 sps:$4 sm:$0xff]   ;;  %v4741_v29 = vld [vmem:[%s6547_s1 + $0x374] ss:$8 sps:$4 sm:$0xff]  }
   0xb   :  { %2322 = vmatpush1.bf16.msra.mxu1 %v4713_v10  ;;  %v4743_v30 = vld [vmem:[%s6547_s1 + $0x70] ss:$8 sps:$4 sm:$0xff]   ;;  %v4745_v32 = vld [vmem:[%s6547_s1 + $0x84] ss:$8 sps:$4 sm:$0xff]   ;;  %v4749_v34 = vld [vmem:[%s6547_s1 + $0x80] ss:$8 sps:$4 sm:$0xff]  }
   0xc   :  { %2901 = vmatpush1.bf16.msra.mxu0 %v4714_v11  ;;  %2323 = vmatprep.subr.bf16.mxu1 %v4715_v12  ;;  %v4744_v31 = vld [vmem:[%s6547_s1 + $0x370] ss:$8 sps:$4 sm:$0xff]   ;;  %v4747_v33 = vld [vmem:[%s6547_s1 + $0x384] ss:$8 sps:$4 sm:$0xff]   ;;  %v4750_v35 = vld [vmem:[%s6547_s1 + $0x380] ss:$8 sps:$4 sm:$0xff]  }
   0xd   :  { %2902 = vmatprep.subr.bf16.mxu0 %v4717_v13  ;;  %v4751_v36 = vld [vmem:[%s6547_s1 + $0x94] ss:$8 sps:$4 sm:$0xff]   ;;  %v4755_v38 = vld [vmem:[%s6547_s1 + $0x90] ss:$8 sps:$4 sm:$0xff]   ;;  %v4757_v40 = vld [vmem:[%s6547_s1 + $0xa4] ss:$8 sps:$4 sm:$0xff]  }
   0xe   :  { %v4753_v37 = vld [vmem:[%s6547_s1 + $0x394] ss:$8 sps:$4 sm:$0xff]   ;;  %v4756_v39 = vld [vmem:[%s6547_s1 + $0x390] ss:$8 sps:$4 sm:$0xff]   ;;  %v4759_v41 = vld [vmem:[%s6547_s1 + $0x3a4] ss:$8 sps:$4 sm:$0xff]  }
   0xf   :  { %2324 = vmatpush1.bf16.msra.mxu1 %v4719_v14  ;;  %v4761_v42 = vld [vmem:[%s6547_s1 + $0xa0] ss:$8 sps:$4 sm:$0xff]   ;;  %v4763_v44 = vld [vmem:[%s6547_s1 + $0xb4] ss:$8 sps:$4 sm:$0xff]   ;;  %v4767_v46 = vld [vmem:[%s6547_s1 + $0xb0] ss:$8 sps:$4 sm:$0xff]  }
  0x10   :  { %2903 = vmatpush1.bf16.msra.mxu0 %v4720_v15  ;;  %2325 = vmatprep.subr.bf16.mxu1 %v4721_v16  ;;  %v4762_v43 = vld [vmem:[%s6547_s1 + $0x3a0] ss:$8 sps:$4 sm:$0xff]   ;;  %v4765_v45 = vld [vmem:[%s6547_s1 + $0x3b4] ss:$8 sps:$4 sm:$0xff]   ;;  %v4768_v47 = vld [vmem:[%s6547_s1 + $0x3b0] ss:$8 sps:$4 sm:$0xff]  }
  0x11   :  { %2904 = vmatprep.subr.bf16.mxu0 %v4723_v17  ;;  %v4769_v48 = vld [vmem:[%s6547_s1 + $0xc4] ss:$8 sps:$4 sm:$0xff]   ;;  %v4773_v52 = vld [vmem:[%s6547_s1 + $0xc0] ss:$8 sps:$4 sm:$0xff]   ;;  %v4775_v54 = vld [vmem:[%s6547_s1 + $0xd4] ss:$8 sps:$4 sm:$0xff]  }
  0x12   :  { %v4795_v49 = vld [vmem:[%s6548_s0 + $0x4] ss:$48 sps:$4 sm:$0xff]   ;;  %v4798_v51 = vld [vmem:[%s6548_s0 + $0x1c] ss:$48 sps:$4 sm:$0xff]   ;;  %v4774_v53 = vld [vmem:[%s6547_s1 + $0x3c0] ss:$8 sps:$4 sm:$0xff]  }
  0x13   :  { %2326 = vmatpush1.bf16.msra.mxu1 %v4725_v18  ;;  %v4771_v50 = vld [vmem:[%s6547_s1 + $0x3c4] ss:$8 sps:$4 sm:$0xff]   ;;  %2349 = vmatprep.mubr.bf16.mxu1 %v4795_v49  ;;  %v4777_v55 = vld [vmem:[%s6547_s1 + $0x3d4] ss:$8 sps:$4 sm:$0xff]   ;;  %v4779_v56 = vld [vmem:[%s6547_s1 + $0xd0] ss:$8 sps:$4 sm:$0xff]  }
  0x14   :  { %2905 = vmatpush1.bf16.msra.mxu0 %v4726_v19  ;;  %2327 = vmatprep.subr.bf16.mxu1 %v4727_v20  ;;  %v4780_v57 = vld [vmem:[%s6547_s1 + $0x3d0] ss:$8 sps:$4 sm:$0xff]   ;;  %v4781_v58 = vld [vmem:[%s6547_s1 + $0xe4] ss:$8 sps:$4 sm:$0xff]   ;;  %v4785_v60 = vld [vmem:[%s6547_s1 + $0xe0] ss:$8 sps:$4 sm:$0xff]  }
  0x15   :  { %2906 = vmatprep.subr.bf16.mxu0 %v4729_v21  ;;  %2928 = vmatprep.mubr.bf16.mxu0 %v4798_v51  ;;  %v4783_v59 = vld [vmem:[%s6547_s1 + $0x3e4] ss:$8 sps:$4 sm:$0xff]   ;;  %v4786_v61 = vld [vmem:[%s6547_s1 + $0x3e0] ss:$8 sps:$4 sm:$0xff]   ;;  %v4787_v62 = vld [vmem:[%s6547_s1 + $0xf4] ss:$8 sps:$4 sm:$0xff]  }
  0x16   :  { %v4789_v63 = vld [vmem:[%s6547_s1 + $0x3f4] ss:$8 sps:$4 sm:$0xff]   ;;  %v4791_v0 = vld [vmem:[%s6547_s1 + $0xf0] ss:$8 sps:$4 sm:$0xff]   ;;  %v4801_v2 = vld [vmem:[%s6547_s1 + $0x104] ss:$8 sps:$4 sm:$0xff]  }
  0x17   :  { %2328 = vmatpush1.bf16.msra.mxu1 %v4731_v22  ;;  %v4792_v1 = vld [vmem:[%s6547_s1 + $0x3f0] ss:$8 sps:$4 sm:$0xff]   ;;  %v4804_v4 = vld [vmem:[%s6547_s1 + $0x404] ss:$8 sps:$4 sm:$0xff]   ;;  %v4799_v6 = vld [vmem:[%s6547_s1 + $0x100] ss:$8 sps:$4 sm:$0xff]  }
  0x18   :  { %2907 = vmatpush1.bf16.msra.mxu0 %v4732_v23  ;;  %2329 = vmatprep.subr.bf16.mxu1 %v4733_v24  ;;  %v4793_v3 = vld [vmem:[%s6548_s0] ss:$48 sps:$4 sm:$0xff]   ;;  %v4796_v5 = vld [vmem:[%s6548_s0 + $0x18] ss:$48 sps:$4 sm:$0xff]   ;;  %v4805_v8 = vld [vmem:[%s6548_s0 + $0x64] ss:$48 sps:$4 sm:$0xff]  }
  0x19   :  { %2908 = vmatprep.subr.bf16.mxu0 %v4735_v25  ;;  %v4802_v7 = vld [vmem:[%s6547_s1 + $0x400] ss:$8 sps:$4 sm:$0xff]   ;;  %v4807_v9 = vld [vmem:[%s6548_s0 + $0x7c] ss:$48 sps:$4 sm:$0xff]   ;;  %v4810_v12 = vld [vmem:[%s6547_s1 + $0x110] ss:$8 sps:$4 sm:$0xff]  }
  0x1a   :  { %v4812_v10 = vld [vmem:[%s6547_s1 + $0x114] ss:$8 sps:$4 sm:$0xff]   ;;  %v4814_v13 = vld [vmem:[%s6547_s1 + $0x410] ss:$8 sps:$4 sm:$0xff]   ;;  %v4824_v14 = vld [vmem:[%s6547_s1 + $0x124] ss:$8 sps:$4 sm:$0xff]  }
  0x1b   :  { %2330 = vmatpush1.bf16.msra.mxu1 %v4737_v26  ;;  %v4816_v11 = vld [vmem:[%s6547_s1 + $0x414] ss:$8 sps:$4 sm:$0xff]   ;;  %v4828_v15 = vld [vmem:[%s6547_s1 + $0x424] ss:$8 sps:$4 sm:$0xff]   ;;  %v4809_v16 = vld [vmem:[%s6548_s0 + $0x60] ss:$48 sps:$4 sm:$0xff]  }
  0x1c   :  { %2909 = vmatpush1.bf16.msra.mxu0 %v4738_v27  ;;  %2331 = vmatprep.subr.bf16.mxu1 %v4739_v28  ;;  %v4813_v17 = vld [vmem:[%s6548_s0 + $0x78] ss:$48 sps:$4 sm:$0xff]   ;;  %v4817_v18 = vld [vmem:[%s6548_s0 + $0xc4] ss:$48 sps:$4 sm:$0xff]   ;;  %v4819_v19 = vld [vmem:[%s6548_s0 + $0xdc] ss:$48 sps:$4 sm:$0xff]  }
  0x1d   :  { %2910 = vmatprep.subr.bf16.mxu0 %v4741_v29  ;;  %v4822_v20 = vld [vmem:[%s6547_s1 + $0x120] ss:$8 sps:$4 sm:$0xff]   ;;  %v4836_v22 = vld [vmem:[%s6547_s1 + $0x134] ss:$8 sps:$4 sm:$0xff]   ;;  %v4834_v24 = vld [vmem:[%s6547_s1 + $0x130] ss:$8 sps:$4 sm:$0xff]  }
  0x1e   :  { %v4826_v21 = vld [vmem:[%s6547_s1 + $0x420] ss:$8 sps:$4 sm:$0xff]   ;;  %v4840_v23 = vld [vmem:[%s6547_s1 + $0x434] ss:$8 sps:$4 sm:$0xff]   ;;  %v4838_v27 = vld [vmem:[%s6547_s1 + $0x430] ss:$8 sps:$4 sm:$0xff]  }
  0x1f   :  { %2332 = vmatpush1.bf16.msra.mxu1 %v4743_v30  ;;  %v4821_v25 = vld [vmem:[%s6548_s0 + $0xc0] ss:$48 sps:$4 sm:$0xff]   ;;  %v4825_v26 = vld [vmem:[%s6548_s0 + $0xd8] ss:$48 sps:$4 sm:$0xff]   ;;  %v4829_v28 = vld [vmem:[%s6548_s0 + $0x124] ss:$48 sps:$4 sm:$0xff]  }
  0x20   :  { %2911 = vmatpush1.bf16.msra.mxu0 %v4744_v31  ;;  %2333 = vmatprep.subr.bf16.mxu1 %v4745_v32  ;;  %v4848_v29 = vld [vmem:[%s6547_s1 + $0x144] ss:$8 sps:$4 sm:$0xff]   ;;  %v4846_v32 = vld [vmem:[%s6547_s1 + $0x140] ss:$8 sps:$4 sm:$0xff]   ;;  %v4886_v51 = vld [vmem:[%s6547_s1 + $0x470] ss:$8 sps:$4 sm:$0xff]  }
  0x21   :  { %2912 = vmatprep.subr.bf16.mxu0 %v4747_v33  ;;  %v4852_v30 = vld [vmem:[%s6547_s1 + $0x444] ss:$8 sps:$4 sm:$0xff]   ;;  %v4850_v33 = vld [vmem:[%s6547_s1 + $0x440] ss:$8 sps:$4 sm:$0xff]  }
  0x22   :  { %v4831_v31 = vld [vmem:[%s6548_s0 + $0x13c] ss:$48 sps:$4 sm:$0xff]   ;;  %v4845_v49 = vld [vmem:[%s6548_s0 + $0x180] ss:$48 sps:$4 sm:$0xff]  }
  0x23   :  { %2334 = vmatpush1.bf16.msra.mxu1 %v4749_v34  ;;  %v4860_v34 = vld [vmem:[%s6547_s1 + $0x154] ss:$8 sps:$4 sm:$0xff]  }
  0x24   :  { %2913 = vmatpush1.bf16.msra.mxu0 %v4750_v35  ;;  %2335 = vmatprep.subr.bf16.mxu1 %v4751_v36  ;;  %v4864_v35 = vld [vmem:[%s6547_s1 + $0x454] ss:$8 sps:$4 sm:$0xff]   ;;  %v4858_v36 = vld [vmem:[%s6547_s1 + $0x150] ss:$8 sps:$4 sm:$0xff]  }
  0x25   :  { %2914 = vmatprep.subr.bf16.mxu0 %v4753_v37  ;;  %v4862_v37 = vld [vmem:[%s6547_s1 + $0x450] ss:$8 sps:$4 sm:$0xff]  }
  0x27   :  { %2336 = vmatpush1.bf16.msra.mxu1 %v4755_v38  ;;  %v4833_v38 = vld [vmem:[%s6548_s0 + $0x120] ss:$48 sps:$4 sm:$0xff]  }
  0x28   :  { %2915 = vmatpush1.bf16.msra.mxu0 %v4756_v39  ;;  %2337 = vmatprep.subr.bf16.mxu1 %v4757_v40  ;;  %v4872_v39 = vld [vmem:[%s6547_s1 + $0x164] ss:$8 sps:$4 sm:$0xff]  }
  0x29   :  { %2916 = vmatprep.subr.bf16.mxu0 %v4759_v41  ;;  %v4876_v40 = vld [vmem:[%s6547_s1 + $0x464] ss:$8 sps:$4 sm:$0xff]   ;;  %v4837_v41 = vld [vmem:[%s6548_s0 + $0x138] ss:$48 sps:$4 sm:$0xff]  }
  0x2b   :  { %2338 = vmatpush1.bf16.msra.mxu1 %v4761_v42  ;;  %v4841_v42 = vld [vmem:[%s6548_s0 + $0x184] ss:$48 sps:$4 sm:$0xff]  }
  0x2c   :  { %2917 = vmatpush1.bf16.msra.mxu0 %v4762_v43  ;;  %2339 = vmatprep.subr.bf16.mxu1 %v4763_v44  ;;  %v4843_v43 = vld [vmem:[%s6548_s0 + $0x19c] ss:$48 sps:$4 sm:$0xff]   ;;  %v4870_v44 = vld [vmem:[%s6547_s1 + $0x160] ss:$8 sps:$4 sm:$0xff]  }
  0x2d   :  { %2918 = vmatprep.subr.bf16.mxu0 %v4765_v45  ;;  %v4874_v45 = vld [vmem:[%s6547_s1 + $0x460] ss:$8 sps:$4 sm:$0xff]  }
  0x2f   :  { %2340 = vmatpush1.bf16.msra.mxu1 %v4767_v46  ;;  %v4884_v46 = vld [vmem:[%s6547_s1 + $0x174] ss:$8 sps:$4 sm:$0xff]  }
  0x30   :  { %2919 = vmatpush1.bf16.msra.mxu0 %v4768_v47  ;;  %2341 = vmatprep.subr.bf16.mxu1 %v4769_v48  ;;  %v4888_v47 = vld [vmem:[%s6547_s1 + $0x474] ss:$8 sps:$4 sm:$0xff]   ;;  %v4882_v48 = vld [vmem:[%s6547_s1 + $0x170] ss:$8 sps:$4 sm:$0xff]  }
  0x31   :  { %2920 = vmatprep.subr.bf16.mxu0 %v4771_v50  ;;  %v4849_v50 = vld [vmem:[%s6548_s0 + $0x198] ss:$48 sps:$4 sm:$0xff]  }
  0x33   :  { %2342 = vmatpush1.bf16.msra.mxu1 %v4773_v52  ;;  %v4853_v52 = vld [vmem:[%s6548_s0 + $0x1e4] ss:$48 sps:$4 sm:$0xff]  }
  0x34   :  { %2921 = vmatpush1.bf16.msra.mxu0 %v4774_v53  ;;  %2343 = vmatprep.subr.bf16.mxu1 %v4775_v54  ;;  %v4896_v53 = vld [vmem:[%s6547_s1 + $0x184] ss:$8 sps:$4 sm:$0xff]  }
  0x35   :  { %2922 = vmatprep.subr.bf16.mxu0 %v4777_v55  ;;  %v4900_v54 = vld [vmem:[%s6547_s1 + $0x484] ss:$8 sps:$4 sm:$0xff]  }
  0x36   :  { %v4855_v55 = vld [vmem:[%s6548_s0 + $0x1fc] ss:$48 sps:$4 sm:$0xff]  }
  0x37   :  { %2344 = vmatpush1.bf16.msra.mxu1 %v4779_v56  ;;  %v4894_v56 = vld [vmem:[%s6547_s1 + $0x180] ss:$8 sps:$4 sm:$0xff]  }
  0x38   :  { %2923 = vmatpush1.bf16.msra.mxu0 %v4780_v57  ;;  %2345 = vmatprep.subr.bf16.mxu1 %v4781_v58  ;;  %v4898_v57 = vld [vmem:[%s6547_s1 + $0x480] ss:$8 sps:$4 sm:$0xff]   ;;  %v4908_v58 = vld [vmem:[%s6547_s1 + $0x194] ss:$8 sps:$4 sm:$0xff]  }
  0x39   :  { %2924 = vmatprep.subr.bf16.mxu0 %v4783_v59  ;;  %v4912_v59 = vld [vmem:[%s6547_s1 + $0x494] ss:$8 sps:$4 sm:$0xff]  }
  0x3b   :  { %2346 = vmatpush1.bf16.msra.mxu1 %v4785_v60  ;;  %v4906_v60 = vld [vmem:[%s6547_s1 + $0x190] ss:$8 sps:$4 sm:$0xff]  }
  0x3c   :  { %2925 = vmatpush1.bf16.msra.mxu0 %v4786_v61  ;;  %2347 = vmatprep.subr.bf16.mxu1 %v4787_v62  ;;  %v4910_v61 = vld [vmem:[%s6547_s1 + $0x490] ss:$8 sps:$4 sm:$0xff]  }
  0x3d   :  { %2926 = vmatprep.subr.bf16.mxu0 %v4789_v63  ;;  %v4857_v62 = vld [vmem:[%s6548_s0 + $0x1e0] ss:$48 sps:$4 sm:$0xff]   ;;  %v4920_v63 = vld [vmem:[%s6547_s1 + $0x1a4] ss:$8 sps:$4 sm:$0xff]  }
  0x3f   :  { %2348 = vmatpush1.bf16.msra.mxu1 %v4791_v0  ;;  %v4924_v0 = vld [vmem:[%s6547_s1 + $0x4a4] ss:$8 sps:$4 sm:$0xff]  }
  0x40   :  { %2927 = vmatpush1.bf16.msra.mxu0 %v4792_v1  ;;  %2510 = vmatprep.subr.bf16.mxu1 %v4801_v2  ;;  %v4861_v1 = vld [vmem:[%s6548_s0 + $0x1f8] ss:$48 sps:$4 sm:$0xff]   ;;  %v4865_v2 = vld [vmem:[%s6548_s0 + $0x244] ss:$48 sps:$4 sm:$0xff]  }
  0x41   :  { %3089 = vmatprep.subr.bf16.mxu0 %v4804_v4  ;;  %v4918_v4 = vld [vmem:[%s6547_s1 + $0x1a0] ss:$8 sps:$4 sm:$0xff]  }
  0x42   :  { %2350 = vmatmul.mubr.bf16.vlgmr.msra.gmra.mrb[0].mxu1 %v4793_v3  ;;  %v4867_v3 = vld [vmem:[%s6548_s0 + $0x25c] ss:$48 sps:$4 sm:$0xff]  }
  0x43   :  { %2929 = vmatmul.mubr.bf16.vlgmr.msra.gmra.mrb[0].mxu0 %v4796_v5  ;;  %2511 = vmatpush1.bf16.msra.mxu1 %v4799_v6  ;;  %v4922_v5 = vld [vmem:[%s6547_s1 + $0x4a0] ss:$8 sps:$4 sm:$0xff]   ;;  %v4932_v6 = vld [vmem:[%s6547_s1 + $0x1b4] ss:$8 sps:$4 sm:$0xff]  }
  0x44   :  { %3090 = vmatpush1.bf16.msra.mxu0 %v4802_v7  ;;  %2359 = vmatprep.mubr.bf16.mxu1 %v4805_v8  ;;  %v4936_v7 = vld [vmem:[%s6547_s1 + $0x4b4] ss:$8 sps:$4 sm:$0xff]   ;;  %v4930_v8 = vld [vmem:[%s6547_s1 + $0x1b0] ss:$8 sps:$4 sm:$0xff]  }
  0x45   :  { %2938 = vmatprep.mubr.bf16.mxu0 %v4807_v9  ;;  %2512 = vmatprep.subr.bf16.mxu1 %v4812_v10  ;;  %v4869_v9 = vld [vmem:[%s6548_s0 + $0x240] ss:$48 sps:$4 sm:$0xff]   ;;  %v4873_v10 = vld [vmem:[%s6548_s0 + $0x258] ss:$48 sps:$4 sm:$0xff]  }
  0x46   :  { %3091 = vmatprep.subr.bf16.mxu0 %v4816_v11  ;;  %v4934_v11 = vld [vmem:[%s6547_s1 + $0x4b0] ss:$8 sps:$4 sm:$0xff]  }
  0x47   :  { %2513 = vmatpush1.bf16.msra.mxu1 %v4810_v12  ;;  %v4877_v12 = vld [vmem:[%s6548_s0 + $0x2a4] ss:$48 sps:$4 sm:$0xff]  }
  0x48   :  { %3092 = vmatpush1.bf16.msra.mxu0 %v4814_v13  ;;  %2514 = vmatprep.subr.bf16.mxu1 %v4824_v14  ;;  %v4944_v13 = vld [vmem:[%s6547_s1 + $0x1c4] ss:$8 sps:$4 sm:$0xff]  }
  0x49   :  { %3093 = vmatprep.subr.bf16.mxu0 %v4828_v15  ;;  %v4879_v14 = vld [vmem:[%s6548_s0 + $0x2bc] ss:$48 sps:$4 sm:$0xff]  }
  0x4a   :  { %2360 = vmatmul.mubr.bf16.gmra.mrb[4].mxu1 %v4809_v16  ;;  %v4948_v15 = vld [vmem:[%s6547_s1 + $0x4c4] ss:$8 sps:$4 sm:$0xff]   ;;  %v4942_v16 = vld [vmem:[%s6547_s1 + $0x1c0] ss:$8 sps:$4 sm:$0xff]  }
  0x4b   :  { %2939 = vmatmul.mubr.bf16.gmra.mrb[4].mxu0 %v4813_v17  ;;  %2369 = vmatprep.mubr.bf16.mxu1 %v4817_v18  ;;  %v4946_v17 = vld [vmem:[%s6547_s1 + $0x4c0] ss:$8 sps:$4 sm:$0xff]   ;;  %v4954_v18 = vld [vmem:[%s6547_s1 + $0x1d0] ss:$8 sps:$4 sm:$0xff]  }
  0x4c   :  { %2948 = vmatprep.mubr.bf16.mxu0 %v4819_v19  ;;  %2515 = vmatpush1.bf16.msra.mxu1 %v4822_v20  ;;  %v4956_v19 = vld [vmem:[%s6547_s1 + $0x1d4] ss:$8 sps:$4 sm:$0xff]   ;;  %v4958_v20 = vld [vmem:[%s6547_s1 + $0x4d0] ss:$8 sps:$4 sm:$0xff]  }
  0x4d   :  { %3094 = vmatpush1.bf16.msra.mxu0 %v4826_v21  ;;  %2516 = vmatprep.subr.bf16.mxu1 %v4836_v22  ;;  %v4960_v21 = vld [vmem:[%s6547_s1 + $0x4d4] ss:$8 sps:$4 sm:$0xff]   ;;  %v4881_v22 = vld [vmem:[%s6548_s0 + $0x2a0] ss:$48 sps:$4 sm:$0xff]  }
  0x4e   :  { %3095 = vmatprep.subr.bf16.mxu0 %v4840_v23  ;;  %v4885_v23 = vld [vmem:[%s6548_s0 + $0x2b8] ss:$48 sps:$4 sm:$0xff]  }
  0x50   :  { %2517 = vmatpush1.bf16.msra.mxu1 %v4834_v24  ;;  %v4889_v24 = vld [vmem:[%s6548_s0 + $0x304] ss:$48 sps:$4 sm:$0xff]  }
  0x51   :  { %3096 = vmatpush1.bf16.msra.mxu0 %v4838_v27  ;;  %2518 = vmatprep.subr.bf16.mxu1 %v4848_v29  ;;  %v4966_v27 = vld [vmem:[%s6547_s1 + $0x1e0] ss:$8 sps:$4 sm:$0xff]   ;;  %v4972_v29 = vld [vmem:[%s6547_s1 + $0x4e4] ss:$8 sps:$4 sm:$0xff]  }
  0x52   :  { %3097 = vmatprep.subr.bf16.mxu0 %v4852_v30  ;;  %2370 = vmatmul.mubr.bf16.gmra.mrb[8].mxu1 %v4821_v25  ;;  %v4891_v25 = vld [vmem:[%s6548_s0 + $0x31c] ss:$48 sps:$4 sm:$0xff]   ;;  %v4893_v30 = vld [vmem:[%s6548_s0 + $0x300] ss:$48 sps:$4 sm:$0xff]  }
  0x53   :  { %2949 = vmatmul.mubr.bf16.gmra.mrb[8].mxu0 %v4825_v26  ;;  %2379 = vmatprep.mubr.bf16.mxu1 %v4829_v28  ;;  %v4968_v26 = vld [vmem:[%s6547_s1 + $0x1e4] ss:$8 sps:$4 sm:$0xff]   ;;  %v4970_v28 = vld [vmem:[%s6547_s1 + $0x4e0] ss:$8 sps:$4 sm:$0xff]  }
  0x54   :  { %2958 = vmatprep.mubr.bf16.mxu0 %v4831_v31  ;;  %2519 = vmatpush1.bf16.msra.mxu1 %v4846_v32  ;;  %v4897_v31 = vld [vmem:[%s6548_s0 + $0x318] ss:$48 sps:$4 sm:$0xff]  }
  0x55   :  { %3098 = vmatpush1.bf16.msra.mxu0 %v4850_v33  ;;  %2520 = vmatprep.subr.bf16.mxu1 %v4860_v34  ;;  %v4978_v32 = vld [vmem:[%s6547_s1 + $0x1f0] ss:$8 sps:$4 sm:$0xff]   ;;  %v4901_v33 = vld [vmem:[%s6548_s0 + $0x364] ss:$48 sps:$4 sm:$0xff]  }
  0x56   :  { %3099 = vmatprep.subr.bf16.mxu0 %v4864_v35  ;;  %v4980_v34 = vld [vmem:[%s6547_s1 + $0x1f4] ss:$8 sps:$4 sm:$0xff]   ;;  %v4982_v35 = vld [vmem:[%s6547_s1 + $0x4f0] ss:$8 sps:$4 sm:$0xff]  }
  0x58   :  { %2521 = vmatpush1.bf16.msra.mxu1 %v4858_v36  ;;  %v4984_v36 = vld [vmem:[%s6547_s1 + $0x4f4] ss:$8 sps:$4 sm:$0xff]  }
  0x59   :  { %3100 = vmatpush1.bf16.msra.mxu0 %v4862_v37  ;;  %2522 = vmatprep.subr.bf16.mxu1 %v4872_v39  ;;  %v4903_v37 = vld [vmem:[%s6548_s0 + $0x37c] ss:$48 sps:$4 sm:$0xff]  }
  0x5a   :  { %3101 = vmatprep.subr.bf16.mxu0 %v4876_v40  ;;  %2380 = vmatmul.mubr.bf16.gmra.mrb[12].mxu1 %v4833_v38  ;;  %v4993_v38 = vld [vmem:[%s6547_s1 + $0x204] ss:$8 sps:$4 sm:$0xff]   ;;  %v4905_v40 = vld [vmem:[%s6548_s0 + $0x360] ss:$48 sps:$4 sm:$0xff]  }
  0x5b   :  { %2959 = vmatmul.mubr.bf16.gmra.mrb[12].mxu0 %v4837_v41  ;;  %2389 = vmatprep.mubr.bf16.mxu1 %v4841_v42  ;;  %v4996_v39 = vld [vmem:[%s6547_s1 + $0x504] ss:$8 sps:$4 sm:$0xff]   ;;  %v4909_v41 = vld [vmem:[%s6548_s0 + $0x378] ss:$48 sps:$4 sm:$0xff]  }
  0x5c   :  { %2968 = vmatprep.mubr.bf16.mxu0 %v4843_v43  ;;  %2523 = vmatpush1.bf16.msra.mxu1 %v4870_v44  ;;  %v4913_v42 = vld [vmem:[%s6548_s0 + $0x3c4] ss:$48 sps:$4 sm:$0xff]   ;;  %v4915_v43 = vld [vmem:[%s6548_s0 + $0x3dc] ss:$48 sps:$4 sm:$0xff]   ;;  %v4917_v44 = vld [vmem:[%s6548_s0 + $0x3c0] ss:$48 sps:$4 sm:$0xff]  }
  0x5d   :  { %3102 = vmatpush1.bf16.msra.mxu0 %v4874_v45  ;;  %2524 = vmatprep.subr.bf16.mxu1 %v4884_v46  ;;  %v4921_v45 = vld [vmem:[%s6548_s0 + $0x3d8] ss:$48 sps:$4 sm:$0xff]   ;;  %v4925_v46 = vld [vmem:[%s6548_s0 + $0x424] ss:$48 sps:$4 sm:$0xff]  }
  0x5e   :  { %3103 = vmatprep.subr.bf16.mxu0 %v4888_v47  ;;  %v4927_v47 = vld [vmem:[%s6548_s0 + $0x43c] ss:$48 sps:$4 sm:$0xff]  }
  0x60   :  { %2525 = vmatpush1.bf16.msra.mxu1 %v4882_v48  ;;  %v4929_v48 = vld [vmem:[%s6548_s0 + $0x420] ss:$48 sps:$4 sm:$0xff]  }
  0x61   :  { %3104 = vmatpush1.bf16.msra.mxu0 %v4886_v51  ;;  %2526 = vmatprep.subr.bf16.mxu1 %v4896_v53  ;;  %v4939_v51 = vld [vmem:[%s6548_s0 + $0x49c] ss:$48 sps:$4 sm:$0xff]   ;;  %v4945_v53 = vld [vmem:[%s6548_s0 + $0x498] ss:$48 sps:$4 sm:$0xff]  }
  0x62   :  { %3105 = vmatprep.subr.bf16.mxu0 %v4900_v54  ;;  %2390 = vmatmul.mubr.bf16.gmra.mrb[16].mxu1 %v4845_v49  ;;  %v4933_v49 = vld [vmem:[%s6548_s0 + $0x438] ss:$48 sps:$4 sm:$0xff]   ;;  %v4949_v54 = vld [vmem:[%s6548_s0 + $0x4e4] ss:$48 sps:$4 sm:$0xff]  }
  0x63   :  { %2969 = vmatmul.mubr.bf16.gmra.mrb[16].mxu0 %v4849_v50  ;;  %2399 = vmatprep.mubr.bf16.mxu1 %v4853_v52  ;;  %v4937_v50 = vld [vmem:[%s6548_s0 + $0x484] ss:$48 sps:$4 sm:$0xff]   ;;  %v4941_v52 = vld [vmem:[%s6548_s0 + $0x480] ss:$48 sps:$4 sm:$0xff]  }
  0x64   :  { %2978 = vmatprep.mubr.bf16.mxu0 %v4855_v55  ;;  %2527 = vmatpush1.bf16.msra.mxu1 %v4894_v56  ;;  %v4951_v55 = vld [vmem:[%s6548_s0 + $0x4fc] ss:$48 sps:$4 sm:$0xff]   ;;  %v4953_v56 = vld [vmem:[%s6548_s0 + $0x4e0] ss:$48 sps:$4 sm:$0xff]  }
  0x65   :  { %3106 = vmatpush1.bf16.msra.mxu0 %v4898_v57  ;;  %2528 = vmatprep.subr.bf16.mxu1 %v4908_v58  ;;  %v4957_v57 = vld [vmem:[%s6548_s0 + $0x4f8] ss:$48 sps:$4 sm:$0xff]   ;;  %v4961_v58 = vld [vmem:[%s6548_s0 + $0x544] ss:$48 sps:$4 sm:$0xff]  }
  0x66   :  { %3107 = vmatprep.subr.bf16.mxu0 %v4912_v59  ;;  %v4963_v59 = vld [vmem:[%s6548_s0 + $0x55c] ss:$48 sps:$4 sm:$0xff]  }
  0x68   :  { %2529 = vmatpush1.bf16.msra.mxu1 %v4906_v60  ;;  %v4965_v60 = vld [vmem:[%s6548_s0 + $0x540] ss:$48 sps:$4 sm:$0xff]  }
  0x69   :  { %3108 = vmatpush1.bf16.msra.mxu0 %v4910_v61  ;;  %2530 = vmatprep.subr.bf16.mxu1 %v4920_v63  ;;  %v4969_v61 = vld [vmem:[%s6548_s0 + $0x558] ss:$48 sps:$4 sm:$0xff]   ;;  %v4975_v63 = vld [vmem:[%s6548_s0 + $0x5bc] ss:$48 sps:$4 sm:$0xff]  }
  0x6a   :  { %3109 = vmatprep.subr.bf16.mxu0 %v4924_v0  ;;  %2400 = vmatmul.mubr.bf16.gmra.mrb[20].mxu1 %v4857_v62  ;;  %v4973_v62 = vld [vmem:[%s6548_s0 + $0x5a4] ss:$48 sps:$4 sm:$0xff]   ;;  %v4977_v0 = vld [vmem:[%s6548_s0 + $0x5a0] ss:$48 sps:$4 sm:$0xff]  }
  0x6b   :  { %2979 = vmatmul.mubr.bf16.gmra.mrb[20].mxu0 %v4861_v1  ;;  %2409 = vmatprep.mubr.bf16.mxu1 %v4865_v2  ;;  %v4981_v1 = vld [vmem:[%s6548_s0 + $0x5b8] ss:$48 sps:$4 sm:$0xff]   ;;  %v4987_v2 = vld [vmem:[%s6548_s0 + $0xc] ss:$48 sps:$4 sm:$0xff]  }
  0x6c   :  { %2988 = vmatprep.mubr.bf16.mxu0 %v4867_v3  ;;  %2531 = vmatpush1.bf16.msra.mxu1 %v4918_v4  ;;  %v4990_v3 = vld [vmem:[%s6548_s0 + $0x24] ss:$48 sps:$4 sm:$0xff]   ;;  %v4985_v4 = vld [vmem:[%s6548_s0 + $0x8] ss:$48 sps:$4 sm:$0xff]  }
  0x6d   :  { %3110 = vmatpush1.bf16.msra.mxu0 %v4922_v5  ;;  %2532 = vmatprep.subr.bf16.mxu1 %v4932_v6  ;;  %v4988_v5 = vld [vmem:[%s6548_s0 + $0x20] ss:$48 sps:$4 sm:$0xff]  }
  0x6e   :  { %3111 = vmatprep.subr.bf16.mxu0 %v4936_v7  ;;  %v4991_v6 = vld [vmem:[%s6547_s1 + $0x200] ss:$8 sps:$4 sm:$0xff]  }
  0x6f   :  { %v4994_v7 = vld [vmem:[%s6547_s1 + $0x500] ss:$8 sps:$4 sm:$0xff]  }
  0x70   :  { %2533 = vmatpush1.bf16.msra.mxu1 %v4930_v8  ;;  %v4997_v8 = vld [vmem:[%s6548_s0 + $0x6c] ss:$48 sps:$4 sm:$0xff]  }
  0x71   :  { %3112 = vmatpush1.bf16.msra.mxu0 %v4934_v11  ;;  %2534 = vmatprep.subr.bf16.mxu1 %v4944_v13  ;;  %v5008_v11 = vld [vmem:[%s6547_s1 + $0x514] ss:$8 sps:$4 sm:$0xff]   ;;  %v5006_v13 = vld [vmem:[%s6547_s1 + $0x510] ss:$8 sps:$4 sm:$0xff]  }
  0x72   :  { %3113 = vmatprep.subr.bf16.mxu0 %v4948_v15  ;;  %2410 = vmatmul.mubr.bf16.gmra.mrb[24].mxu1 %v4869_v9  ;;  %v4999_v9 = vld [vmem:[%s6548_s0 + $0x84] ss:$48 sps:$4 sm:$0xff]  }
  0x73   :  { %2989 = vmatmul.mubr.bf16.gmra.mrb[24].mxu0 %v4873_v10  ;;  %2419 = vmatprep.mubr.bf16.mxu1 %v4877_v12  ;;  %v5004_v10 = vld [vmem:[%s6547_s1 + $0x214] ss:$8 sps:$4 sm:$0xff]   ;;  %v5002_v12 = vld [vmem:[%s6547_s1 + $0x210] ss:$8 sps:$4 sm:$0xff]   ;;  %v5020_v15 = vld [vmem:[%s6547_s1 + $0x524] ss:$8 sps:$4 sm:$0xff]  }
  0x74   :  { %2998 = vmatprep.mubr.bf16.mxu0 %v4879_v14  ;;  %2535 = vmatpush1.bf16.msra.mxu1 %v4942_v16  ;;  %v5016_v14 = vld [vmem:[%s6547_s1 + $0x224] ss:$8 sps:$4 sm:$0xff]   ;;  %v5001_v16 = vld [vmem:[%s6548_s0 + $0x68] ss:$48 sps:$4 sm:$0xff]  }
  0x75   :  { %3114 = vmatpush1.bf16.msra.mxu0 %v4946_v17  ;;  %2536 = vmatprep.subr.bf16.mxu1 %v4956_v19  ;;  %v5005_v17 = vld [vmem:[%s6548_s0 + $0x80] ss:$48 sps:$4 sm:$0xff]   ;;  %v5011_v19 = vld [vmem:[%s6548_s0 + $0xe4] ss:$48 sps:$4 sm:$0xff]  }
  0x76   :  { %3115 = vmatprep.subr.bf16.mxu0 %v4960_v21  ;;  %v5018_v21 = vld [vmem:[%s6547_s1 + $0x520] ss:$8 sps:$4 sm:$0xff]  }
  0x78   :  { %2537 = vmatpush1.bf16.msra.mxu1 %v4954_v18  ;;  %v5009_v18 = vld [vmem:[%s6548_s0 + $0xcc] ss:$48 sps:$4 sm:$0xff]  }
  0x79   :  { %3116 = vmatpush1.bf16.msra.mxu0 %v4958_v20  ;;  %2538 = vmatprep.subr.bf16.mxu1 %v4968_v26  ;;  %v5014_v20 = vld [vmem:[%s6547_s1 + $0x220] ss:$8 sps:$4 sm:$0xff]  }
  0x7a   :  { %2420 = vmatmul.mubr.bf16.gmra.mrb[28].mxu1 %v4881_v22  ;;  %3117 = vmatprep.subr.bf16.mxu0 %v4972_v29  ;;  %v5028_v22 = vld [vmem:[%s6547_s1 + $0x234] ss:$8 sps:$4 sm:$0xff]   ;;  %v5017_v26 = vld [vmem:[%s6548_s0 + $0xe0] ss:$48 sps:$4 sm:$0xff]   ;;  %v5040_v29 = vld [vmem:[%s6547_s1 + $0x244] ss:$8 sps:$4 sm:$0xff]  }
  0x7b   :  { %2999 = vmatmul.mubr.bf16.gmra.mrb[28].mxu0 %v4885_v23  ;;  %2429 = vmatprep.mubr.bf16.mxu1 %v4889_v24  ;;  %v5032_v23 = vld [vmem:[%s6547_s1 + $0x534] ss:$8 sps:$4 sm:$0xff]   ;;  %v5026_v24 = vld [vmem:[%s6547_s1 + $0x230] ss:$8 sps:$4 sm:$0xff]  }
  0x7c   :  { %3008 = vmatprep.mubr.bf16.mxu0 %v4891_v25  ;;  %2539 = vmatpush1.bf16.msra.mxu1 %v4966_v27  ;;  %v5013_v25 = vld [vmem:[%s6548_s0 + $0xc8] ss:$48 sps:$4 sm:$0xff]  }
  0x7d   :  { %3118 = vmatpush1.bf16.msra.mxu0 %v4970_v28  ;;  %2540 = vmatprep.subr.bf16.mxu1 %v4980_v34  ;;  %v5030_v27 = vld [vmem:[%s6547_s1 + $0x530] ss:$8 sps:$4 sm:$0xff]   ;;  %v5021_v28 = vld [vmem:[%s6548_s0 + $0x12c] ss:$48 sps:$4 sm:$0xff]  }
  0x7e   :  { %3119 = vmatprep.subr.bf16.mxu0 %v4984_v36  ;;  %v5052_v34 = vld [vmem:[%s6547_s1 + $0x254] ss:$8 sps:$4 sm:$0xff]   ;;  %v5050_v36 = vld [vmem:[%s6547_s1 + $0x250] ss:$8 sps:$4 sm:$0xff]  }
  0x80   :  { %2541 = vmatpush1.bf16.msra.mxu1 %v4978_v32  ;;  %v5038_v32 = vld [vmem:[%s6547_s1 + $0x240] ss:$8 sps:$4 sm:$0xff]  }
  0x81   :  { %3120 = vmatpush1.bf16.msra.mxu0 %v4982_v35  ;;  %2703 = vmatprep.subr.bf16.mxu1 %v4993_v38  ;;  %v5056_v35 = vld [vmem:[%s6547_s1 + $0x554] ss:$8 sps:$4 sm:$0xff]   ;;  %v5029_v38 = vld [vmem:[%s6548_s0 + $0x140] ss:$48 sps:$4 sm:$0xff]  }
  0x82   :  { %2430 = vmatmul.mubr.bf16.gmra.mrb[32].mxu1 %v4893_v30  ;;  %3282 = vmatprep.subr.bf16.mxu0 %v4996_v39  ;;  %v5044_v30 = vld [vmem:[%s6547_s1 + $0x544] ss:$8 sps:$4 sm:$0xff]   ;;  %v5054_v39 = vld [vmem:[%s6547_s1 + $0x550] ss:$8 sps:$4 sm:$0xff]  }
  0x83   :  { %3009 = vmatmul.mubr.bf16.gmra.mrb[32].mxu0 %v4897_v31  ;;  %2439 = vmatprep.mubr.bf16.mxu1 %v4901_v33  ;;  %v5023_v31 = vld [vmem:[%s6548_s0 + $0x144] ss:$48 sps:$4 sm:$0xff]   ;;  %v5042_v33 = vld [vmem:[%s6547_s1 + $0x540] ss:$8 sps:$4 sm:$0xff]  }
  0x84   :  { %3018 = vmatprep.mubr.bf16.mxu0 %v4903_v37  ;;  %v5025_v37 = vld [vmem:[%s6548_s0 + $0x128] ss:$48 sps:$4 sm:$0xff]  }
  0x8a   :  { %2440 = vmatmul.mubr.bf16.gmra.mrb[36].mxu1 %v4905_v40  ;;  %v5064_v40 = vld [vmem:[%s6547_s1 + $0x264] ss:$8 sps:$4 sm:$0xff]  }
  0x8b   :  { %3019 = vmatmul.mubr.bf16.gmra.mrb[36].mxu0 %v4909_v41  ;;  %2449 = vmatprep.mubr.bf16.mxu1 %v4913_v42  ;;  %v5068_v41 = vld [vmem:[%s6547_s1 + $0x564] ss:$8 sps:$4 sm:$0xff]  }
  0x8c   :  { %3028 = vmatprep.mubr.bf16.mxu0 %v4915_v43  ;;  %v5033_v42 = vld [vmem:[%s6548_s0 + $0x18c] ss:$48 sps:$4 sm:$0xff]   ;;  %v5035_v43 = vld [vmem:[%s6548_s0 + $0x1a4] ss:$48 sps:$4 sm:$0xff]  }
  0x92   :  { %2450 = vmatmul.mubr.bf16.gmra.mrb[40].mxu1 %v4917_v44  ;;  %v5062_v44 = vld [vmem:[%s6547_s1 + $0x260] ss:$8 sps:$4 sm:$0xff]  }
  0x93   :  { %3029 = vmatmul.mubr.bf16.gmra.mrb[40].mxu0 %v4921_v45  ;;  %2459 = vmatprep.mubr.bf16.mxu1 %v4925_v46  ;;  %v5066_v45 = vld [vmem:[%s6547_s1 + $0x560] ss:$8 sps:$4 sm:$0xff]   ;;  %v5076_v46 = vld [vmem:[%s6547_s1 + $0x274] ss:$8 sps:$4 sm:$0xff]  }
  0x94   :  { %3038 = vmatprep.mubr.bf16.mxu0 %v4927_v47  ;;  %v5080_v47 = vld [vmem:[%s6547_s1 + $0x574] ss:$8 sps:$4 sm:$0xff]  }
  0x9a   :  { %2460 = vmatmul.mubr.bf16.gmra.mrb[44].mxu1 %v4929_v48  ;;  %v5074_v48 = vld [vmem:[%s6547_s1 + $0x270] ss:$8 sps:$4 sm:$0xff]  }
  0x9b   :  { %3039 = vmatmul.mubr.bf16.gmra.mrb[44].mxu0 %v4933_v49  ;;  %2469 = vmatprep.mubr.bf16.mxu1 %v4937_v50  ;;  %v5078_v49 = vld [vmem:[%s6547_s1 + $0x570] ss:$8 sps:$4 sm:$0xff]  }
  0x9c   :  { %3048 = vmatprep.mubr.bf16.mxu0 %v4939_v51  ;;  %v5037_v50 = vld [vmem:[%s6548_s0 + $0x188] ss:$48 sps:$4 sm:$0xff]   ;;  %v5088_v51 = vld [vmem:[%s6547_s1 + $0x284] ss:$8 sps:$4 sm:$0xff]  }
  0xa2   :  { %2470 = vmatmul.mubr.bf16.gmra.mrb[48].mxu1 %v4941_v52  ;;  %v5092_v52 = vld [vmem:[%s6547_s1 + $0x584] ss:$8 sps:$4 sm:$0xff]  }
  0xa3   :  { %3049 = vmatmul.mubr.bf16.gmra.mrb[48].mxu0 %v4945_v53  ;;  %2479 = vmatprep.mubr.bf16.mxu1 %v4949_v54  ;;  %v5041_v53 = vld [vmem:[%s6548_s0 + $0x1a0] ss:$48 sps:$4 sm:$0xff]   ;;  %v5045_v54 = vld [vmem:[%s6548_s0 + $0x1ec] ss:$48 sps:$4 sm:$0xff]  }
  0xa4   :  { %3058 = vmatprep.mubr.bf16.mxu0 %v4951_v55  ;;  %v5047_v55 = vld [vmem:[%s6548_s0 + $0x204] ss:$48 sps:$4 sm:$0xff]  }
  0xaa   :  { %2480 = vmatmul.mubr.bf16.gmra.mrb[52].mxu1 %v4953_v56  ;;  %v5086_v56 = vld [vmem:[%s6547_s1 + $0x280] ss:$8 sps:$4 sm:$0xff]  }
  0xab   :  { %3059 = vmatmul.mubr.bf16.gmra.mrb[52].mxu0 %v4957_v57  ;;  %2489 = vmatprep.mubr.bf16.mxu1 %v4961_v58  ;;  %v5090_v57 = vld [vmem:[%s6547_s1 + $0x580] ss:$8 sps:$4 sm:$0xff]   ;;  %v5100_v58 = vld [vmem:[%s6547_s1 + $0x294] ss:$8 sps:$4 sm:$0xff]  }
  0xac   :  { %3068 = vmatprep.mubr.bf16.mxu0 %v4963_v59  ;;  %v5104_v59 = vld [vmem:[%s6547_s1 + $0x594] ss:$8 sps:$4 sm:$0xff]  }
  0xb2   :  { %2490 = vmatmul.mubr.bf16.gmra.mrb[56].mxu1 %v4965_v60  ;;  %v5098_v60 = vld [vmem:[%s6547_s1 + $0x290] ss:$8 sps:$4 sm:$0xff]  }
  0xb3   :  { %3069 = vmatmul.mubr.bf16.gmra.mrb[56].mxu0 %v4969_v61  ;;  %2499 = vmatprep.mubr.bf16.mxu1 %v4973_v62  ;;  %v5102_v61 = vld [vmem:[%s6547_s1 + $0x590] ss:$8 sps:$4 sm:$0xff]   ;;  %v5112_v62 = vld [vmem:[%s6547_s1 + $0x2a4] ss:$8 sps:$4 sm:$0xff]  }
  0xb4   :  { %3078 = vmatprep.mubr.bf16.mxu0 %v4975_v63  ;;  %v5116_v63 = vld [vmem:[%s6547_s1 + $0x5a4] ss:$8 sps:$4 sm:$0xff]  }
  0xba   :  { %2500 = vmatmul.mubr.bf16.gmra.mrb[60].mxu1 %v4977_v0  ;;  %v5049_v0 = vld [vmem:[%s6548_s0 + $0x1e8] ss:$48 sps:$4 sm:$0xff]  }
  0xbb   :  { %3079 = vmatmul.mubr.bf16.gmra.mrb[60].mxu0 %v4981_v1  ;;  %2542 = vmatprep.mubr.bf16.mxu1 %v4987_v2  ;;  %v5053_v1 = vld [vmem:[%s6548_s0 + $0x200] ss:$48 sps:$4 sm:$0xff]   ;;  %v5057_v2 = vld [vmem:[%s6548_s0 + $0x24c] ss:$48 sps:$4 sm:$0xff]  }
  0xbc   :  { %3121 = vmatprep.mubr.bf16.mxu0 %v4990_v3  ;;  %v5059_v3 = vld [vmem:[%s6548_s0 + $0x264] ss:$48 sps:$4 sm:$0xff]  }
  0xc2   :  { %2543 = vmatmul.mubr.bf16.vlgmr.msra.gmra.mrb[0].mxu1 %v4985_v4  ;;  %v5110_v4 = vld [vmem:[%s6547_s1 + $0x2a0] ss:$8 sps:$4 sm:$0xff]  }
  0xc3   :  { %3122 = vmatmul.mubr.bf16.vlgmr.msra.gmra.mrb[0].mxu0 %v4988_v5  ;;  %2704 = vmatpush1.bf16.msra.mxu1 %v4991_v6  ;;  %v5114_v5 = vld [vmem:[%s6547_s1 + $0x5a0] ss:$8 sps:$4 sm:$0xff]   ;;  %v5124_v6 = vld [vmem:[%s6547_s1 + $0x2b4] ss:$8 sps:$4 sm:$0xff]  }
  0xc4   :  { %3283 = vmatpush1.bf16.msra.mxu0 %v4994_v7  ;;  %2552 = vmatprep.mubr.bf16.mxu1 %v4997_v8  ;;  %v5128_v7 = vld [vmem:[%s6547_s1 + $0x5b4] ss:$8 sps:$4 sm:$0xff]   ;;  %v5122_v8 = vld [vmem:[%s6547_s1 + $0x2b0] ss:$8 sps:$4 sm:$0xff]  }
  0xc5   :  { %3131 = vmatprep.mubr.bf16.mxu0 %v4999_v9  ;;  %2705 = vmatprep.subr.bf16.mxu1 %v5004_v10  ;;  %v5126_v9 = vld [vmem:[%s6547_s1 + $0x5b0] ss:$8 sps:$4 sm:$0xff]   ;;  %v5136_v10 = vld [vmem:[%s6547_s1 + $0x2c4] ss:$8 sps:$4 sm:$0xff]  }
  0xc6   :  { %3284 = vmatprep.subr.bf16.mxu0 %v5008_v11  ;;  %v5140_v11 = vld [vmem:[%s6547_s1 + $0x5c4] ss:$8 sps:$4 sm:$0xff]  }
  0xc7   :  { %2706 = vmatpush1.bf16.msra.mxu1 %v5002_v12  ;;  %v5061_v12 = vld [vmem:[%s6548_s0 + $0x248] ss:$48 sps:$4 sm:$0xff]  }
  0xc8   :  { %3285 = vmatpush1.bf16.msra.mxu0 %v5006_v13  ;;  %2707 = vmatprep.subr.bf16.mxu1 %v5016_v14  ;;  %v5065_v13 = vld [vmem:[%s6548_s0 + $0x260] ss:$48 sps:$4 sm:$0xff]   ;;  %v5069_v14 = vld [vmem:[%s6548_s0 + $0x2ac] ss:$48 sps:$4 sm:$0xff]  }
  0xc9   :  { %3286 = vmatprep.subr.bf16.mxu0 %v5020_v15  ;;  %v5071_v15 = vld [vmem:[%s6548_s0 + $0x2c4] ss:$48 sps:$4 sm:$0xff]  }
  0xca   :  { %2553 = vmatmul.mubr.bf16.gmra.mrb[4].mxu1 %v5001_v16  ;;  %v5134_v16 = vld [vmem:[%s6547_s1 + $0x2c0] ss:$8 sps:$4 sm:$0xff]  }
  0xcb   :  { %3132 = vmatmul.mubr.bf16.gmra.mrb[4].mxu0 %v5005_v17  ;;  %2562 = vmatprep.mubr.bf16.mxu1 %v5009_v18  ;;  %v5138_v17 = vld [vmem:[%s6547_s1 + $0x5c0] ss:$8 sps:$4 sm:$0xff]   ;;  %v5148_v18 = vld [vmem:[%s6547_s1 + $0x2d4] ss:$8 sps:$4 sm:$0xff]  }
  0xcc   :  { %3141 = vmatprep.mubr.bf16.mxu0 %v5011_v19  ;;  %2708 = vmatpush1.bf16.msra.mxu1 %v5014_v20  ;;  %v5152_v19 = vld [vmem:[%s6547_s1 + $0x5d4] ss:$8 sps:$4 sm:$0xff]   ;;  %v5146_v20 = vld [vmem:[%s6547_s1 + $0x2d0] ss:$8 sps:$4 sm:$0xff]  }
  0xcd   :  { %3287 = vmatpush1.bf16.msra.mxu0 %v5018_v21  ;;  %2709 = vmatprep.subr.bf16.mxu1 %v5028_v22  ;;  %v5150_v21 = vld [vmem:[%s6547_s1 + $0x5d0] ss:$8 sps:$4 sm:$0xff]   ;;  %v5160_v22 = vld [vmem:[%s6547_s1 + $0x2e4] ss:$8 sps:$4 sm:$0xff]  }
  0xce   :  { %3288 = vmatprep.subr.bf16.mxu0 %v5032_v23  ;;  %v5164_v23 = vld [vmem:[%s6547_s1 + $0x5e4] ss:$8 sps:$4 sm:$0xff]  }
  0xd0   :  { %2710 = vmatpush1.bf16.msra.mxu1 %v5026_v24  ;;  %v5073_v24 = vld [vmem:[%s6548_s0 + $0x2a8] ss:$48 sps:$4 sm:$0xff]  }
  0xd1   :  { %3289 = vmatpush1.bf16.msra.mxu0 %v5030_v27  ;;  %2711 = vmatprep.subr.bf16.mxu1 %v5040_v29  ;;  %v5083_v27 = vld [vmem:[%s6548_s0 + $0x324] ss:$48 sps:$4 sm:$0xff]   ;;  %v5162_v29 = vld [vmem:[%s6547_s1 + $0x5e0] ss:$8 sps:$4 sm:$0xff]  }
  0xd2   :  { %3290 = vmatprep.subr.bf16.mxu0 %v5044_v30  ;;  %2563 = vmatmul.mubr.bf16.gmra.mrb[8].mxu1 %v5013_v25  ;;  %v5077_v25 = vld [vmem:[%s6548_s0 + $0x2c0] ss:$48 sps:$4 sm:$0xff]   ;;  %v5172_v30 = vld [vmem:[%s6547_s1 + $0x2f4] ss:$8 sps:$4 sm:$0xff]  }
  0xd3   :  { %3142 = vmatmul.mubr.bf16.gmra.mrb[8].mxu0 %v5017_v26  ;;  %2572 = vmatprep.mubr.bf16.mxu1 %v5021_v28  ;;  %v5081_v26 = vld [vmem:[%s6548_s0 + $0x30c] ss:$48 sps:$4 sm:$0xff]   ;;  %v5158_v28 = vld [vmem:[%s6547_s1 + $0x2e0] ss:$8 sps:$4 sm:$0xff]  }
  0xd4   :  { %3151 = vmatprep.mubr.bf16.mxu0 %v5023_v31  ;;  %2712 = vmatpush1.bf16.msra.mxu1 %v5038_v32  ;;  %v5176_v31 = vld [vmem:[%s6547_s1 + $0x5f4] ss:$8 sps:$4 sm:$0xff]   ;;  %v5170_v32 = vld [vmem:[%s6547_s1 + $0x2f0] ss:$8 sps:$4 sm:$0xff]  }
  0xd5   :  { %3291 = vmatpush1.bf16.msra.mxu0 %v5042_v33  ;;  %2713 = vmatprep.subr.bf16.mxu1 %v5052_v34  ;;  %v5174_v33 = vld [vmem:[%s6547_s1 + $0x5f0] ss:$8 sps:$4 sm:$0xff]  }
  0xd6   :  { %3292 = vmatprep.subr.bf16.mxu0 %v5056_v35  ;;  %v5085_v34 = vld [vmem:[%s6548_s0 + $0x308] ss:$48 sps:$4 sm:$0xff]   ;;  %v5089_v35 = vld [vmem:[%s6548_s0 + $0x320] ss:$48 sps:$4 sm:$0xff]  }
  0xd8   :  { %2714 = vmatpush1.bf16.msra.mxu1 %v5050_v36  ;;  %v5093_v36 = vld [vmem:[%s6548_s0 + $0x36c] ss:$48 sps:$4 sm:$0xff]  }
  0xd9   :  { %3293 = vmatpush1.bf16.msra.mxu0 %v5054_v39  ;;  %2715 = vmatprep.subr.bf16.mxu1 %v5064_v40  ;;  %v5101_v39 = vld [vmem:[%s6548_s0 + $0x380] ss:$48 sps:$4 sm:$0xff]   ;;  %v5105_v40 = vld [vmem:[%s6548_s0 + $0x3cc] ss:$48 sps:$4 sm:$0xff]  }
  0xda   :  { %3294 = vmatprep.subr.bf16.mxu0 %v5068_v41  ;;  %2573 = vmatmul.mubr.bf16.gmra.mrb[12].mxu1 %v5025_v37  ;;  %v5095_v37 = vld [vmem:[%s6548_s0 + $0x384] ss:$48 sps:$4 sm:$0xff]  }
  0xdb   :  { %3152 = vmatmul.mubr.bf16.gmra.mrb[12].mxu0 %v5029_v38  ;;  %2582 = vmatprep.mubr.bf16.mxu1 %v5033_v42  ;;  %v5097_v38 = vld [vmem:[%s6548_s0 + $0x368] ss:$48 sps:$4 sm:$0xff]   ;;  %v5107_v41 = vld [vmem:[%s6548_s0 + $0x3e4] ss:$48 sps:$4 sm:$0xff]  }
  0xdc   :  { %3161 = vmatprep.mubr.bf16.mxu0 %v5035_v43  ;;  %2716 = vmatpush1.bf16.msra.mxu1 %v5062_v44  ;;  %v5109_v42 = vld [vmem:[%s6548_s0 + $0x3c8] ss:$48 sps:$4 sm:$0xff]   ;;  %v5113_v43 = vld [vmem:[%s6548_s0 + $0x3e0] ss:$48 sps:$4 sm:$0xff]   ;;  %v5117_v44 = vld [vmem:[%s6548_s0 + $0x42c] ss:$48 sps:$4 sm:$0xff]  }
  0xdd   :  { %3295 = vmatpush1.bf16.msra.mxu0 %v5066_v45  ;;  %2717 = vmatprep.subr.bf16.mxu1 %v5076_v46  ;;  %v5119_v45 = vld [vmem:[%s6548_s0 + $0x444] ss:$48 sps:$4 sm:$0xff]   ;;  %v5121_v46 = vld [vmem:[%s6548_s0 + $0x428] ss:$48 sps:$4 sm:$0xff]  }
  0xde   :  { %3296 = vmatprep.subr.bf16.mxu0 %v5080_v47  ;;  %v5125_v47 = vld [vmem:[%s6548_s0 + $0x440] ss:$48 sps:$4 sm:$0xff]  }
  0xe0   :  { %2718 = vmatpush1.bf16.msra.mxu1 %v5074_v48  ;;  %v5129_v48 = vld [vmem:[%s6548_s0 + $0x48c] ss:$48 sps:$4 sm:$0xff]  }
  0xe1   :  { %3297 = vmatpush1.bf16.msra.mxu0 %v5078_v49  ;;  %2719 = vmatprep.subr.bf16.mxu1 %v5088_v51  ;;  %v5131_v49 = vld [vmem:[%s6548_s0 + $0x4a4] ss:$48 sps:$4 sm:$0xff]   ;;  %v5137_v51 = vld [vmem:[%s6548_s0 + $0x4a0] ss:$48 sps:$4 sm:$0xff]  }
  0xe2   :  { %3298 = vmatprep.subr.bf16.mxu0 %v5092_v52  ;;  %2583 = vmatmul.mubr.bf16.gmra.mrb[16].mxu1 %v5037_v50  ;;  %v5133_v50 = vld [vmem:[%s6548_s0 + $0x488] ss:$48 sps:$4 sm:$0xff]   ;;  %v5141_v52 = vld [vmem:[%s6548_s0 + $0x4ec] ss:$48 sps:$4 sm:$0xff]  }
  0xe3   :  { %3162 = vmatmul.mubr.bf16.gmra.mrb[16].mxu0 %v5041_v53  ;;  %2592 = vmatprep.mubr.bf16.mxu1 %v5045_v54  ;;  %v5143_v53 = vld [vmem:[%s6548_s0 + $0x504] ss:$48 sps:$4 sm:$0xff]   ;;  %v5145_v54 = vld [vmem:[%s6548_s0 + $0x4e8] ss:$48 sps:$4 sm:$0xff]  }
  0xe4   :  { %3171 = vmatprep.mubr.bf16.mxu0 %v5047_v55  ;;  %2720 = vmatpush1.bf16.msra.mxu1 %v5086_v56  ;;  %v5149_v55 = vld [vmem:[%s6548_s0 + $0x500] ss:$48 sps:$4 sm:$0xff]   ;;  %v5153_v56 = vld [vmem:[%s6548_s0 + $0x54c] ss:$48 sps:$4 sm:$0xff]  }
  0xe5   :  { %3299 = vmatpush1.bf16.msra.mxu0 %v5090_v57  ;;  %2721 = vmatprep.subr.bf16.mxu1 %v5100_v58  ;;  %v5155_v57 = vld [vmem:[%s6548_s0 + $0x564] ss:$48 sps:$4 sm:$0xff]   ;;  %v5157_v58 = vld [vmem:[%s6548_s0 + $0x548] ss:$48 sps:$4 sm:$0xff]  }
  0xe6   :  { %3300 = vmatprep.subr.bf16.mxu0 %v5104_v59  ;;  %v5161_v59 = vld [vmem:[%s6548_s0 + $0x560] ss:$48 sps:$4 sm:$0xff]  }
  0xe8   :  { %2722 = vmatpush1.bf16.msra.mxu1 %v5098_v60  ;;  %v5165_v60 = vld [vmem:[%s6548_s0 + $0x5ac] ss:$48 sps:$4 sm:$0xff]  }
  0xe9   :  { %3301 = vmatpush1.bf16.msra.mxu0 %v5102_v61  ;;  %2723 = vmatprep.subr.bf16.mxu1 %v5112_v62  ;;  %v5167_v61 = vld [vmem:[%s6548_s0 + $0x5c4] ss:$48 sps:$4 sm:$0xff]   ;;  %v5169_v62 = vld [vmem:[%s6548_s0 + $0x5a8] ss:$48 sps:$4 sm:$0xff]  }
  0xea   :  { %3302 = vmatprep.subr.bf16.mxu0 %v5116_v63  ;;  %2593 = vmatmul.mubr.bf16.gmra.mrb[20].mxu1 %v5049_v0  ;;  %v5173_v63 = vld [vmem:[%s6548_s0 + $0x5c0] ss:$48 sps:$4 sm:$0xff]   ;;  %v5179_v0 = vld [vmem:[%s6548_s0 + $0x14] ss:$48 sps:$4 sm:$0xff]  }
  0xeb   :  { %3172 = vmatmul.mubr.bf16.gmra.mrb[20].mxu0 %v5053_v1  ;;  %2602 = vmatprep.mubr.bf16.mxu1 %v5057_v2  ;;  %v5182_v1 = vld [vmem:[%s6548_s0 + $0x2c] ss:$48 sps:$4 sm:$0xff]   ;;  %v5177_v2 = vld [vmem:[%s6548_s0 + $0x10] ss:$48 sps:$4 sm:$0xff]  }
  0xec   :  { %3181 = vmatprep.mubr.bf16.mxu0 %v5059_v3  ;;  %2724 = vmatpush1.bf16.msra.mxu1 %v5110_v4  ;;  %v5180_v3 = vld [vmem:[%s6548_s0 + $0x28] ss:$48 sps:$4 sm:$0xff]   ;;  %v5183_v4 = vld [vmem:[%s6548_s0 + $0x74] ss:$48 sps:$4 sm:$0xff]  }
  0xed   :  { %3303 = vmatpush1.bf16.msra.mxu0 %v5114_v5  ;;  %2725 = vmatprep.subr.bf16.mxu1 %v5124_v6  ;;  %v5185_v5 = vld [vmem:[%s6548_s0 + $0x8c] ss:$48 sps:$4 sm:$0xff]   ;;  %v5187_v6 = vld [vmem:[%s6548_s0 + $0x70] ss:$48 sps:$4 sm:$0xff]  }
  0xee   :  { %3304 = vmatprep.subr.bf16.mxu0 %v5128_v7  ;;  %v5188_v7 = vld [vmem:[%s6548_s0 + $0x88] ss:$48 sps:$4 sm:$0xff]  }
  0xf0   :  { %2726 = vmatpush1.bf16.msra.mxu1 %v5122_v8  ;;  %v5189_v8 = vld [vmem:[%s6548_s0 + $0xd4] ss:$48 sps:$4 sm:$0xff]  }
  0xf1   :  { %3305 = vmatpush1.bf16.msra.mxu0 %v5126_v9  ;;  %2727 = vmatprep.subr.bf16.mxu1 %v5136_v10  ;;  %v5191_v9 = vld [vmem:[%s6548_s0 + $0xec] ss:$48 sps:$4 sm:$0xff]   ;;  %v5193_v10 = vld [vmem:[%s6548_s0 + $0xd0] ss:$48 sps:$4 sm:$0xff]  }
  0xf2   :  { %3306 = vmatprep.subr.bf16.mxu0 %v5140_v11  ;;  %2603 = vmatmul.mubr.bf16.gmra.mrb[24].mxu1 %v5061_v12  ;;  %v5194_v11 = vld [vmem:[%s6548_s0 + $0xe8] ss:$48 sps:$4 sm:$0xff]   ;;  %v5195_v12 = vld [vmem:[%s6548_s0 + $0x134] ss:$48 sps:$4 sm:$0xff]  }
  0xf3   :  { %3182 = vmatmul.mubr.bf16.gmra.mrb[24].mxu0 %v5065_v13  ;;  %2612 = vmatprep.mubr.bf16.mxu1 %v5069_v14  ;;  %v5197_v13 = vld [vmem:[%s6548_s0 + $0x14c] ss:$48 sps:$4 sm:$0xff]   ;;  %v5199_v14 = vld [vmem:[%s6548_s0 + $0x130] ss:$48 sps:$4 sm:$0xff]  }
  0xf4   :  { %3191 = vmatprep.mubr.bf16.mxu0 %v5071_v15  ;;  %2728 = vmatpush1.bf16.msra.mxu1 %v5134_v16  ;;  %v5200_v15 = vld [vmem:[%s6548_s0 + $0x148] ss:$48 sps:$4 sm:$0xff]   ;;  %v5201_v16 = vld [vmem:[%s6548_s0 + $0x194] ss:$48 sps:$4 sm:$0xff]  }
  0xf5   :  { %3307 = vmatpush1.bf16.msra.mxu0 %v5138_v17  ;;  %2729 = vmatprep.subr.bf16.mxu1 %v5148_v18  ;;  %v5203_v17 = vld [vmem:[%s6548_s0 + $0x1ac] ss:$48 sps:$4 sm:$0xff]   ;;  %v5205_v18 = vld [vmem:[%s6548_s0 + $0x190] ss:$48 sps:$4 sm:$0xff]  }
  0xf6   :  { %3308 = vmatprep.subr.bf16.mxu0 %v5152_v19  ;;  %v5206_v19 = vld [vmem:[%s6548_s0 + $0x1a8] ss:$48 sps:$4 sm:$0xff]  }
  0xf8   :  { %2730 = vmatpush1.bf16.msra.mxu1 %v5146_v20  ;;  %v5207_v20 = vld [vmem:[%s6548_s0 + $0x1f4] ss:$48 sps:$4 sm:$0xff]  }
  0xf9   :  { %3309 = vmatpush1.bf16.msra.mxu0 %v5150_v21  ;;  %2731 = vmatprep.subr.bf16.mxu1 %v5160_v22  ;;  %v5209_v21 = vld [vmem:[%s6548_s0 + $0x20c] ss:$48 sps:$4 sm:$0xff]   ;;  %v5211_v22 = vld [vmem:[%s6548_s0 + $0x1f0] ss:$48 sps:$4 sm:$0xff]  }
  0xfa   :  { %3310 = vmatprep.subr.bf16.mxu0 %v5164_v23  ;;  %2613 = vmatmul.mubr.bf16.gmra.mrb[28].mxu1 %v5073_v24  ;;  %v5212_v23 = vld [vmem:[%s6548_s0 + $0x208] ss:$48 sps:$4 sm:$0xff]   ;;  %v5213_v24 = vld [vmem:[%s6548_s0 + $0x254] ss:$48 sps:$4 sm:$0xff]  }
  0xfb   :  { %3192 = vmatmul.mubr.bf16.gmra.mrb[28].mxu0 %v5077_v25  ;;  %2622 = vmatprep.mubr.bf16.mxu1 %v5081_v26  ;;  %v5215_v25 = vld [vmem:[%s6548_s0 + $0x26c] ss:$48 sps:$4 sm:$0xff]   ;;  %v5217_v26 = vld [vmem:[%s6548_s0 + $0x250] ss:$48 sps:$4 sm:$0xff]  }
  0xfc   :  { %3201 = vmatprep.mubr.bf16.mxu0 %v5083_v27  ;;  %2732 = vmatpush1.bf16.msra.mxu1 %v5158_v28  ;;  %v5218_v27 = vld [vmem:[%s6548_s0 + $0x268] ss:$48 sps:$4 sm:$0xff]   ;;  %v5219_v28 = vld [vmem:[%s6548_s0 + $0x2b4] ss:$48 sps:$4 sm:$0xff]  }
  0xfd   :  { %3311 = vmatpush1.bf16.msra.mxu0 %v5162_v29  ;;  %2733 = vmatprep.subr.bf16.mxu1 %v5172_v30  ;;  %v5221_v29 = vld [vmem:[%s6548_s0 + $0x2cc] ss:$48 sps:$4 sm:$0xff]   ;;  %v5223_v30 = vld [vmem:[%s6548_s0 + $0x2b0] ss:$48 sps:$4 sm:$0xff]  }
  0xfe   :  { %3312 = vmatprep.subr.bf16.mxu0 %v5176_v31  ;;  %v5224_v31 = vld [vmem:[%s6548_s0 + $0x2c8] ss:$48 sps:$4 sm:$0xff]  }
 0x100   :  { %2734 = vmatpush1.bf16.msra.mxu1 %v5170_v32  ;;  %v5225_v32 = vld [vmem:[%s6548_s0 + $0x314] ss:$48 sps:$4 sm:$0xff]  }
 0x101   :  { %3313 = vmatpush1.bf16.msra.mxu0 %v5174_v33  ;;  %v5227_v33 = vld [vmem:[%s6548_s0 + $0x32c] ss:$48 sps:$4 sm:$0xff]  }
 0x102   :  { %2623 = vmatmul.mubr.bf16.gmra.mrb[32].mxu1 %v5085_v34  ;;  %v5229_v34 = vld [vmem:[%s6548_s0 + $0x310] ss:$48 sps:$4 sm:$0xff]  }
 0x103   :  { %3202 = vmatmul.mubr.bf16.gmra.mrb[32].mxu0 %v5089_v35  ;;  %2632 = vmatprep.mubr.bf16.mxu1 %v5093_v36  ;;  %v5230_v35 = vld [vmem:[%s6548_s0 + $0x328] ss:$48 sps:$4 sm:$0xff]   ;;  %v5231_v36 = vld [vmem:[%s6548_s0 + $0x374] ss:$48 sps:$4 sm:$0xff]  }
 0x104   :  { %3211 = vmatprep.mubr.bf16.mxu0 %v5095_v37  ;;  %v5233_v37 = vld [vmem:[%s6548_s0 + $0x38c] ss:$48 sps:$4 sm:$0xff]  }
 0x10a   :  { %2633 = vmatmul.mubr.bf16.gmra.mrb[36].mxu1 %v5097_v38  ;;  %v5235_v38 = vld [vmem:[%s6548_s0 + $0x370] ss:$48 sps:$4 sm:$0xff]  }
 0x10b   :  { %3212 = vmatmul.mubr.bf16.gmra.mrb[36].mxu0 %v5101_v39  ;;  %2642 = vmatprep.mubr.bf16.mxu1 %v5105_v40  ;;  %v5236_v39 = vld [vmem:[%s6548_s0 + $0x388] ss:$48 sps:$4 sm:$0xff]   ;;  %v5237_v40 = vld [vmem:[%s6548_s0 + $0x3d4] ss:$48 sps:$4 sm:$0xff]  }
 0x10c   :  { %3221 = vmatprep.mubr.bf16.mxu0 %v5107_v41  ;;  %v5239_v41 = vld [vmem:[%s6548_s0 + $0x3ec] ss:$48 sps:$4 sm:$0xff]  }
 0x112   :  { %2643 = vmatmul.mubr.bf16.gmra.mrb[40].mxu1 %v5109_v42  ;;  %v5241_v42 = vld [vmem:[%s6548_s0 + $0x3d0] ss:$48 sps:$4 sm:$0xff]  }
 0x113   :  { %3222 = vmatmul.mubr.bf16.gmra.mrb[40].mxu0 %v5113_v43  ;;  %2652 = vmatprep.mubr.bf16.mxu1 %v5117_v44  ;;  %v5242_v43 = vld [vmem:[%s6548_s0 + $0x3e8] ss:$48 sps:$4 sm:$0xff]   ;;  %v5243_v44 = vld [vmem:[%s6548_s0 + $0x434] ss:$48 sps:$4 sm:$0xff]  }
 0x114   :  { %3231 = vmatprep.mubr.bf16.mxu0 %v5119_v45  ;;  %v5245_v45 = vld [vmem:[%s6548_s0 + $0x44c] ss:$48 sps:$4 sm:$0xff]  }
 0x11a   :  { %2653 = vmatmul.mubr.bf16.gmra.mrb[44].mxu1 %v5121_v46  ;;  %v5247_v46 = vld [vmem:[%s6548_s0 + $0x430] ss:$48 sps:$4 sm:$0xff]  }
 0x11b   :  { %3232 = vmatmul.mubr.bf16.gmra.mrb[44].mxu0 %v5125_v47  ;;  %2662 = vmatprep.mubr.bf16.mxu1 %v5129_v48  ;;  %v5248_v47 = vld [vmem:[%s6548_s0 + $0x448] ss:$48 sps:$4 sm:$0xff]   ;;  %v5249_v48 = vld [vmem:[%s6548_s0 + $0x494] ss:$48 sps:$4 sm:$0xff]  }
 0x11c   :  { %3241 = vmatprep.mubr.bf16.mxu0 %v5131_v49  ;;  %v5251_v49 = vld [vmem:[%s6548_s0 + $0x4ac] ss:$48 sps:$4 sm:$0xff]  }
 0x122   :  { %2663 = vmatmul.mubr.bf16.gmra.mrb[48].mxu1 %v5133_v50  ;;  %v5253_v50 = vld [vmem:[%s6548_s0 + $0x490] ss:$48 sps:$4 sm:$0xff]  }
 0x123   :  { %3242 = vmatmul.mubr.bf16.gmra.mrb[48].mxu0 %v5137_v51  ;;  %2672 = vmatprep.mubr.bf16.mxu1 %v5141_v52  ;;  %v5254_v51 = vld [vmem:[%s6548_s0 + $0x4a8] ss:$48 sps:$4 sm:$0xff]   ;;  %v5255_v52 = vld [vmem:[%s6548_s0 + $0x4f4] ss:$48 sps:$4 sm:$0xff]  }
 0x124   :  { %3251 = vmatprep.mubr.bf16.mxu0 %v5143_v53  ;;  %v5257_v53 = vld [vmem:[%s6548_s0 + $0x50c] ss:$48 sps:$4 sm:$0xff]  }
 0x12a   :  { %2673 = vmatmul.mubr.bf16.gmra.mrb[52].mxu1 %v5145_v54  ;;  %v5259_v54 = vld [vmem:[%s6548_s0 + $0x4f0] ss:$48 sps:$4 sm:$0xff]  }
 0x12b   :  { %3252 = vmatmul.mubr.bf16.gmra.mrb[52].mxu0 %v5149_v55  ;;  %2682 = vmatprep.mubr.bf16.mxu1 %v5153_v56  ;;  %v5260_v55 = vld [vmem:[%s6548_s0 + $0x508] ss:$48 sps:$4 sm:$0xff]   ;;  %v5261_v56 = vld [vmem:[%s6548_s0 + $0x554] ss:$48 sps:$4 sm:$0xff]  }
 0x12c   :  { %3261 = vmatprep.mubr.bf16.mxu0 %v5155_v57  ;;  %v5263_v57 = vld [vmem:[%s6548_s0 + $0x56c] ss:$48 sps:$4 sm:$0xff]  }
 0x132   :  { %2683 = vmatmul.mubr.bf16.gmra.mrb[56].mxu1 %v5157_v58  ;;  %v5265_v58 = vld [vmem:[%s6548_s0 + $0x550] ss:$48 sps:$4 sm:$0xff]  }
 0x133   :  { %3262 = vmatmul.mubr.bf16.gmra.mrb[56].mxu0 %v5161_v59  ;;  %2692 = vmatprep.mubr.bf16.mxu1 %v5165_v60  ;;  %v5266_v59 = vld [vmem:[%s6548_s0 + $0x568] ss:$48 sps:$4 sm:$0xff]   ;;  %v5267_v60 = vld [vmem:[%s6548_s0 + $0x5b4] ss:$48 sps:$4 sm:$0xff]  }
 0x134   :  { %3271 = vmatprep.mubr.bf16.mxu0 %v5167_v61  ;;  %v5269_v61 = vld [vmem:[%s6548_s0 + $0x5cc] ss:$48 sps:$4 sm:$0xff]  }
 0x13a   :  { %2693 = vmatmul.mubr.bf16.gmra.mrb[60].mxu1 %v5169_v62  ;;  %v5271_v62 = vld [vmem:[%s6548_s0 + $0x5b0] ss:$48 sps:$4 sm:$0xff]  }
 0x13b   :  { %3272 = vmatmul.mubr.bf16.gmra.mrb[60].mxu0 %v5173_v63  ;;  %2735 = vmatprep.mubr.bf16.mxu1 %v5179_v0  ;;  %v5272_v63 = vld [vmem:[%s6548_s0 + $0x5c8] ss:$48 sps:$4 sm:$0xff]  }
 0x13c   :  { %3314 = vmatprep.mubr.bf16.mxu0 %v5182_v1 }
 0x142   :  { %2736 = vmatmul.mubr.bf16.vlgmr.msra.gmra.mrb[0].mxu1 %v5177_v2 }
 0x143   :  { %3315 = vmatmul.mubr.bf16.vlgmr.msra.gmra.mrb[0].mxu0 %v5180_v3  ;;  %2745 = vmatprep.mubr.bf16.mxu1 %v5183_v4 }
 0x144   :  { %3324 = vmatprep.mubr.bf16.mxu0 %v5185_v5 }
 0x14a   :  { %2746 = vmatmul.mubr.bf16.gmra.mrb[4].mxu1 %v5187_v6 }
 0x14b   :  { %3325 = vmatmul.mubr.bf16.gmra.mrb[4].mxu0 %v5188_v7  ;;  %2755 = vmatprep.mubr.bf16.mxu1 %v5189_v8 }
 0x14c   :  { %3334 = vmatprep.mubr.bf16.mxu0 %v5191_v9 }
 0x152   :  { %2756 = vmatmul.mubr.bf16.gmra.mrb[8].mxu1 %v5193_v10 }
 0x153   :  { %3335 = vmatmul.mubr.bf16.gmra.mrb[8].mxu0 %v5194_v11  ;;  %2765 = vmatprep.mubr.bf16.mxu1 %v5195_v12 }
 0x154   :  { %3344 = vmatprep.mubr.bf16.mxu0 %v5197_v13 }
 0x15a   :  { %2766 = vmatmul.mubr.bf16.gmra.mrb[12].mxu1 %v5199_v14 }
 0x15b   :  { %3345 = vmatmul.mubr.bf16.gmra.mrb[12].mxu0 %v5200_v15  ;;  %2775 = vmatprep.mubr.bf16.mxu1 %v5201_v16 }
 0x15c   :  { %3354 = vmatprep.mubr.bf16.mxu0 %v5203_v17 }
 0x162   :  { %2776 = vmatmul.mubr.bf16.gmra.mrb[16].mxu1 %v5205_v18 }
 0x163   :  { %3355 = vmatmul.mubr.bf16.gmra.mrb[16].mxu0 %v5206_v19  ;;  %2785 = vmatprep.mubr.bf16.mxu1 %v5207_v20 }
 0x164   :  { %3364 = vmatprep.mubr.bf16.mxu0 %v5209_v21 }
 0x16a   :  { %2786 = vmatmul.mubr.bf16.gmra.mrb[20].mxu1 %v5211_v22 }
 0x16b   :  { %3365 = vmatmul.mubr.bf16.gmra.mrb[20].mxu0 %v5212_v23  ;;  %2795 = vmatprep.mubr.bf16.mxu1 %v5213_v24 }
 0x16c   :  { %3374 = vmatprep.mubr.bf16.mxu0 %v5215_v25 }
 0x172   :  { %2796 = vmatmul.mubr.bf16.gmra.mrb[24].mxu1 %v5217_v26 }
 0x173   :  { %3375 = vmatmul.mubr.bf16.gmra.mrb[24].mxu0 %v5218_v27  ;;  %2805 = vmatprep.mubr.bf16.mxu1 %v5219_v28 }
 0x174   :  { %3384 = vmatprep.mubr.bf16.mxu0 %v5221_v29 }
 0x17a   :  { %2806 = vmatmul.mubr.bf16.gmra.mrb[28].mxu1 %v5223_v30 }
 0x17b   :  { %3385 = vmatmul.mubr.bf16.gmra.mrb[28].mxu0 %v5224_v31  ;;  %2815 = vmatprep.mubr.bf16.mxu1 %v5225_v32 }
 0x17c   :  { %3394 = vmatprep.mubr.bf16.mxu0 %v5227_v33 }
 0x182   :  { %2816 = vmatmul.mubr.bf16.gmra.mrb[32].mxu1 %v5229_v34 }
 0x183   :  { %3395 = vmatmul.mubr.bf16.gmra.mrb[32].mxu0 %v5230_v35  ;;  %2825 = vmatprep.mubr.bf16.mxu1 %v5231_v36 }
 0x184   :  { %3404 = vmatprep.mubr.bf16.mxu0 %v5233_v37 }
 0x18a   :  { %2826 = vmatmul.mubr.bf16.gmra.mrb[36].mxu1 %v5235_v38 }
 0x18b   :  { %3405 = vmatmul.mubr.bf16.gmra.mrb[36].mxu0 %v5236_v39  ;;  %2835 = vmatprep.mubr.bf16.mxu1 %v5237_v40 }
 0x18c   :  { %3414 = vmatprep.mubr.bf16.mxu0 %v5239_v41 }
 0x192   :  { %2836 = vmatmul.mubr.bf16.gmra.mrb[40].mxu1 %v5241_v42 }
 0x193   :  { %3415 = vmatmul.mubr.bf16.gmra.mrb[40].mxu0 %v5242_v43  ;;  %2845 = vmatprep.mubr.bf16.mxu1 %v5243_v44 }
 0x194   :  { %3424 = vmatprep.mubr.bf16.mxu0 %v5245_v45 }
 0x19a   :  { %2846 = vmatmul.mubr.bf16.gmra.mrb[44].mxu1 %v5247_v46 }
 0x19b   :  { %3425 = vmatmul.mubr.bf16.gmra.mrb[44].mxu0 %v5248_v47  ;;  %2855 = vmatprep.mubr.bf16.mxu1 %v5249_v48 }
 0x19c   :  { %3434 = vmatprep.mubr.bf16.mxu0 %v5251_v49 }
 0x1a2   :  { %2856 = vmatmul.mubr.bf16.gmra.mrb[48].mxu1 %v5253_v50 }
 0x1a3   :  { %3435 = vmatmul.mubr.bf16.gmra.mrb[48].mxu0 %v5254_v51  ;;  %2865 = vmatprep.mubr.bf16.mxu1 %v5255_v52 }
 0x1a4   :  { %3444 = vmatprep.mubr.bf16.mxu0 %v5257_v53 }
 0x1aa   :  { %2866 = vmatmul.mubr.bf16.gmra.mrb[52].mxu1 %v5259_v54 }
 0x1ab   :  { %3445 = vmatmul.mubr.bf16.gmra.mrb[52].mxu0 %v5260_v55  ;;  %2875 = vmatprep.mubr.bf16.mxu1 %v5261_v56 }
 0x1ac   :  { %3454 = vmatprep.mubr.bf16.mxu0 %v5263_v57 }
 0x1b2   :  { %2876 = vmatmul.mubr.bf16.gmra.mrb[56].mxu1 %v5265_v58 }
 0x1b3   :  { %3455 = vmatmul.mubr.bf16.gmra.mrb[56].mxu0 %v5266_v59  ;;  %2885 = vmatprep.mubr.bf16.mxu1 %v5267_v60 }
 0x1b4   :  { %3464 = vmatprep.mubr.bf16.mxu0 %v5269_v61 }
 0x1ba   :  { %2886 = vmatmul.mubr.bf16.gmra.mrb[60].mxu1 %v5271_v62 }
 0x1bb   :  { %3465 = vmatmul.mubr.bf16.gmra.mrb[60].mxu0 %v5272_v63 }
 0x215   :  { %v2737_v0 = vpop.f32.mrb[0].mxu1 }
 0x216   :  { %v3316_v1 = vpop.f32.mrb[0].mxu0  ;;  %v2739_v3 = vpop.f32.mrb[1].mxu1 }
 0x217   :  { %v4377_v2 = vadd.f32 %v3316_v1, %v2737_v0  ;;  %v3318_v4 = vpop.f32.mrb[1].mxu0  ;;  %v2741_v6 = vpop.f32.mrb[2].mxu1 }
 0x218   :  { %v4378_v5 = vadd.f32 %v3318_v4, %v2739_v3  ;;  %v3320_v7 = vpop.f32.mrb[2].mxu0  ;;  %v2743_v9 = vpop.f32.mrb[3].mxu1 }
 0x219   :  { %v4379_v8 = vadd.f32 %v3320_v7, %v2741_v6  ;;  %v3322_v10 = vpop.f32.mrb[3].mxu0  ;;  %v3773_v13 = vmul.f32 %v4377_v2, %v4377_v2 }
 0x21a   :  { %v4345_v11 = vpack.c.bf16 %v4378_v5, %v4377_v2  ;;  %v4380_v12 = vadd.f32 %v3322_v10, %v2743_v9  ;;  %v3774_v16 = vmul.f32 %v4378_v5, %v4378_v5 }
 0x21b   :  { %v3699_v14 = vadd.f32 %v4379_v8, %v4377_v2  ;;  %v3775_v15 = vmul.f32 %v4379_v8, %v4379_v8 }
 0x21c   :  { %3667 = vst [vmem:[%s6549_s2] sm:$0xff] %v4345_v11  ;;  %v4346_v17 = vpack.c.bf16 %v4380_v12, %v4379_v8  ;;  %v3736_v18 = vadd.f32 %v4380_v12, %v4378_v5  ;;  %v3776_v19 = vmul.f32 %v4380_v12, %v4380_v12 }
 0x21d   :  { %v3837_v20 = vadd.f32 %v3775_v15, %v3773_v13  ;;  %v2747_v22 = vpop.f32.mrb[4].mxu1 }
 0x21e   :  { %3668 = vst [vmem:[%s6549_s2 + $0x8] sm:$0xff] %v4346_v17  ;;  %v3874_v21 = vadd.f32 %v3776_v19, %v3774_v16  ;;  %v3326_v23 = vpop.f32.mrb[4].mxu0  ;;  %v2749_v25 = vpop.f32.mrb[5].mxu1 }
 0x21f   :  { %v4381_v24 = vadd.f32 %v3326_v23, %v2747_v22  ;;  %v3328_v26 = vpop.f32.mrb[5].mxu0  ;;  %v2751_v28 = vpop.f32.mrb[6].mxu1 }
 0x220   :  { %v4382_v27 = vadd.f32 %v3328_v26, %v2749_v25  ;;  %v3330_v29 = vpop.f32.mrb[6].mxu0  ;;  %v2753_v33 = vpop.f32.mrb[7].mxu1 }
 0x221   :  { %v3700_v30 = vadd.f32 %v4381_v24, %v3699_v14  ;;  %v3777_v31 = vmul.f32 %v4381_v24, %v4381_v24  ;;  %v4383_v32 = vadd.f32 %v3330_v29, %v2751_v28  ;;  %v3332_v34 = vpop.f32.mrb[7].mxu0 }
 0x222   :  { %v4347_v35 = vpack.c.bf16 %v4382_v27, %v4381_v24  ;;  %v3737_v36 = vadd.f32 %v4382_v27, %v3736_v18  ;;  %v3778_v37 = vmul.f32 %v4382_v27, %v4382_v27  ;;  %v4384_v38 = vadd.f32 %v3332_v34, %v2753_v33 }
 0x223   :  { %v3838_v39 = vadd.f32 %v3837_v20, %v3777_v31  ;;  %v3701_v40 = vadd.f32 %v4383_v32, %v3700_v30  ;;  %v3779_v41 = vmul.f32 %v4383_v32, %v4383_v32 }
 0x224   :  { %3669 = vst [vmem:[%s6549_s2 + $0x10] sm:$0xff] %v4347_v35  ;;  %v3875_v42 = vadd.f32 %v3874_v21, %v3778_v37  ;;  %v4348_v43 = vpack.c.bf16 %v4384_v38, %v4383_v32  ;;  %v3738_v44 = vadd.f32 %v4384_v38, %v3737_v36  ;;  %v3780_v45 = vmul.f32 %v4384_v38, %v4384_v38 }
 0x225   :  { %v3839_v46 = vadd.f32 %v3838_v39, %v3779_v41  ;;  %v2757_v48 = vpop.f32.mrb[8].mxu1 }
 0x226   :  { %3670 = vst [vmem:[%s6549_s2 + $0x18] sm:$0xff] %v4348_v43  ;;  %v3876_v47 = vadd.f32 %v3875_v42, %v3780_v45  ;;  %v3336_v49 = vpop.f32.mrb[8].mxu0  ;;  %v2759_v51 = vpop.f32.mrb[9].mxu1 }
 0x227   :  { %v4385_v50 = vadd.f32 %v3336_v49, %v2757_v48  ;;  %v3338_v52 = vpop.f32.mrb[9].mxu0  ;;  %v2761_v54 = vpop.f32.mrb[10].mxu1 }
 0x228   :  { %v4386_v53 = vadd.f32 %v3338_v52, %v2759_v51  ;;  %v3340_v55 = vpop.f32.mrb[10].mxu0  ;;  %v2763_v59 = vpop.f32.mrb[11].mxu1 }
 0x229   :  { %v3702_v56 = vadd.f32 %v4385_v50, %v3701_v40  ;;  %v3781_v57 = vmul.f32 %v4385_v50, %v4385_v50  ;;  %v4387_v58 = vadd.f32 %v3340_v55, %v2761_v54  ;;  %v3342_v60 = vpop.f32.mrb[11].mxu0 }
 0x22a   :  { %v4349_v61 = vpack.c.bf16 %v4386_v53, %v4385_v50  ;;  %v3739_v62 = vadd.f32 %v4386_v53, %v3738_v44  ;;  %v3782_v63 = vmul.f32 %v4386_v53, %v4386_v53  ;;  %v4388_v0 = vadd.f32 %v3342_v60, %v2763_v59 }
 0x22b   :  { %v3840_v1 = vadd.f32 %v3839_v46, %v3781_v57  ;;  %v3703_v2 = vadd.f32 %v4387_v58, %v3702_v56  ;;  %v3783_v3 = vmul.f32 %v4387_v58, %v4387_v58 }
 0x22c   :  { %3671 = vst [vmem:[%s6549_s2 + $0x20] sm:$0xff] %v4349_v61  ;;  %v3877_v4 = vadd.f32 %v3876_v47, %v3782_v63  ;;  %v4350_v5 = vpack.c.bf16 %v4388_v0, %v4387_v58  ;;  %v3740_v6 = vadd.f32 %v4388_v0, %v3739_v62  ;;  %v3784_v7 = vmul.f32 %v4388_v0, %v4388_v0 }
 0x22d   :  { %v3841_v8 = vadd.f32 %v3840_v1, %v3783_v3  ;;  %v2767_v10 = vpop.f32.mrb[12].mxu1 }
 0x22e   :  { %3672 = vst [vmem:[%s6549_s2 + $0x28] sm:$0xff] %v4350_v5  ;;  %v3878_v9 = vadd.f32 %v3877_v4, %v3784_v7  ;;  %v3346_v11 = vpop.f32.mrb[12].mxu0  ;;  %v2769_v13 = vpop.f32.mrb[13].mxu1 }
 0x22f   :  { %v4389_v12 = vadd.f32 %v3346_v11, %v2767_v10  ;;  %v3348_v14 = vpop.f32.mrb[13].mxu0  ;;  %v2771_v16 = vpop.f32.mrb[14].mxu1 }
 0x230   :  { %v4390_v15 = vadd.f32 %v3348_v14, %v2769_v13  ;;  %v3350_v17 = vpop.f32.mrb[14].mxu0  ;;  %v2773_v21 = vpop.f32.mrb[15].mxu1 }
 0x231   :  { %v3704_v18 = vadd.f32 %v4389_v12, %v3703_v2  ;;  %v3785_v19 = vmul.f32 %v4389_v12, %v4389_v12  ;;  %v4391_v20 = vadd.f32 %v3350_v17, %v2771_v16  ;;  %v3352_v22 = vpop.f32.mrb[15].mxu0 }
 0x232   :  { %v4351_v23 = vpack.c.bf16 %v4390_v15, %v4389_v12  ;;  %v3741_v24 = vadd.f32 %v4390_v15, %v3740_v6  ;;  %v3786_v25 = vmul.f32 %v4390_v15, %v4390_v15  ;;  %v4392_v26 = vadd.f32 %v3352_v22, %v2773_v21 }
 0x233   :  { %v3842_v27 = vadd.f32 %v3841_v8, %v3785_v19  ;;  %v3705_v28 = vadd.f32 %v4391_v20, %v3704_v18  ;;  %v3787_v29 = vmul.f32 %v4391_v20, %v4391_v20 }
 0x234   :  { %3673 = vst [vmem:[%s6549_s2 + $0x30] sm:$0xff] %v4351_v23  ;;  %v3879_v30 = vadd.f32 %v3878_v9, %v3786_v25  ;;  %v4352_v31 = vpack.c.bf16 %v4392_v26, %v4391_v20  ;;  %v3742_v32 = vadd.f32 %v4392_v26, %v3741_v24  ;;  %v3788_v33 = vmul.f32 %v4392_v26, %v4392_v26 }
 0x235   :  { %v3843_v34 = vadd.f32 %v3842_v27, %v3787_v29  ;;  %v2777_v36 = vpop.f32.mrb[16].mxu1 }
 0x236   :  { %3674 = vst [vmem:[%s6549_s2 + $0x38] sm:$0xff] %v4352_v31  ;;  %v3880_v35 = vadd.f32 %v3879_v30, %v3788_v33  ;;  %v3356_v37 = vpop.f32.mrb[16].mxu0  ;;  %v2779_v39 = vpop.f32.mrb[17].mxu1 }
 0x237   :  { %v4393_v38 = vadd.f32 %v3356_v37, %v2777_v36  ;;  %v3358_v40 = vpop.f32.mrb[17].mxu0  ;;  %v2781_v42 = vpop.f32.mrb[18].mxu1 }
 0x238   :  { %v4394_v41 = vadd.f32 %v3358_v40, %v2779_v39  ;;  %v3360_v43 = vpop.f32.mrb[18].mxu0  ;;  %v2783_v47 = vpop.f32.mrb[19].mxu1 }
 0x239   :  { %v3706_v44 = vadd.f32 %v4393_v38, %v3705_v28  ;;  %v3789_v45 = vmul.f32 %v4393_v38, %v4393_v38  ;;  %v4395_v46 = vadd.f32 %v3360_v43, %v2781_v42  ;;  %v3362_v48 = vpop.f32.mrb[19].mxu0 }
 0x23a   :  { %v4353_v49 = vpack.c.bf16 %v4394_v41, %v4393_v38  ;;  %v3743_v50 = vadd.f32 %v4394_v41, %v3742_v32  ;;  %v3790_v51 = vmul.f32 %v4394_v41, %v4394_v41  ;;  %v4396_v52 = vadd.f32 %v3362_v48, %v2783_v47 }
 0x23b   :  { %v3844_v53 = vadd.f32 %v3843_v34, %v3789_v45  ;;  %v3707_v54 = vadd.f32 %v4395_v46, %v3706_v44  ;;  %v3791_v55 = vmul.f32 %v4395_v46, %v4395_v46 }
 0x23c   :  { %3675 = vst [vmem:[%s6549_s2 + $0x40] sm:$0xff] %v4353_v49  ;;  %v3881_v56 = vadd.f32 %v3880_v35, %v3790_v51  ;;  %v4354_v57 = vpack.c.bf16 %v4396_v52, %v4395_v46  ;;  %v3744_v58 = vadd.f32 %v4396_v52, %v3743_v50  ;;  %v3792_v59 = vmul.f32 %v4396_v52, %v4396_v52 }
 0x23d   :  { %v3845_v60 = vadd.f32 %v3844_v53, %v3791_v55  ;;  %v2787_v62 = vpop.f32.mrb[20].mxu1 }
 0x23e   :  { %3676 = vst [vmem:[%s6549_s2 + $0x48] sm:$0xff] %v4354_v57  ;;  %v3882_v61 = vadd.f32 %v3881_v56, %v3792_v59  ;;  %v3366_v63 = vpop.f32.mrb[20].mxu0  ;;  %v2789_v1 = vpop.f32.mrb[21].mxu1 }
 0x23f   :  { %v4397_v0 = vadd.f32 %v3366_v63, %v2787_v62  ;;  %v3368_v2 = vpop.f32.mrb[21].mxu0  ;;  %v2791_v4 = vpop.f32.mrb[22].mxu1 }
 0x240   :  { %v4398_v3 = vadd.f32 %v3368_v2, %v2789_v1  ;;  %v3370_v5 = vpop.f32.mrb[22].mxu0  ;;  %v2793_v9 = vpop.f32.mrb[23].mxu1 }
 0x241   :  { %v3708_v6 = vadd.f32 %v4397_v0, %v3707_v54  ;;  %v3793_v7 = vmul.f32 %v4397_v0, %v4397_v0  ;;  %v4399_v8 = vadd.f32 %v3370_v5, %v2791_v4  ;;  %v3372_v10 = vpop.f32.mrb[23].mxu0 }
 0x242   :  { %v4355_v11 = vpack.c.bf16 %v4398_v3, %v4397_v0  ;;  %v3745_v12 = vadd.f32 %v4398_v3, %v3744_v58  ;;  %v3794_v13 = vmul.f32 %v4398_v3, %v4398_v3  ;;  %v4400_v14 = vadd.f32 %v3372_v10, %v2793_v9 }
 0x243   :  { %v3846_v15 = vadd.f32 %v3845_v60, %v3793_v7  ;;  %v3709_v16 = vadd.f32 %v4399_v8, %v3708_v6  ;;  %v3795_v17 = vmul.f32 %v4399_v8, %v4399_v8 }
 0x244   :  { %3677 = vst [vmem:[%s6549_s2 + $0x50] sm:$0xff] %v4355_v11  ;;  %v3883_v18 = vadd.f32 %v3882_v61, %v3794_v13  ;;  %v4356_v19 = vpack.c.bf16 %v4400_v14, %v4399_v8  ;;  %v3746_v20 = vadd.f32 %v4400_v14, %v3745_v12  ;;  %v3796_v21 = vmul.f32 %v4400_v14, %v4400_v14 }
 0x245   :  { %v3847_v22 = vadd.f32 %v3846_v15, %v3795_v17  ;;  %v2797_v24 = vpop.f32.mrb[24].mxu1 }
 0x246   :  { %3678 = vst [vmem:[%s6549_s2 + $0x58] sm:$0xff] %v4356_v19  ;;  %v3884_v23 = vadd.f32 %v3883_v18, %v3796_v21  ;;  %v3376_v25 = vpop.f32.mrb[24].mxu0  ;;  %v2799_v27 = vpop.f32.mrb[25].mxu1 }
 0x247   :  { %v4401_v26 = vadd.f32 %v3376_v25, %v2797_v24  ;;  %v3378_v28 = vpop.f32.mrb[25].mxu0  ;;  %v2801_v30 = vpop.f32.mrb[26].mxu1 }
 0x248   :  { %v4402_v29 = vadd.f32 %v3378_v28, %v2799_v27  ;;  %v3380_v31 = vpop.f32.mrb[26].mxu0  ;;  %v2803_v35 = vpop.f32.mrb[27].mxu1 }
 0x249   :  { %v3710_v32 = vadd.f32 %v4401_v26, %v3709_v16  ;;  %v3797_v33 = vmul.f32 %v4401_v26, %v4401_v26  ;;  %v4403_v34 = vadd.f32 %v3380_v31, %v2801_v30  ;;  %v3382_v36 = vpop.f32.mrb[27].mxu0 }
 0x24a   :  { %v4357_v37 = vpack.c.bf16 %v4402_v29, %v4401_v26  ;;  %v3747_v38 = vadd.f32 %v4402_v29, %v3746_v20  ;;  %v3798_v39 = vmul.f32 %v4402_v29, %v4402_v29  ;;  %v4404_v40 = vadd.f32 %v3382_v36, %v2803_v35 }
 0x24b   :  { %v3848_v41 = vadd.f32 %v3847_v22, %v3797_v33  ;;  %v3711_v42 = vadd.f32 %v4403_v34, %v3710_v32  ;;  %v3799_v43 = vmul.f32 %v4403_v34, %v4403_v34 }
 0x24c   :  { %3679 = vst [vmem:[%s6549_s2 + $0x60] sm:$0xff] %v4357_v37  ;;  %v3885_v44 = vadd.f32 %v3884_v23, %v3798_v39  ;;  %v4358_v45 = vpack.c.bf16 %v4404_v40, %v4403_v34  ;;  %v3748_v46 = vadd.f32 %v4404_v40, %v3747_v38  ;;  %v3800_v47 = vmul.f32 %v4404_v40, %v4404_v40 }
 0x24d   :  { %v3849_v48 = vadd.f32 %v3848_v41, %v3799_v43  ;;  %v2807_v50 = vpop.f32.mrb[28].mxu1 }
 0x24e   :  { %3680 = vst [vmem:[%s6549_s2 + $0x68] sm:$0xff] %v4358_v45  ;;  %v3886_v49 = vadd.f32 %v3885_v44, %v3800_v47  ;;  %v3386_v51 = vpop.f32.mrb[28].mxu0  ;;  %v2809_v53 = vpop.f32.mrb[29].mxu1 }
 0x24f   :  { %v4405_v52 = vadd.f32 %v3386_v51, %v2807_v50  ;;  %v3388_v54 = vpop.f32.mrb[29].mxu0  ;;  %v2811_v56 = vpop.f32.mrb[30].mxu1 }
 0x250   :  { %v4406_v55 = vadd.f32 %v3388_v54, %v2809_v53  ;;  %v3390_v57 = vpop.f32.mrb[30].mxu0  ;;  %v2813_v61 = vpop.f32.mrb[31].mxu1 }
 0x251   :  { %v3712_v58 = vadd.f32 %v4405_v52, %v3711_v42  ;;  %v3801_v59 = vmul.f32 %v4405_v52, %v4405_v52  ;;  %v4407_v60 = vadd.f32 %v3390_v57, %v2811_v56  ;;  %v3392_v62 = vpop.f32.mrb[31].mxu0 }
 0x252   :  { %v4359_v63 = vpack.c.bf16 %v4406_v55, %v4405_v52  ;;  %v3749_v0 = vadd.f32 %v4406_v55, %v3748_v46  ;;  %v3802_v1 = vmul.f32 %v4406_v55, %v4406_v55  ;;  %v4408_v2 = vadd.f32 %v3392_v62, %v2813_v61 }
 0x253   :  { %v3850_v3 = vadd.f32 %v3849_v48, %v3801_v59  ;;  %v3713_v4 = vadd.f32 %v4407_v60, %v3712_v58  ;;  %v3803_v5 = vmul.f32 %v4407_v60, %v4407_v60 }
 0x254   :  { %3681 = vst [vmem:[%s6549_s2 + $0x70] sm:$0xff] %v4359_v63  ;;  %v3887_v6 = vadd.f32 %v3886_v49, %v3802_v1  ;;  %v4360_v7 = vpack.c.bf16 %v4408_v2, %v4407_v60  ;;  %v3750_v8 = vadd.f32 %v4408_v2, %v3749_v0  ;;  %v3804_v9 = vmul.f32 %v4408_v2, %v4408_v2 }
 0x255   :  { %v3851_v10 = vadd.f32 %v3850_v3, %v3803_v5  ;;  %v2817_v12 = vpop.f32.mrb[32].mxu1 }
 0x256   :  { %3682 = vst [vmem:[%s6549_s2 + $0x78] sm:$0xff] %v4360_v7  ;;  %v3888_v11 = vadd.f32 %v3887_v6, %v3804_v9  ;;  %v3396_v13 = vpop.f32.mrb[32].mxu0  ;;  %v2819_v15 = vpop.f32.mrb[33].mxu1 }
 0x257   :  { %v4409_v14 = vadd.f32 %v3396_v13, %v2817_v12  ;;  %v3398_v16 = vpop.f32.mrb[33].mxu0  ;;  %v2821_v18 = vpop.f32.mrb[34].mxu1 }
 0x258   :  { %v4410_v17 = vadd.f32 %v3398_v16, %v2819_v15  ;;  %v3400_v19 = vpop.f32.mrb[34].mxu0  ;;  %v2823_v23 = vpop.f32.mrb[35].mxu1 }
 0x259   :  { %v3714_v20 = vadd.f32 %v4409_v14, %v3713_v4  ;;  %v3805_v21 = vmul.f32 %v4409_v14, %v4409_v14  ;;  %v4411_v22 = vadd.f32 %v3400_v19, %v2821_v18  ;;  %v3402_v24 = vpop.f32.mrb[35].mxu0 }
 0x25a   :  { %v4361_v25 = vpack.c.bf16 %v4410_v17, %v4409_v14  ;;  %v3751_v26 = vadd.f32 %v4410_v17, %v3750_v8  ;;  %v3806_v27 = vmul.f32 %v4410_v17, %v4410_v17  ;;  %v4412_v28 = vadd.f32 %v3402_v24, %v2823_v23 }
 0x25b   :  { %v3852_v29 = vadd.f32 %v3851_v10, %v3805_v21  ;;  %v3715_v30 = vadd.f32 %v4411_v22, %v3714_v20  ;;  %v3807_v31 = vmul.f32 %v4411_v22, %v4411_v22 }
 0x25c   :  { %3683 = vst [vmem:[%s6549_s2 + $0x80] sm:$0xff] %v4361_v25  ;;  %v3889_v32 = vadd.f32 %v3888_v11, %v3806_v27  ;;  %v4362_v33 = vpack.c.bf16 %v4412_v28, %v4411_v22  ;;  %v3752_v34 = vadd.f32 %v4412_v28, %v3751_v26  ;;  %v3808_v35 = vmul.f32 %v4412_v28, %v4412_v28 }
 0x25d   :  { %v3853_v36 = vadd.f32 %v3852_v29, %v3807_v31  ;;  %v2827_v38 = vpop.f32.mrb[36].mxu1 }
 0x25e   :  { %3684 = vst [vmem:[%s6549_s2 + $0x88] sm:$0xff] %v4362_v33  ;;  %v3890_v37 = vadd.f32 %v3889_v32, %v3808_v35  ;;  %v3406_v39 = vpop.f32.mrb[36].mxu0  ;;  %v2829_v41 = vpop.f32.mrb[37].mxu1 }
 0x25f   :  { %v4413_v40 = vadd.f32 %v3406_v39, %v2827_v38  ;;  %v3408_v42 = vpop.f32.mrb[37].mxu0  ;;  %v2831_v44 = vpop.f32.mrb[38].mxu1 }
 0x260   :  { %v4414_v43 = vadd.f32 %v3408_v42, %v2829_v41  ;;  %v3410_v45 = vpop.f32.mrb[38].mxu0  ;;  %v2833_v49 = vpop.f32.mrb[39].mxu1 }
 0x261   :  { %v3716_v46 = vadd.f32 %v4413_v40, %v3715_v30  ;;  %v3809_v47 = vmul.f32 %v4413_v40, %v4413_v40  ;;  %v4415_v48 = vadd.f32 %v3410_v45, %v2831_v44  ;;  %v3412_v50 = vpop.f32.mrb[39].mxu0 }
 0x262   :  { %v4363_v51 = vpack.c.bf16 %v4414_v43, %v4413_v40  ;;  %v3753_v52 = vadd.f32 %v4414_v43, %v3752_v34  ;;  %v3810_v53 = vmul.f32 %v4414_v43, %v4414_v43  ;;  %v4416_v54 = vadd.f32 %v3412_v50, %v2833_v49 }
 0x263   :  { %v3854_v55 = vadd.f32 %v3853_v36, %v3809_v47  ;;  %v3717_v56 = vadd.f32 %v4415_v48, %v3716_v46  ;;  %v3811_v57 = vmul.f32 %v4415_v48, %v4415_v48 }
 0x264   :  { %3685 = vst [vmem:[%s6549_s2 + $0x90] sm:$0xff] %v4363_v51  ;;  %v3891_v58 = vadd.f32 %v3890_v37, %v3810_v53  ;;  %v4364_v59 = vpack.c.bf16 %v4416_v54, %v4415_v48  ;;  %v3754_v60 = vadd.f32 %v4416_v54, %v3753_v52  ;;  %v3812_v61 = vmul.f32 %v4416_v54, %v4416_v54 }
 0x265   :  { %v3855_v62 = vadd.f32 %v3854_v55, %v3811_v57  ;;  %v2837_v0 = vpop.f32.mrb[40].mxu1 }
 0x266   :  { %3686 = vst [vmem:[%s6549_s2 + $0x98] sm:$0xff] %v4364_v59  ;;  %v3892_v63 = vadd.f32 %v3891_v58, %v3812_v61  ;;  %v3416_v1 = vpop.f32.mrb[40].mxu0  ;;  %v2839_v3 = vpop.f32.mrb[41].mxu1 }
 0x267   :  { %v4417_v2 = vadd.f32 %v3416_v1, %v2837_v0  ;;  %v3418_v4 = vpop.f32.mrb[41].mxu0  ;;  %v2841_v6 = vpop.f32.mrb[42].mxu1 }
 0x268   :  { %v4418_v5 = vadd.f32 %v3418_v4, %v2839_v3  ;;  %v3420_v7 = vpop.f32.mrb[42].mxu0  ;;  %v2843_v11 = vpop.f32.mrb[43].mxu1 }
 0x269   :  { %v3718_v8 = vadd.f32 %v4417_v2, %v3717_v56  ;;  %v3813_v9 = vmul.f32 %v4417_v2, %v4417_v2  ;;  %v4419_v10 = vadd.f32 %v3420_v7, %v2841_v6  ;;  %v3422_v12 = vpop.f32.mrb[43].mxu0 }
 0x26a   :  { %v4365_v13 = vpack.c.bf16 %v4418_v5, %v4417_v2  ;;  %v3755_v14 = vadd.f32 %v4418_v5, %v3754_v60  ;;  %v3814_v15 = vmul.f32 %v4418_v5, %v4418_v5  ;;  %v4420_v16 = vadd.f32 %v3422_v12, %v2843_v11 }
 0x26b   :  { %v3856_v17 = vadd.f32 %v3855_v62, %v3813_v9  ;;  %v3719_v18 = vadd.f32 %v4419_v10, %v3718_v8  ;;  %v3815_v19 = vmul.f32 %v4419_v10, %v4419_v10 }
 0x26c   :  { %3687 = vst [vmem:[%s6549_s2 + $0xa0] sm:$0xff] %v4365_v13  ;;  %v3893_v20 = vadd.f32 %v3892_v63, %v3814_v15  ;;  %v4366_v21 = vpack.c.bf16 %v4420_v16, %v4419_v10  ;;  %v3756_v22 = vadd.f32 %v4420_v16, %v3755_v14  ;;  %v3816_v23 = vmul.f32 %v4420_v16, %v4420_v16 }
 0x26d   :  { %v3857_v24 = vadd.f32 %v3856_v17, %v3815_v19  ;;  %v2847_v26 = vpop.f32.mrb[44].mxu1 }
 0x26e   :  { %3688 = vst [vmem:[%s6549_s2 + $0xa8] sm:$0xff] %v4366_v21  ;;  %v3894_v25 = vadd.f32 %v3893_v20, %v3816_v23  ;;  %v3426_v27 = vpop.f32.mrb[44].mxu0  ;;  %v2849_v29 = vpop.f32.mrb[45].mxu1 }
 0x26f   :  { %v4421_v28 = vadd.f32 %v3426_v27, %v2847_v26  ;;  %v3428_v30 = vpop.f32.mrb[45].mxu0  ;;  %v2851_v32 = vpop.f32.mrb[46].mxu1 }
 0x270   :  { %v4422_v31 = vadd.f32 %v3428_v30, %v2849_v29  ;;  %v3430_v33 = vpop.f32.mrb[46].mxu0  ;;  %v2853_v37 = vpop.f32.mrb[47].mxu1 }
 0x271   :  { %v3720_v34 = vadd.f32 %v4421_v28, %v3719_v18  ;;  %v3817_v35 = vmul.f32 %v4421_v28, %v4421_v28  ;;  %v4423_v36 = vadd.f32 %v3430_v33, %v2851_v32  ;;  %v3432_v38 = vpop.f32.mrb[47].mxu0 }
 0x272   :  { %v4367_v39 = vpack.c.bf16 %v4422_v31, %v4421_v28  ;;  %v3757_v40 = vadd.f32 %v4422_v31, %v3756_v22  ;;  %v3818_v41 = vmul.f32 %v4422_v31, %v4422_v31  ;;  %v4424_v42 = vadd.f32 %v3432_v38, %v2853_v37 }
 0x273   :  { %v3858_v43 = vadd.f32 %v3857_v24, %v3817_v35  ;;  %v3721_v44 = vadd.f32 %v4423_v36, %v3720_v34  ;;  %v3819_v45 = vmul.f32 %v4423_v36, %v4423_v36 }
 0x274   :  { %3689 = vst [vmem:[%s6549_s2 + $0xb0] sm:$0xff] %v4367_v39  ;;  %v3895_v46 = vadd.f32 %v3894_v25, %v3818_v41  ;;  %v4368_v47 = vpack.c.bf16 %v4424_v42, %v4423_v36  ;;  %v3758_v48 = vadd.f32 %v4424_v42, %v3757_v40  ;;  %v3820_v49 = vmul.f32 %v4424_v42, %v4424_v42 }
 0x275   :  { %v3859_v50 = vadd.f32 %v3858_v43, %v3819_v45  ;;  %v2857_v52 = vpop.f32.mrb[48].mxu1 }
 0x276   :  { %3690 = vst [vmem:[%s6549_s2 + $0xb8] sm:$0xff] %v4368_v47  ;;  %v3896_v51 = vadd.f32 %v3895_v46, %v3820_v49  ;;  %v3436_v53 = vpop.f32.mrb[48].mxu0  ;;  %v2859_v55 = vpop.f32.mrb[49].mxu1 }
 0x277   :  { %v4425_v54 = vadd.f32 %v3436_v53, %v2857_v52  ;;  %v3438_v56 = vpop.f32.mrb[49].mxu0  ;;  %v2861_v58 = vpop.f32.mrb[50].mxu1 }
 0x278   :  { %v4426_v57 = vadd.f32 %v3438_v56, %v2859_v55  ;;  %v3440_v59 = vpop.f32.mrb[50].mxu0  ;;  %v2863_v63 = vpop.f32.mrb[51].mxu1 }
 0x279   :  { %v3722_v60 = vadd.f32 %v4425_v54, %v3721_v44  ;;  %v3821_v61 = vmul.f32 %v4425_v54, %v4425_v54  ;;  %v4427_v62 = vadd.f32 %v3440_v59, %v2861_v58  ;;  %v3442_v0 = vpop.f32.mrb[51].mxu0 }
 0x27a   :  { %v4369_v1 = vpack.c.bf16 %v4426_v57, %v4425_v54  ;;  %v3759_v2 = vadd.f32 %v4426_v57, %v3758_v48  ;;  %v3822_v3 = vmul.f32 %v4426_v57, %v4426_v57  ;;  %v4428_v4 = vadd.f32 %v3442_v0, %v2863_v63 }
 0x27b   :  { %v3860_v5 = vadd.f32 %v3859_v50, %v3821_v61  ;;  %v3723_v6 = vadd.f32 %v4427_v62, %v3722_v60  ;;  %v3823_v7 = vmul.f32 %v4427_v62, %v4427_v62 }
 0x27c   :  { %3691 = vst [vmem:[%s6549_s2 + $0xc0] sm:$0xff] %v4369_v1  ;;  %v3897_v8 = vadd.f32 %v3896_v51, %v3822_v3  ;;  %v4370_v9 = vpack.c.bf16 %v4428_v4, %v4427_v62  ;;  %v3760_v10 = vadd.f32 %v4428_v4, %v3759_v2  ;;  %v3824_v11 = vmul.f32 %v4428_v4, %v4428_v4 }
 0x27d   :  { %v3861_v12 = vadd.f32 %v3860_v5, %v3823_v7  ;;  %v2867_v14 = vpop.f32.mrb[52].mxu1 }
 0x27e   :  { %3692 = vst [vmem:[%s6549_s2 + $0xc8] sm:$0xff] %v4370_v9  ;;  %v3898_v13 = vadd.f32 %v3897_v8, %v3824_v11  ;;  %v3446_v15 = vpop.f32.mrb[52].mxu0  ;;  %v2869_v17 = vpop.f32.mrb[53].mxu1 }
 0x27f   :  { %v4429_v16 = vadd.f32 %v3446_v15, %v2867_v14  ;;  %v3448_v18 = vpop.f32.mrb[53].mxu0  ;;  %v2871_v20 = vpop.f32.mrb[54].mxu1 }
 0x280   :  { %v4430_v19 = vadd.f32 %v3448_v18, %v2869_v17  ;;  %v3450_v21 = vpop.f32.mrb[54].mxu0  ;;  %v2873_v25 = vpop.f32.mrb[55].mxu1 }
 0x281   :  { %v3724_v22 = vadd.f32 %v4429_v16, %v3723_v6  ;;  %v3825_v23 = vmul.f32 %v4429_v16, %v4429_v16  ;;  %v4431_v24 = vadd.f32 %v3450_v21, %v2871_v20  ;;  %v3452_v26 = vpop.f32.mrb[55].mxu0 }
 0x282   :  { %v4371_v27 = vpack.c.bf16 %v4430_v19, %v4429_v16  ;;  %v3761_v28 = vadd.f32 %v4430_v19, %v3760_v10  ;;  %v3826_v29 = vmul.f32 %v4430_v19, %v4430_v19  ;;  %v4432_v30 = vadd.f32 %v3452_v26, %v2873_v25 }
 0x283   :  { %v3862_v31 = vadd.f32 %v3861_v12, %v3825_v23  ;;  %v3725_v32 = vadd.f32 %v4431_v24, %v3724_v22  ;;  %v3827_v33 = vmul.f32 %v4431_v24, %v4431_v24 }
 0x284   :  { %3693 = vst [vmem:[%s6549_s2 + $0xd0] sm:$0xff] %v4371_v27  ;;  %v3899_v34 = vadd.f32 %v3898_v13, %v3826_v29  ;;  %v4372_v35 = vpack.c.bf16 %v4432_v30, %v4431_v24  ;;  %v3762_v36 = vadd.f32 %v4432_v30, %v3761_v28  ;;  %v3828_v37 = vmul.f32 %v4432_v30, %v4432_v30 }
 0x285   :  { %v3863_v38 = vadd.f32 %v3862_v31, %v3827_v33  ;;  %v2877_v40 = vpop.f32.mrb[56].mxu1 }
 0x286   :  { %3694 = vst [vmem:[%s6549_s2 + $0xd8] sm:$0xff] %v4372_v35  ;;  %v3900_v39 = vadd.f32 %v3899_v34, %v3828_v37  ;;  %v3456_v41 = vpop.f32.mrb[56].mxu0  ;;  %v2879_v43 = vpop.f32.mrb[57].mxu1 }
 0x287   :  { %v4433_v42 = vadd.f32 %v3456_v41, %v2877_v40  ;;  %v3458_v44 = vpop.f32.mrb[57].mxu0  ;;  %v2881_v46 = vpop.f32.mrb[58].mxu1 }
 0x288   :  { %v4434_v45 = vadd.f32 %v3458_v44, %v2879_v43  ;;  %v3460_v47 = vpop.f32.mrb[58].mxu0  ;;  %v2883_v51 = vpop.f32.mrb[59].mxu1 }
 0x289   :  { %v3726_v48 = vadd.f32 %v4433_v42, %v3725_v32  ;;  %v3829_v49 = vmul.f32 %v4433_v42, %v4433_v42  ;;  %v4435_v50 = vadd.f32 %v3460_v47, %v2881_v46  ;;  %v3462_v52 = vpop.f32.mrb[59].mxu0  ;;  %v3911_v32 = vlaneseq }
 0x28a   :  { %v4373_v53 = vpack.c.bf16 %v4434_v45, %v4433_v42  ;;  %v3763_v54 = vadd.f32 %v4434_v45, %v3762_v36  ;;  %v3830_v55 = vmul.f32 %v4434_v45, %v4434_v45  ;;  %v4436_v56 = vadd.f32 %v3462_v52, %v2883_v51 }
 0x28b   :  { %v3864_v57 = vadd.f32 %v3863_v38, %v3829_v49  ;;  %v3727_v58 = vadd.f32 %v4435_v50, %v3726_v48  ;;  %v3831_v59 = vmul.f32 %v4435_v50, %v4435_v50  ;;  %v3912_v41 = vshrl.u32 %v3911_v32, 7 }
 0x28c   :  { %3695 = vst [vmem:[%s6549_s2 + $0xe0] sm:$0xff] %v4373_v53  ;;  %v3901_v60 = vadd.f32 %v3900_v39, %v3830_v55  ;;  %v4374_v61 = vpack.c.bf16 %v4436_v56, %v4435_v50  ;;  %v3764_v62 = vadd.f32 %v4436_v56, %v3763_v54  ;;  %v3832_v63 = vmul.f32 %v4436_v56, %v4436_v56 }
 0x28d   :  { %v3865_v0 = vadd.f32 %v3864_v57, %v3831_v59  ;;  %v2887_v2 = vpop.f32.mrb[60].mxu1  ;;  %vm3914_vm0 = vcmp.eq.s32.totalorder %v3912_v41, 1  ;;  %vm3913_vm1 = vcmp.eq.s32.totalorder %v3912_v41, 0 }
 0x28e   :  { %3696 = vst [vmem:[%s6549_s2 + $0xe8] sm:$0xff] %v4374_v61  ;;  %v3902_v1 = vadd.f32 %v3901_v60, %v3832_v63  ;;  %v3466_v3 = vpop.f32.mrb[60].mxu0  ;;  %v2889_v5 = vpop.f32.mrb[61].mxu1 }
 0x28f   :  { %v4437_v4 = vadd.f32 %v3466_v3, %v2887_v2  ;;  %v3468_v6 = vpop.f32.mrb[61].mxu0  ;;  %v2891_v8 = vpop.f32.mrb[62].mxu1 }
 0x290   :  { %v4438_v7 = vadd.f32 %v3468_v6, %v2889_v5  ;;  %v3470_v9 = vpop.f32.mrb[62].mxu0  ;;  %v2893_v13 = vpop.f32.mrb[63].mxu1 }
 0x291   :  { %v3728_v10 = vadd.f32 %v4437_v4, %v3727_v58  ;;  %v3833_v11 = vmul.f32 %v4437_v4, %v4437_v4  ;;  %v4439_v12 = vadd.f32 %v3470_v9, %v2891_v8  ;;  %v3472_v14 = vpop.f32.mrb[63].mxu0 }
 0x292   :  { %v4375_v15 = vpack.c.bf16 %v4438_v7, %v4437_v4  ;;  %v3765_v16 = vadd.f32 %v4438_v7, %v3764_v62  ;;  %v3834_v17 = vmul.f32 %v4438_v7, %v4438_v7  ;;  %v4440_v18 = vadd.f32 %v3472_v14, %v2893_v13 }
 0x293   :  { %v3866_v19 = vadd.f32 %v3865_v0, %v3833_v11  ;;  %v3729_v20 = vadd.f32 %v4439_v12, %v3728_v10  ;;  %v3835_v21 = vmul.f32 %v4439_v12, %v4439_v12 }
 0x294   :  { %3697 = vst [vmem:[%s6549_s2 + $0xf0] sm:$0xff] %v4375_v15  ;;  %v3903_v22 = vadd.f32 %v3902_v1, %v3834_v17  ;;  %v4376_v23 = vpack.c.bf16 %v4440_v18, %v4439_v12  ;;  %v3766_v24 = vadd.f32 %v4440_v18, %v3765_v16  ;;  %v3836_v25 = vmul.f32 %v4440_v18, %v4440_v18 }
 0x295   :  { %v3730_v26 = vrot.slane %v3729_v20, 4  ;;  %v3867_v27 = vadd.f32 %v3866_v19, %v3835_v21 }
 0x296   :  { %3698 = vst [vmem:[%s6549_s2 + $0xf8] sm:$0xff] %v4376_v23  ;;  %v3767_v28 = vrot.slane %v3766_v24, 4  ;;  %v3904_v29 = vadd.f32 %v3903_v22, %v3836_v25 }
 0x297   :  { %v3731_v30 = vadd.f32 %v3730_v26, %v3729_v20  ;;  %v3868_v31 = vrot.slane %v3867_v27, 4 }
 0x298   :  { %v3768_v33 = vadd.f32 %v3767_v28, %v3766_v24  ;;  %v3905_v34 = vrot.slane %v3904_v29, 4 }
 0x299   :  { %v3732_v35 = vrot.slane %v3731_v30, 2  ;;  %v3869_v36 = vadd.f32 %v3868_v31, %v3867_v27 }
 0x29a   :  { %v3769_v37 = vrot.slane %v3768_v33, 2  ;;  %v3906_v38 = vadd.f32 %v3905_v34, %v3904_v29 }
 0x29b   :  { %v3733_v39 = vadd.f32 %v3732_v35, %v3731_v30  ;;  %v3870_v40 = vrot.slane %v3869_v36, 2 }
 0x29c   :  { %v3770_v42 = vadd.f32 %v3769_v37, %v3768_v33  ;;  %v3907_v43 = vrot.slane %v3906_v38, 2 }
 0x29d   :  { %v3871_v44 = vadd.f32 %v3870_v40, %v3869_v36  ;;  %v3734_v45 = vrot.slane %v3733_v39, 1 }
 0x29e   :  { %v3908_v46 = vadd.f32 %v3907_v43, %v3906_v38  ;;  %v3771_v48 = vrot.slane %v3770_v42, 1 }
 0x29f   :  { %v3872_v47 = vrot.slane %v3871_v44, 1  ;;  %v3735_v51 = vadd.f32 %v3734_v45, %v3733_v39 }
 0x2a0   :  { %v3909_v49 = vrot.slane %v3908_v46, 1  ;;  %v3772_v54 = vadd.f32 %v3771_v48, %v3770_v42 }
 0x2a1   :  { %v3873_v50 = vadd.f32 %v3872_v47, %v3871_v44 }
 0x2a2   :  { %v3910_v52 = vadd.f32 %v3909_v49, %v3908_v46 }
 0x2a3   :  { %v3915_v53 = vsel %vm3914_vm0, %v3873_v50, 0.0 }
 0x2a4   :  { %v3917_v55 = vsel %vm3913_vm1, %v3735_v51, %v3915_v53  ;;  %v3916_v56 = vsel %vm3914_vm0, %v3910_v52, 0.0 }
 0x2a5   :  { %3919 = vst [vmem:[%s6550_s3] sm:$0xff] %v3917_v55  ;;  %v3918_v57 = vsel %vm3913_vm1, %v3772_v54, %v3916_v56 }
 0x2a6   :  { %3920 = vst [vmem:[%s6550_s3 + $0x8] sm:$0xff] %v3918_v57 }

// kernel: cnn_block2.7
= control target key start
LH: loop header
LB: loop body
LE: loop exit
PB: predicated region body
PF: predicated region fallthrough
CT: control target
= control target key end

     0   :  { %v176_v0 = vlaneseq  ;;  %s1258_s0 = inlined_call_operand.vmem [shape: bf16[256,384], index: 0, kind: input, shape index: {}]   ;;  %s1259_s1 = inlined_call_operand.vmem [shape: f32[1,384], index: 1, kind: input, shape index: {}]   ;;  %s1260_s2 = inlined_call_operand.vmem [shape: f32[1,384], index: 2, kind: input, shape index: {}]   ;;  %s1261_s3 = inlined_call_operand.vmem [shape: f32[256,384], index: 3, kind: output, shape index: {}]  }
   0x1   :  { %v14_v1 = vld [vmem:[%s1258_s0] sm:$0xff]  ;;  %v15_v6 = vld [vmem:[%s1258_s0 + $0x8] ss:$12 sps:$4 sm:$0xff]   ;;  %v16_v7 = vld [vmem:[%s1258_s0 + $0xc] sm:$0xff] }
   0x2   :  { %v174_v2 = vld [vmem:[%s1259_s1] sm:$0x7]  ;;  %v78_v3 = vunpack.c.l.bf16 %v14_v1  ;;  %v177_v4 = vshrl.u32 %v176_v0, 7  ;;  %v79_v5 = vunpack.c.h.bf16 %v14_v1  ;;  %v18_v8 = vld [vmem:[%s1258_s0 + $0x18] sm:$0xff]  ;;  %v80_v10 = vunpack.c.l.bf16 %v15_v6  ;;  %v20_v15 = vld [vmem:[%s1258_s0 + $0x24] sm:$0xff] }
   0x3   :  { %v287_v9 = vld [vmem:[%s1260_s2] sm:$0x7]  ;;  %v81_v11 = vunpack.c.l.bf16 %v16_v7  ;;  %v82_v12 = vunpack.c.h.bf16 %v16_v7  ;;  %v83_v13 = vunpack.c.h.bf16 %v15_v6  ;;  %v84_v19 = vunpack.c.l.bf16 %v18_v8  ;;  %v22_v20 = vld [vmem:[%s1258_s0 + $0x30] sm:$0xff]  ;;  %v23_v49 = vld [vmem:[%s1258_s0 + $0x38] ss:$12 sps:$4 sm:$0xff]  }
   0x4   :  { %v19_v14 = vld [vmem:[%s1258_s0 + $0x20] ss:$12 sps:$4 sm:$0xff]   ;;  %v178_v16 = vsub.s32 0, %v177_v4  ;;  %v182_v17 = vsub.s32 1, %v177_v4  ;;  %v186_v18 = vsub.s32 2, %v177_v4  ;;  %v85_v21 = vunpack.c.h.bf16 %v18_v8 }
   0x5   :  { %v86_v22 = vunpack.c.l.bf16 %v19_v14  ;;  %v87_v23 = vunpack.c.l.bf16 %v20_v15  ;;  %v88_v24 = vunpack.c.h.bf16 %v20_v15  ;;  %v89_v31 = vunpack.c.h.bf16 %v19_v14  ;;  %v24_v54 = vld [vmem:[%s1258_s0 + $0x3c] sm:$0xff] }
   0x6   :  { %v643_v25 = vrot.slane %v174_v2, %v178_v16  ;;  %v645_v26 = vrot.slane %v287_v9, %v178_v16  ;;  %v647_v27 = vrot.slane %v174_v2, %v182_v17  ;;  %v649_v28 = vrot.slane %v287_v9, %v182_v17  ;;  %v27_v16 = vld [vmem:[%s1258_s0 + $0x50] ss:$12 sps:$4 sm:$0xff]  }
   0x7   :  { %v651_v29 = vrot.slane %v174_v2, %v186_v18  ;;  %v653_v30 = vrot.slane %v287_v9, %v186_v18  ;;  %v90_v32 = vunpack.c.l.bf16 %v22_v20  ;;  %v91_v0 = vunpack.c.h.bf16 %v22_v20 }
   0x8   :  { %v191_v33 = vmul.f32 %v643_v25, %v78_v3  ;;  %v192_v34 = vmul.f32 %v647_v27, %v79_v5  ;;  %v194_v35 = vmul.f32 %v643_v25, %v81_v11  ;;  %v195_v36 = vmul.f32 %v647_v27, %v82_v12  ;;  %v26_v11 = vld [vmem:[%s1258_s0 + $0x48] sm:$0xff] }
   0x9   :  { %v193_v37 = vmul.f32 %v651_v29, %v80_v10  ;;  %v196_v38 = vmul.f32 %v651_v29, %v83_v13  ;;  %v197_v39 = vmul.f32 %v643_v25, %v84_v19  ;;  %v198_v40 = vmul.f32 %v647_v27, %v85_v21 }
   0xa   :  { %v304_v41 = vadd.f32 %v645_v26, %v191_v33  ;;  %v305_v42 = vadd.f32 %v649_v28, %v192_v34  ;;  %v307_v43 = vadd.f32 %v645_v26, %v194_v35  ;;  %v308_v44 = vadd.f32 %v649_v28, %v195_v36 }
   0xb   :  { %v306_v45 = vadd.f32 %v653_v30, %v193_v37  ;;  %v309_v46 = vadd.f32 %v653_v30, %v196_v38  ;;  %v310_v47 = vadd.f32 %v645_v26, %v197_v39  ;;  %v311_v48 = vadd.f32 %v649_v28, %v198_v40 }
   0xc   :  { %v400_v50 = vmax.f32 %v304_v41, 0.0  ;;  %v401_v51 = vmax.f32 %v305_v42, 0.0  ;;  %v403_v52 = vmax.f32 %v307_v43, 0.0  ;;  %v404_v53 = vmax.f32 %v308_v44, 0.0 }
   0xd   :  { %v402_v55 = vmax.f32 %v306_v45, 0.0  ;;  %v405_v56 = vmax.f32 %v309_v46, 0.0  ;;  %v406_v57 = vmax.f32 %v310_v47, 0.0  ;;  %v407_v58 = vmax.f32 %v311_v48, 0.0 }
   0xe   :  { %496 = vst [vmem:[%s1261_s3] sm:$0xff] %v400_v50  ;;  %497 = vst [vmem:[%s1261_s3 + $0x8] sm:$0xff] %v401_v51  ;;  %v199_v59 = vmul.f32 %v651_v29, %v86_v22  ;;  %v200_v60 = vmul.f32 %v643_v25, %v87_v23  ;;  %v201_v61 = vmul.f32 %v647_v27, %v88_v24  ;;  %v92_v1 = vunpack.c.l.bf16 %v23_v49 }
   0xf   :  { %499 = vst [vmem:[%s1261_s3 + $0x18] sm:$0xff] %v403_v52  ;;  %500 = vst [vmem:[%s1261_s3 + $0x20] sm:$0xff] %v404_v53  ;;  %v202_v62 = vmul.f32 %v651_v29, %v89_v31  ;;  %v203_v63 = vmul.f32 %v643_v25, %v90_v32  ;;  %v93_v2 = vunpack.c.l.bf16 %v24_v54  ;;  %v204_v8 = vmul.f32 %v647_v27, %v91_v0  ;;  %v28_v31 = vld [vmem:[%s1258_s0 + $0x54] sm:$0xff]  ;;  %v30_v52 = vld [vmem:[%s1258_s0 + $0x60] sm:$0xff] }
  0x10   :  { %498 = vst [vmem:[%s1261_s3 + $0x10] sm:$0xff] %v402_v55  ;;  %501 = vst [vmem:[%s1261_s3 + $0x28] sm:$0xff] %v405_v56  ;;  %v312_v3 = vadd.f32 %v653_v30, %v199_v59  ;;  %v313_v4 = vadd.f32 %v645_v26, %v200_v60  ;;  %v314_v5 = vadd.f32 %v649_v28, %v201_v61  ;;  %v94_v21 = vunpack.c.h.bf16 %v24_v54  ;;  %v31_v53 = vld [vmem:[%s1258_s0 + $0x68] ss:$12 sps:$4 sm:$0xff]   ;;  %v32_v54 = vld [vmem:[%s1258_s0 + $0x6c] sm:$0xff] }
  0x11   :  { %502 = vst [vmem:[%s1261_s3 + $0x30] sm:$0xff] %v406_v57  ;;  %503 = vst [vmem:[%s1261_s3 + $0x38] sm:$0xff] %v407_v58  ;;  %v315_v6 = vadd.f32 %v653_v30, %v202_v62  ;;  %v316_v7 = vadd.f32 %v645_v26, %v203_v63  ;;  %v205_v9 = vmul.f32 %v651_v29, %v92_v1  ;;  %v95_v22 = vunpack.c.h.bf16 %v23_v49 }
  0x12   :  { %v206_v10 = vmul.f32 %v643_v25, %v93_v2  ;;  %v408_v12 = vmax.f32 %v312_v3, 0.0  ;;  %v409_v13 = vmax.f32 %v313_v4, 0.0  ;;  %v410_v14 = vmax.f32 %v314_v5, 0.0  ;;  %v34_v3 = vld [vmem:[%s1258_s0 + $0x78] sm:$0xff] }
  0x13   :  { %v411_v15 = vmax.f32 %v315_v6, 0.0  ;;  %v412_v17 = vmax.f32 %v316_v7, 0.0  ;;  %v317_v18 = vadd.f32 %v649_v28, %v204_v8  ;;  %v318_v19 = vadd.f32 %v653_v30, %v205_v9 }
  0x14   :  { %v319_v20 = vadd.f32 %v645_v26, %v206_v10  ;;  %504 = vst [vmem:[%s1261_s3 + $0x40] sm:$0xff] %v408_v12  ;;  %505 = vst [vmem:[%s1261_s3 + $0x48] sm:$0xff] %v409_v13  ;;  %v96_v23 = vunpack.c.l.bf16 %v26_v11  ;;  %v97_v24 = vunpack.c.h.bf16 %v26_v11  ;;  %v98_v35 = vunpack.c.l.bf16 %v27_v16 }
  0x15   :  { %506 = vst [vmem:[%s1261_s3 + $0x50] sm:$0xff] %v410_v14  ;;  %507 = vst [vmem:[%s1261_s3 + $0x58] sm:$0xff] %v411_v15  ;;  %v413_v32 = vmax.f32 %v317_v18, 0.0  ;;  %v414_v33 = vmax.f32 %v318_v19, 0.0  ;;  %v207_v36 = vmul.f32 %v647_v27, %v94_v21  ;;  %v208_v37 = vmul.f32 %v651_v29, %v95_v22 }
  0x16   :  { %508 = vst [vmem:[%s1261_s3 + $0x60] sm:$0xff] %v412_v17  ;;  %v415_v34 = vmax.f32 %v319_v20, 0.0  ;;  %v209_v38 = vmul.f32 %v643_v25, %v96_v23  ;;  %v210_v39 = vmul.f32 %v647_v27, %v97_v24  ;;  %v211_v40 = vmul.f32 %v651_v29, %v98_v35  ;;  %v35_v24 = vld [vmem:[%s1258_s0 + $0x80] ss:$12 sps:$4 sm:$0xff]  }
  0x17   :  { %509 = vst [vmem:[%s1261_s3 + $0x68] sm:$0xff] %v413_v32  ;;  %510 = vst [vmem:[%s1261_s3 + $0x70] sm:$0xff] %v414_v33  ;;  %v99_v41 = vunpack.c.l.bf16 %v28_v31  ;;  %v100_v42 = vunpack.c.h.bf16 %v28_v31  ;;  %v101_v43 = vunpack.c.h.bf16 %v27_v16  ;;  %v320_v44 = vadd.f32 %v649_v28, %v207_v36  ;;  %v36_v31 = vld [vmem:[%s1258_s0 + $0x84] sm:$0xff]  ;;  %v38_v36 = vld [vmem:[%s1258_s0 + $0x90] sm:$0xff] }
  0x18   :  { %511 = vst [vmem:[%s1261_s3 + $0x78] sm:$0xff] %v415_v34  ;;  %v321_v45 = vadd.f32 %v653_v30, %v208_v37  ;;  %v322_v46 = vadd.f32 %v645_v26, %v209_v38  ;;  %v323_v47 = vadd.f32 %v649_v28, %v210_v39  ;;  %v324_v48 = vadd.f32 %v653_v30, %v211_v40 }
  0x19   :  { %v212_v49 = vmul.f32 %v643_v25, %v99_v41  ;;  %v213_v50 = vmul.f32 %v647_v27, %v100_v42  ;;  %v214_v51 = vmul.f32 %v651_v29, %v101_v43  ;;  %v416_v55 = vmax.f32 %v320_v44, 0.0 }
  0x1a   :  { %v417_v56 = vmax.f32 %v321_v45, 0.0  ;;  %v418_v57 = vmax.f32 %v322_v46, 0.0  ;;  %v419_v58 = vmax.f32 %v323_v47, 0.0  ;;  %v420_v59 = vmax.f32 %v324_v48, 0.0  ;;  %v39_v45 = vld [vmem:[%s1258_s0 + $0x98] ss:$12 sps:$4 sm:$0xff]  }
  0x1b   :  { %v325_v60 = vadd.f32 %v645_v26, %v212_v49  ;;  %v326_v61 = vadd.f32 %v649_v28, %v213_v50  ;;  %v327_v62 = vadd.f32 %v653_v30, %v214_v51  ;;  %512 = vst [vmem:[%s1261_s3 + $0x80] sm:$0xff] %v416_v55  ;;  %v102_v63 = vunpack.c.l.bf16 %v30_v52  ;;  %v40_v46 = vld [vmem:[%s1258_s0 + $0x9c] sm:$0xff] }
  0x1c   :  { %513 = vst [vmem:[%s1261_s3 + $0x88] sm:$0xff] %v417_v56  ;;  %514 = vst [vmem:[%s1261_s3 + $0x90] sm:$0xff] %v418_v57  ;;  %v103_v0 = vunpack.c.h.bf16 %v30_v52  ;;  %v104_v1 = vunpack.c.l.bf16 %v31_v53  ;;  %v105_v2 = vunpack.c.l.bf16 %v32_v54  ;;  %v106_v7 = vunpack.c.h.bf16 %v32_v54 }
  0x1d   :  { %515 = vst [vmem:[%s1261_s3 + $0x98] sm:$0xff] %v419_v58  ;;  %516 = vst [vmem:[%s1261_s3 + $0xa0] sm:$0xff] %v420_v59  ;;  %v421_v4 = vmax.f32 %v325_v60, 0.0  ;;  %v422_v5 = vmax.f32 %v326_v61, 0.0  ;;  %v423_v6 = vmax.f32 %v327_v62, 0.0  ;;  %v215_v8 = vmul.f32 %v643_v25, %v102_v63 }
  0x1e   :  { %v216_v9 = vmul.f32 %v647_v27, %v103_v0  ;;  %v217_v10 = vmul.f32 %v651_v29, %v104_v1  ;;  %v218_v11 = vmul.f32 %v643_v25, %v105_v2  ;;  %v219_v12 = vmul.f32 %v647_v27, %v106_v7 }
  0x1f   :  { %517 = vst [vmem:[%s1261_s3 + $0xa8] sm:$0xff] %v421_v4  ;;  %518 = vst [vmem:[%s1261_s3 + $0xb0] sm:$0xff] %v422_v5  ;;  %v107_v13 = vunpack.c.h.bf16 %v31_v53  ;;  %v108_v14 = vunpack.c.l.bf16 %v34_v3  ;;  %v109_v15 = vunpack.c.h.bf16 %v34_v3  ;;  %v328_v16 = vadd.f32 %v645_v26, %v215_v8  ;;  %v42_v3 = vld [vmem:[%s1258_s0 + $0xa8] sm:$0xff]  ;;  %v43_v8 = vld [vmem:[%s1258_s0 + $0xb0] ss:$12 sps:$4 sm:$0xff]  }
  0x20   :  { %519 = vst [vmem:[%s1261_s3 + $0xb8] sm:$0xff] %v423_v6  ;;  %v329_v17 = vadd.f32 %v649_v28, %v216_v9  ;;  %v330_v18 = vadd.f32 %v653_v30, %v217_v10  ;;  %v331_v19 = vadd.f32 %v645_v26, %v218_v11  ;;  %v332_v20 = vadd.f32 %v649_v28, %v219_v12 }
  0x21   :  { %v220_v21 = vmul.f32 %v651_v29, %v107_v13  ;;  %v221_v22 = vmul.f32 %v643_v25, %v108_v14  ;;  %v222_v23 = vmul.f32 %v647_v27, %v109_v15  ;;  %v424_v32 = vmax.f32 %v328_v16, 0.0 }
  0x22   :  { %v425_v33 = vmax.f32 %v329_v17, 0.0  ;;  %v426_v34 = vmax.f32 %v330_v18, 0.0  ;;  %v427_v35 = vmax.f32 %v331_v19, 0.0  ;;  %v428_v37 = vmax.f32 %v332_v20, 0.0  ;;  %v44_v17 = vld [vmem:[%s1258_s0 + $0xb4] sm:$0xff] }
  0x23   :  { %v333_v38 = vadd.f32 %v653_v30, %v220_v21  ;;  %v334_v39 = vadd.f32 %v645_v26, %v221_v22  ;;  %v335_v40 = vadd.f32 %v649_v28, %v222_v23  ;;  %520 = vst [vmem:[%s1261_s3 + $0xc0] sm:$0xff] %v424_v32  ;;  %v110_v41 = vunpack.c.l.bf16 %v35_v24 }
  0x24   :  { %521 = vst [vmem:[%s1261_s3 + $0xc8] sm:$0xff] %v425_v33  ;;  %522 = vst [vmem:[%s1261_s3 + $0xd0] sm:$0xff] %v426_v34  ;;  %v111_v42 = vunpack.c.l.bf16 %v36_v31  ;;  %v112_v43 = vunpack.c.h.bf16 %v36_v31  ;;  %v113_v44 = vunpack.c.h.bf16 %v35_v24  ;;  %v114_v50 = vunpack.c.l.bf16 %v38_v36 }
  0x25   :  { %523 = vst [vmem:[%s1261_s3 + $0xd8] sm:$0xff] %v427_v35  ;;  %524 = vst [vmem:[%s1261_s3 + $0xe0] sm:$0xff] %v428_v37  ;;  %v429_v47 = vmax.f32 %v333_v38, 0.0  ;;  %v430_v48 = vmax.f32 %v334_v39, 0.0  ;;  %v431_v49 = vmax.f32 %v335_v40, 0.0  ;;  %v223_v51 = vmul.f32 %v651_v29, %v110_v41 }
  0x26   :  { %v224_v52 = vmul.f32 %v643_v25, %v111_v42  ;;  %v225_v53 = vmul.f32 %v647_v27, %v112_v43  ;;  %v226_v54 = vmul.f32 %v651_v29, %v113_v44  ;;  %v227_v55 = vmul.f32 %v643_v25, %v114_v50  ;;  %v46_v44 = vld [vmem:[%s1258_s0 + $0xc0] sm:$0xff] }
  0x27   :  { %525 = vst [vmem:[%s1261_s3 + $0xe8] sm:$0xff] %v429_v47  ;;  %526 = vst [vmem:[%s1261_s3 + $0xf0] sm:$0xff] %v430_v48  ;;  %v115_v56 = vunpack.c.h.bf16 %v38_v36  ;;  %v116_v57 = vunpack.c.l.bf16 %v39_v45  ;;  %v117_v58 = vunpack.c.l.bf16 %v40_v46  ;;  %v336_v59 = vadd.f32 %v653_v30, %v223_v51 }
  0x28   :  { %527 = vst [vmem:[%s1261_s3 + $0xf8] sm:$0xff] %v431_v49  ;;  %v337_v60 = vadd.f32 %v645_v26, %v224_v52  ;;  %v338_v61 = vadd.f32 %v649_v28, %v225_v53  ;;  %v339_v62 = vadd.f32 %v653_v30, %v226_v54  ;;  %v340_v63 = vadd.f32 %v645_v26, %v227_v55 }
  0x29   :  { %v228_v0 = vmul.f32 %v647_v27, %v115_v56  ;;  %v229_v1 = vmul.f32 %v651_v29, %v116_v57  ;;  %v230_v2 = vmul.f32 %v643_v25, %v117_v58  ;;  %v432_v4 = vmax.f32 %v336_v59, 0.0  ;;  %v50_v59 = vld [vmem:[%s1258_s0 + $0xd8] sm:$0xff] }
  0x2a   :  { %v433_v5 = vmax.f32 %v337_v60, 0.0  ;;  %v434_v6 = vmax.f32 %v338_v61, 0.0  ;;  %v435_v7 = vmax.f32 %v339_v62, 0.0  ;;  %v436_v9 = vmax.f32 %v340_v63, 0.0 }
  0x2b   :  { %v341_v10 = vadd.f32 %v649_v28, %v228_v0  ;;  %v342_v11 = vadd.f32 %v653_v30, %v229_v1  ;;  %v343_v12 = vadd.f32 %v645_v26, %v230_v2  ;;  %528 = vst [vmem:[%s1261_s3 + $0x100] sm:$0xff] %v432_v4  ;;  %v118_v13 = vunpack.c.h.bf16 %v40_v46  ;;  %v48_v46 = vld [vmem:[%s1258_s0 + $0xcc] sm:$0xff] }
  0x2c   :  { %529 = vst [vmem:[%s1261_s3 + $0x108] sm:$0xff] %v433_v5  ;;  %530 = vst [vmem:[%s1261_s3 + $0x110] sm:$0xff] %v434_v6  ;;  %v119_v14 = vunpack.c.h.bf16 %v39_v45  ;;  %v120_v15 = vunpack.c.l.bf16 %v42_v3  ;;  %v121_v16 = vunpack.c.h.bf16 %v42_v3  ;;  %v122_v21 = vunpack.c.l.bf16 %v43_v8  ;;  %v47_v45 = vld [vmem:[%s1258_s0 + $0xc8] ss:$12 sps:$4 sm:$0xff]  }
  0x2d   :  { %531 = vst [vmem:[%s1261_s3 + $0x118] sm:$0xff] %v435_v7  ;;  %532 = vst [vmem:[%s1261_s3 + $0x120] sm:$0xff] %v436_v9  ;;  %v437_v18 = vmax.f32 %v341_v10, 0.0  ;;  %v438_v19 = vmax.f32 %v342_v11, 0.0  ;;  %v439_v20 = vmax.f32 %v343_v12, 0.0  ;;  %v231_v22 = vmul.f32 %v647_v27, %v118_v13 }
  0x2e   :  { %v232_v23 = vmul.f32 %v651_v29, %v119_v14  ;;  %v233_v24 = vmul.f32 %v643_v25, %v120_v15  ;;  %v234_v31 = vmul.f32 %v647_v27, %v121_v16  ;;  %v235_v32 = vmul.f32 %v651_v29, %v122_v21  ;;  %v51_v16 = vld [vmem:[%s1258_s0 + $0xe0] ss:$12 sps:$4 sm:$0xff]  }
  0x2f   :  { %533 = vst [vmem:[%s1261_s3 + $0x128] sm:$0xff] %v437_v18  ;;  %534 = vst [vmem:[%s1261_s3 + $0x130] sm:$0xff] %v438_v19  ;;  %v123_v33 = vunpack.c.l.bf16 %v44_v17  ;;  %v124_v34 = vunpack.c.h.bf16 %v44_v17  ;;  %v125_v35 = vunpack.c.h.bf16 %v43_v8  ;;  %v344_v36 = vadd.f32 %v649_v28, %v231_v22  ;;  %v52_v17 = vld [vmem:[%s1258_s0 + $0xe4] sm:$0xff]  ;;  %v54_v22 = vld [vmem:[%s1258_s0 + $0xf0] sm:$0xff] }
  0x30   :  { %535 = vst [vmem:[%s1261_s3 + $0x138] sm:$0xff] %v439_v20  ;;  %v345_v37 = vadd.f32 %v653_v30, %v232_v23  ;;  %v346_v38 = vadd.f32 %v645_v26, %v233_v24  ;;  %v347_v39 = vadd.f32 %v649_v28, %v234_v31  ;;  %v348_v40 = vadd.f32 %v653_v30, %v235_v32 }
  0x31   :  { %v236_v41 = vmul.f32 %v643_v25, %v123_v33  ;;  %v237_v42 = vmul.f32 %v647_v27, %v124_v34  ;;  %v238_v43 = vmul.f32 %v651_v29, %v125_v35  ;;  %v440_v47 = vmax.f32 %v344_v36, 0.0 }
  0x32   :  { %v441_v48 = vmax.f32 %v345_v37, 0.0  ;;  %v442_v49 = vmax.f32 %v346_v38, 0.0  ;;  %v443_v50 = vmax.f32 %v347_v39, 0.0  ;;  %v444_v51 = vmax.f32 %v348_v40, 0.0  ;;  %v55_v37 = vld [vmem:[%s1258_s0 + $0xf8] ss:$12 sps:$4 sm:$0xff]  }
  0x33   :  { %v349_v52 = vadd.f32 %v645_v26, %v236_v41  ;;  %v350_v53 = vadd.f32 %v649_v28, %v237_v42  ;;  %v351_v54 = vadd.f32 %v653_v30, %v238_v43  ;;  %536 = vst [vmem:[%s1261_s3 + $0x140] sm:$0xff] %v440_v47  ;;  %v126_v55 = vunpack.c.l.bf16 %v46_v44  ;;  %v56_v38 = vld [vmem:[%s1258_s0 + $0xfc] sm:$0xff] }
  0x34   :  { %537 = vst [vmem:[%s1261_s3 + $0x148] sm:$0xff] %v441_v48  ;;  %538 = vst [vmem:[%s1261_s3 + $0x150] sm:$0xff] %v442_v49  ;;  %v127_v56 = vunpack.c.h.bf16 %v46_v44  ;;  %v128_v57 = vunpack.c.l.bf16 %v47_v45  ;;  %v129_v58 = vunpack.c.l.bf16 %v48_v46  ;;  %v130_v63 = vunpack.c.h.bf16 %v48_v46 }
  0x35   :  { %539 = vst [vmem:[%s1261_s3 + $0x158] sm:$0xff] %v443_v50  ;;  %540 = vst [vmem:[%s1261_s3 + $0x160] sm:$0xff] %v444_v51  ;;  %v445_v60 = vmax.f32 %v349_v52, 0.0  ;;  %v446_v61 = vmax.f32 %v350_v53, 0.0  ;;  %v447_v62 = vmax.f32 %v351_v54, 0.0  ;;  %v239_v0 = vmul.f32 %v643_v25, %v126_v55 }
  0x36   :  { %v240_v1 = vmul.f32 %v647_v27, %v127_v56  ;;  %v241_v2 = vmul.f32 %v651_v29, %v128_v57  ;;  %v242_v3 = vmul.f32 %v643_v25, %v129_v58  ;;  %v243_v4 = vmul.f32 %v647_v27, %v130_v63 }
  0x37   :  { %541 = vst [vmem:[%s1261_s3 + $0x168] sm:$0xff] %v445_v60  ;;  %542 = vst [vmem:[%s1261_s3 + $0x170] sm:$0xff] %v446_v61  ;;  %v131_v5 = vunpack.c.h.bf16 %v47_v45  ;;  %v132_v6 = vunpack.c.l.bf16 %v50_v59  ;;  %v133_v7 = vunpack.c.h.bf16 %v50_v59  ;;  %v352_v8 = vadd.f32 %v645_v26, %v239_v0  ;;  %v58_v59 = vld [vmem:[%s1258_s0 + $0x108] sm:$0xff]  ;;  %v59_v0 = vld [vmem:[%s1258_s0 + $0x110] ss:$12 sps:$4 sm:$0xff]  }
  0x38   :  { %543 = vst [vmem:[%s1261_s3 + $0x178] sm:$0xff] %v447_v62  ;;  %v353_v9 = vadd.f32 %v649_v28, %v240_v1  ;;  %v354_v10 = vadd.f32 %v653_v30, %v241_v2  ;;  %v355_v11 = vadd.f32 %v645_v26, %v242_v3  ;;  %v356_v12 = vadd.f32 %v649_v28, %v243_v4 }
  0x39   :  { %v244_v13 = vmul.f32 %v651_v29, %v131_v5  ;;  %v245_v14 = vmul.f32 %v643_v25, %v132_v6  ;;  %v246_v15 = vmul.f32 %v647_v27, %v133_v7  ;;  %v448_v18 = vmax.f32 %v352_v8, 0.0 }
  0x3a   :  { %v449_v19 = vmax.f32 %v353_v9, 0.0  ;;  %v450_v20 = vmax.f32 %v354_v10, 0.0  ;;  %v451_v21 = vmax.f32 %v355_v11, 0.0  ;;  %v452_v23 = vmax.f32 %v356_v12, 0.0  ;;  %v60_v9 = vld [vmem:[%s1258_s0 + $0x114] sm:$0xff] }
  0x3b   :  { %v357_v24 = vadd.f32 %v653_v30, %v244_v13  ;;  %v358_v31 = vadd.f32 %v645_v26, %v245_v14  ;;  %v359_v32 = vadd.f32 %v649_v28, %v246_v15  ;;  %544 = vst [vmem:[%s1261_s3 + $0x180] sm:$0xff] %v448_v18  ;;  %v134_v33 = vunpack.c.l.bf16 %v51_v16 }
  0x3c   :  { %545 = vst [vmem:[%s1261_s3 + $0x188] sm:$0xff] %v449_v19  ;;  %546 = vst [vmem:[%s1261_s3 + $0x190] sm:$0xff] %v450_v20  ;;  %v135_v34 = vunpack.c.l.bf16 %v52_v17  ;;  %v136_v35 = vunpack.c.h.bf16 %v52_v17  ;;  %v137_v36 = vunpack.c.h.bf16 %v51_v16  ;;  %v138_v42 = vunpack.c.l.bf16 %v54_v22 }
  0x3d   :  { %547 = vst [vmem:[%s1261_s3 + $0x198] sm:$0xff] %v451_v21  ;;  %548 = vst [vmem:[%s1261_s3 + $0x1a0] sm:$0xff] %v452_v23  ;;  %v453_v39 = vmax.f32 %v357_v24, 0.0  ;;  %v454_v40 = vmax.f32 %v358_v31, 0.0  ;;  %v455_v41 = vmax.f32 %v359_v32, 0.0  ;;  %v247_v43 = vmul.f32 %v651_v29, %v134_v33 }
  0x3e   :  { %v248_v44 = vmul.f32 %v643_v25, %v135_v34  ;;  %v249_v45 = vmul.f32 %v647_v27, %v136_v35  ;;  %v250_v46 = vmul.f32 %v651_v29, %v137_v36  ;;  %v251_v47 = vmul.f32 %v643_v25, %v138_v42  ;;  %v62_v36 = vld [vmem:[%s1258_s0 + $0x120] sm:$0xff] }
  0x3f   :  { %549 = vst [vmem:[%s1261_s3 + $0x1a8] sm:$0xff] %v453_v39  ;;  %550 = vst [vmem:[%s1261_s3 + $0x1b0] sm:$0xff] %v454_v40  ;;  %v139_v48 = vunpack.c.h.bf16 %v54_v22  ;;  %v140_v49 = vunpack.c.l.bf16 %v55_v37  ;;  %v141_v50 = vunpack.c.l.bf16 %v56_v38  ;;  %v360_v51 = vadd.f32 %v653_v30, %v247_v43 }
  0x40   :  { %551 = vst [vmem:[%s1261_s3 + $0x1b8] sm:$0xff] %v455_v41  ;;  %v361_v52 = vadd.f32 %v645_v26, %v248_v44  ;;  %v362_v53 = vadd.f32 %v649_v28, %v249_v45  ;;  %v363_v54 = vadd.f32 %v653_v30, %v250_v46  ;;  %v364_v55 = vadd.f32 %v645_v26, %v251_v47 }
  0x41   :  { %v252_v56 = vmul.f32 %v647_v27, %v139_v48  ;;  %v253_v57 = vmul.f32 %v651_v29, %v140_v49  ;;  %v254_v58 = vmul.f32 %v643_v25, %v141_v50  ;;  %v456_v60 = vmax.f32 %v360_v51, 0.0  ;;  %v66_v51 = vld [vmem:[%s1258_s0 + $0x138] sm:$0xff] }
  0x42   :  { %v457_v61 = vmax.f32 %v361_v52, 0.0  ;;  %v458_v62 = vmax.f32 %v362_v53, 0.0  ;;  %v459_v63 = vmax.f32 %v363_v54, 0.0  ;;  %v460_v1 = vmax.f32 %v364_v55, 0.0 }
  0x43   :  { %v365_v2 = vadd.f32 %v649_v28, %v252_v56  ;;  %v366_v3 = vadd.f32 %v653_v30, %v253_v57  ;;  %v367_v4 = vadd.f32 %v645_v26, %v254_v58  ;;  %552 = vst [vmem:[%s1261_s3 + $0x1c0] sm:$0xff] %v456_v60  ;;  %v142_v5 = vunpack.c.h.bf16 %v56_v38  ;;  %v64_v38 = vld [vmem:[%s1258_s0 + $0x12c] sm:$0xff] }
  0x44   :  { %553 = vst [vmem:[%s1261_s3 + $0x1c8] sm:$0xff] %v457_v61  ;;  %554 = vst [vmem:[%s1261_s3 + $0x1d0] sm:$0xff] %v458_v62  ;;  %v143_v6 = vunpack.c.h.bf16 %v55_v37  ;;  %v144_v7 = vunpack.c.l.bf16 %v58_v59  ;;  %v145_v8 = vunpack.c.h.bf16 %v58_v59  ;;  %v146_v13 = vunpack.c.l.bf16 %v59_v0  ;;  %v63_v37 = vld [vmem:[%s1258_s0 + $0x128] ss:$12 sps:$4 sm:$0xff]  }
  0x45   :  { %555 = vst [vmem:[%s1261_s3 + $0x1d8] sm:$0xff] %v459_v63  ;;  %556 = vst [vmem:[%s1261_s3 + $0x1e0] sm:$0xff] %v460_v1  ;;  %v461_v10 = vmax.f32 %v365_v2, 0.0  ;;  %v462_v11 = vmax.f32 %v366_v3, 0.0  ;;  %v463_v12 = vmax.f32 %v367_v4, 0.0  ;;  %v255_v14 = vmul.f32 %v647_v27, %v142_v5 }
  0x46   :  { %v256_v15 = vmul.f32 %v651_v29, %v143_v6  ;;  %v257_v16 = vmul.f32 %v643_v25, %v144_v7  ;;  %v258_v17 = vmul.f32 %v647_v27, %v145_v8  ;;  %v259_v18 = vmul.f32 %v651_v29, %v146_v13  ;;  %v67_v8 = vld [vmem:[%s1258_s0 + $0x140] ss:$12 sps:$4 sm:$0xff]  }
  0x47   :  { %557 = vst [vmem:[%s1261_s3 + $0x1e8] sm:$0xff] %v461_v10  ;;  %558 = vst [vmem:[%s1261_s3 + $0x1f0] sm:$0xff] %v462_v11  ;;  %v147_v19 = vunpack.c.l.bf16 %v60_v9  ;;  %v148_v20 = vunpack.c.h.bf16 %v60_v9  ;;  %v149_v21 = vunpack.c.h.bf16 %v59_v0  ;;  %v368_v22 = vadd.f32 %v649_v28, %v255_v14  ;;  %v68_v9 = vld [vmem:[%s1258_s0 + $0x144] sm:$0xff]  ;;  %v70_v14 = vld [vmem:[%s1258_s0 + $0x150] sm:$0xff] }
  0x48   :  { %559 = vst [vmem:[%s1261_s3 + $0x1f8] sm:$0xff] %v463_v12  ;;  %v369_v23 = vadd.f32 %v653_v30, %v256_v15  ;;  %v370_v24 = vadd.f32 %v645_v26, %v257_v16  ;;  %v371_v31 = vadd.f32 %v649_v28, %v258_v17  ;;  %v372_v32 = vadd.f32 %v653_v30, %v259_v18 }
  0x49   :  { %v260_v33 = vmul.f32 %v643_v25, %v147_v19  ;;  %v261_v34 = vmul.f32 %v647_v27, %v148_v20  ;;  %v262_v35 = vmul.f32 %v651_v29, %v149_v21  ;;  %v464_v39 = vmax.f32 %v368_v22, 0.0 }
  0x4a   :  { %v465_v40 = vmax.f32 %v369_v23, 0.0  ;;  %v466_v41 = vmax.f32 %v370_v24, 0.0  ;;  %v467_v42 = vmax.f32 %v371_v31, 0.0  ;;  %v468_v43 = vmax.f32 %v372_v32, 0.0  ;;  %v71_v23 = vld [vmem:[%s1258_s0 + $0x158] ss:$12 sps:$4 sm:$0xff]  }
  0x4b   :  { %v373_v44 = vadd.f32 %v645_v26, %v260_v33  ;;  %v374_v45 = vadd.f32 %v649_v28, %v261_v34  ;;  %v375_v46 = vadd.f32 %v653_v30, %v262_v35  ;;  %560 = vst [vmem:[%s1261_s3 + $0x200] sm:$0xff] %v464_v39  ;;  %v150_v47 = vunpack.c.l.bf16 %v62_v36  ;;  %v72_v24 = vld [vmem:[%s1258_s0 + $0x15c] sm:$0xff] }
  0x4c   :  { %561 = vst [vmem:[%s1261_s3 + $0x208] sm:$0xff] %v465_v40  ;;  %562 = vst [vmem:[%s1261_s3 + $0x210] sm:$0xff] %v466_v41  ;;  %v151_v48 = vunpack.c.h.bf16 %v62_v36  ;;  %v152_v49 = vunpack.c.l.bf16 %v63_v37  ;;  %v153_v50 = vunpack.c.l.bf16 %v64_v38  ;;  %v154_v55 = vunpack.c.h.bf16 %v64_v38 }
  0x4d   :  { %563 = vst [vmem:[%s1261_s3 + $0x218] sm:$0xff] %v467_v42  ;;  %564 = vst [vmem:[%s1261_s3 + $0x220] sm:$0xff] %v468_v43  ;;  %v469_v52 = vmax.f32 %v373_v44, 0.0  ;;  %v470_v53 = vmax.f32 %v374_v45, 0.0  ;;  %v471_v54 = vmax.f32 %v375_v46, 0.0  ;;  %v263_v56 = vmul.f32 %v643_v25, %v150_v47 }
  0x4e   :  { %v264_v57 = vmul.f32 %v647_v27, %v151_v48  ;;  %v265_v58 = vmul.f32 %v651_v29, %v152_v49  ;;  %v266_v59 = vmul.f32 %v643_v25, %v153_v50  ;;  %v267_v60 = vmul.f32 %v647_v27, %v154_v55 }
  0x4f   :  { %565 = vst [vmem:[%s1261_s3 + $0x228] sm:$0xff] %v469_v52  ;;  %566 = vst [vmem:[%s1261_s3 + $0x230] sm:$0xff] %v470_v53  ;;  %v155_v61 = vunpack.c.h.bf16 %v63_v37  ;;  %v156_v62 = vunpack.c.l.bf16 %v66_v51  ;;  %v157_v63 = vunpack.c.h.bf16 %v66_v51  ;;  %v376_v0 = vadd.f32 %v645_v26, %v263_v56  ;;  %v74_v51 = vld [vmem:[%s1258_s0 + $0x168] sm:$0xff]  ;;  %v75_v56 = vld [vmem:[%s1258_s0 + $0x170] ss:$12 sps:$4 sm:$0xff]  }
  0x50   :  { %567 = vst [vmem:[%s1261_s3 + $0x238] sm:$0xff] %v471_v54  ;;  %v377_v1 = vadd.f32 %v649_v28, %v264_v57  ;;  %v378_v2 = vadd.f32 %v653_v30, %v265_v58  ;;  %v379_v3 = vadd.f32 %v645_v26, %v266_v59  ;;  %v380_v4 = vadd.f32 %v649_v28, %v267_v60 }
  0x51   :  { %v268_v5 = vmul.f32 %v651_v29, %v155_v61  ;;  %v269_v6 = vmul.f32 %v643_v25, %v156_v62  ;;  %v270_v7 = vmul.f32 %v647_v27, %v157_v63  ;;  %v472_v10 = vmax.f32 %v376_v0, 0.0 }
  0x52   :  { %v473_v11 = vmax.f32 %v377_v1, 0.0  ;;  %v474_v12 = vmax.f32 %v378_v2, 0.0  ;;  %v475_v13 = vmax.f32 %v379_v3, 0.0  ;;  %v476_v15 = vmax.f32 %v380_v4, 0.0  ;;  %v76_v1 = vld [vmem:[%s1258_s0 + $0x174] sm:$0xff] }
  0x53   :  { %v381_v16 = vadd.f32 %v653_v30, %v268_v5  ;;  %v382_v17 = vadd.f32 %v645_v26, %v269_v6  ;;  %v383_v18 = vadd.f32 %v649_v28, %v270_v7  ;;  %568 = vst [vmem:[%s1261_s3 + $0x240] sm:$0xff] %v472_v10  ;;  %v158_v19 = vunpack.c.l.bf16 %v67_v8 }
  0x54   :  { %569 = vst [vmem:[%s1261_s3 + $0x248] sm:$0xff] %v473_v11  ;;  %570 = vst [vmem:[%s1261_s3 + $0x250] sm:$0xff] %v474_v12  ;;  %v159_v20 = vunpack.c.l.bf16 %v68_v9  ;;  %v160_v21 = vunpack.c.h.bf16 %v68_v9  ;;  %v161_v22 = vunpack.c.h.bf16 %v67_v8  ;;  %v162_v34 = vunpack.c.l.bf16 %v70_v14 }
  0x55   :  { %571 = vst [vmem:[%s1261_s3 + $0x258] sm:$0xff] %v475_v13  ;;  %572 = vst [vmem:[%s1261_s3 + $0x260] sm:$0xff] %v476_v15  ;;  %v477_v31 = vmax.f32 %v381_v16, 0.0  ;;  %v478_v32 = vmax.f32 %v382_v17, 0.0  ;;  %v479_v33 = vmax.f32 %v383_v18, 0.0  ;;  %v271_v35 = vmul.f32 %v651_v29, %v158_v19 }
  0x56   :  { %v272_v36 = vmul.f32 %v643_v25, %v159_v20  ;;  %v273_v37 = vmul.f32 %v647_v27, %v160_v21  ;;  %v274_v38 = vmul.f32 %v651_v29, %v161_v22  ;;  %v275_v39 = vmul.f32 %v643_v25, %v162_v34 }
  0x57   :  { %573 = vst [vmem:[%s1261_s3 + $0x268] sm:$0xff] %v477_v31  ;;  %574 = vst [vmem:[%s1261_s3 + $0x270] sm:$0xff] %v478_v32  ;;  %v163_v40 = vunpack.c.h.bf16 %v70_v14  ;;  %v164_v41 = vunpack.c.l.bf16 %v71_v23  ;;  %v165_v42 = vunpack.c.l.bf16 %v72_v24  ;;  %v384_v43 = vadd.f32 %v653_v30, %v271_v35 }
  0x58   :  { %575 = vst [vmem:[%s1261_s3 + $0x278] sm:$0xff] %v479_v33  ;;  %v385_v44 = vadd.f32 %v645_v26, %v272_v36  ;;  %v386_v45 = vadd.f32 %v649_v28, %v273_v37  ;;  %v387_v46 = vadd.f32 %v653_v30, %v274_v38  ;;  %v388_v47 = vadd.f32 %v645_v26, %v275_v39 }
  0x59   :  { %v276_v48 = vmul.f32 %v647_v27, %v163_v40  ;;  %v277_v49 = vmul.f32 %v651_v29, %v164_v41  ;;  %v278_v50 = vmul.f32 %v643_v25, %v165_v42  ;;  %v480_v52 = vmax.f32 %v384_v43, 0.0 }
  0x5a   :  { %v481_v53 = vmax.f32 %v385_v44, 0.0  ;;  %v482_v54 = vmax.f32 %v386_v45, 0.0  ;;  %v483_v55 = vmax.f32 %v387_v46, 0.0  ;;  %v484_v57 = vmax.f32 %v388_v47, 0.0 }
  0x5b   :  { %v389_v58 = vadd.f32 %v649_v28, %v276_v48  ;;  %v390_v59 = vadd.f32 %v653_v30, %v277_v49  ;;  %v391_v60 = vadd.f32 %v645_v26, %v278_v50  ;;  %576 = vst [vmem:[%s1261_s3 + $0x280] sm:$0xff] %v480_v52  ;;  %v166_v61 = vunpack.c.h.bf16 %v72_v24 }
  0x5c   :  { %577 = vst [vmem:[%s1261_s3 + $0x288] sm:$0xff] %v481_v53  ;;  %578 = vst [vmem:[%s1261_s3 + $0x290] sm:$0xff] %v482_v54  ;;  %v167_v62 = vunpack.c.h.bf16 %v71_v23  ;;  %v168_v63 = vunpack.c.l.bf16 %v74_v51  ;;  %v169_v0 = vunpack.c.h.bf16 %v74_v51  ;;  %v170_v5 = vunpack.c.l.bf16 %v75_v56 }
  0x5d   :  { %579 = vst [vmem:[%s1261_s3 + $0x298] sm:$0xff] %v483_v55  ;;  %580 = vst [vmem:[%s1261_s3 + $0x2a0] sm:$0xff] %v484_v57  ;;  %v485_v2 = vmax.f32 %v389_v58, 0.0  ;;  %v486_v3 = vmax.f32 %v390_v59, 0.0  ;;  %v487_v4 = vmax.f32 %v391_v60, 0.0  ;;  %v279_v6 = vmul.f32 %v647_v27, %v166_v61 }
  0x5e   :  { %v280_v7 = vmul.f32 %v651_v29, %v167_v62  ;;  %v281_v8 = vmul.f32 %v643_v25, %v168_v63  ;;  %v282_v9 = vmul.f32 %v647_v27, %v169_v0  ;;  %v283_v10 = vmul.f32 %v651_v29, %v170_v5 }
  0x5f   :  { %581 = vst [vmem:[%s1261_s3 + $0x2a8] sm:$0xff] %v485_v2  ;;  %582 = vst [vmem:[%s1261_s3 + $0x2b0] sm:$0xff] %v486_v3  ;;  %v171_v11 = vunpack.c.l.bf16 %v76_v1  ;;  %v172_v12 = vunpack.c.h.bf16 %v76_v1  ;;  %v173_v13 = vunpack.c.h.bf16 %v75_v56  ;;  %v392_v14 = vadd.f32 %v649_v28, %v279_v6 }
  0x60   :  { %583 = vst [vmem:[%s1261_s3 + $0x2b8] sm:$0xff] %v487_v4  ;;  %v393_v15 = vadd.f32 %v653_v30, %v280_v7  ;;  %v394_v16 = vadd.f32 %v645_v26, %v281_v8  ;;  %v395_v17 = vadd.f32 %v649_v28, %v282_v9  ;;  %v396_v18 = vadd.f32 %v653_v30, %v283_v10 }
  0x61   :  { %v284_v19 = vmul.f32 %v643_v25, %v171_v11  ;;  %v285_v20 = vmul.f32 %v647_v27, %v172_v12  ;;  %v286_v21 = vmul.f32 %v651_v29, %v173_v13  ;;  %v488_v22 = vmax.f32 %v392_v14, 0.0 }
  0x62   :  { %v489_v23 = vmax.f32 %v393_v15, 0.0  ;;  %v490_v24 = vmax.f32 %v394_v16, 0.0  ;;  %v491_v31 = vmax.f32 %v395_v17, 0.0  ;;  %v492_v32 = vmax.f32 %v396_v18, 0.0 }
  0x63   :  { %v397_v33 = vadd.f32 %v645_v26, %v284_v19  ;;  %v398_v34 = vadd.f32 %v649_v28, %v285_v20  ;;  %v399_v35 = vadd.f32 %v653_v30, %v286_v21  ;;  %584 = vst [vmem:[%s1261_s3 + $0x2c0] sm:$0xff] %v488_v22 }
  0x64   :  { %585 = vst [vmem:[%s1261_s3 + $0x2c8] sm:$0xff] %v489_v23  ;;  %586 = vst [vmem:[%s1261_s3 + $0x2d0] sm:$0xff] %v490_v24 }
  0x65   :  { %587 = vst [vmem:[%s1261_s3 + $0x2d8] sm:$0xff] %v491_v31  ;;  %588 = vst [vmem:[%s1261_s3 + $0x2e0] sm:$0xff] %v492_v32  ;;  %v493_v25 = vmax.f32 %v397_v33, 0.0  ;;  %v494_v26 = vmax.f32 %v398_v34, 0.0  ;;  %v495_v27 = vmax.f32 %v399_v35, 0.0 }
  0x67   :  { %589 = vst [vmem:[%s1261_s3 + $0x2e8] sm:$0xff] %v493_v25  ;;  %590 = vst [vmem:[%s1261_s3 + $0x2f0] sm:$0xff] %v494_v26 }
  0x68   :  { %591 = vst [vmem:[%s1261_s3 + $0x2f8] sm:$0xff] %v495_v27 }

// kernel: cnn_block2.6
= control target key start
LH: loop header
LB: loop body
LE: loop exit
PB: predicated region body
PF: predicated region fallthrough
CT: control target
= control target key end

     0   :  { %s20658_s1 = inlined_call_operand.vmem [shape: bf16[3072,384], index: 1, kind: input, shape index: {}]   ;;  %s20659_s0 = inlined_call_operand.vmem [shape: bf16[256,3072], index: 0, kind: input, shape index: {}]   ;;  %s20660_s2 = inlined_call_operand.vmem [shape: bf16[256,384], index: 2, kind: output, shape index: {0}]   ;;  %s20661_s3 = inlined_call_operand.vmem [shape: f32[8,384], index: 3, kind: output, shape index: {1}]  }
   0x1   :  { %v14265_v0 = vld [vmem:[%s20658_s1 + $0x4] ss:$12 sps:$4 sm:$0xff]   ;;  %v14267_v1 = vld [vmem:[%s20658_s1 + $0xc8] ss:$12 sps:$4 sm:$0xff]   ;;  %v14268_v2 = vld [vmem:[%s20658_s1] ss:$12 sps:$4 sm:$0xff]  }
   0x2   :  { %6158 = vmatprep.subr.bf16.mxu0 %v14265_v0  ;;  %12217 = vmatprep.subr.bf16.mxu1 %v14267_v1  ;;  %v14269_v3 = vld [vmem:[%s20658_s1 + $0x8] ss:$12 sps:$4 sm:$0xff]   ;;  %v14272_v5 = vld [vmem:[%s20658_s1 + $0xe0] ss:$12 sps:$4 sm:$0xff]   ;;  %v14273_v6 = vld [vmem:[%s20658_s1 + $0x18] ss:$12 sps:$4 sm:$0xff]  }
   0x3   :  { %6159 = vmatpush1.bf16.msra.mxu0 %v14268_v2  ;;  %v14270_v4 = vld [vmem:[%s20658_s1 + $0x1c] ss:$12 sps:$4 sm:$0xff]   ;;  %12218 = vmatpush3.bf16.msra.mxu1 %v14269_v3  ;;  %v14274_v7 = vld [vmem:[%s20658_s1 + $0x20] ss:$12 sps:$4 sm:$0xff]   ;;  %v14277_v9 = vld [vmem:[%s20658_s1 + $0xf8] ss:$12 sps:$4 sm:$0xff]  }
   0x4   :  { %6160 = vmatprep.subr.bf16.mxu0 %v14270_v4  ;;  %12219 = vmatprep.subr.bf16.mxu1 %v14272_v5  ;;  %v14275_v8 = vld [vmem:[%s20658_s1 + $0x34] ss:$12 sps:$4 sm:$0xff]   ;;  %v14278_v10 = vld [vmem:[%s20658_s1 + $0x30] ss:$12 sps:$4 sm:$0xff]   ;;  %v14279_v11 = vld [vmem:[%s20658_s1 + $0x38] ss:$12 sps:$4 sm:$0xff]  }
   0x5   :  { %v14280_v12 = vld [vmem:[%s20658_s1 + $0x4c] ss:$12 sps:$4 sm:$0xff]   ;;  %v14282_v13 = vld [vmem:[%s20658_s1 + $0x110] ss:$12 sps:$4 sm:$0xff]   ;;  %v14283_v14 = vld [vmem:[%s20658_s1 + $0x48] ss:$12 sps:$4 sm:$0xff]  }
   0x6   :  { %v14284_v15 = vld [vmem:[%s20658_s1 + $0x50] ss:$12 sps:$4 sm:$0xff]   ;;  %v14287_v17 = vld [vmem:[%s20658_s1 + $0x128] ss:$12 sps:$4 sm:$0xff]   ;;  %v14288_v18 = vld [vmem:[%s20658_s1 + $0x60] ss:$12 sps:$4 sm:$0xff]  }
   0x7   :  { %6161 = vmatpush1.bf16.msra.mxu0 %v14273_v6  ;;  %12220 = vmatpush3.bf16.msra.mxu1 %v14274_v7  ;;  %v14285_v16 = vld [vmem:[%s20658_s1 + $0x64] ss:$12 sps:$4 sm:$0xff]   ;;  %v14289_v19 = vld [vmem:[%s20658_s1 + $0x68] ss:$12 sps:$4 sm:$0xff]   ;;  %v14292_v21 = vld [vmem:[%s20658_s1 + $0x140] ss:$12 sps:$4 sm:$0xff]  }
   0x8   :  { %6162 = vmatprep.subr.bf16.mxu0 %v14275_v8  ;;  %12221 = vmatprep.subr.bf16.mxu1 %v14277_v9  ;;  %v14290_v20 = vld [vmem:[%s20658_s1 + $0x7c] ss:$12 sps:$4 sm:$0xff]   ;;  %v14293_v22 = vld [vmem:[%s20658_s1 + $0x78] ss:$12 sps:$4 sm:$0xff]   ;;  %v14294_v23 = vld [vmem:[%s20658_s1 + $0x80] ss:$12 sps:$4 sm:$0xff]  }
   0x9   :  { %v14295_v24 = vld [vmem:[%s20658_s1 + $0x94] ss:$12 sps:$4 sm:$0xff]   ;;  %v14297_v25 = vld [vmem:[%s20658_s1 + $0x158] ss:$12 sps:$4 sm:$0xff]   ;;  %v14298_v26 = vld [vmem:[%s20658_s1 + $0x90] ss:$12 sps:$4 sm:$0xff]  }
   0xa   :  { %v14299_v27 = vld [vmem:[%s20658_s1 + $0x98] ss:$12 sps:$4 sm:$0xff]   ;;  %v14302_v29 = vld [vmem:[%s20658_s1 + $0x170] ss:$12 sps:$4 sm:$0xff]   ;;  %v14303_v32 = vld [vmem:[%s20658_s1 + $0xa8] ss:$12 sps:$4 sm:$0xff]  }
   0xb   :  { %6163 = vmatpush1.bf16.msra.mxu0 %v14278_v10  ;;  %12222 = vmatpush3.bf16.msra.mxu1 %v14279_v11  ;;  %v14300_v28 = vld [vmem:[%s20658_s1 + $0xac] ss:$12 sps:$4 sm:$0xff]   ;;  %v14_v30 = vld [vmem:[%s20659_s0] sm:$0xff]  ;;  %v14304_v34 = vld [vmem:[%s20658_s1 + $0xb0] ss:$12 sps:$4 sm:$0xff]  }
   0xc   :  { %6164 = vmatprep.subr.bf16.mxu0 %v14280_v12  ;;  %12223 = vmatprep.subr.bf16.mxu1 %v14282_v13  ;;  %v26_v31 = vld [vmem:[%s20659_s0 + $0x60] sm:$0xff]  ;;  %v14308_v40 = vld [vmem:[%s20658_s1 + $0xdc] ss:$12 sps:$4 sm:$0xff]   ;;  %v14314_v48 = vld [vmem:[%s20658_s1 + $0x10c] ss:$12 sps:$4 sm:$0xff]  }
   0xd   :  { %v11130_v33 = vcombine.high %v14_v30, %v26_v31  ;;  %v14305_v35 = vld [vmem:[%s20658_s1 + $0xc4] ss:$12 sps:$4 sm:$0xff]   ;;  %v15164_v38 = vcombine.low %v14_v30, %v26_v31  ;;  %v14307_v39 = vld [vmem:[%s20658_s1 + $0xc0] ss:$12 sps:$4 sm:$0xff]   ;;  %v14328_v49 = vld [vmem:[%s20658_s1 + $0x248] ss:$12 sps:$4 sm:$0xff]  }
   0xe   :  { %v38_v36 = vld [vmem:[%s20659_s0 + $0xc0] sm:$0xff]  ;;  %v14313_v46 = vld [vmem:[%s20658_s1 + $0xf0] ss:$12 sps:$4 sm:$0xff]   ;;  %v14330_v51 = vld [vmem:[%s20658_s1 + $0x188] ss:$12 sps:$4 sm:$0xff]  }
   0xf   :  { %6165 = vmatpush1.bf16.msra.mxu0 %v14283_v14  ;;  %12224 = vmatpush3.bf16.msra.mxu1 %v14284_v15  ;;  %v50_v37 = vld [vmem:[%s20659_s0 + $0x120] sm:$0xff]  ;;  %v14316_v52 = vld [vmem:[%s20658_s1 + $0x108] ss:$12 sps:$4 sm:$0xff]   ;;  %v14325_v5 = vld [vmem:[%s20658_s1 + $0x150] ss:$12 sps:$4 sm:$0xff]  }
  0x10   :  { %6166 = vmatprep.subr.bf16.mxu0 %v14285_v16  ;;  %12225 = vmatprep.subr.bf16.mxu1 %v14287_v17  ;;  %v15172_v41 = vcombine.high %v38_v36, %v50_v37  ;;  %v14310_v42 = vld [vmem:[%s20658_s1 + $0xd8] ss:$12 sps:$4 sm:$0xff]   ;;  %v14311_v43 = vld [vmem:[%s20658_s1 + $0xf4] ss:$12 sps:$4 sm:$0xff]   ;;  %v15191_v47 = vcombine.low %v38_v36, %v50_v37  ;;  %v14320_v60 = vld [vmem:[%s20658_s1 + $0x13c] ss:$12 sps:$4 sm:$0xff]  }
  0x11   :  { %8506 = vmatprep.mubr.bf16.mxu1 %v11130_v33  ;;  %6190 = vmatprep.mubr.bf16.mxu0 %v11130_v33  ;;  %v62_v44 = vld [vmem:[%s20659_s0 + $0x180] sm:$0xff]  ;;  %v14326_v6 = vld [vmem:[%s20658_s1 + $0x16c] ss:$12 sps:$4 sm:$0xff]   ;;  %v14353_v8 = vld [vmem:[%s20658_s1 + $0x290] ss:$12 sps:$4 sm:$0xff]  }
  0x12   :  { %v74_v45 = vld [vmem:[%s20659_s0 + $0x1e0] sm:$0xff]  ;;  %v14354_v9 = vld [vmem:[%s20658_s1 + $0x1d0] ss:$12 sps:$4 sm:$0xff]   ;;  %v14329_v10 = vld [vmem:[%s20658_s1 + $0x168] ss:$12 sps:$4 sm:$0xff]  }
  0x13   :  { %6167 = vmatpush1.bf16.msra.mxu0 %v14288_v18  ;;  %12226 = vmatpush3.bf16.msra.mxu1 %v14289_v19  ;;  %v15199_v50 = vcombine.high %v62_v44, %v74_v45  ;;  %v14317_v53 = vld [vmem:[%s20658_s1 + $0x124] ss:$12 sps:$4 sm:$0xff]   ;;  %v14337_v56 = vld [vmem:[%s20658_s1 + $0x260] ss:$12 sps:$4 sm:$0xff]   ;;  %v15224_v58 = vcombine.low %v62_v44, %v74_v45  ;;  %v14361_v16 = vld [vmem:[%s20658_s1 + $0x2a8] ss:$12 sps:$4 sm:$0xff]  }
  0x14   :  { %6168 = vmatprep.subr.bf16.mxu0 %v14290_v20  ;;  %12227 = vmatprep.subr.bf16.mxu1 %v14292_v21  ;;  %v86_v54 = vld [vmem:[%s20659_s0 + $0x240] sm:$0xff]  ;;  %v14362_v18 = vld [vmem:[%s20658_s1 + $0x1e8] ss:$12 sps:$4 sm:$0xff]   ;;  %v14379_v36 = vld [vmem:[%s20658_s1 + $0x2f0] ss:$12 sps:$4 sm:$0xff]  }
  0x15   :  { %v98_v55 = vld [vmem:[%s20659_s0 + $0x2a0] sm:$0xff]  ;;  %v14336_v19 = vld [vmem:[%s20658_s1 + $0x19c] ss:$12 sps:$4 sm:$0xff]  }
  0x16   :  { %v14338_v57 = vld [vmem:[%s20658_s1 + $0x1a0] ss:$12 sps:$4 sm:$0xff]   ;;  %v15232_v61 = vcombine.high %v86_v54, %v98_v55  ;;  %v14322_v62 = vld [vmem:[%s20658_s1 + $0x138] ss:$12 sps:$4 sm:$0xff]   ;;  %v15254_v4 = vcombine.low %v86_v54, %v98_v55  ;;  %v14342_v30 = vld [vmem:[%s20658_s1 + $0x1c8] ss:$12 sps:$4 sm:$0xff]  }
  0x17   :  { %6169 = vmatpush1.bf16.msra.mxu0 %v14293_v22  ;;  %12228 = vmatpush3.bf16.msra.mxu1 %v14294_v23  ;;  %v14319_v59 = vld [vmem:[%s20658_s1 + $0x120] ss:$12 sps:$4 sm:$0xff]   ;;  %v14345_v0 = vld [vmem:[%s20658_s1 + $0x278] ss:$12 sps:$4 sm:$0xff]   ;;  %v14380_v37 = vld [vmem:[%s20658_s1 + $0x230] ss:$12 sps:$4 sm:$0xff]  }
  0x18   :  { %6170 = vmatprep.subr.bf16.mxu0 %v14295_v24  ;;  %12229 = vmatprep.subr.bf16.mxu1 %v14297_v25  ;;  %v14323_v63 = vld [vmem:[%s20658_s1 + $0x154] ss:$12 sps:$4 sm:$0xff]   ;;  %v14346_v1 = vld [vmem:[%s20658_s1 + $0x1b8] ss:$12 sps:$4 sm:$0xff]  }
  0x19   :  { %v110_v2 = vld [vmem:[%s20659_s0 + $0x300] sm:$0xff] }
  0x1a   :  { %v122_v3 = vld [vmem:[%s20659_s0 + $0x360] sm:$0xff] }
  0x1b   :  { %6171 = vmatpush1.bf16.msra.mxu0 %v14298_v26  ;;  %12230 = vmatpush3.bf16.msra.mxu1 %v14299_v27  ;;  %v15262_v7 = vcombine.high %v110_v2, %v122_v3  ;;  %v14333_v11 = vld [vmem:[%s20658_s1 + $0x184] ss:$12 sps:$4 sm:$0xff]   ;;  %v14331_v14 = vld [vmem:[%s20658_s1 + $0x180] ss:$12 sps:$4 sm:$0xff]   ;;  %v15287_v15 = vcombine.low %v110_v2, %v122_v3 }
  0x1c   :  { %6172 = vmatprep.subr.bf16.mxu0 %v14300_v28  ;;  %12231 = vmatprep.subr.bf16.mxu1 %v14302_v29  ;;  %v134_v12 = vld [vmem:[%s20659_s0 + $0x3c0] sm:$0xff]  ;;  %v14339_v28 = vld [vmem:[%s20658_s1 + $0x1b0] ss:$12 sps:$4 sm:$0xff]   ;;  %v14344_v29 = vld [vmem:[%s20658_s1 + $0x1cc] ss:$12 sps:$4 sm:$0xff]  }
  0x1d   :  { %v146_v13 = vld [vmem:[%s20659_s0 + $0x420] sm:$0xff] }
  0x1e   :  { %v15292_v17 = vcombine.high %v134_v12, %v146_v13  ;;  %v14334_v20 = vld [vmem:[%s20658_s1 + $0x198] ss:$12 sps:$4 sm:$0xff]   ;;  %v14341_v23 = vld [vmem:[%s20658_s1 + $0x1b4] ss:$12 sps:$4 sm:$0xff]   ;;  %v15322_v26 = vcombine.low %v134_v12, %v146_v13 }
  0x1f   :  { %6173 = vmatpush1.bf16.msra.mxu0 %v14303_v32  ;;  %12232 = vmatpush3.bf16.msra.mxu1 %v14304_v34  ;;  %v158_v21 = vld [vmem:[%s20659_s0 + $0x480] sm:$0xff] }
  0x20   :  { %6174 = vmatprep.subr.bf16.mxu0 %v14305_v35  ;;  %12329 = vmatprep.subr.bf16.mxu1 %v14328_v49  ;;  %v170_v22 = vld [vmem:[%s20659_s0 + $0x4e0] sm:$0xff]  ;;  %v14355_v49 = vld [vmem:[%s20658_s1 + $0x210] ss:$12 sps:$4 sm:$0xff]  }
  0x21   :  { %v14369_v24 = vld [vmem:[%s20658_s1 + $0x2c0] ss:$12 sps:$4 sm:$0xff]   ;;  %v15324_v27 = vcombine.high %v158_v21, %v170_v22  ;;  %v14349_v33 = vld [vmem:[%s20658_s1 + $0x1e4] ss:$12 sps:$4 sm:$0xff]  }
  0x22   :  { %8507 = vmatmul.mubr.bf16.vlgmr.msra.gmra.mrb[0].mxu1 %v15164_v38  ;;  %v14370_v25 = vld [vmem:[%s20658_s1 + $0x200] ss:$12 sps:$4 sm:$0xff]   ;;  %v14377_v34 = vld [vmem:[%s20658_s1 + $0x2d8] ss:$12 sps:$4 sm:$0xff]  }
  0x23   :  { %6175 = vmatpush1.bf16.msra.mxu0 %v14307_v39  ;;  %8514 = vmatprep.mubr.bf16.mxu1 %v15172_v41  ;;  %v182_v31 = vld [vmem:[%s20659_s0 + $0x540] sm:$0xff] }
  0x24   :  { %6176 = vmatprep.subr.bf16.mxu0 %v14308_v40  ;;  %12330 = vmatpush3.bf16.msra.mxu1 %v14330_v51  ;;  %v194_v32 = vld [vmem:[%s20659_s0 + $0x5a0] sm:$0xff] }
  0x25   :  { %12331 = vmatprep.subr.bf16.mxu1 %v14337_v56  ;;  %v14378_v35 = vld [vmem:[%s20658_s1 + $0x218] ss:$12 sps:$4 sm:$0xff]   ;;  %v15362_v39 = vcombine.high %v182_v31, %v194_v32  ;;  %v14347_v40 = vld [vmem:[%s20658_s1 + $0x1e0] ss:$12 sps:$4 sm:$0xff]  }
  0x26   :  { %v218_v44 = vld [vmem:[%s20659_s0 + $0x660] sm:$0xff] }
  0x27   :  { %6177 = vmatpush1.bf16.msra.mxu0 %v14310_v42  ;;  %v206_v42 = vld [vmem:[%s20659_s0 + $0x600] sm:$0xff] }
  0x28   :  { %6178 = vmatprep.subr.bf16.mxu0 %v14311_v43  ;;  %12332 = vmatpush3.bf16.msra.mxu1 %v14338_v57  ;;  %v14350_v43 = vld [vmem:[%s20658_s1 + $0x1f8] ss:$12 sps:$4 sm:$0xff]   ;;  %v14357_v45 = vld [vmem:[%s20658_s1 + $0x214] ss:$12 sps:$4 sm:$0xff]   ;;  %v15415_v55 = vcombine.low %v206_v42, %v218_v44 }
  0x29   :  { %12333 = vmatprep.subr.bf16.mxu1 %v14345_v0  ;;  %v230_v51 = vld [vmem:[%s20659_s0 + $0x6c0] sm:$0xff]  ;;  %v14371_v0 = vld [vmem:[%s20658_s1 + $0x270] ss:$12 sps:$4 sm:$0xff]  }
  0x2a   :  { %8515 = vmatmul.mubr.bf16.gmra.mrb[4].mxu1 %v15191_v47  ;;  %v14365_v54 = vld [vmem:[%s20658_s1 + $0x244] ss:$12 sps:$4 sm:$0xff]   ;;  %v14363_v57 = vld [vmem:[%s20658_s1 + $0x240] ss:$12 sps:$4 sm:$0xff]  }
  0x2b   :  { %6179 = vmatpush1.bf16.msra.mxu0 %v14313_v46  ;;  %8522 = vmatprep.mubr.bf16.mxu1 %v15199_v50  ;;  %v15386_v46 = vcombine.low %v182_v31, %v194_v32  ;;  %v278_v3 = vld [vmem:[%s20659_s0 + $0x840] sm:$0xff] }
  0x2c   :  { %6180 = vmatprep.subr.bf16.mxu0 %v14314_v48  ;;  %12334 = vmatpush3.bf16.msra.mxu1 %v14346_v1  ;;  %v15391_v48 = vcombine.high %v206_v42, %v218_v44  ;;  %v14376_v1 = vld [vmem:[%s20658_s1 + $0x28c] ss:$12 sps:$4 sm:$0xff]   ;;  %v314_v12 = vld [vmem:[%s20659_s0 + $0x960] sm:$0xff] }
  0x2d   :  { %12335 = vmatprep.subr.bf16.mxu1 %v14353_v8  ;;  %v14384_v13 = vld [vmem:[%s20658_s1 + $0x2b8] ss:$12 sps:$4 sm:$0xff]   ;;  %v75_v44 = vld [vmem:[%s20659_s0 + $0x1e8] sm:$0xff] }
  0x2f   :  { %6181 = vmatpush1.bf16.msra.mxu0 %v14316_v52  ;;  %v242_v52 = vld [vmem:[%s20659_s0 + $0x720] sm:$0xff] }
  0x30   :  { %6182 = vmatprep.subr.bf16.mxu0 %v14317_v53  ;;  %12336 = vmatpush3.bf16.msra.mxu1 %v14354_v9  ;;  %v14358_v53 = vld [vmem:[%s20658_s1 + $0x228] ss:$12 sps:$4 sm:$0xff]   ;;  %v15417_v56 = vcombine.high %v230_v51, %v242_v52 }
  0x31   :  { %12337 = vmatprep.subr.bf16.mxu1 %v14361_v16  ;;  %v14386_v9 = vld [vmem:[%s20658_s1 + $0x2bc] ss:$12 sps:$4 sm:$0xff]  }
  0x32   :  { %8523 = vmatmul.mubr.bf16.gmra.mrb[8].mxu1 %v15224_v58 }
  0x33   :  { %6183 = vmatpush1.bf16.msra.mxu0 %v14319_v59  ;;  %8530 = vmatprep.mubr.bf16.mxu1 %v15232_v61  ;;  %v254_v59 = vld [vmem:[%s20659_s0 + $0x780] sm:$0xff] }
  0x34   :  { %6184 = vmatprep.subr.bf16.mxu0 %v14320_v60  ;;  %12338 = vmatpush3.bf16.msra.mxu1 %v14362_v18  ;;  %v14366_v60 = vld [vmem:[%s20658_s1 + $0x258] ss:$12 sps:$4 sm:$0xff]  }
  0x35   :  { %12339 = vmatprep.subr.bf16.mxu1 %v14369_v24 }
  0x37   :  { %6185 = vmatpush1.bf16.msra.mxu0 %v14322_v62  ;;  %v14373_v62 = vld [vmem:[%s20658_s1 + $0x274] ss:$12 sps:$4 sm:$0xff]  }
  0x38   :  { %6186 = vmatprep.subr.bf16.mxu0 %v14323_v63  ;;  %12340 = vmatpush3.bf16.msra.mxu1 %v14370_v25  ;;  %v11345_v63 = vcombine.low %v230_v51, %v242_v52  ;;  %v350_v25 = vld [vmem:[%s20659_s0 + $0xa80] sm:$0xff]  ;;  %v87_v51 = vld [vmem:[%s20659_s0 + $0x248] sm:$0xff] }
  0x39   :  { %12341 = vmatprep.subr.bf16.mxu1 %v14377_v34  ;;  %v27_v34 = vld [vmem:[%s20659_s0 + $0x68] sm:$0xff] }
  0x3a   :  { %8531 = vmatmul.mubr.bf16.gmra.mrb[12].mxu1 %v15254_v4  ;;  %v99_v52 = vld [vmem:[%s20659_s0 + $0x2a8] sm:$0xff] }
  0x3b   :  { %6187 = vmatpush1.bf16.msra.mxu0 %v14325_v5  ;;  %8538 = vmatprep.mubr.bf16.mxu1 %v15262_v7  ;;  %v14374_v5 = vld [vmem:[%s20658_s1 + $0x288] ss:$12 sps:$4 sm:$0xff]  }
  0x3c   :  { %6188 = vmatprep.subr.bf16.mxu0 %v14326_v6  ;;  %12342 = vmatpush3.bf16.msra.mxu1 %v14378_v35  ;;  %v14383_v6 = vld [vmem:[%s20658_s1 + $0x2a4] ss:$12 sps:$4 sm:$0xff]  }
  0x3d   :  { %12343 = vmatprep.subr.bf16.mxu1 %v14379_v36 }
  0x3f   :  { %6189 = vmatpush1.bf16.msra.mxu0 %v14329_v10 }
  0x40   :  { %6351 = vmatprep.subr.bf16.mxu0 %v14333_v11  ;;  %12344 = vmatpush3.bf16.msra.mxu1 %v14380_v37  ;;  %v302_v11 = vld [vmem:[%s20659_s0 + $0x900] sm:$0xff]  ;;  %v39_v37 = vld [vmem:[%s20659_s0 + $0xc8] sm:$0xff] }
  0x41   :  { %v11418_v18 = vcombine.high %v302_v11, %v314_v12 }
  0x42   :  { %6191 = vmatmul.mubr.bf16.vlgmr.msra.gmra.mrb[0].mxu0 %v15164_v38  ;;  %8539 = vmatmul.mubr.bf16.gmra.mrb[16].mxu1 %v15287_v15  ;;  %v15360_v38 = vcombine.low %v158_v21, %v170_v22  ;;  %v14390_v21 = vld [vmem:[%s20658_s1 + $0x2e8] ss:$12 sps:$4 sm:$0xff]   ;;  %v14397_v22 = vld [vmem:[%s20658_s1 + $0x304] ss:$12 sps:$4 sm:$0xff]  }
  0x43   :  { %6352 = vmatpush1.bf16.msra.mxu0 %v14331_v14  ;;  %6200 = vmatprep.mubr.bf16.mxu0 %v15172_v41  ;;  %v14352_v41 = vld [vmem:[%s20658_s1 + $0x1fc] ss:$12 sps:$4 sm:$0xff]   ;;  %v14389_v14 = vld [vmem:[%s20658_s1 + $0x2d4] ss:$12 sps:$4 sm:$0xff]  }
  0x44   :  { %8546 = vmatprep.mubr.bf16.mxu1 %v15292_v17  ;;  %6353 = vmatprep.subr.bf16.mxu0 %v14336_v19  ;;  %v326_v19 = vld [vmem:[%s20659_s0 + $0x9c0] sm:$0xff] }
  0x47   :  { %6354 = vmatpush1.bf16.msra.mxu0 %v14334_v20  ;;  %v338_v20 = vld [vmem:[%s20659_s0 + $0xa20] sm:$0xff] }
  0x48   :  { %6355 = vmatprep.subr.bf16.mxu0 %v14341_v23  ;;  %v11417_v23 = vcombine.low %v302_v11, %v314_v12  ;;  %v11442_v24 = vcombine.high %v326_v19, %v338_v20  ;;  %v14398_v11 = vld [vmem:[%s20658_s1 + $0x318] ss:$12 sps:$4 sm:$0xff]   ;;  %v159_v12 = vld [vmem:[%s20659_s0 + $0x488] sm:$0xff] }
  0x4a   :  { %6201 = vmatmul.mubr.bf16.gmra.mrb[4].mxu0 %v15191_v47  ;;  %8547 = vmatmul.mubr.bf16.gmra.mrb[20].mxu1 %v15322_v26  ;;  %v14393_v47 = vld [vmem:[%s20658_s1 + $0x3c8] ss:$12 sps:$4 sm:$0xff]  }
  0x4b   :  { %6210 = vmatprep.mubr.bf16.mxu0 %v15199_v50  ;;  %8554 = vmatprep.mubr.bf16.mxu1 %v15324_v27  ;;  %v14360_v50 = vld [vmem:[%s20658_s1 + $0x22c] ss:$12 sps:$4 sm:$0xff]  }
  0x4c   :  { %6356 = vmatpush1.bf16.msra.mxu0 %v14339_v28  ;;  %12441 = vmatprep.subr.bf16.mxu1 %v14393_v47  ;;  %v14410_v47 = vld [vmem:[%s20658_s1 + $0x338] ss:$12 sps:$4 sm:$0xff]  }
  0x4d   :  { %6357 = vmatprep.subr.bf16.mxu0 %v14344_v29  ;;  %v374_v29 = vld [vmem:[%s20659_s0 + $0xb40] sm:$0xff] }
  0x50   :  { %6358 = vmatpush1.bf16.msra.mxu0 %v14342_v30  ;;  %v386_v30 = vld [vmem:[%s20659_s0 + $0xba0] sm:$0xff] }
  0x51   :  { %6359 = vmatprep.subr.bf16.mxu0 %v14349_v33  ;;  %v11490_v32 = vcombine.high %v374_v29, %v386_v30  ;;  %v15_v33 = vld [vmem:[%s20659_s0 + $0x8] sm:$0xff]  ;;  %v11489_v35 = vcombine.low %v374_v29, %v386_v30  ;;  %v14414_v29 = vld [vmem:[%s20658_s1 + $0x378] ss:$12 sps:$4 sm:$0xff]   ;;  %v14421_v30 = vld [vmem:[%s20658_s1 + $0x394] ss:$12 sps:$4 sm:$0xff]  }
  0x52   :  { %6211 = vmatmul.mubr.bf16.gmra.mrb[8].mxu0 %v15224_v58  ;;  %8555 = vmatmul.mubr.bf16.gmra.mrb[24].mxu1 %v15360_v38  ;;  %v14368_v58 = vld [vmem:[%s20658_s1 + $0x25c] ss:$12 sps:$4 sm:$0xff]   ;;  %v11132_v36 = vcombine.high %v15_v33, %v27_v34 }
  0x53   :  { %6220 = vmatprep.mubr.bf16.mxu0 %v15232_v61  ;;  %8562 = vmatprep.mubr.bf16.mxu1 %v15362_v39  ;;  %v266_v61 = vld [vmem:[%s20659_s0 + $0x7e0] sm:$0xff] }
  0x54   :  { %6360 = vmatpush1.bf16.msra.mxu0 %v14347_v40  ;;  %v11370_v2 = vcombine.high %v254_v59, %v266_v61  ;;  %v11369_v8 = vcombine.low %v254_v59, %v266_v61  ;;  %v15530_v40 = vcombine.low %v15_v33, %v27_v34  ;;  %v111_v59 = vld [vmem:[%s20659_s0 + $0x308] sm:$0xff] }
  0x55   :  { %6361 = vmatprep.subr.bf16.mxu0 %v14352_v41  ;;  %v14401_v41 = vld [vmem:[%s20658_s1 + $0x3e0] ss:$12 sps:$4 sm:$0xff]  }
  0x56   :  { %v14434_v61 = vld [vmem:[%s20658_s1 + $0x380] ss:$12 sps:$4 sm:$0xff]  }
  0x57   :  { %v14424_v33 = vld [vmem:[%s20658_s1 + $0x3ac] ss:$12 sps:$4 sm:$0xff]  }
  0x58   :  { %6362 = vmatpush1.bf16.msra.mxu0 %v14350_v43  ;;  %v63_v43 = vld [vmem:[%s20659_s0 + $0x188] sm:$0xff] }
  0x59   :  { %6363 = vmatprep.subr.bf16.mxu0 %v14357_v45  ;;  %v14402_v45 = vld [vmem:[%s20658_s1 + $0x320] ss:$12 sps:$4 sm:$0xff]  }
  0x5a   :  { %6221 = vmatmul.mubr.bf16.gmra.mrb[12].mxu0 %v15254_v4  ;;  %8563 = vmatmul.mubr.bf16.gmra.mrb[28].mxu1 %v15386_v46  ;;  %v290_v4 = vld [vmem:[%s20659_s0 + $0x8a0] sm:$0xff] }
  0x5b   :  { %6230 = vmatprep.mubr.bf16.mxu0 %v15262_v7  ;;  %8570 = vmatprep.mubr.bf16.mxu1 %v15391_v48  ;;  %v14381_v7 = vld [vmem:[%s20658_s1 + $0x2a0] ss:$12 sps:$4 sm:$0xff]   ;;  %v11394_v10 = vcombine.high %v278_v3, %v290_v4  ;;  %v11393_v16 = vcombine.low %v278_v3, %v290_v4 }
  0x5c   :  { %6364 = vmatpush1.bf16.msra.mxu0 %v14355_v49  ;;  %v14417_v49 = vld [vmem:[%s20658_s1 + $0x410] ss:$12 sps:$4 sm:$0xff]   ;;  %v135_v3 = vld [vmem:[%s20659_s0 + $0x3c8] sm:$0xff] }
  0x5d   :  { %6365 = vmatprep.subr.bf16.mxu0 %v14360_v50  ;;  %v15559_v50 = vcombine.high %v63_v43, %v75_v44  ;;  %v147_v4 = vld [vmem:[%s20659_s0 + $0x428] sm:$0xff] }
  0x60   :  { %6366 = vmatpush1.bf16.msra.mxu0 %v14358_v53  ;;  %v14418_v53 = vld [vmem:[%s20658_s1 + $0x350] ss:$12 sps:$4 sm:$0xff]  }
  0x61   :  { %6367 = vmatprep.subr.bf16.mxu0 %v14365_v54  ;;  %v14425_v54 = vld [vmem:[%s20658_s1 + $0x428] ss:$12 sps:$4 sm:$0xff]  }
  0x62   :  { %6231 = vmatmul.mubr.bf16.gmra.mrb[16].mxu0 %v15287_v15  ;;  %8571 = vmatmul.mubr.bf16.gmra.mrb[32].mxu1 %v15415_v55  ;;  %v14387_v15 = vld [vmem:[%s20658_s1 + $0x2d0] ss:$12 sps:$4 sm:$0xff]  }
  0x63   :  { %6240 = vmatprep.mubr.bf16.mxu0 %v15292_v17  ;;  %8578 = vmatprep.mubr.bf16.mxu1 %v15417_v56  ;;  %v14392_v17 = vld [vmem:[%s20658_s1 + $0x2ec] ss:$12 sps:$4 sm:$0xff]  }
  0x64   :  { %6368 = vmatpush1.bf16.msra.mxu0 %v14363_v57  ;;  %v14433_v57 = vld [vmem:[%s20658_s1 + $0x440] ss:$12 sps:$4 sm:$0xff]  }
  0x65   :  { %6369 = vmatprep.subr.bf16.mxu0 %v14368_v58  ;;  %v15583_v58 = vcombine.high %v87_v51, %v99_v52 }
  0x68   :  { %6370 = vmatpush1.bf16.msra.mxu0 %v14366_v60  ;;  %v123_v60 = vld [vmem:[%s20659_s0 + $0x368] sm:$0xff] }
  0x69   :  { %6371 = vmatprep.subr.bf16.mxu0 %v14373_v62  ;;  %v14441_v62 = vld [vmem:[%s20658_s1 + $0x458] ss:$12 sps:$4 sm:$0xff]  }
  0x6a   :  { %6241 = vmatmul.mubr.bf16.gmra.mrb[20].mxu0 %v15322_v26  ;;  %8579 = vmatmul.mubr.bf16.gmra.mrb[36].mxu1 %v11345_v63  ;;  %v362_v26 = vld [vmem:[%s20659_s0 + $0xae0] sm:$0xff] }
  0x6b   :  { %6250 = vmatprep.mubr.bf16.mxu0 %v15324_v27  ;;  %8586 = vmatprep.mubr.bf16.mxu1 %v11370_v2  ;;  %v11441_v27 = vcombine.low %v326_v19, %v338_v20  ;;  %v11466_v28 = vcombine.high %v350_v25, %v362_v26  ;;  %v11465_v31 = vcombine.low %v350_v25, %v362_v26  ;;  %v183_v19 = vld [vmem:[%s20659_s0 + $0x548] sm:$0xff] }
  0x6c   :  { %6372 = vmatpush1.bf16.msra.mxu0 %v14371_v0  ;;  %v15602_v0 = vcombine.low %v87_v51, %v99_v52  ;;  %v195_v20 = vld [vmem:[%s20659_s0 + $0x5a8] sm:$0xff] }
  0x6d   :  { %6373 = vmatprep.subr.bf16.mxu0 %v14376_v1  ;;  %v14443_v1 = vld [vmem:[%s20658_s1 + $0x470] ss:$12 sps:$4 sm:$0xff]   ;;  %v15683_v26 = vcombine.high %v183_v19, %v195_v20  ;;  %v279_v51 = vld [vmem:[%s20659_s0 + $0x848] sm:$0xff] }
  0x6e   :  { %v14416_v25 = vld [vmem:[%s20658_s1 + $0x37c] ss:$12 sps:$4 sm:$0xff]  }
  0x6f   :  { %v291_v52 = vld [vmem:[%s20659_s0 + $0x8a8] sm:$0xff] }
  0x70   :  { %6374 = vmatpush1.bf16.msra.mxu0 %v14374_v5  ;;  %v14444_v5 = vld [vmem:[%s20658_s1 + $0x3b0] ss:$12 sps:$4 sm:$0xff]  }
  0x71   :  { %6375 = vmatprep.subr.bf16.mxu0 %v14383_v6  ;;  %v14457_v6 = vld [vmem:[%s20658_s1 + $0x548] ss:$12 sps:$4 sm:$0xff]  }
  0x72   :  { %6251 = vmatmul.mubr.bf16.gmra.mrb[24].mxu0 %v15360_v38  ;;  %8587 = vmatmul.mubr.bf16.gmra.mrb[40].mxu1 %v11369_v8  ;;  %v51_v38 = vld [vmem:[%s20659_s0 + $0x128] sm:$0xff] }
  0x73   :  { %6260 = vmatprep.mubr.bf16.mxu0 %v15362_v39  ;;  %8594 = vmatprep.mubr.bf16.mxu1 %v11394_v10  ;;  %v14394_v39 = vld [vmem:[%s20658_s1 + $0x308] ss:$12 sps:$4 sm:$0xff]   ;;  %v15535_v42 = vcombine.high %v39_v37, %v51_v38 }
  0x74   :  { %6376 = vmatpush1.bf16.msra.mxu0 %v14381_v7  ;;  %v14395_v7 = vld [vmem:[%s20658_s1 + $0x300] ss:$12 sps:$4 sm:$0xff]  }
  0x75   :  { %6377 = vmatprep.subr.bf16.mxu0 %v14386_v9  ;;  %v14400_v9 = vld [vmem:[%s20658_s1 + $0x31c] ss:$12 sps:$4 sm:$0xff]  }
  0x78   :  { %6378 = vmatpush1.bf16.msra.mxu0 %v14384_v13  ;;  %v171_v13 = vld [vmem:[%s20659_s0 + $0x4e8] sm:$0xff] }
  0x79   :  { %6379 = vmatprep.subr.bf16.mxu0 %v14389_v14  ;;  %v14405_v14 = vld [vmem:[%s20658_s1 + $0x334] ss:$12 sps:$4 sm:$0xff]  }
  0x7a   :  { %6261 = vmatmul.mubr.bf16.gmra.mrb[28].mxu0 %v15386_v46  ;;  %8595 = vmatmul.mubr.bf16.gmra.mrb[44].mxu1 %v11393_v16  ;;  %v14409_v46 = vld [vmem:[%s20658_s1 + $0x3f8] ss:$12 sps:$4 sm:$0xff]  }
  0x7b   :  { %6270 = vmatprep.mubr.bf16.mxu0 %v15391_v48  ;;  %8602 = vmatprep.mubr.bf16.mxu1 %v11418_v18  ;;  %v15554_v48 = vcombine.low %v39_v37, %v51_v38  ;;  %v14422_v37 = vld [vmem:[%s20658_s1 + $0x3a8] ss:$12 sps:$4 sm:$0xff]   ;;  %v14429_v38 = vld [vmem:[%s20658_s1 + $0x3c4] ss:$12 sps:$4 sm:$0xff]  }
  0x7c   :  { %6380 = vmatpush1.bf16.msra.mxu0 %v14387_v15  ;;  %v14403_v15 = vld [vmem:[%s20658_s1 + $0x330] ss:$12 sps:$4 sm:$0xff]  }
  0x7d   :  { %6381 = vmatprep.subr.bf16.mxu0 %v14392_v17  ;;  %v14408_v17 = vld [vmem:[%s20658_s1 + $0x34c] ss:$12 sps:$4 sm:$0xff]  }
  0x80   :  { %6382 = vmatpush1.bf16.msra.mxu0 %v14390_v21  ;;  %v14406_v21 = vld [vmem:[%s20658_s1 + $0x348] ss:$12 sps:$4 sm:$0xff]  }
  0x81   :  { %6544 = vmatprep.subr.bf16.mxu0 %v14397_v22  ;;  %v14413_v22 = vld [vmem:[%s20658_s1 + $0x364] ss:$12 sps:$4 sm:$0xff]  }
  0x82   :  { %6271 = vmatmul.mubr.bf16.gmra.mrb[32].mxu0 %v15415_v55  ;;  %8603 = vmatmul.mubr.bf16.gmra.mrb[48].mxu1 %v11417_v23  ;;  %v14426_v55 = vld [vmem:[%s20658_s1 + $0x368] ss:$12 sps:$4 sm:$0xff]  }
  0x83   :  { %6280 = vmatprep.mubr.bf16.mxu0 %v15417_v56  ;;  %8610 = vmatprep.mubr.bf16.mxu1 %v11442_v24  ;;  %v15578_v56 = vcombine.low %v63_v43, %v75_v44  ;;  %v255_v43 = vld [vmem:[%s20659_s0 + $0x788] sm:$0xff] }
  0x84   :  { %v267_v44 = vld [vmem:[%s20659_s0 + $0x7e8] sm:$0xff] }
  0x8a   :  { %6281 = vmatmul.mubr.bf16.gmra.mrb[36].mxu0 %v11345_v63  ;;  %8611 = vmatmul.mubr.bf16.gmra.mrb[52].mxu1 %v11441_v27  ;;  %v14442_v63 = vld [vmem:[%s20658_s1 + $0x398] ss:$12 sps:$4 sm:$0xff]  }
  0x8b   :  { %6290 = vmatprep.mubr.bf16.mxu0 %v11370_v2  ;;  %8618 = vmatprep.mubr.bf16.mxu1 %v11466_v28  ;;  %v15607_v2 = vcombine.high %v111_v59, %v123_v60 }
  0x92   :  { %6291 = vmatmul.mubr.bf16.gmra.mrb[40].mxu0 %v11369_v8  ;;  %8619 = vmatmul.mubr.bf16.gmra.mrb[56].mxu1 %v11465_v31  ;;  %v15626_v8 = vcombine.low %v111_v59, %v123_v60  ;;  %v14448_v59 = vld [vmem:[%s20658_s1 + $0x438] ss:$12 sps:$4 sm:$0xff]   ;;  %v303_v60 = vld [vmem:[%s20659_s0 + $0x908] sm:$0xff] }
  0x93   :  { %6300 = vmatprep.mubr.bf16.mxu0 %v11394_v10  ;;  %8626 = vmatprep.mubr.bf16.mxu1 %v11490_v32  ;;  %v15631_v10 = vcombine.high %v135_v3, %v147_v4 }
  0x9a   :  { %6301 = vmatmul.mubr.bf16.gmra.mrb[44].mxu0 %v11393_v16  ;;  %8627 = vmatmul.mubr.bf16.gmra.mrb[60].mxu1 %v11489_v35  ;;  %v15652_v16 = vcombine.low %v135_v3, %v147_v4  ;;  %v14456_v3 = vld [vmem:[%s20658_s1 + $0x46c] ss:$12 sps:$4 sm:$0xff]  }
  0x9b   :  { %6310 = vmatprep.mubr.bf16.mxu0 %v11418_v18  ;;  %8667 = vmatprep.mubr.bf16.mxu1 %v11132_v36  ;;  %v15657_v18 = vcombine.high %v159_v12, %v171_v13 }
  0xa2   :  { %6311 = vmatmul.mubr.bf16.gmra.mrb[48].mxu0 %v11417_v23  ;;  %8668 = vmatmul.mubr.bf16.vlgmr.msra.gmra.mrb[64].mxu1 %v15530_v40  ;;  %v14411_v23 = vld [vmem:[%s20658_s1 + $0x360] ss:$12 sps:$4 sm:$0xff]  }
  0xa3   :  { %6320 = vmatprep.mubr.bf16.mxu0 %v11442_v24  ;;  %8675 = vmatprep.mubr.bf16.mxu1 %v15535_v42  ;;  %v15678_v24 = vcombine.low %v159_v12, %v171_v13  ;;  %v14461_v12 = vld [vmem:[%s20658_s1 + $0x484] ss:$12 sps:$4 sm:$0xff]  }
  0xa4   :  { %12442 = vmatpush3.bf16.msra.mxu1 %v14394_v39  ;;  %v14427_v39 = vld [vmem:[%s20658_s1 + $0x3c0] ss:$12 sps:$4 sm:$0xff]  }
  0xa5   :  { %12443 = vmatprep.subr.bf16.mxu1 %v14401_v41  ;;  %v14432_v41 = vld [vmem:[%s20658_s1 + $0x3dc] ss:$12 sps:$4 sm:$0xff]  }
  0xa8   :  { %12444 = vmatpush3.bf16.msra.mxu1 %v14402_v45  ;;  %v14430_v45 = vld [vmem:[%s20658_s1 + $0x3d8] ss:$12 sps:$4 sm:$0xff]  }
  0xa9   :  { %12445 = vmatprep.subr.bf16.mxu1 %v14409_v46  ;;  %v14437_v46 = vld [vmem:[%s20658_s1 + $0x3f4] ss:$12 sps:$4 sm:$0xff]  }
  0xaa   :  { %6321 = vmatmul.mubr.bf16.gmra.mrb[52].mxu0 %v11441_v27  ;;  %8676 = vmatmul.mubr.bf16.gmra.mrb[68].mxu1 %v15554_v48  ;;  %v207_v27 = vld [vmem:[%s20659_s0 + $0x608] sm:$0xff] }
  0xab   :  { %6330 = vmatprep.mubr.bf16.mxu0 %v11466_v28  ;;  %8683 = vmatprep.mubr.bf16.mxu1 %v15559_v50  ;;  %v219_v28 = vld [vmem:[%s20659_s0 + $0x668] sm:$0xff] }
  0xac   :  { %12446 = vmatpush3.bf16.msra.mxu1 %v14410_v47  ;;  %v15709_v34 = vcombine.high %v207_v27, %v219_v28  ;;  %v14435_v47 = vld [vmem:[%s20658_s1 + $0x3f0] ss:$12 sps:$4 sm:$0xff]  }
  0xad   :  { %12447 = vmatprep.subr.bf16.mxu1 %v14417_v49  ;;  %v14440_v49 = vld [vmem:[%s20658_s1 + $0x40c] ss:$12 sps:$4 sm:$0xff]  }
  0xb0   :  { %12448 = vmatpush3.bf16.msra.mxu1 %v14418_v53  ;;  %v14438_v53 = vld [vmem:[%s20658_s1 + $0x408] ss:$12 sps:$4 sm:$0xff]  }
  0xb1   :  { %12449 = vmatprep.subr.bf16.mxu1 %v14425_v54  ;;  %v14447_v54 = vld [vmem:[%s20658_s1 + $0x424] ss:$12 sps:$4 sm:$0xff]  }
  0xb2   :  { %6331 = vmatmul.mubr.bf16.gmra.mrb[56].mxu0 %v11465_v31  ;;  %8684 = vmatmul.mubr.bf16.gmra.mrb[72].mxu1 %v15578_v56  ;;  %v14419_v31 = vld [vmem:[%s20658_s1 + $0x390] ss:$12 sps:$4 sm:$0xff]  }
  0xb3   :  { %6340 = vmatprep.mubr.bf16.mxu0 %v11490_v32  ;;  %8691 = vmatprep.mubr.bf16.mxu1 %v15583_v58  ;;  %v15704_v32 = vcombine.low %v183_v19, %v195_v20 }
  0xb4   :  { %12450 = vmatpush3.bf16.msra.mxu1 %v14426_v55  ;;  %v14445_v55 = vld [vmem:[%s20658_s1 + $0x420] ss:$12 sps:$4 sm:$0xff]  }
  0xb5   :  { %12451 = vmatprep.subr.bf16.mxu1 %v14433_v57  ;;  %v14450_v57 = vld [vmem:[%s20658_s1 + $0x43c] ss:$12 sps:$4 sm:$0xff]  }
  0xb8   :  { %12452 = vmatpush3.bf16.msra.mxu1 %v14434_v61  ;;  %v315_v61 = vld [vmem:[%s20659_s0 + $0x968] sm:$0xff] }
  0xb9   :  { %12453 = vmatprep.subr.bf16.mxu1 %v14441_v62  ;;  %v14453_v62 = vld [vmem:[%s20658_s1 + $0x454] ss:$12 sps:$4 sm:$0xff]   ;;  %v15813_v4 = vcombine.high %v303_v60, %v315_v61 }
  0xba   :  { %6341 = vmatmul.mubr.bf16.gmra.mrb[60].mxu0 %v11489_v35  ;;  %8692 = vmatmul.mubr.bf16.gmra.mrb[76].mxu1 %v15602_v0  ;;  %v231_v35 = vld [vmem:[%s20659_s0 + $0x6c8] sm:$0xff] }
  0xbb   :  { %6383 = vmatprep.mubr.bf16.mxu0 %v11132_v36  ;;  %8699 = vmatprep.mubr.bf16.mxu1 %v15607_v2  ;;  %v243_v36 = vld [vmem:[%s20659_s0 + $0x728] sm:$0xff] }
  0xbc   :  { %12454 = vmatpush3.bf16.msra.mxu1 %v14442_v63 }
  0xbd   :  { %12455 = vmatprep.subr.bf16.mxu1 %v14443_v1  ;;  %v15808_v1 = vcombine.low %v279_v51, %v291_v52 }
  0xc0   :  { %12456 = vmatpush3.bf16.msra.mxu1 %v14444_v5 }
  0xc1   :  { %12553 = vmatprep.subr.bf16.mxu1 %v14457_v6 }
  0xc2   :  { %6384 = vmatmul.mubr.bf16.vlgmr.msra.gmra.mrb[0].mxu0 %v15530_v40  ;;  %8700 = vmatmul.mubr.bf16.gmra.mrb[80].mxu1 %v15626_v8  ;;  %v15730_v40 = vcombine.low %v207_v27, %v219_v28 }
  0xc3   :  { %6545 = vmatpush1.bf16.msra.mxu0 %v14395_v7  ;;  %6393 = vmatprep.mubr.bf16.mxu0 %v15535_v42  ;;  %v15735_v42 = vcombine.high %v231_v35, %v243_v36 }
  0xc4   :  { %8707 = vmatprep.mubr.bf16.mxu1 %v15631_v10  ;;  %6546 = vmatprep.subr.bf16.mxu0 %v14400_v9  ;;  %v327_v9 = vld [vmem:[%s20659_s0 + $0x9c8] sm:$0xff] }
  0xc7   :  { %6547 = vmatpush1.bf16.msra.mxu0 %v14398_v11  ;;  %v14454_v11 = vld [vmem:[%s20658_s1 + $0x468] ss:$12 sps:$4 sm:$0xff]  }
  0xc8   :  { %6548 = vmatprep.subr.bf16.mxu0 %v14405_v14  ;;  %v15835_v14 = vcombine.low %v303_v60, %v315_v61 }
  0xca   :  { %6394 = vmatmul.mubr.bf16.gmra.mrb[4].mxu0 %v15554_v48  ;;  %8708 = vmatmul.mubr.bf16.gmra.mrb[84].mxu1 %v15652_v16  ;;  %v15756_v48 = vcombine.low %v231_v35, %v243_v36 }
  0xcb   :  { %6403 = vmatprep.mubr.bf16.mxu0 %v15559_v50  ;;  %8715 = vmatprep.mubr.bf16.mxu1 %v15657_v18  ;;  %v15761_v50 = vcombine.high %v255_v43, %v267_v44 }
  0xcc   :  { %6549 = vmatpush1.bf16.msra.mxu0 %v14403_v15 }
  0xcd   :  { %6550 = vmatprep.subr.bf16.mxu0 %v14408_v17 }
  0xd0   :  { %6551 = vmatpush1.bf16.msra.mxu0 %v14406_v21  ;;  %v351_v21 = vld [vmem:[%s20659_s0 + $0xa88] sm:$0xff] }
  0xd1   :  { %6552 = vmatprep.subr.bf16.mxu0 %v14413_v22  ;;  %v363_v22 = vld [vmem:[%s20659_s0 + $0xae8] sm:$0xff] }
  0xd2   :  { %6404 = vmatmul.mubr.bf16.gmra.mrb[8].mxu0 %v15578_v56  ;;  %8716 = vmatmul.mubr.bf16.gmra.mrb[88].mxu1 %v15678_v24  ;;  %v15782_v56 = vcombine.low %v255_v43, %v267_v44 }
  0xd3   :  { %6413 = vmatprep.mubr.bf16.mxu0 %v15583_v58  ;;  %8723 = vmatprep.mubr.bf16.mxu1 %v15683_v26  ;;  %v15787_v58 = vcombine.high %v279_v51, %v291_v52  ;;  %v40_v51 = vld [vmem:[%s20659_s0 + $0xd0] sm:$0xff] }
  0xd4   :  { %6553 = vmatpush1.bf16.msra.mxu0 %v14411_v23  ;;  %v52_v52 = vld [vmem:[%s20659_s0 + $0x130] sm:$0xff] }
  0xd5   :  { %6554 = vmatprep.subr.bf16.mxu0 %v14416_v25 }
  0xd8   :  { %6555 = vmatpush1.bf16.msra.mxu0 %v14414_v29 }
  0xd9   :  { %6556 = vmatprep.subr.bf16.mxu0 %v14421_v30 }
  0xda   :  { %6414 = vmatmul.mubr.bf16.gmra.mrb[12].mxu0 %v15602_v0  ;;  %8724 = vmatmul.mubr.bf16.gmra.mrb[92].mxu1 %v15704_v32  ;;  %v14451_v0 = vld [vmem:[%s20658_s1 + $0x450] ss:$12 sps:$4 sm:$0xff]  }
  0xdb   :  { %6423 = vmatprep.mubr.bf16.mxu0 %v15607_v2  ;;  %8731 = vmatprep.mubr.bf16.mxu1 %v15709_v34 }
  0xdc   :  { %6557 = vmatpush1.bf16.msra.mxu0 %v14419_v31  ;;  %v375_v31 = vld [vmem:[%s20659_s0 + $0xb48] sm:$0xff] }
  0xdd   :  { %6558 = vmatprep.subr.bf16.mxu0 %v14424_v33 }
  0xe0   :  { %6559 = vmatpush1.bf16.msra.mxu0 %v14422_v37 }
  0xe1   :  { %6560 = vmatprep.subr.bf16.mxu0 %v14429_v38 }
  0xe2   :  { %6424 = vmatmul.mubr.bf16.gmra.mrb[16].mxu0 %v15626_v8  ;;  %8732 = vmatmul.mubr.bf16.gmra.mrb[96].mxu1 %v15730_v40 }
  0xe3   :  { %6433 = vmatprep.mubr.bf16.mxu0 %v15631_v10  ;;  %8739 = vmatprep.mubr.bf16.mxu1 %v15735_v42  ;;  %v339_v10 = vld [vmem:[%s20659_s0 + $0xa28] sm:$0xff] }
  0xe4   :  { %6561 = vmatpush1.bf16.msra.mxu0 %v14427_v39 }
  0xe5   :  { %6562 = vmatprep.subr.bf16.mxu0 %v14432_v41  ;;  %v16_v41 = vld [vmem:[%s20659_s0 + $0x10] sm:$0xff] }
  0xe8   :  { %6563 = vmatpush1.bf16.msra.mxu0 %v14430_v45 }
  0xe9   :  { %6564 = vmatprep.subr.bf16.mxu0 %v14437_v46 }
  0xea   :  { %6434 = vmatmul.mubr.bf16.gmra.mrb[20].mxu0 %v15652_v16  ;;  %8740 = vmatmul.mubr.bf16.gmra.mrb[100].mxu1 %v15756_v48  ;;  %v15837_v16 = vcombine.high %v327_v9, %v339_v10 }
  0xeb   :  { %6443 = vmatprep.mubr.bf16.mxu0 %v15657_v18  ;;  %8747 = vmatprep.mubr.bf16.mxu1 %v15761_v50 }
  0xec   :  { %6565 = vmatpush1.bf16.msra.mxu0 %v14435_v47 }
  0xed   :  { %6566 = vmatprep.subr.bf16.mxu0 %v14440_v49 }
  0xf0   :  { %6567 = vmatpush1.bf16.msra.mxu0 %v14438_v53 }
  0xf1   :  { %6568 = vmatprep.subr.bf16.mxu0 %v14447_v54  ;;  %v14458_v54 = vld [vmem:[%s20658_s1 + $0x488] ss:$12 sps:$4 sm:$0xff]  }
  0xf2   :  { %6444 = vmatmul.mubr.bf16.gmra.mrb[24].mxu0 %v15678_v24  ;;  %8748 = vmatmul.mubr.bf16.gmra.mrb[104].mxu1 %v15782_v56  ;;  %v15853_v24 = vcombine.low %v327_v9, %v339_v10  ;;  %v14481_v9 = vld [vmem:[%s20658_s1 + $0x590] ss:$12 sps:$4 sm:$0xff]  }
  0xf3   :  { %6453 = vmatprep.mubr.bf16.mxu0 %v15683_v26  ;;  %8755 = vmatprep.mubr.bf16.mxu1 %v15787_v58  ;;  %v15855_v26 = vcombine.high %v351_v21, %v363_v22 }
  0xf4   :  { %6569 = vmatpush1.bf16.msra.mxu0 %v14445_v55 }
  0xf5   :  { %6570 = vmatprep.subr.bf16.mxu0 %v14450_v57  ;;  %v12233_v63 = vpop.f32.mrb[0].mxu1  ;;  %v14465_v57 = vld [vmem:[%s20658_s1 + $0x560] ss:$12 sps:$4 sm:$0xff]  }
  0xf6   :  { %v12234_v2 = vpop.f32.mrb[1].mxu1 }
  0xf7   :  { %v15815_v5 = vadd.f32 %v12234_v2, %v12233_v63  ;;  %v12236_v6 = vpop.f32.mrb[2].mxu1  ;;  %v64_v63 = vld [vmem:[%s20659_s0 + $0x190] sm:$0xff]  ;;  %v14473_v2 = vld [vmem:[%s20658_s1 + $0x578] ss:$12 sps:$4 sm:$0xff]  }
  0xf8   :  { %6571 = vmatpush1.bf16.msra.mxu0 %v14448_v59  ;;  %v12237_v7 = vpop.f32.mrb[3].mxu1 }
  0xf9   :  { %6572 = vmatprep.subr.bf16.mxu0 %v14453_v62  ;;  %v15818_v8 = vadd.f32 %v12237_v7, %v12236_v6  ;;  %v15940_v6 = vcombine.low %v40_v51, %v52_v52 }
  0xfa   :  { %6454 = vmatmul.mubr.bf16.gmra.mrb[28].mxu0 %v15704_v32  ;;  %8756 = vmatmul.mubr.bf16.gmra.mrb[108].mxu1 %v15808_v1  ;;  %v387_v32 = vld [vmem:[%s20659_s0 + $0xba8] sm:$0xff] }
  0xfb   :  { %6463 = vmatprep.mubr.bf16.mxu0 %v15709_v34  ;;  %8763 = vmatprep.mubr.bf16.mxu1 %v15813_v4  ;;  %v15871_v34 = vcombine.low %v351_v21, %v363_v22  ;;  %v15873_v36 = vcombine.high %v375_v31, %v387_v32  ;;  %v15889_v44 = vcombine.low %v375_v31, %v387_v32  ;;  %v14490_v22 = vld [vmem:[%s20658_s1 + $0x4e8] ss:$12 sps:$4 sm:$0xff]  }
  0xfc   :  { %6573 = vmatpush1.bf16.msra.mxu0 %v14451_v0  ;;  %v76_v0 = vld [vmem:[%s20659_s0 + $0x1f0] sm:$0xff] }
  0xfd   :  { %6574 = vmatprep.subr.bf16.mxu0 %v14456_v3  ;;  %v12239_v13 = vpop.f32.mrb[4].mxu1  ;;  %v15945_v10 = vcombine.high %v64_v63, %v76_v0 }
  0xfe   :  { %v12240_v15 = vpop.f32.mrb[5].mxu1 }
  0xff   :  { %v15839_v17 = vadd.f32 %v12240_v15, %v12239_v13  ;;  %v12242_v18 = vpop.f32.mrb[6].mxu1  ;;  %v88_v15 = vld [vmem:[%s20659_s0 + $0x250] sm:$0xff] }
 0x100   :  { %6575 = vmatpush1.bf16.msra.mxu0 %v14454_v11  ;;  %v12243_v19 = vpop.f32.mrb[7].mxu1 }
 0x101   :  { %6737 = vmatprep.subr.bf16.mxu0 %v14461_v12  ;;  %v15842_v20 = vadd.f32 %v12243_v19, %v12242_v18  ;;  %v14482_v18 = vld [vmem:[%s20658_s1 + $0x4d0] ss:$12 sps:$4 sm:$0xff]   ;;  %v14489_v19 = vld [vmem:[%s20658_s1 + $0x5a8] ss:$12 sps:$4 sm:$0xff]  }
 0x102   :  { %6464 = vmatmul.mubr.bf16.gmra.mrb[32].mxu0 %v15730_v40  ;;  %8764 = vmatmul.mubr.bf16.gmra.mrb[112].mxu1 %v15835_v14 }
 0x103   :  { %6473 = vmatprep.mubr.bf16.mxu0 %v15735_v42  ;;  %8771 = vmatprep.mubr.bf16.mxu1 %v15837_v16  ;;  %v28_v42 = vld [vmem:[%s20659_s0 + $0x70] sm:$0xff] }
 0x104   :  { %v15891_v46 = vcombine.high %v16_v41, %v28_v42  ;;  %v15910_v55 = vcombine.low %v16_v41, %v28_v42 }
 0x105   :  { %v12245_v23 = vpop.f32.mrb[8].mxu1 }
 0x106   :  { %v12246_v25 = vpop.f32.mrb[9].mxu1 }
 0x107   :  { %v15857_v27 = vadd.f32 %v12246_v25, %v12245_v23  ;;  %v12248_v28 = vpop.f32.mrb[10].mxu1  ;;  %v15970_v23 = vcombine.low %v64_v63, %v76_v0  ;;  %v14497_v25 = vld [vmem:[%s20658_s1 + $0x5c0] ss:$12 sps:$4 sm:$0xff]  }
 0x108   :  { %v12249_v29 = vpop.f32.mrb[11].mxu1 }
 0x109   :  { %v15860_v30 = vadd.f32 %v12249_v29, %v12248_v28 }
 0x10a   :  { %6474 = vmatmul.mubr.bf16.gmra.mrb[36].mxu0 %v15756_v48  ;;  %8772 = vmatmul.mubr.bf16.gmra.mrb[116].mxu1 %v15853_v24 }
 0x10b   :  { %6483 = vmatprep.mubr.bf16.mxu0 %v15761_v50  ;;  %8779 = vmatprep.mubr.bf16.mxu1 %v15855_v26 }
 0x10d   :  { %v12251_v33 = vpop.f32.mrb[12].mxu1 }
 0x10e   :  { %v12252_v35 = vpop.f32.mrb[13].mxu1 }
 0x10f   :  { %v15875_v37 = vadd.f32 %v12252_v35, %v12251_v33  ;;  %v12254_v38 = vpop.f32.mrb[14].mxu1  ;;  %v112_v33 = vld [vmem:[%s20659_s0 + $0x310] sm:$0xff] }
 0x110   :  { %v12255_v39 = vpop.f32.mrb[15].mxu1  ;;  %v124_v35 = vld [vmem:[%s20659_s0 + $0x370] sm:$0xff] }
 0x111   :  { %v15878_v40 = vadd.f32 %v12255_v39, %v12254_v38  ;;  %v14505_v38 = vld [vmem:[%s20658_s1 + $0x5d8] ss:$12 sps:$4 sm:$0xff]  }
 0x112   :  { %6484 = vmatmul.mubr.bf16.gmra.mrb[40].mxu0 %v15782_v56  ;;  %8780 = vmatmul.mubr.bf16.gmra.mrb[120].mxu1 %v15871_v34  ;;  %v14506_v39 = vld [vmem:[%s20658_s1 + $0x518] ss:$12 sps:$4 sm:$0xff]  }
 0x113   :  { %6493 = vmatprep.mubr.bf16.mxu0 %v15787_v58  ;;  %8787 = vmatprep.mubr.bf16.mxu1 %v15873_v36  ;;  %v15915_v58 = vcombine.high %v40_v51, %v52_v52 }
 0x115   :  { %v12257_v43 = vpop.f32.mrb[16].mxu1 }
 0x116   :  { %v12258_v45 = vpop.f32.mrb[17].mxu1 }
 0x117   :  { %v15893_v47 = vadd.f32 %v12258_v45, %v12257_v43  ;;  %v12260_v48 = vpop.f32.mrb[18].mxu1  ;;  %v14507_v43 = vld [vmem:[%s20658_s1 + $0x5f0] ss:$12 sps:$4 sm:$0xff]   ;;  %v16005_v45 = vcombine.high %v112_v33, %v124_v35 }
 0x118   :  { %v12261_v49 = vpop.f32.mrb[19].mxu1 }
 0x119   :  { %v15896_v50 = vadd.f32 %v12261_v49, %v12260_v48 }
 0x11a   :  { %6494 = vmatmul.mubr.bf16.gmra.mrb[44].mxu0 %v15808_v1  ;;  %8788 = vmatmul.mubr.bf16.gmra.mrb[124].mxu1 %v15889_v44  ;;  %v14466_v1 = vld [vmem:[%s20658_s1 + $0x4a0] ss:$12 sps:$4 sm:$0xff]  }
 0x11b   :  { %6503 = vmatprep.mubr.bf16.mxu0 %v15813_v4  ;;  %8828 = vmatprep.mubr.bf16.mxu1 %v15891_v46  ;;  %v14474_v4 = vld [vmem:[%s20658_s1 + $0x4b8] ss:$12 sps:$4 sm:$0xff]  }
 0x11d   :  { %v12263_v53 = vpop.f32.mrb[20].mxu1 }
 0x11e   :  { %v12264_v56 = vpop.f32.mrb[21].mxu1 }
 0x11f   :  { %v15917_v59 = vadd.f32 %v12264_v56, %v12263_v53  ;;  %v12266_v60 = vpop.f32.mrb[22].mxu1  ;;  %v136_v53 = vld [vmem:[%s20659_s0 + $0x3d0] sm:$0xff]  ;;  %v14459_v56 = vld [vmem:[%s20658_s1 + $0x480] ss:$12 sps:$4 sm:$0xff]  }
 0x120   :  { %v12267_v61 = vpop.f32.mrb[23].mxu1 }
 0x121   :  { %v15920_v62 = vadd.f32 %v12267_v61, %v12266_v60  ;;  %v14464_v60 = vld [vmem:[%s20658_s1 + $0x49c] ss:$12 sps:$4 sm:$0xff]  }
 0x122   :  { %6504 = vmatmul.mubr.bf16.gmra.mrb[48].mxu0 %v15835_v14  ;;  %8829 = vmatmul.mubr.bf16.vlgmr.msra.gmra.mrb[128].mxu1 %v15910_v55 }
 0x123   :  { %6513 = vmatprep.mubr.bf16.mxu0 %v15837_v16  ;;  %8836 = vmatprep.mubr.bf16.mxu1 %v15915_v58  ;;  %v100_v16 = vld [vmem:[%s20659_s0 + $0x2b0] sm:$0xff] }
 0x124   :  { %12554 = vmatpush3.bf16.msra.mxu1 %v14458_v54  ;;  %v16000_v41 = vcombine.low %v88_v15, %v100_v16  ;;  %v148_v54 = vld [vmem:[%s20659_s0 + $0x430] sm:$0xff] }
 0x125   :  { %12555 = vmatprep.subr.bf16.mxu1 %v14465_v57  ;;  %v12269_v3 = vpop.f32.mrb[24].mxu1  ;;  %v16027_v57 = vcombine.low %v112_v33, %v124_v35  ;;  %v16032_v63 = vcombine.high %v136_v53, %v148_v54  ;;  %v14477_v33 = vld [vmem:[%s20658_s1 + $0x4e4] ss:$12 sps:$4 sm:$0xff]  }
 0x126   :  { %v12270_v7 = vpop.f32.mrb[25].mxu1 }
 0x127   :  { %v15947_v11 = vadd.f32 %v12270_v7, %v12269_v3  ;;  %v12272_v12 = vpop.f32.mrb[26].mxu1  ;;  %v14462_v3 = vld [vmem:[%s20658_s1 + $0x498] ss:$12 sps:$4 sm:$0xff]   ;;  %v14521_v7 = vld [vmem:[%s20658_s1 + $0x6c8] ss:$12 sps:$4 sm:$0xff]  }
 0x128   :  { %12556 = vmatpush3.bf16.msra.mxu1 %v14466_v1  ;;  %v12273_v13 = vpop.f32.mrb[27].mxu1 }
 0x129   :  { %12557 = vmatprep.subr.bf16.mxu1 %v14473_v2  ;;  %v15950_v14 = vadd.f32 %v12273_v13, %v12272_v12  ;;  %v14469_v12 = vld [vmem:[%s20658_s1 + $0x4b4] ss:$12 sps:$4 sm:$0xff]   ;;  %v14467_v13 = vld [vmem:[%s20658_s1 + $0x4b0] ss:$12 sps:$4 sm:$0xff]  }
 0x12a   :  { %6514 = vmatmul.mubr.bf16.gmra.mrb[52].mxu0 %v15853_v24  ;;  %8837 = vmatmul.mubr.bf16.gmra.mrb[132].mxu1 %v15940_v6 }
 0x12b   :  { %6523 = vmatprep.mubr.bf16.mxu0 %v15855_v26  ;;  %8844 = vmatprep.mubr.bf16.mxu1 %v15945_v10  ;;  %v15975_v26 = vcombine.high %v88_v15, %v100_v16  ;;  %v16060_v16 = vcombine.low %v136_v53, %v148_v54  ;;  %v208_v53 = vld [vmem:[%s20659_s0 + $0x610] sm:$0xff] }
 0x12c   :  { %12558 = vmatpush3.bf16.msra.mxu1 %v14474_v4  ;;  %v220_v54 = vld [vmem:[%s20659_s0 + $0x670] sm:$0xff] }
 0x12d   :  { %12559 = vmatprep.subr.bf16.mxu1 %v14481_v9  ;;  %v12275_v21 = vpop.f32.mrb[28].mxu1  ;;  %v160_v9 = vld [vmem:[%s20659_s0 + $0x490] sm:$0xff] }
 0x12e   :  { %v12276_v24 = vpop.f32.mrb[29].mxu1 }
 0x12f   :  { %v15977_v28 = vadd.f32 %v12276_v24, %v12275_v21  ;;  %v12278_v29 = vpop.f32.mrb[30].mxu1 }
 0x130   :  { %12560 = vmatpush3.bf16.msra.mxu1 %v14482_v18  ;;  %v12279_v31 = vpop.f32.mrb[31].mxu1 }
 0x131   :  { %12561 = vmatprep.subr.bf16.mxu1 %v14489_v19  ;;  %v15980_v32 = vadd.f32 %v12279_v31, %v12278_v29  ;;  %v184_v29 = vld [vmem:[%s20659_s0 + $0x550] sm:$0xff] }
 0x132   :  { %6524 = vmatmul.mubr.bf16.gmra.mrb[56].mxu0 %v15871_v34  ;;  %8845 = vmatmul.mubr.bf16.gmra.mrb[136].mxu1 %v15970_v23  ;;  %v14498_v34 = vld [vmem:[%s20658_s1 + $0x500] ss:$12 sps:$4 sm:$0xff]   ;;  %v196_v31 = vld [vmem:[%s20659_s0 + $0x5b0] sm:$0xff] }
 0x133   :  { %6533 = vmatprep.mubr.bf16.mxu0 %v15873_v36  ;;  %8852 = vmatprep.mubr.bf16.mxu1 %v15975_v26 }
 0x134   :  { %12562 = vmatpush3.bf16.msra.mxu1 %v14490_v22 }
 0x135   :  { %12563 = vmatprep.subr.bf16.mxu1 %v14497_v25  ;;  %v12281_v36 = vpop.f32.mrb[32].mxu1 }
 0x136   :  { %v12282_v42 = vpop.f32.mrb[33].mxu1 }
 0x137   :  { %v16007_v48 = vadd.f32 %v12282_v42, %v12281_v36  ;;  %v12284_v49 = vpop.f32.mrb[34].mxu1  ;;  %v14480_v36 = vld [vmem:[%s20658_s1 + $0x4fc] ss:$12 sps:$4 sm:$0xff]  }
 0x138   :  { %12564 = vmatpush3.bf16.msra.mxu1 %v14498_v34  ;;  %v12285_v51 = vpop.f32.mrb[35].mxu1  ;;  %v14475_v34 = vld [vmem:[%s20658_s1 + $0x4e0] ss:$12 sps:$4 sm:$0xff]  }
 0x139   :  { %12565 = vmatprep.subr.bf16.mxu1 %v14505_v38  ;;  %v16010_v52 = vadd.f32 %v12285_v51, %v12284_v49 }
 0x13a   :  { %6534 = vmatmul.mubr.bf16.gmra.mrb[60].mxu0 %v15889_v44  ;;  %8853 = vmatmul.mubr.bf16.gmra.mrb[140].mxu1 %v16000_v41  ;;  %v14508_v44 = vld [vmem:[%s20658_s1 + $0x530] ss:$12 sps:$4 sm:$0xff]  }
 0x13b   :  { %6576 = vmatprep.mubr.bf16.mxu0 %v15891_v46  ;;  %8860 = vmatprep.mubr.bf16.mxu1 %v16005_v45 }
 0x13c   :  { %12566 = vmatpush3.bf16.msra.mxu1 %v14506_v39  ;;  %v16095_v39 = vcombine.high %v184_v29, %v196_v31 }
 0x13d   :  { %12567 = vmatprep.subr.bf16.mxu1 %v14507_v43  ;;  %v12287_v46 = vpop.f32.mrb[36].mxu1 }
 0x13e   :  { %v12288_v61 = vpop.f32.mrb[37].mxu1 }
 0x13f   :  { %v16034_v0 = vadd.f32 %v12288_v61, %v12287_v46  ;;  %v12290_v1 = vpop.f32.mrb[38].mxu1  ;;  %v16120_v46 = vcombine.low %v184_v29, %v196_v31  ;;  %v14488_v61 = vld [vmem:[%s20658_s1 + $0x52c] ss:$12 sps:$4 sm:$0xff]  }
 0x140   :  { %12568 = vmatpush3.bf16.msra.mxu1 %v14508_v44  ;;  %v12291_v2 = vpop.f32.mrb[39].mxu1  ;;  %v14485_v44 = vld [vmem:[%s20658_s1 + $0x514] ss:$12 sps:$4 sm:$0xff]  }
 0x141   :  { %v16040_v4 = vadd.f32 %v12291_v2, %v12290_v1  ;;  %12665 = vmatprep.subr.bf16.mxu1 %v14521_v7  ;;  %v16125_v1 = vcombine.high %v208_v53, %v220_v54 }
 0x142   :  { %6577 = vmatmul.mubr.bf16.vlgmr.msra.gmra.mrb[0].mxu0 %v15910_v55  ;;  %8861 = vmatmul.mubr.bf16.gmra.mrb[144].mxu1 %v16027_v57  ;;  %v172_v55 = vld [vmem:[%s20659_s0 + $0x4f0] sm:$0xff] }
 0x143   :  { %6738 = vmatpush1.bf16.msra.mxu0 %v14459_v56  ;;  %6586 = vmatprep.mubr.bf16.mxu0 %v15915_v58  ;;  %v14472_v58 = vld [vmem:[%s20658_s1 + $0x4cc] ss:$12 sps:$4 sm:$0xff]   ;;  %v16065_v19 = vcombine.high %v160_v9, %v172_v55  ;;  %v16087_v35 = vcombine.low %v160_v9, %v172_v55  ;;  %v14483_v56 = vld [vmem:[%s20658_s1 + $0x510] ss:$12 sps:$4 sm:$0xff]  }
 0x144   :  { %8868 = vmatprep.mubr.bf16.mxu1 %v16032_v63  ;;  %6739 = vmatprep.subr.bf16.mxu0 %v14464_v60  ;;  %v232_v55 = vld [vmem:[%s20659_s0 + $0x6d0] sm:$0xff] }
 0x145   :  { %v12293_v15 = vpop.f32.mrb[40].mxu1 }
 0x146   :  { %v12294_v18 = vpop.f32.mrb[41].mxu1 }
 0x147   :  { %6740 = vmatpush1.bf16.msra.mxu0 %v14462_v3  ;;  %v16067_v21 = vadd.f32 %v12294_v18, %v12293_v15  ;;  %v12296_v22 = vpop.f32.mrb[42].mxu1  ;;  %v14491_v15 = vld [vmem:[%s20658_s1 + $0x540] ss:$12 sps:$4 sm:$0xff]  }
 0x148   :  { %6741 = vmatprep.subr.bf16.mxu0 %v14469_v12  ;;  %v12297_v24 = vpop.f32.mrb[43].mxu1  ;;  %v244_v12 = vld [vmem:[%s20659_s0 + $0x730] sm:$0xff] }
 0x149   :  { %v16070_v25 = vadd.f32 %v12297_v24, %v12296_v22  ;;  %v14496_v22 = vld [vmem:[%s20658_s1 + $0x55c] ss:$12 sps:$4 sm:$0xff]   ;;  %v16155_v24 = vcombine.high %v232_v55, %v244_v12 }
 0x14a   :  { %6587 = vmatmul.mubr.bf16.gmra.mrb[4].mxu0 %v15940_v6  ;;  %8869 = vmatmul.mubr.bf16.gmra.mrb[148].mxu1 %v16060_v16  ;;  %v14470_v6 = vld [vmem:[%s20658_s1 + $0x4c8] ss:$12 sps:$4 sm:$0xff]  }
 0x14b   :  { %6596 = vmatprep.mubr.bf16.mxu0 %v15945_v10  ;;  %8876 = vmatprep.mubr.bf16.mxu1 %v16065_v19 }
 0x14c   :  { %6742 = vmatpush1.bf16.msra.mxu0 %v14467_v13  ;;  %v14493_v13 = vld [vmem:[%s20658_s1 + $0x544] ss:$12 sps:$4 sm:$0xff]  }
 0x14d   :  { %6743 = vmatprep.subr.bf16.mxu0 %v14472_v58  ;;  %v12299_v10 = vpop.f32.mrb[44].mxu1  ;;  %v16150_v58 = vcombine.low %v208_v53, %v220_v54  ;;  %v14504_v53 = vld [vmem:[%s20658_s1 + $0x58c] ss:$12 sps:$4 sm:$0xff]  }
 0x14e   :  { %v12300_v38 = vpop.f32.mrb[45].mxu1 }
 0x14f   :  { %v16097_v42 = vadd.f32 %v12300_v38, %v12299_v10  ;;  %v12302_v43 = vpop.f32.mrb[46].mxu1  ;;  %v256_v10 = vld [vmem:[%s20659_s0 + $0x790] sm:$0xff] }
 0x150   :  { %6744 = vmatpush1.bf16.msra.mxu0 %v14470_v6  ;;  %v12303_v49 = vpop.f32.mrb[47].mxu1  ;;  %v14501_v38 = vld [vmem:[%s20658_s1 + $0x574] ss:$12 sps:$4 sm:$0xff]  }
 0x151   :  { %6745 = vmatprep.subr.bf16.mxu0 %v14477_v33  ;;  %v16100_v51 = vadd.f32 %v12303_v49, %v12302_v43  ;;  %v16180_v43 = vcombine.low %v232_v55, %v244_v12 }
 0x152   :  { %6597 = vmatmul.mubr.bf16.gmra.mrb[8].mxu0 %v15970_v23  ;;  %8877 = vmatmul.mubr.bf16.gmra.mrb[152].mxu1 %v16087_v35  ;;  %v14478_v23 = vld [vmem:[%s20658_s1 + $0x4f8] ss:$12 sps:$4 sm:$0xff]  }
 0x153   :  { %6606 = vmatprep.mubr.bf16.mxu0 %v15975_v26  ;;  %8884 = vmatprep.mubr.bf16.mxu1 %v16095_v39 }
 0x154   :  { %6746 = vmatpush1.bf16.msra.mxu0 %v14475_v34  ;;  %v268_v34 = vld [vmem:[%s20659_s0 + $0x7f0] sm:$0xff] }
 0x155   :  { %6747 = vmatprep.subr.bf16.mxu0 %v14480_v36  ;;  %v12305_v26 = vpop.f32.mrb[48].mxu1  ;;  %v14499_v36 = vld [vmem:[%s20658_s1 + $0x570] ss:$12 sps:$4 sm:$0xff]   ;;  %v16207_v55 = vcombine.low %v256_v10, %v268_v34 }
 0x156   :  { %v12306_v60 = vpop.f32.mrb[49].mxu1 }
 0x157   :  { %v16127_v2 = vadd.f32 %v12306_v60, %v12305_v26  ;;  %v12308_v3 = vpop.f32.mrb[50].mxu1  ;;  %v14502_v60 = vld [vmem:[%s20658_s1 + $0x588] ss:$12 sps:$4 sm:$0xff]  }
 0x158   :  { %6748 = vmatpush1.bf16.msra.mxu0 %v14478_v23  ;;  %v12309_v7 = vpop.f32.mrb[51].mxu1 }
 0x159   :  { %6749 = vmatprep.subr.bf16.mxu0 %v14485_v44  ;;  %v16130_v9 = vadd.f32 %v12309_v7, %v12308_v3  ;;  %v16187_v44 = vcombine.high %v256_v10, %v268_v34 }
 0x15a   :  { %6607 = vmatmul.mubr.bf16.gmra.mrb[12].mxu0 %v16000_v41  ;;  %8885 = vmatmul.mubr.bf16.gmra.mrb[156].mxu1 %v16120_v46  ;;  %v14486_v41 = vld [vmem:[%s20658_s1 + $0x528] ss:$12 sps:$4 sm:$0xff]  }
 0x15b   :  { %6616 = vmatprep.mubr.bf16.mxu0 %v16005_v45  ;;  %8892 = vmatprep.mubr.bf16.mxu1 %v16125_v1 }
 0x15c   :  { %6750 = vmatpush1.bf16.msra.mxu0 %v14483_v56 }
 0x15d   :  { %6751 = vmatprep.subr.bf16.mxu0 %v14488_v61  ;;  %v12311_v45 = vpop.f32.mrb[52].mxu1  ;;  %v280_v61 = vld [vmem:[%s20659_s0 + $0x850] sm:$0xff] }
 0x15e   :  { %v12312_v18 = vpop.f32.mrb[53].mxu1 }
 0x15f   :  { %v16157_v29 = vadd.f32 %v12312_v18, %v12311_v45  ;;  %v12314_v31 = vpop.f32.mrb[54].mxu1  ;;  %v14509_v45 = vld [vmem:[%s20658_s1 + $0x5a0] ss:$12 sps:$4 sm:$0xff]   ;;  %v14514_v18 = vld [vmem:[%s20658_s1 + $0x5bc] ss:$12 sps:$4 sm:$0xff]  }
 0x160   :  { %6752 = vmatpush1.bf16.msra.mxu0 %v14486_v41  ;;  %v12315_v6 = vpop.f32.mrb[55].mxu1 }
 0x161   :  { %6753 = vmatprep.subr.bf16.mxu0 %v14493_v13  ;;  %v16160_v33 = vadd.f32 %v12315_v6, %v12314_v31  ;;  %v14512_v31 = vld [vmem:[%s20658_s1 + $0x5b8] ss:$12 sps:$4 sm:$0xff]   ;;  %v304_v6 = vld [vmem:[%s20659_s0 + $0x910] sm:$0xff] }
 0x162   :  { %6617 = vmatmul.mubr.bf16.gmra.mrb[16].mxu0 %v16027_v57  ;;  %8893 = vmatmul.mubr.bf16.gmra.mrb[160].mxu1 %v16150_v58  ;;  %v14494_v57 = vld [vmem:[%s20658_s1 + $0x558] ss:$12 sps:$4 sm:$0xff]  }
 0x163   :  { %6626 = vmatprep.mubr.bf16.mxu0 %v16032_v63  ;;  %8900 = vmatprep.mubr.bf16.mxu1 %v16155_v24 }
 0x164   :  { %6754 = vmatpush1.bf16.msra.mxu0 %v14491_v15 }
 0x165   :  { %6755 = vmatprep.subr.bf16.mxu0 %v14496_v22  ;;  %v12317_v63 = vpop.f32.mrb[56].mxu1 }
 0x166   :  { %v12318_v49 = vpop.f32.mrb[57].mxu1 }
 0x167   :  { %v16185_v54 = vadd.f32 %v12318_v49, %v12317_v63  ;;  %v12320_v23 = vpop.f32.mrb[58].mxu1  ;;  %v14515_v49 = vld [vmem:[%s20658_s1 + $0x5d0] ss:$12 sps:$4 sm:$0xff]  }
 0x168   :  { %6756 = vmatpush1.bf16.msra.mxu0 %v14494_v57  ;;  %v12321_v26 = vpop.f32.mrb[59].mxu1 }
 0x169   :  { %6757 = vmatprep.subr.bf16.mxu0 %v14501_v38  ;;  %v16190_v56 = vadd.f32 %v12321_v26, %v12320_v23  ;;  %v14520_v23 = vld [vmem:[%s20658_s1 + $0x5ec] ss:$12 sps:$4 sm:$0xff]  }
 0x16a   :  { %6627 = vmatmul.mubr.bf16.gmra.mrb[20].mxu0 %v16060_v16  ;;  %8901 = vmatmul.mubr.bf16.gmra.mrb[164].mxu1 %v16180_v43  ;;  %v292_v16 = vld [vmem:[%s20659_s0 + $0x8b0] sm:$0xff] }
 0x16b   :  { %6636 = vmatprep.mubr.bf16.mxu0 %v16065_v19  ;;  %8908 = vmatprep.mubr.bf16.mxu1 %v16187_v44  ;;  %v14511_v19 = vld [vmem:[%s20658_s1 + $0x5a4] ss:$12 sps:$4 sm:$0xff]   ;;  %v16211_v13 = vcombine.high %v280_v61, %v292_v16  ;;  %v16237_v57 = vcombine.low %v280_v61, %v292_v16  ;;  %v14518_v16 = vld [vmem:[%s20658_s1 + $0x5e8] ss:$12 sps:$4 sm:$0xff]  }
 0x16c   :  { %6758 = vmatpush1.bf16.msra.mxu0 %v14499_v36 }
 0x16d   :  { %6759 = vmatprep.subr.bf16.mxu0 %v14504_v53  ;;  %v12323_v3 = vpop.f32.mrb[60].mxu1 }
 0x16e   :  { %v12324_v7 = vpop.f32.mrb[61].mxu1 }
 0x16f   :  { %v16209_v12 = vadd.f32 %v12324_v7, %v12323_v3  ;;  %v12326_v41 = vpop.f32.mrb[62].mxu1 }
 0x170   :  { %6760 = vmatpush1.bf16.msra.mxu0 %v14502_v60  ;;  %v12327_v15 = vpop.f32.mrb[63].mxu1 }
 0x171   :  { %6761 = vmatprep.subr.bf16.mxu0 %v14511_v19  ;;  %v16220_v22 = vadd.f32 %v12327_v15, %v12326_v41 }
 0x172   :  { %6637 = vmatmul.mubr.bf16.gmra.mrb[24].mxu0 %v16087_v35  ;;  %8909 = vmatmul.mubr.bf16.gmra.mrb[168].mxu1 %v16207_v55  ;;  %v316_v35 = vld [vmem:[%s20659_s0 + $0x970] sm:$0xff] }
 0x173   :  { %6646 = vmatprep.mubr.bf16.mxu0 %v16095_v39  ;;  %8916 = vmatprep.mubr.bf16.mxu1 %v16211_v13  ;;  %v14517_v39 = vld [vmem:[%s20658_s1 + $0x5d4] ss:$12 sps:$4 sm:$0xff]   ;;  %v16239_v36 = vcombine.high %v304_v6, %v316_v35  ;;  %v16269_v3 = vcombine.low %v304_v6, %v316_v35 }
 0x174   :  { %6762 = vmatpush1.bf16.msra.mxu0 %v14509_v45  ;;  %v352_v35 = vld [vmem:[%s20659_s0 + $0xa90] sm:$0xff] }
 0x175   :  { %6763 = vmatprep.subr.bf16.mxu0 %v14514_v18  ;;  %v12345_v10 = vpop.f32.mrb[64].mxu1 }
 0x176   :  { %v12346_v34 = vpop.f32.mrb[65].mxu1 }
 0x177   :  { %v12347_v38 = vadd.f32 %v12346_v34, %v12345_v10  ;;  %v12348_v63 = vpop.f32.mrb[66].mxu1 }
 0x178   :  { %6764 = vmatpush1.bf16.msra.mxu0 %v14512_v31  ;;  %v12349_v53 = vpop.f32.mrb[67].mxu1 }
 0x179   :  { %6765 = vmatprep.subr.bf16.mxu0 %v14517_v39  ;;  %v16248_v26 = vadd.f32 %v12347_v38, %v15815_v5  ;;  %v12350_v60 = vadd.f32 %v12349_v53, %v12348_v63  ;;  %v328_v5 = vld [vmem:[%s20659_s0 + $0x9d0] sm:$0xff] }
 0x17a   :  { %6647 = vmatmul.mubr.bf16.gmra.mrb[28].mxu0 %v16120_v46  ;;  %8917 = vmatmul.mubr.bf16.gmra.mrb[172].mxu1 %v16237_v57  ;;  %v340_v46 = vld [vmem:[%s20659_s0 + $0xa30] sm:$0xff] }
 0x17b   :  { %6656 = vmatprep.mubr.bf16.mxu0 %v16125_v1  ;;  %v16254_v61 = vadd.f32 %v12350_v60, %v15818_v8  ;;  %8924 = vmatprep.mubr.bf16.mxu1 %v16239_v36  ;;  %v14525_v8 = vld [vmem:[%s20658_s1 + $0x604] ss:$12 sps:$4 sm:$0xff]   ;;  %v16271_v45 = vcombine.high %v328_v5, %v340_v46 }
 0x17c   :  { %6766 = vmatpush1.bf16.msra.mxu0 %v14515_v49 }
 0x17d   :  { %6767 = vmatprep.subr.bf16.mxu0 %v14520_v23  ;;  %v12351_v1 = vpop.f32.mrb[68].mxu1  ;;  %v376_v23 = vld [vmem:[%s20659_s0 + $0xb50] sm:$0xff] }
 0x17e   :  { %v12352_v19 = vpop.f32.mrb[69].mxu1 }
 0x17f   :  { %v12353_v7 = vadd.f32 %v12352_v19, %v12351_v1  ;;  %v12354_v41 = vpop.f32.mrb[70].mxu1 }
 0x180   :  { %6768 = vmatpush1.bf16.msra.mxu0 %v14518_v16  ;;  %v12355_v15 = vpop.f32.mrb[71].mxu1 }
 0x181   :  { %6930 = vmatprep.subr.bf16.mxu0 %v14525_v8  ;;  %v16274_v18 = vadd.f32 %v12353_v7, %v15839_v17  ;;  %v12356_v31 = vadd.f32 %v12355_v15, %v12354_v41  ;;  %v364_v17 = vld [vmem:[%s20659_s0 + $0xaf0] sm:$0xff]  ;;  %v17_v7 = vld [vmem:[%s20659_s0 + $0x18] sm:$0xff] }
 0x182   :  { %6657 = vmatmul.mubr.bf16.gmra.mrb[32].mxu0 %v16150_v58  ;;  %8925 = vmatmul.mubr.bf16.gmra.mrb[176].mxu1 %v16269_v3  ;;  %v16289_v58 = vcombine.low %v328_v5, %v340_v46 }
 0x183   :  { %6666 = vmatprep.mubr.bf16.mxu0 %v16155_v24  ;;  %v16280_v6 = vadd.f32 %v12356_v31, %v15842_v20  ;;  %8932 = vmatprep.mubr.bf16.mxu1 %v16271_v45  ;;  %v16291_v24 = vcombine.high %v352_v35, %v364_v17 }
 0x185   :  { %v12357_v39 = vpop.f32.mrb[72].mxu1 }
 0x186   :  { %v12358_v10 = vpop.f32.mrb[73].mxu1 }
 0x187   :  { %v12359_v34 = vadd.f32 %v12358_v10, %v12357_v39  ;;  %v12360_v38 = vpop.f32.mrb[74].mxu1 }
 0x188   :  { %v12361_v20 = vpop.f32.mrb[75].mxu1 }
 0x189   :  { %v16294_v63 = vadd.f32 %v12359_v34, %v15857_v27  ;;  %v12362_v49 = vadd.f32 %v12361_v20, %v12360_v38  ;;  %v388_v27 = vld [vmem:[%s20659_s0 + $0xbb0] sm:$0xff]  ;;  %v41_v34 = vld [vmem:[%s20659_s0 + $0xd8] sm:$0xff] }
 0x18a   :  { %6667 = vmatmul.mubr.bf16.gmra.mrb[36].mxu0 %v16180_v43  ;;  %8933 = vmatmul.mubr.bf16.gmra.mrb[180].mxu1 %v16289_v58  ;;  %v16309_v43 = vcombine.low %v352_v35, %v364_v17 }
 0x18b   :  { %6676 = vmatprep.mubr.bf16.mxu0 %v16187_v44  ;;  %v16300_v53 = vadd.f32 %v12362_v49, %v15860_v30  ;;  %8940 = vmatprep.mubr.bf16.mxu1 %v16291_v24  ;;  %v16311_v44 = vcombine.high %v376_v23, %v388_v27 }
 0x18d   :  { %v12363_v60 = vpop.f32.mrb[76].mxu1 }
 0x18e   :  { %v12364_v16 = vpop.f32.mrb[77].mxu1 }
 0x18f   :  { %v12365_v5 = vadd.f32 %v12364_v16, %v12363_v60  ;;  %v12366_v46 = vpop.f32.mrb[78].mxu1  ;;  %v14529_v60 = vld [vmem:[%s20658_s1 + $0x6e0] ss:$12 sps:$4 sm:$0xff]  }
 0x190   :  { %v12367_v30 = vpop.f32.mrb[79].mxu1 }
 0x191   :  { %v16314_v8 = vadd.f32 %v12365_v5, %v15875_v37  ;;  %v12368_v1 = vadd.f32 %v12367_v30, %v12366_v46  ;;  %v29_v37 = vld [vmem:[%s20659_s0 + $0x78] sm:$0xff]  ;;  %v14530_v30 = vld [vmem:[%s20658_s1 + $0x620] ss:$12 sps:$4 sm:$0xff]  }
 0x192   :  { %6677 = vmatmul.mubr.bf16.gmra.mrb[40].mxu0 %v16207_v55  ;;  %8941 = vmatmul.mubr.bf16.gmra.mrb[184].mxu1 %v16309_v43  ;;  %v16329_v55 = vcombine.low %v376_v23, %v388_v27 }
 0x193   :  { %6686 = vmatprep.mubr.bf16.mxu0 %v16211_v13  ;;  %v16320_v19 = vadd.f32 %v12368_v1, %v15878_v40  ;;  %8948 = vmatprep.mubr.bf16.mxu1 %v16311_v44  ;;  %v16331_v13 = vcombine.high %v17_v7, %v29_v37 }
 0x195   :  { %v12369_v41 = vpop.f32.mrb[80].mxu1 }
 0x196   :  { %v12370_v15 = vpop.f32.mrb[81].mxu1 }
 0x197   :  { %v12371_v31 = vadd.f32 %v12370_v15, %v12369_v41  ;;  %v12372_v35 = vpop.f32.mrb[82].mxu1 }
 0x198   :  { %v12373_v40 = vpop.f32.mrb[83].mxu1 }
 0x199   :  { %v16334_v17 = vadd.f32 %v12371_v31, %v15893_v47  ;;  %v12374_v39 = vadd.f32 %v12373_v40, %v12372_v35  ;;  %v53_v47 = vld [vmem:[%s20659_s0 + $0x138] sm:$0xff] }
 0x19a   :  { %6687 = vmatmul.mubr.bf16.gmra.mrb[44].mxu0 %v16237_v57  ;;  %8949 = vmatmul.mubr.bf16.gmra.mrb[188].mxu1 %v16329_v55  ;;  %v16349_v57 = vcombine.low %v17_v7, %v29_v37  ;;  %v16381_v7 = vcombine.low %v41_v34, %v53_v47  ;;  %v14538_v31 = vld [vmem:[%s20658_s1 + $0x638] ss:$12 sps:$4 sm:$0xff]   ;;  %v14545_v40 = vld [vmem:[%s20658_s1 + $0x710] ss:$12 sps:$4 sm:$0xff]  }
 0x19b   :  { %6696 = vmatprep.mubr.bf16.mxu0 %v16239_v36  ;;  %v16340_v10 = vadd.f32 %v12374_v39, %v15896_v50  ;;  %8989 = vmatprep.mubr.bf16.mxu1 %v16331_v13  ;;  %v16351_v36 = vcombine.high %v41_v34, %v53_v47  ;;  %v14522_v50 = vld [vmem:[%s20658_s1 + $0x608] ss:$12 sps:$4 sm:$0xff]  }
 0x19d   :  { %v12375_v38 = vpop.f32.mrb[84].mxu1 }
 0x19e   :  { %v12376_v20 = vpop.f32.mrb[85].mxu1 }
 0x19f   :  { %v12377_v49 = vadd.f32 %v12376_v20, %v12375_v38  ;;  %v12378_v23 = vpop.f32.mrb[86].mxu1  ;;  %v14546_v38 = vld [vmem:[%s20658_s1 + $0x650] ss:$12 sps:$4 sm:$0xff]  }
 0x1a0   :  { %v12379_v27 = vpop.f32.mrb[87].mxu1 }
 0x1a1   :  { %v16360_v16 = vadd.f32 %v12377_v49, %v15917_v59  ;;  %v12380_v5 = vadd.f32 %v12379_v27, %v12378_v23  ;;  %v65_v59 = vld [vmem:[%s20659_s0 + $0x198] sm:$0xff] }
 0x1a2   :  { %6697 = vmatmul.mubr.bf16.gmra.mrb[48].mxu0 %v16269_v3  ;;  %8990 = vmatmul.mubr.bf16.vlgmr.msra.gmra.mrb[192].mxu1 %v16349_v57  ;;  %v77_v3 = vld [vmem:[%s20659_s0 + $0x1f8] sm:$0xff] }
 0x1a3   :  { %6706 = vmatprep.mubr.bf16.mxu0 %v16271_v45  ;;  %v16366_v46 = vadd.f32 %v12380_v5, %v15920_v62  ;;  %8997 = vmatprep.mubr.bf16.mxu1 %v16351_v36  ;;  %v14537_v62 = vld [vmem:[%s20658_s1 + $0x6f8] ss:$12 sps:$4 sm:$0xff]   ;;  %v16383_v15 = vcombine.high %v65_v59, %v77_v3  ;;  %v16413_v49 = vcombine.low %v65_v59, %v77_v3 }
 0x1a4   :  { %12666 = vmatpush3.bf16.msra.mxu1 %v14522_v50 }
 0x1a5   :  { %12667 = vmatprep.subr.bf16.mxu1 %v14529_v60  ;;  %v12381_v45 = vpop.f32.mrb[88].mxu1  ;;  %v14554_v60 = vld [vmem:[%s20658_s1 + $0x668] ss:$12 sps:$4 sm:$0xff]  }
 0x1a6   :  { %v12382_v1 = vpop.f32.mrb[89].mxu1 }
 0x1a7   :  { %v12383_v37 = vadd.f32 %v12382_v1, %v12381_v45  ;;  %v12384_v41 = vpop.f32.mrb[90].mxu1  ;;  %v14562_v45 = vld [vmem:[%s20658_s1 + $0x680] ss:$12 sps:$4 sm:$0xff]  }
 0x1a8   :  { %12668 = vmatpush3.bf16.msra.mxu1 %v14530_v30  ;;  %v12385_v35 = vpop.f32.mrb[91].mxu1  ;;  %v14561_v30 = vld [vmem:[%s20658_s1 + $0x740] ss:$12 sps:$4 sm:$0xff]  }
 0x1a9   :  { %12669 = vmatprep.subr.bf16.mxu1 %v14537_v62  ;;  %v16392_v39 = vadd.f32 %v12383_v37, %v15947_v11  ;;  %v12386_v34 = vadd.f32 %v12385_v35, %v12384_v41  ;;  %v89_v11 = vld [vmem:[%s20659_s0 + $0x258] sm:$0xff] }
 0x1aa   :  { %6707 = vmatmul.mubr.bf16.gmra.mrb[52].mxu0 %v16289_v58  ;;  %8998 = vmatmul.mubr.bf16.gmra.mrb[196].mxu1 %v16381_v7  ;;  %v101_v58 = vld [vmem:[%s20659_s0 + $0x2b8] sm:$0xff] }
 0x1ab   :  { %6716 = vmatprep.mubr.bf16.mxu0 %v16291_v24  ;;  %v16398_v47 = vadd.f32 %v12386_v34, %v15950_v14  ;;  %9005 = vmatprep.mubr.bf16.mxu1 %v16383_v15  ;;  %v14553_v14 = vld [vmem:[%s20658_s1 + $0x728] ss:$12 sps:$4 sm:$0xff]   ;;  %v16415_v27 = vcombine.high %v89_v11, %v101_v58  ;;  %v16445_v37 = vcombine.low %v89_v11, %v101_v58 }
 0x1ac   :  { %12670 = vmatpush3.bf16.msra.mxu1 %v14538_v31 }
 0x1ad   :  { %12671 = vmatprep.subr.bf16.mxu1 %v14545_v40  ;;  %v12387_v24 = vpop.f32.mrb[92].mxu1  ;;  %v14570_v40 = vld [vmem:[%s20658_s1 + $0x698] ss:$12 sps:$4 sm:$0xff]  }
 0x1ae   :  { %v12388_v20 = vpop.f32.mrb[93].mxu1 }
 0x1af   :  { %v12389_v23 = vadd.f32 %v12388_v20, %v12387_v24  ;;  %v12390_v50 = vpop.f32.mrb[94].mxu1  ;;  %v14572_v24 = vld [vmem:[%s20658_s1 + $0x6b0] ss:$12 sps:$4 sm:$0xff]  }
 0x1b0   :  { %12672 = vmatpush3.bf16.msra.mxu1 %v14546_v38  ;;  %v12391_v5 = vpop.f32.mrb[95].mxu1  ;;  %v14571_v38 = vld [vmem:[%s20658_s1 + $0x770] ss:$12 sps:$4 sm:$0xff]  }
 0x1b1   :  { %12673 = vmatprep.subr.bf16.mxu1 %v14553_v14  ;;  %v16424_v62 = vadd.f32 %v12389_v23, %v15977_v28  ;;  %v12392_v59 = vadd.f32 %v12391_v5, %v12390_v50  ;;  %v113_v28 = vld [vmem:[%s20659_s0 + $0x318] sm:$0xff] }
 0x1b2   :  { %6717 = vmatmul.mubr.bf16.gmra.mrb[56].mxu0 %v16309_v43  ;;  %9006 = vmatmul.mubr.bf16.gmra.mrb[200].mxu1 %v16413_v49  ;;  %v125_v43 = vld [vmem:[%s20659_s0 + $0x378] sm:$0xff] }
 0x1b3   :  { %6726 = vmatprep.mubr.bf16.mxu0 %v16311_v44  ;;  %v16430_v3 = vadd.f32 %v12392_v59, %v15980_v32  ;;  %9013 = vmatprep.mubr.bf16.mxu1 %v16415_v27  ;;  %v14569_v32 = vld [vmem:[%s20658_s1 + $0x758] ss:$12 sps:$4 sm:$0xff]   ;;  %v16447_v35 = vcombine.high %v113_v28, %v125_v43  ;;  %v16477_v23 = vcombine.low %v113_v28, %v125_v43  ;;  %v14528_v59 = vld [vmem:[%s20658_s1 + $0x61c] ss:$12 sps:$4 sm:$0xff]  }
 0x1b4   :  { %12674 = vmatpush3.bf16.msra.mxu1 %v14554_v60  ;;  %v14585_v28 = vld [vmem:[%s20658_s1 + $0x848] ss:$12 sps:$4 sm:$0xff]   ;;  %v14526_v43 = vld [vmem:[%s20658_s1 + $0x618] ss:$12 sps:$4 sm:$0xff]  }
 0x1b5   :  { %12675 = vmatprep.subr.bf16.mxu1 %v14561_v30  ;;  %v12393_v44 = vpop.f32.mrb[96].mxu1 }
 0x1b6   :  { %v12394_v1 = vpop.f32.mrb[97].mxu1 }
 0x1b7   :  { %v12395_v41 = vadd.f32 %v12394_v1, %v12393_v44  ;;  %v12396_v31 = vpop.f32.mrb[98].mxu1  ;;  %v173_v1 = vld [vmem:[%s20659_s0 + $0x4f8] sm:$0xff] }
 0x1b8   :  { %12676 = vmatpush3.bf16.msra.mxu1 %v14562_v45  ;;  %v12397_v34 = vpop.f32.mrb[99].mxu1 }
 0x1b9   :  { %12677 = vmatprep.subr.bf16.mxu1 %v14569_v32  ;;  %v16456_v14 = vadd.f32 %v12395_v41, %v16007_v48  ;;  %v12398_v11 = vadd.f32 %v12397_v34, %v12396_v31  ;;  %v137_v48 = vld [vmem:[%s20659_s0 + $0x3d8] sm:$0xff] }
 0x1ba   :  { %6727 = vmatmul.mubr.bf16.gmra.mrb[60].mxu0 %v16329_v55  ;;  %9014 = vmatmul.mubr.bf16.gmra.mrb[204].mxu1 %v16445_v37  ;;  %v149_v55 = vld [vmem:[%s20659_s0 + $0x438] sm:$0xff] }
 0x1bb   :  { %6769 = vmatprep.mubr.bf16.mxu0 %v16331_v13  ;;  %v16462_v58 = vadd.f32 %v12398_v11, %v16010_v52  ;;  %9021 = vmatprep.mubr.bf16.mxu1 %v16447_v35  ;;  %v14523_v52 = vld [vmem:[%s20658_s1 + $0x600] ss:$12 sps:$4 sm:$0xff]   ;;  %v16479_v5 = vcombine.high %v137_v48, %v149_v55  ;;  %v16509_v31 = vcombine.low %v137_v48, %v149_v55 }
 0x1bc   :  { %12678 = vmatpush3.bf16.msra.mxu1 %v14570_v40 }
 0x1bd   :  { %12679 = vmatprep.subr.bf16.mxu1 %v14571_v38  ;;  %v12399_v13 = vpop.f32.mrb[100].mxu1  ;;  %v14531_v38 = vld [vmem:[%s20658_s1 + $0x630] ss:$12 sps:$4 sm:$0xff]  }
 0x1be   :  { %v12400_v20 = vpop.f32.mrb[101].mxu1 }
 0x1bf   :  { %v12401_v50 = vadd.f32 %v12400_v20, %v12399_v13  ;;  %v12402_v60 = vpop.f32.mrb[102].mxu1  ;;  %v14534_v20 = vld [vmem:[%s20658_s1 + $0x648] ss:$12 sps:$4 sm:$0xff]  }
 0x1c0   :  { %12680 = vmatpush3.bf16.msra.mxu1 %v14572_v24  ;;  %v12403_v30 = vpop.f32.mrb[103].mxu1  ;;  %v14536_v24 = vld [vmem:[%s20658_s1 + $0x64c] ss:$12 sps:$4 sm:$0xff]  }
 0x1c1   :  { %v16485_v45 = vadd.f32 %v12401_v50, %v16034_v0  ;;  %v12404_v32 = vadd.f32 %v12403_v30, %v12402_v60  ;;  %v14533_v0 = vld [vmem:[%s20658_s1 + $0x634] ss:$12 sps:$4 sm:$0xff]   ;;  %12777 = vmatprep.subr.bf16.mxu1 %v14585_v28 }
 0x1c2   :  { %6770 = vmatmul.mubr.bf16.vlgmr.msra.gmra.mrb[0].mxu0 %v16349_v57  ;;  %9022 = vmatmul.mubr.bf16.gmra.mrb[208].mxu1 %v16477_v23  ;;  %v161_v57 = vld [vmem:[%s20659_s0 + $0x498] sm:$0xff] }
 0x1c3   :  { %6931 = vmatpush1.bf16.msra.mxu0 %v14523_v52  ;;  %v16496_v44 = vadd.f32 %v12404_v32, %v16040_v4  ;;  %6779 = vmatprep.mubr.bf16.mxu0 %v16351_v36  ;;  %v16511_v34 = vcombine.high %v161_v57, %v173_v1  ;;  %v16541_v50 = vcombine.low %v161_v57, %v173_v1  ;;  %v14539_v32 = vld [vmem:[%s20658_s1 + $0x660] ss:$12 sps:$4 sm:$0xff]  }
 0x1c4   :  { %9029 = vmatprep.mubr.bf16.mxu1 %v16479_v5  ;;  %6932 = vmatprep.subr.bf16.mxu0 %v14528_v59 }
 0x1c5   :  { %v12405_v4 = vpop.f32.mrb[104].mxu1 }
 0x1c6   :  { %v12406_v41 = vpop.f32.mrb[105].mxu1 }
 0x1c7   :  { %6933 = vmatpush1.bf16.msra.mxu0 %v14526_v43  ;;  %v12407_v36 = vadd.f32 %v12406_v41, %v12405_v4  ;;  %v12408_v40 = vpop.f32.mrb[106].mxu1  ;;  %v14544_v43 = vld [vmem:[%s20658_s1 + $0x67c] ss:$12 sps:$4 sm:$0xff]   ;;  %v14542_v4 = vld [vmem:[%s20658_s1 + $0x678] ss:$12 sps:$4 sm:$0xff]  }
 0x1c8   :  { %6934 = vmatprep.subr.bf16.mxu0 %v14533_v0  ;;  %v12409_v11 = vpop.f32.mrb[107].mxu1 }
 0x1c9   :  { %v16520_v13 = vadd.f32 %v12407_v36, %v16067_v21  ;;  %v12410_v48 = vadd.f32 %v12409_v11, %v12408_v40  ;;  %v185_v21 = vld [vmem:[%s20659_s0 + $0x558] sm:$0xff] }
 0x1ca   :  { %6780 = vmatmul.mubr.bf16.gmra.mrb[4].mxu0 %v16381_v7  ;;  %9030 = vmatmul.mubr.bf16.gmra.mrb[212].mxu1 %v16509_v31  ;;  %v197_v7 = vld [vmem:[%s20659_s0 + $0x5b8] sm:$0xff] }
 0x1cb   :  { %6789 = vmatprep.mubr.bf16.mxu0 %v16383_v15  ;;  %v16526_v55 = vadd.f32 %v12410_v48, %v16070_v25  ;;  %9037 = vmatprep.mubr.bf16.mxu1 %v16511_v34  ;;  %v14541_v25 = vld [vmem:[%s20658_s1 + $0x664] ss:$12 sps:$4 sm:$0xff]   ;;  %v16543_v59 = vcombine.high %v185_v21, %v197_v7  ;;  %v16573_v36 = vcombine.low %v185_v21, %v197_v7 }
 0x1cc   :  { %6935 = vmatpush1.bf16.msra.mxu0 %v14531_v38 }
 0x1cd   :  { %6936 = vmatprep.subr.bf16.mxu0 %v14536_v24  ;;  %v12411_v15 = vpop.f32.mrb[108].mxu1  ;;  %v14547_v24 = vld [vmem:[%s20658_s1 + $0x690] ss:$12 sps:$4 sm:$0xff]  }
 0x1ce   :  { %v12412_v52 = vpop.f32.mrb[109].mxu1 }
 0x1cf   :  { %v12413_v60 = vadd.f32 %v12412_v52, %v12411_v15  ;;  %v12414_v30 = vpop.f32.mrb[110].mxu1  ;;  %v14550_v15 = vld [vmem:[%s20658_s1 + $0x6a8] ss:$12 sps:$4 sm:$0xff]  }
 0x1d0   :  { %6937 = vmatpush1.bf16.msra.mxu0 %v14534_v20  ;;  %v12415_v28 = vpop.f32.mrb[111].mxu1  ;;  %v14552_v20 = vld [vmem:[%s20658_s1 + $0x6ac] ss:$12 sps:$4 sm:$0xff]  }
 0x1d1   :  { %6938 = vmatprep.subr.bf16.mxu0 %v14541_v25  ;;  %v16552_v0 = vadd.f32 %v12413_v60, %v16097_v42  ;;  %v12416_v57 = vadd.f32 %v12415_v28, %v12414_v30  ;;  %v209_v42 = vld [vmem:[%s20659_s0 + $0x618] sm:$0xff] }
 0x1d2   :  { %6790 = vmatmul.mubr.bf16.gmra.mrb[8].mxu0 %v16413_v49  ;;  %9038 = vmatmul.mubr.bf16.gmra.mrb[216].mxu1 %v16541_v50  ;;  %v221_v49 = vld [vmem:[%s20659_s0 + $0x678] sm:$0xff] }
 0x1d3   :  { %6799 = vmatprep.mubr.bf16.mxu0 %v16415_v27  ;;  %v16558_v1 = vadd.f32 %v12416_v57, %v16100_v51  ;;  %9045 = vmatprep.mubr.bf16.mxu1 %v16543_v59  ;;  %v14549_v51 = vld [vmem:[%s20658_s1 + $0x694] ss:$12 sps:$4 sm:$0xff]   ;;  %v16575_v11 = vcombine.high %v209_v42, %v221_v49  ;;  %v16605_v60 = vcombine.low %v209_v42, %v221_v49 }
 0x1d4   :  { %6939 = vmatpush1.bf16.msra.mxu0 %v14539_v32 }
 0x1d5   :  { %6940 = vmatprep.subr.bf16.mxu0 %v14544_v43  ;;  %v12417_v27 = vpop.f32.mrb[112].mxu1  ;;  %v14555_v43 = vld [vmem:[%s20658_s1 + $0x6c0] ss:$12 sps:$4 sm:$0xff]  }
 0x1d6   :  { %v12418_v41 = vpop.f32.mrb[113].mxu1 }
 0x1d7   :  { %v12419_v40 = vadd.f32 %v12418_v41, %v12417_v27  ;;  %v12420_v38 = vpop.f32.mrb[114].mxu1  ;;  %v14558_v27 = vld [vmem:[%s20658_s1 + $0x6d8] ss:$12 sps:$4 sm:$0xff]  }
 0x1d8   :  { %6941 = vmatpush1.bf16.msra.mxu0 %v14542_v4  ;;  %v12421_v48 = vpop.f32.mrb[115].mxu1  ;;  %v14560_v4 = vld [vmem:[%s20658_s1 + $0x6dc] ss:$12 sps:$4 sm:$0xff]  }
 0x1d9   :  { %6942 = vmatprep.subr.bf16.mxu0 %v14549_v51  ;;  %v16584_v25 = vadd.f32 %v12419_v40, %v16127_v2  ;;  %v12422_v21 = vadd.f32 %v12421_v48, %v12420_v38  ;;  %v233_v2 = vld [vmem:[%s20659_s0 + $0x6d8] sm:$0xff] }
 0x1da   :  { %6800 = vmatmul.mubr.bf16.gmra.mrb[12].mxu0 %v16445_v37  ;;  %9046 = vmatmul.mubr.bf16.gmra.mrb[220].mxu1 %v16573_v36  ;;  %v245_v37 = vld [vmem:[%s20659_s0 + $0x738] sm:$0xff] }
 0x1db   :  { %6809 = vmatprep.mubr.bf16.mxu0 %v16447_v35  ;;  %v16590_v7 = vadd.f32 %v12422_v21, %v16130_v9  ;;  %9053 = vmatprep.mubr.bf16.mxu1 %v16575_v11  ;;  %v14557_v9 = vld [vmem:[%s20658_s1 + $0x6c4] ss:$12 sps:$4 sm:$0xff]   ;;  %v16607_v28 = vcombine.high %v233_v2, %v245_v37  ;;  %v16637_v40 = vcombine.low %v233_v2, %v245_v37 }
 0x1dc   :  { %6943 = vmatpush1.bf16.msra.mxu0 %v14547_v24 }
 0x1dd   :  { %6944 = vmatprep.subr.bf16.mxu0 %v14552_v20  ;;  %v12423_v35 = vpop.f32.mrb[116].mxu1  ;;  %v14563_v20 = vld [vmem:[%s20658_s1 + $0x6f0] ss:$12 sps:$4 sm:$0xff]  }
 0x1de   :  { %v12424_v52 = vpop.f32.mrb[117].mxu1 }
 0x1df   :  { %v12425_v30 = vadd.f32 %v12424_v52, %v12423_v35  ;;  %v12426_v32 = vpop.f32.mrb[118].mxu1  ;;  %v14566_v35 = vld [vmem:[%s20658_s1 + $0x708] ss:$12 sps:$4 sm:$0xff]  }
 0x1e0   :  { %6945 = vmatpush1.bf16.msra.mxu0 %v14550_v15  ;;  %v12427_v57 = vpop.f32.mrb[119].mxu1  ;;  %v14568_v15 = vld [vmem:[%s20658_s1 + $0x70c] ss:$12 sps:$4 sm:$0xff]  }
 0x1e1   :  { %6946 = vmatprep.subr.bf16.mxu0 %v14557_v9  ;;  %v16616_v51 = vadd.f32 %v12425_v30, %v16157_v29  ;;  %v12428_v42 = vadd.f32 %v12427_v57, %v12426_v32  ;;  %v257_v29 = vld [vmem:[%s20659_s0 + $0x798] sm:$0xff] }
 0x1e2   :  { %6810 = vmatmul.mubr.bf16.gmra.mrb[16].mxu0 %v16477_v23  ;;  %9054 = vmatmul.mubr.bf16.gmra.mrb[224].mxu1 %v16605_v60  ;;  %v269_v23 = vld [vmem:[%s20659_s0 + $0x7f8] sm:$0xff] }
 0x1e3   :  { %6819 = vmatprep.mubr.bf16.mxu0 %v16479_v5  ;;  %v16622_v49 = vadd.f32 %v12428_v42, %v16160_v33  ;;  %9061 = vmatprep.mubr.bf16.mxu1 %v16607_v28  ;;  %v14565_v33 = vld [vmem:[%s20658_s1 + $0x6f4] ss:$12 sps:$4 sm:$0xff]   ;;  %v16639_v48 = vcombine.high %v257_v29, %v269_v23  ;;  %v16669_v30 = vcombine.low %v257_v29, %v269_v23 }
 0x1e4   :  { %6947 = vmatpush1.bf16.msra.mxu0 %v14555_v43 }
 0x1e5   :  { %6948 = vmatprep.subr.bf16.mxu0 %v14560_v4  ;;  %v12429_v5 = vpop.f32.mrb[120].mxu1  ;;  %v14573_v4 = vld [vmem:[%s20658_s1 + $0x720] ss:$12 sps:$4 sm:$0xff]  }
 0x1e6   :  { %v12430_v41 = vpop.f32.mrb[121].mxu1 }
 0x1e7   :  { %v12431_v38 = vadd.f32 %v12430_v41, %v12429_v5  ;;  %v12432_v24 = vpop.f32.mrb[122].mxu1  ;;  %v14576_v5 = vld [vmem:[%s20658_s1 + $0x738] ss:$12 sps:$4 sm:$0xff]  }
 0x1e8   :  { %6949 = vmatpush1.bf16.msra.mxu0 %v14558_v27  ;;  %v12433_v21 = vpop.f32.mrb[123].mxu1  ;;  %v14578_v27 = vld [vmem:[%s20658_s1 + $0x73c] ss:$12 sps:$4 sm:$0xff]  }
 0x1e9   :  { %6950 = vmatprep.subr.bf16.mxu0 %v14565_v33  ;;  %v16648_v9 = vadd.f32 %v12431_v38, %v16185_v54  ;;  %v12434_v2 = vadd.f32 %v12433_v21, %v12432_v24  ;;  %v281_v54 = vld [vmem:[%s20659_s0 + $0x858] sm:$0xff] }
 0x1ea   :  { %6820 = vmatmul.mubr.bf16.gmra.mrb[20].mxu0 %v16509_v31  ;;  %9062 = vmatmul.mubr.bf16.gmra.mrb[228].mxu1 %v16637_v40  ;;  %v293_v31 = vld [vmem:[%s20659_s0 + $0x8b8] sm:$0xff] }
 0x1eb   :  { %6829 = vmatprep.mubr.bf16.mxu0 %v16511_v34  ;;  %v16654_v37 = vadd.f32 %v12434_v2, %v16190_v56  ;;  %9069 = vmatprep.mubr.bf16.mxu1 %v16639_v48  ;;  %v14575_v56 = vld [vmem:[%s20658_s1 + $0x724] ss:$12 sps:$4 sm:$0xff]   ;;  %v16671_v57 = vcombine.high %v281_v54, %v293_v31  ;;  %v16701_v38 = vcombine.low %v281_v54, %v293_v31 }
 0x1ec   :  { %6951 = vmatpush1.bf16.msra.mxu0 %v14563_v20 }
 0x1ed   :  { %6952 = vmatprep.subr.bf16.mxu0 %v14568_v15  ;;  %v12435_v34 = vpop.f32.mrb[124].mxu1  ;;  %v14579_v15 = vld [vmem:[%s20658_s1 + $0x750] ss:$12 sps:$4 sm:$0xff]  }
 0x1ee   :  { %v12436_v52 = vpop.f32.mrb[125].mxu1 }
 0x1ef   :  { %v12437_v32 = vadd.f32 %v12436_v52, %v12435_v34  ;;  %v12438_v43 = vpop.f32.mrb[126].mxu1  ;;  %v14582_v34 = vld [vmem:[%s20658_s1 + $0x768] ss:$12 sps:$4 sm:$0xff]  }
 0x1f0   :  { %6953 = vmatpush1.bf16.msra.mxu0 %v14566_v35  ;;  %v12439_v42 = vpop.f32.mrb[127].mxu1  ;;  %v14584_v35 = vld [vmem:[%s20658_s1 + $0x76c] ss:$12 sps:$4 sm:$0xff]  }
 0x1f1   :  { %6954 = vmatprep.subr.bf16.mxu0 %v14575_v56  ;;  %v16680_v33 = vadd.f32 %v12437_v32, %v16209_v12  ;;  %v12440_v29 = vadd.f32 %v12439_v42, %v12438_v43  ;;  %v305_v12 = vld [vmem:[%s20659_s0 + $0x918] sm:$0xff] }
 0x1f2   :  { %6830 = vmatmul.mubr.bf16.gmra.mrb[24].mxu0 %v16541_v50  ;;  %9070 = vmatmul.mubr.bf16.gmra.mrb[232].mxu1 %v16669_v30  ;;  %v317_v50 = vld [vmem:[%s20659_s0 + $0x978] sm:$0xff] }
 0x1f3   :  { %6839 = vmatprep.mubr.bf16.mxu0 %v16543_v59  ;;  %v16686_v23 = vadd.f32 %v12440_v29, %v16220_v22  ;;  %9077 = vmatprep.mubr.bf16.mxu1 %v16671_v57  ;;  %v14581_v22 = vld [vmem:[%s20658_s1 + $0x754] ss:$12 sps:$4 sm:$0xff]   ;;  %v16703_v21 = vcombine.high %v305_v12, %v317_v50  ;;  %v16733_v32 = vcombine.low %v305_v12, %v317_v50  ;;  %v353_v50 = vld [vmem:[%s20659_s0 + $0xa98] sm:$0xff] }
 0x1f4   :  { %6955 = vmatpush1.bf16.msra.mxu0 %v14573_v4 }
 0x1f5   :  { %6956 = vmatprep.subr.bf16.mxu0 %v14578_v27  ;;  %v12457_v59 = vpop.f32.mrb[128].mxu1 }
 0x1f6   :  { %v12458_v41 = vpop.f32.mrb[129].mxu1 }
 0x1f7   :  { %v12459_v24 = vadd.f32 %v12458_v41, %v12457_v59  ;;  %v12460_v20 = vpop.f32.mrb[130].mxu1 }
 0x1f8   :  { %6957 = vmatpush1.bf16.msra.mxu0 %v14576_v5  ;;  %v12461_v2 = vpop.f32.mrb[131].mxu1 }
 0x1f9   :  { %6958 = vmatprep.subr.bf16.mxu0 %v14581_v22  ;;  %v16712_v56 = vadd.f32 %v12459_v24, %v16248_v26  ;;  %v12462_v54 = vadd.f32 %v12461_v2, %v12460_v20  ;;  %v329_v26 = vld [vmem:[%s20659_s0 + $0x9d8] sm:$0xff] }
 0x1fa   :  { %6840 = vmatmul.mubr.bf16.gmra.mrb[28].mxu0 %v16573_v36  ;;  %9078 = vmatmul.mubr.bf16.gmra.mrb[236].mxu1 %v16701_v38  ;;  %v341_v36 = vld [vmem:[%s20659_s0 + $0xa38] sm:$0xff] }
 0x1fb   :  { %6849 = vmatprep.mubr.bf16.mxu0 %v16575_v11  ;;  %v16718_v31 = vadd.f32 %v12462_v54, %v16254_v61  ;;  %9085 = vmatprep.mubr.bf16.mxu1 %v16703_v21  ;;  %v14589_v61 = vld [vmem:[%s20658_s1 + $0x784] ss:$12 sps:$4 sm:$0xff]   ;;  %v16735_v42 = vcombine.high %v329_v26, %v341_v36 }
 0x1fc   :  { %6959 = vmatpush1.bf16.msra.mxu0 %v14579_v15 }
 0x1fd   :  { %6960 = vmatprep.subr.bf16.mxu0 %v14584_v35  ;;  %v12463_v11 = vpop.f32.mrb[132].mxu1  ;;  %v377_v35 = vld [vmem:[%s20659_s0 + $0xb58] sm:$0xff] }
 0x1fe   :  { %v12464_v52 = vpop.f32.mrb[133].mxu1 }
 0x1ff   :  { %v12465_v43 = vadd.f32 %v12464_v52, %v12463_v11  ;;  %v12466_v4 = vpop.f32.mrb[134].mxu1 }
 0x200   :  { %6961 = vmatpush1.bf16.msra.mxu0 %v14582_v34  ;;  %v12467_v27 = vpop.f32.mrb[135].mxu1 }
 0x201   :  { %7123 = vmatprep.subr.bf16.mxu0 %v14589_v61  ;;  %v16738_v29 = vadd.f32 %v12465_v43, %v16274_v18  ;;  %v12468_v5 = vadd.f32 %v12467_v27, %v12466_v4  ;;  %v365_v18 = vld [vmem:[%s20659_s0 + $0xaf8] sm:$0xff]  ;;  %v18_v43 = vld [vmem:[%s20659_s0 + $0x20] sm:$0xff] }
 0x202   :  { %6850 = vmatmul.mubr.bf16.gmra.mrb[32].mxu0 %v16605_v60  ;;  %9086 = vmatmul.mubr.bf16.gmra.mrb[240].mxu1 %v16733_v32  ;;  %v16753_v60 = vcombine.low %v329_v26, %v341_v36 }
 0x203   :  { %6859 = vmatprep.mubr.bf16.mxu0 %v16607_v28  ;;  %v16744_v12 = vadd.f32 %v12468_v5, %v16280_v6  ;;  %9093 = vmatprep.mubr.bf16.mxu1 %v16735_v42  ;;  %v16755_v28 = vcombine.high %v353_v50, %v365_v18 }
 0x205   :  { %v12469_v22 = vpop.f32.mrb[136].mxu1 }
 0x206   :  { %v12470_v59 = vpop.f32.mrb[137].mxu1 }
 0x207   :  { %v12471_v41 = vadd.f32 %v12470_v59, %v12469_v22  ;;  %v12472_v24 = vpop.f32.mrb[138].mxu1 }
 0x208   :  { %v12473_v6 = vpop.f32.mrb[139].mxu1 }
 0x209   :  { %v16758_v20 = vadd.f32 %v12471_v41, %v16294_v63  ;;  %v12474_v15 = vadd.f32 %v12473_v6, %v12472_v24  ;;  %v389_v63 = vld [vmem:[%s20659_s0 + $0xbb8] sm:$0xff]  ;;  %v42_v41 = vld [vmem:[%s20659_s0 + $0xe0] sm:$0xff] }
 0x20a   :  { %6860 = vmatmul.mubr.bf16.gmra.mrb[36].mxu0 %v16637_v40  ;;  %9094 = vmatmul.mubr.bf16.gmra.mrb[244].mxu1 %v16753_v60  ;;  %v16773_v40 = vcombine.low %v353_v50, %v365_v18 }
 0x20b   :  { %6869 = vmatprep.mubr.bf16.mxu0 %v16639_v48  ;;  %v16764_v2 = vadd.f32 %v12474_v15, %v16300_v53  ;;  %9101 = vmatprep.mubr.bf16.mxu1 %v16755_v28  ;;  %v16775_v48 = vcombine.high %v377_v35, %v389_v63 }
 0x20d   :  { %v12475_v54 = vpop.f32.mrb[140].mxu1 }
 0x20e   :  { %v12476_v34 = vpop.f32.mrb[141].mxu1 }
 0x20f   :  { %v12477_v26 = vadd.f32 %v12476_v34, %v12475_v54  ;;  %v12478_v36 = vpop.f32.mrb[142].mxu1  ;;  %v14593_v54 = vld [vmem:[%s20658_s1 + $0x860] ss:$12 sps:$4 sm:$0xff]  }
 0x210   :  { %v12479_v53 = vpop.f32.mrb[143].mxu1 }
 0x211   :  { %v16778_v61 = vadd.f32 %v12477_v26, %v16314_v8  ;;  %v12480_v11 = vadd.f32 %v12479_v53, %v12478_v36  ;;  %v30_v8 = vld [vmem:[%s20659_s0 + $0x80] sm:$0xff] }
 0x212   :  { %6870 = vmatmul.mubr.bf16.gmra.mrb[40].mxu0 %v16669_v30  ;;  %9102 = vmatmul.mubr.bf16.gmra.mrb[248].mxu1 %v16773_v40  ;;  %v16793_v30 = vcombine.low %v377_v35, %v389_v63  ;;  %v14594_v53 = vld [vmem:[%s20658_s1 + $0x7a0] ss:$12 sps:$4 sm:$0xff]  }
 0x213   :  { %6879 = vmatprep.mubr.bf16.mxu0 %v16671_v57  ;;  %v16784_v52 = vadd.f32 %v12480_v11, %v16320_v19  ;;  %9109 = vmatprep.mubr.bf16.mxu1 %v16775_v48  ;;  %v16795_v57 = vcombine.high %v18_v43, %v30_v8 }
 0x215   :  { %v12481_v4 = vpop.f32.mrb[144].mxu1 }
 0x216   :  { %v12482_v27 = vpop.f32.mrb[145].mxu1 }
 0x217   :  { %v12483_v5 = vadd.f32 %v12482_v27, %v12481_v4  ;;  %v12484_v50 = vpop.f32.mrb[146].mxu1 }
 0x218   :  { %v12485_v19 = vpop.f32.mrb[147].mxu1 }
 0x219   :  { %v16798_v18 = vadd.f32 %v12483_v5, %v16334_v17  ;;  %v12486_v22 = vadd.f32 %v12485_v19, %v12484_v50  ;;  %v54_v17 = vld [vmem:[%s20659_s0 + $0x140] sm:$0xff]  ;;  %v14609_v19 = vld [vmem:[%s20658_s1 + $0x890] ss:$12 sps:$4 sm:$0xff]  }
 0x21a   :  { %6880 = vmatmul.mubr.bf16.gmra.mrb[44].mxu0 %v16701_v38  ;;  %9110 = vmatmul.mubr.bf16.gmra.mrb[252].mxu1 %v16793_v30  ;;  %v16813_v38 = vcombine.low %v18_v43, %v30_v8  ;;  %v16845_v43 = vcombine.low %v42_v41, %v54_v17  ;;  %v14602_v5 = vld [vmem:[%s20658_s1 + $0x7b8] ss:$12 sps:$4 sm:$0xff]  }
 0x21b   :  { %6889 = vmatprep.mubr.bf16.mxu0 %v16703_v21  ;;  %v16804_v59 = vadd.f32 %v12486_v22, %v16340_v10  ;;  %9150 = vmatprep.mubr.bf16.mxu1 %v16795_v57  ;;  %v16815_v21 = vcombine.high %v42_v41, %v54_v17  ;;  %v14586_v10 = vld [vmem:[%s20658_s1 + $0x788] ss:$12 sps:$4 sm:$0xff]  }
 0x21d   :  { %v12487_v24 = vpop.f32.mrb[148].mxu1 }
 0x21e   :  { %v12488_v6 = vpop.f32.mrb[149].mxu1 }
 0x21f   :  { %v12489_v15 = vadd.f32 %v12488_v6, %v12487_v24  ;;  %v12490_v35 = vpop.f32.mrb[150].mxu1  ;;  %v14610_v24 = vld [vmem:[%s20658_s1 + $0x7d0] ss:$12 sps:$4 sm:$0xff]  }
 0x220   :  { %v12491_v63 = vpop.f32.mrb[151].mxu1 }
 0x221   :  { %v16824_v34 = vadd.f32 %v12489_v15, %v16360_v16  ;;  %v12492_v26 = vadd.f32 %v12491_v63, %v12490_v35  ;;  %v66_v16 = vld [vmem:[%s20659_s0 + $0x1a0] sm:$0xff] }
 0x222   :  { %6890 = vmatmul.mubr.bf16.gmra.mrb[48].mxu0 %v16733_v32  ;;  %9151 = vmatmul.mubr.bf16.vlgmr.msra.gmra.mrb[0].mxu1 %v16813_v38  ;;  %v78_v32 = vld [vmem:[%s20659_s0 + $0x200] sm:$0xff] }
 0x223   :  { %6899 = vmatprep.mubr.bf16.mxu0 %v16735_v42  ;;  %v16830_v36 = vadd.f32 %v12492_v26, %v16366_v46  ;;  %9158 = vmatprep.mubr.bf16.mxu1 %v16815_v21  ;;  %v14601_v46 = vld [vmem:[%s20658_s1 + $0x878] ss:$12 sps:$4 sm:$0xff]   ;;  %v16847_v27 = vcombine.high %v66_v16, %v78_v32  ;;  %v16877_v15 = vcombine.low %v66_v16, %v78_v32 }
 0x224   :  { %12778 = vmatpush3.bf16.msra.mxu1 %v14586_v10 }
 0x225   :  { %12779 = vmatprep.subr.bf16.mxu1 %v14593_v54  ;;  %v12493_v42 = vpop.f32.mrb[152].mxu1  ;;  %v14618_v54 = vld [vmem:[%s20658_s1 + $0x7e8] ss:$12 sps:$4 sm:$0xff]  }
 0x226   :  { %v12494_v11 = vpop.f32.mrb[153].mxu1 }
 0x227   :  { %v12495_v8 = vadd.f32 %v12494_v11, %v12493_v42  ;;  %v12496_v4 = vpop.f32.mrb[154].mxu1  ;;  %v14626_v42 = vld [vmem:[%s20658_s1 + $0x800] ss:$12 sps:$4 sm:$0xff]  }
 0x228   :  { %12780 = vmatpush3.bf16.msra.mxu1 %v14594_v53  ;;  %v12497_v50 = vpop.f32.mrb[155].mxu1  ;;  %v14625_v53 = vld [vmem:[%s20658_s1 + $0x8c0] ss:$12 sps:$4 sm:$0xff]  }
 0x229   :  { %12781 = vmatprep.subr.bf16.mxu1 %v14601_v46  ;;  %v16856_v22 = vadd.f32 %v12495_v8, %v16392_v39  ;;  %v12498_v41 = vadd.f32 %v12497_v50, %v12496_v4  ;;  %v90_v39 = vld [vmem:[%s20659_s0 + $0x260] sm:$0xff] }
 0x22a   :  { %6900 = vmatmul.mubr.bf16.gmra.mrb[52].mxu0 %v16753_v60  ;;  %9159 = vmatmul.mubr.bf16.gmra.mrb[4].mxu1 %v16845_v43  ;;  %v102_v60 = vld [vmem:[%s20659_s0 + $0x2c0] sm:$0xff] }
 0x22b   :  { %6909 = vmatprep.mubr.bf16.mxu0 %v16755_v28  ;;  %v16862_v17 = vadd.f32 %v12498_v41, %v16398_v47  ;;  %9166 = vmatprep.mubr.bf16.mxu1 %v16847_v27  ;;  %v14617_v47 = vld [vmem:[%s20658_s1 + $0x8a8] ss:$12 sps:$4 sm:$0xff]   ;;  %v16879_v63 = vcombine.high %v90_v39, %v102_v60  ;;  %v16909_v8 = vcombine.low %v90_v39, %v102_v60 }
 0x22c   :  { %12782 = vmatpush3.bf16.msra.mxu1 %v14602_v5 }
 0x22d   :  { %12783 = vmatprep.subr.bf16.mxu1 %v14609_v19  ;;  %v12499_v28 = vpop.f32.mrb[156].mxu1  ;;  %v14634_v19 = vld [vmem:[%s20658_s1 + $0x818] ss:$12 sps:$4 sm:$0xff]  }
 0x22e   :  { %v12500_v6 = vpop.f32.mrb[157].mxu1 }
 0x22f   :  { %v12501_v35 = vadd.f32 %v12500_v6, %v12499_v28  ;;  %v12502_v10 = vpop.f32.mrb[158].mxu1  ;;  %v14636_v28 = vld [vmem:[%s20658_s1 + $0x830] ss:$12 sps:$4 sm:$0xff]  }
 0x230   :  { %12784 = vmatpush3.bf16.msra.mxu1 %v14610_v24  ;;  %v12503_v26 = vpop.f32.mrb[159].mxu1  ;;  %v14635_v24 = vld [vmem:[%s20658_s1 + $0x8f0] ss:$12 sps:$4 sm:$0xff]  }
 0x231   :  { %12785 = vmatprep.subr.bf16.mxu1 %v14617_v47  ;;  %v16888_v46 = vadd.f32 %v12501_v35, %v16424_v62  ;;  %v12504_v16 = vadd.f32 %v12503_v26, %v12502_v10  ;;  %v114_v62 = vld [vmem:[%s20659_s0 + $0x320] sm:$0xff] }
 0x232   :  { %6910 = vmatmul.mubr.bf16.gmra.mrb[56].mxu0 %v16773_v40  ;;  %9167 = vmatmul.mubr.bf16.gmra.mrb[8].mxu1 %v16877_v15  ;;  %v126_v40 = vld [vmem:[%s20659_s0 + $0x380] sm:$0xff] }
 0x233   :  { %6919 = vmatprep.mubr.bf16.mxu0 %v16775_v48  ;;  %v16894_v32 = vadd.f32 %v12504_v16, %v16430_v3  ;;  %9174 = vmatprep.mubr.bf16.mxu1 %v16879_v63  ;;  %v14633_v3 = vld [vmem:[%s20658_s1 + $0x8d8] ss:$12 sps:$4 sm:$0xff]   ;;  %v16911_v50 = vcombine.high %v114_v62, %v126_v40  ;;  %v14587_v35 = vld [vmem:[%s20658_s1 + $0x780] ss:$12 sps:$4 sm:$0xff]   ;;  %v14592_v16 = vld [vmem:[%s20658_s1 + $0x79c] ss:$12 sps:$4 sm:$0xff]  }
 0x234   :  { %12786 = vmatpush3.bf16.msra.mxu1 %v14618_v54 }
 0x235   :  { %12787 = vmatprep.subr.bf16.mxu1 %v14625_v53  ;;  %v12505_v48 = vpop.f32.mrb[160].mxu1 }
 0x236   :  { %v12506_v11 = vpop.f32.mrb[161].mxu1 }
 0x237   :  { %v12507_v4 = vadd.f32 %v12506_v11, %v12505_v48  ;;  %v12508_v5 = vpop.f32.mrb[162].mxu1  ;;  %v174_v11 = vld [vmem:[%s20659_s0 + $0x500] sm:$0xff] }
 0x238   :  { %12788 = vmatpush3.bf16.msra.mxu1 %v14626_v42  ;;  %v12509_v41 = vpop.f32.mrb[163].mxu1 }
 0x239   :  { %12789 = vmatprep.subr.bf16.mxu1 %v14633_v3  ;;  %v16920_v47 = vadd.f32 %v12507_v4, %v16456_v14  ;;  %v12510_v39 = vadd.f32 %v12509_v41, %v12508_v5  ;;  %v138_v14 = vld [vmem:[%s20659_s0 + $0x3e0] sm:$0xff] }
 0x23a   :  { %6920 = vmatmul.mubr.bf16.gmra.mrb[60].mxu0 %v16793_v30  ;;  %9175 = vmatmul.mubr.bf16.gmra.mrb[12].mxu1 %v16909_v8  ;;  %v150_v30 = vld [vmem:[%s20659_s0 + $0x440] sm:$0xff] }
 0x23b   :  { %6962 = vmatprep.mubr.bf16.mxu0 %v16795_v57  ;;  %v16926_v60 = vadd.f32 %v12510_v39, %v16462_v58  ;;  %9182 = vmatprep.mubr.bf16.mxu1 %v16911_v50  ;;  %v16938_v58 = vcombine.low %v114_v62, %v126_v40  ;;  %v16943_v26 = vcombine.high %v138_v14, %v150_v30  ;;  %v14649_v62 = vld [vmem:[%s20658_s1 + $0x9c8] ss:$12 sps:$4 sm:$0xff]   ;;  %v14590_v40 = vld [vmem:[%s20658_s1 + $0x798] ss:$12 sps:$4 sm:$0xff]  }
 0x23c   :  { %12790 = vmatpush3.bf16.msra.mxu1 %v14634_v19  ;;  %v16973_v5 = vcombine.low %v138_v14, %v150_v30 }
 0x23d   :  { %12791 = vmatprep.subr.bf16.mxu1 %v14635_v24  ;;  %v12511_v57 = vpop.f32.mrb[164].mxu1  ;;  %v14595_v24 = vld [vmem:[%s20658_s1 + $0x7b0] ss:$12 sps:$4 sm:$0xff]  }
 0x23e   :  { %v12512_v6 = vpop.f32.mrb[165].mxu1 }
 0x23f   :  { %v12513_v10 = vadd.f32 %v12512_v6, %v12511_v57  ;;  %v12514_v54 = vpop.f32.mrb[166].mxu1  ;;  %v14598_v6 = vld [vmem:[%s20658_s1 + $0x7c8] ss:$12 sps:$4 sm:$0xff]  }
 0x240   :  { %12792 = vmatpush3.bf16.msra.mxu1 %v14636_v28  ;;  %v12515_v53 = vpop.f32.mrb[167].mxu1  ;;  %v14600_v28 = vld [vmem:[%s20658_s1 + $0x7cc] ss:$12 sps:$4 sm:$0xff]  }
 0x241   :  { %v16949_v42 = vadd.f32 %v12513_v10, %v16485_v45  ;;  %v12516_v3 = vadd.f32 %v12515_v53, %v12514_v54  ;;  %v14597_v45 = vld [vmem:[%s20658_s1 + $0x7b4] ss:$12 sps:$4 sm:$0xff]   ;;  %12889 = vmatprep.subr.bf16.mxu1 %v14649_v62 }
 0x242   :  { %6963 = vmatmul.mubr.bf16.vlgmr.msra.gmra.mrb[0].mxu0 %v16813_v38  ;;  %9183 = vmatmul.mubr.bf16.gmra.mrb[16].mxu1 %v16938_v58  ;;  %v162_v38 = vld [vmem:[%s20659_s0 + $0x4a0] sm:$0xff] }
 0x243   :  { %7124 = vmatpush1.bf16.msra.mxu0 %v14587_v35  ;;  %v16960_v48 = vadd.f32 %v12516_v3, %v16496_v44  ;;  %6972 = vmatprep.mubr.bf16.mxu0 %v16815_v21  ;;  %v16975_v41 = vcombine.high %v162_v38, %v174_v11  ;;  %v17005_v10 = vcombine.low %v162_v38, %v174_v11  ;;  %v14603_v3 = vld [vmem:[%s20658_s1 + $0x7e0] ss:$12 sps:$4 sm:$0xff]  }
 0x244   :  { %9190 = vmatprep.mubr.bf16.mxu1 %v16943_v26  ;;  %7125 = vmatprep.subr.bf16.mxu0 %v14592_v16 }
 0x245   :  { %v12517_v44 = vpop.f32.mrb[168].mxu1 }
 0x246   :  { %v12518_v4 = vpop.f32.mrb[169].mxu1 }
 0x247   :  { %7126 = vmatpush1.bf16.msra.mxu0 %v14590_v40  ;;  %v12519_v21 = vadd.f32 %v12518_v4, %v12517_v44  ;;  %v12520_v19 = vpop.f32.mrb[170].mxu1  ;;  %v14608_v40 = vld [vmem:[%s20658_s1 + $0x7fc] ss:$12 sps:$4 sm:$0xff]   ;;  %v14606_v44 = vld [vmem:[%s20658_s1 + $0x7f8] ss:$12 sps:$4 sm:$0xff]  }
 0x248   :  { %7127 = vmatprep.subr.bf16.mxu0 %v14597_v45  ;;  %v12521_v39 = vpop.f32.mrb[171].mxu1 }
 0x249   :  { %v16984_v57 = vadd.f32 %v12519_v21, %v16520_v13  ;;  %v12522_v14 = vadd.f32 %v12521_v39, %v12520_v19  ;;  %v186_v13 = vld [vmem:[%s20659_s0 + $0x560] sm:$0xff] }
 0x24a   :  { %6973 = vmatmul.mubr.bf16.gmra.mrb[4].mxu0 %v16845_v43  ;;  %9191 = vmatmul.mubr.bf16.gmra.mrb[20].mxu1 %v16973_v5  ;;  %v198_v43 = vld [vmem:[%s20659_s0 + $0x5c0] sm:$0xff] }
 0x24b   :  { %6982 = vmatprep.mubr.bf16.mxu0 %v16847_v27  ;;  %v16990_v30 = vadd.f32 %v12522_v14, %v16526_v55  ;;  %9198 = vmatprep.mubr.bf16.mxu1 %v16975_v41  ;;  %v14605_v55 = vld [vmem:[%s20658_s1 + $0x7e4] ss:$12 sps:$4 sm:$0xff]   ;;  %v17007_v16 = vcombine.high %v186_v13, %v198_v43  ;;  %v17037_v21 = vcombine.low %v186_v13, %v198_v43 }
 0x24c   :  { %7128 = vmatpush1.bf16.msra.mxu0 %v14595_v24 }
 0x24d   :  { %7129 = vmatprep.subr.bf16.mxu0 %v14600_v28  ;;  %v12523_v27 = vpop.f32.mrb[172].mxu1  ;;  %v14611_v28 = vld [vmem:[%s20658_s1 + $0x810] ss:$12 sps:$4 sm:$0xff]  }
 0x24e   :  { %v12524_v35 = vpop.f32.mrb[173].mxu1 }
 0x24f   :  { %v12525_v54 = vadd.f32 %v12524_v35, %v12523_v27  ;;  %v12526_v53 = vpop.f32.mrb[174].mxu1  ;;  %v14614_v27 = vld [vmem:[%s20658_s1 + $0x828] ss:$12 sps:$4 sm:$0xff]  }
 0x250   :  { %7130 = vmatpush1.bf16.msra.mxu0 %v14598_v6  ;;  %v12527_v62 = vpop.f32.mrb[175].mxu1  ;;  %v14616_v6 = vld [vmem:[%s20658_s1 + $0x82c] ss:$12 sps:$4 sm:$0xff]  }
 0x251   :  { %7131 = vmatprep.subr.bf16.mxu0 %v14605_v55  ;;  %v17016_v45 = vadd.f32 %v12525_v54, %v16552_v0  ;;  %v12528_v38 = vadd.f32 %v12527_v62, %v12526_v53  ;;  %v210_v0 = vld [vmem:[%s20659_s0 + $0x620] sm:$0xff] }
 0x252   :  { %6983 = vmatmul.mubr.bf16.gmra.mrb[8].mxu0 %v16877_v15  ;;  %9199 = vmatmul.mubr.bf16.gmra.mrb[24].mxu1 %v17005_v10  ;;  %v222_v15 = vld [vmem:[%s20659_s0 + $0x680] sm:$0xff] }
 0x253   :  { %6992 = vmatprep.mubr.bf16.mxu0 %v16879_v63  ;;  %v17022_v11 = vadd.f32 %v12528_v38, %v16558_v1  ;;  %9206 = vmatprep.mubr.bf16.mxu1 %v17007_v16  ;;  %v14613_v1 = vld [vmem:[%s20658_s1 + $0x814] ss:$12 sps:$4 sm:$0xff]   ;;  %v17039_v39 = vcombine.high %v210_v0, %v222_v15  ;;  %v17069_v54 = vcombine.low %v210_v0, %v222_v15 }
 0x254   :  { %7132 = vmatpush1.bf16.msra.mxu0 %v14603_v3 }
 0x255   :  { %7133 = vmatprep.subr.bf16.mxu0 %v14608_v40  ;;  %v12529_v63 = vpop.f32.mrb[176].mxu1  ;;  %v14619_v40 = vld [vmem:[%s20658_s1 + $0x840] ss:$12 sps:$4 sm:$0xff]  }
 0x256   :  { %v12530_v4 = vpop.f32.mrb[177].mxu1 }
 0x257   :  { %v12531_v19 = vadd.f32 %v12530_v4, %v12529_v63  ;;  %v12532_v24 = vpop.f32.mrb[178].mxu1  ;;  %v14622_v63 = vld [vmem:[%s20658_s1 + $0x858] ss:$12 sps:$4 sm:$0xff]  }
 0x258   :  { %7134 = vmatpush1.bf16.msra.mxu0 %v14606_v44  ;;  %v12533_v14 = vpop.f32.mrb[179].mxu1  ;;  %v14624_v44 = vld [vmem:[%s20658_s1 + $0x85c] ss:$12 sps:$4 sm:$0xff]  }
 0x259   :  { %7135 = vmatprep.subr.bf16.mxu0 %v14613_v1  ;;  %v17048_v55 = vadd.f32 %v12531_v19, %v16584_v25  ;;  %v12534_v13 = vadd.f32 %v12533_v14, %v12532_v24  ;;  %v234_v25 = vld [vmem:[%s20659_s0 + $0x6e0] sm:$0xff] }
 0x25a   :  { %6993 = vmatmul.mubr.bf16.gmra.mrb[12].mxu0 %v16909_v8  ;;  %9207 = vmatmul.mubr.bf16.gmra.mrb[28].mxu1 %v17037_v21  ;;  %v246_v8 = vld [vmem:[%s20659_s0 + $0x740] sm:$0xff] }
 0x25b   :  { %7002 = vmatprep.mubr.bf16.mxu0 %v16911_v50  ;;  %v17054_v43 = vadd.f32 %v12534_v13, %v16590_v7  ;;  %9214 = vmatprep.mubr.bf16.mxu1 %v17039_v39  ;;  %v14621_v7 = vld [vmem:[%s20658_s1 + $0x844] ss:$12 sps:$4 sm:$0xff]   ;;  %v17071_v62 = vcombine.high %v234_v25, %v246_v8  ;;  %v17101_v19 = vcombine.low %v234_v25, %v246_v8 }
 0x25c   :  { %7136 = vmatpush1.bf16.msra.mxu0 %v14611_v28 }
 0x25d   :  { %7137 = vmatprep.subr.bf16.mxu0 %v14616_v6  ;;  %v12535_v50 = vpop.f32.mrb[180].mxu1  ;;  %v14627_v6 = vld [vmem:[%s20658_s1 + $0x870] ss:$12 sps:$4 sm:$0xff]  }
 0x25e   :  { %v12536_v35 = vpop.f32.mrb[181].mxu1 }
 0x25f   :  { %v12537_v53 = vadd.f32 %v12536_v35, %v12535_v50  ;;  %v12538_v3 = vpop.f32.mrb[182].mxu1  ;;  %v14630_v50 = vld [vmem:[%s20658_s1 + $0x888] ss:$12 sps:$4 sm:$0xff]  }
 0x260   :  { %7138 = vmatpush1.bf16.msra.mxu0 %v14614_v27  ;;  %v12539_v38 = vpop.f32.mrb[183].mxu1  ;;  %v14632_v27 = vld [vmem:[%s20658_s1 + $0x88c] ss:$12 sps:$4 sm:$0xff]  }
 0x261   :  { %7139 = vmatprep.subr.bf16.mxu0 %v14621_v7  ;;  %v17080_v1 = vadd.f32 %v12537_v53, %v16616_v51  ;;  %v12540_v0 = vadd.f32 %v12539_v38, %v12538_v3  ;;  %v258_v51 = vld [vmem:[%s20659_s0 + $0x7a0] sm:$0xff] }
 0x262   :  { %7003 = vmatmul.mubr.bf16.gmra.mrb[16].mxu0 %v16938_v58  ;;  %9215 = vmatmul.mubr.bf16.gmra.mrb[32].mxu1 %v17069_v54  ;;  %v270_v58 = vld [vmem:[%s20659_s0 + $0x800] sm:$0xff] }
 0x263   :  { %7012 = vmatprep.mubr.bf16.mxu0 %v16943_v26  ;;  %v17086_v15 = vadd.f32 %v12540_v0, %v16622_v49  ;;  %9222 = vmatprep.mubr.bf16.mxu1 %v17071_v62  ;;  %v14629_v49 = vld [vmem:[%s20658_s1 + $0x874] ss:$12 sps:$4 sm:$0xff]   ;;  %v17103_v14 = vcombine.high %v258_v51, %v270_v58  ;;  %v17133_v53 = vcombine.low %v258_v51, %v270_v58 }
 0x264   :  { %7140 = vmatpush1.bf16.msra.mxu0 %v14619_v40 }
 0x265   :  { %7141 = vmatprep.subr.bf16.mxu0 %v14624_v44  ;;  %v12541_v26 = vpop.f32.mrb[184].mxu1  ;;  %v14637_v44 = vld [vmem:[%s20658_s1 + $0x8a0] ss:$12 sps:$4 sm:$0xff]  }
 0x266   :  { %v12542_v4 = vpop.f32.mrb[185].mxu1 }
 0x267   :  { %v12543_v24 = vadd.f32 %v12542_v4, %v12541_v26  ;;  %v12544_v28 = vpop.f32.mrb[186].mxu1  ;;  %v14640_v26 = vld [vmem:[%s20658_s1 + $0x8b8] ss:$12 sps:$4 sm:$0xff]  }
 0x268   :  { %7142 = vmatpush1.bf16.msra.mxu0 %v14622_v63  ;;  %v12545_v13 = vpop.f32.mrb[187].mxu1  ;;  %v14642_v63 = vld [vmem:[%s20658_s1 + $0x8bc] ss:$12 sps:$4 sm:$0xff]  }
 0x269   :  { %7143 = vmatprep.subr.bf16.mxu0 %v14629_v49  ;;  %v17112_v7 = vadd.f32 %v12543_v24, %v16648_v9  ;;  %v12546_v25 = vadd.f32 %v12545_v13, %v12544_v28  ;;  %v282_v9 = vld [vmem:[%s20659_s0 + $0x860] sm:$0xff] }
 0x26a   :  { %7013 = vmatmul.mubr.bf16.gmra.mrb[20].mxu0 %v16973_v5  ;;  %9223 = vmatmul.mubr.bf16.gmra.mrb[36].mxu1 %v17101_v19  ;;  %v294_v5 = vld [vmem:[%s20659_s0 + $0x8c0] sm:$0xff] }
 0x26b   :  { %7022 = vmatprep.mubr.bf16.mxu0 %v16975_v41  ;;  %v17118_v8 = vadd.f32 %v12546_v25, %v16654_v37  ;;  %9230 = vmatprep.mubr.bf16.mxu1 %v17103_v14  ;;  %v14639_v37 = vld [vmem:[%s20658_s1 + $0x8a4] ss:$12 sps:$4 sm:$0xff]   ;;  %v17135_v38 = vcombine.high %v282_v9, %v294_v5  ;;  %v17165_v24 = vcombine.low %v282_v9, %v294_v5 }
 0x26c   :  { %7144 = vmatpush1.bf16.msra.mxu0 %v14627_v6 }
 0x26d   :  { %7145 = vmatprep.subr.bf16.mxu0 %v14632_v27  ;;  %v12547_v41 = vpop.f32.mrb[188].mxu1  ;;  %v14643_v27 = vld [vmem:[%s20658_s1 + $0x8d0] ss:$12 sps:$4 sm:$0xff]  }
 0x26e   :  { %v12548_v35 = vpop.f32.mrb[189].mxu1 }
 0x26f   :  { %v12549_v3 = vadd.f32 %v12548_v35, %v12547_v41  ;;  %v12550_v40 = vpop.f32.mrb[190].mxu1  ;;  %v14646_v41 = vld [vmem:[%s20658_s1 + $0x8e8] ss:$12 sps:$4 sm:$0xff]  }
 0x270   :  { %7146 = vmatpush1.bf16.msra.mxu0 %v14630_v50  ;;  %v12551_v0 = vpop.f32.mrb[191].mxu1  ;;  %v14648_v50 = vld [vmem:[%s20658_s1 + $0x8ec] ss:$12 sps:$4 sm:$0xff]  }
 0x271   :  { %7147 = vmatprep.subr.bf16.mxu0 %v14639_v37  ;;  %v17144_v49 = vadd.f32 %v12549_v3, %v16680_v33  ;;  %v12552_v51 = vadd.f32 %v12551_v0, %v12550_v40  ;;  %v306_v33 = vld [vmem:[%s20659_s0 + $0x920] sm:$0xff] }
 0x272   :  { %7023 = vmatmul.mubr.bf16.gmra.mrb[24].mxu0 %v17005_v10  ;;  %9231 = vmatmul.mubr.bf16.gmra.mrb[40].mxu1 %v17133_v53  ;;  %v318_v10 = vld [vmem:[%s20659_s0 + $0x980] sm:$0xff] }
 0x273   :  { %7032 = vmatprep.mubr.bf16.mxu0 %v17007_v16  ;;  %v17150_v58 = vadd.f32 %v12552_v51, %v16686_v23  ;;  %9238 = vmatprep.mubr.bf16.mxu1 %v17135_v38  ;;  %v14645_v23 = vld [vmem:[%s20658_s1 + $0x8d4] ss:$12 sps:$4 sm:$0xff]   ;;  %v17167_v13 = vcombine.high %v306_v33, %v318_v10  ;;  %v17197_v3 = vcombine.low %v306_v33, %v318_v10 }
 0x274   :  { %7148 = vmatpush1.bf16.msra.mxu0 %v14637_v44  ;;  %v354_v10 = vld [vmem:[%s20659_s0 + $0xaa0] sm:$0xff] }
 0x275   :  { %7149 = vmatprep.subr.bf16.mxu0 %v14642_v63  ;;  %v12569_v16 = vpop.f32.mrb[192].mxu1 }
 0x276   :  { %v12570_v4 = vpop.f32.mrb[193].mxu1 }
 0x277   :  { %v12571_v28 = vadd.f32 %v12570_v4, %v12569_v16  ;;  %v12572_v6 = vpop.f32.mrb[194].mxu1 }
 0x278   :  { %7150 = vmatpush1.bf16.msra.mxu0 %v14640_v26  ;;  %v12573_v25 = vpop.f32.mrb[195].mxu1 }
 0x279   :  { %7151 = vmatprep.subr.bf16.mxu0 %v14645_v23  ;;  %v17176_v37 = vadd.f32 %v12571_v28, %v16712_v56  ;;  %v12574_v9 = vadd.f32 %v12573_v25, %v12572_v6  ;;  %v330_v56 = vld [vmem:[%s20659_s0 + $0x9e0] sm:$0xff] }
 0x27a   :  { %7033 = vmatmul.mubr.bf16.gmra.mrb[28].mxu0 %v17037_v21  ;;  %9239 = vmatmul.mubr.bf16.gmra.mrb[44].mxu1 %v17165_v24  ;;  %v342_v21 = vld [vmem:[%s20659_s0 + $0xa40] sm:$0xff] }
 0x27b   :  { %7042 = vmatprep.mubr.bf16.mxu0 %v17039_v39  ;;  %v17182_v5 = vadd.f32 %v12574_v9, %v16718_v31  ;;  %9246 = vmatprep.mubr.bf16.mxu1 %v17167_v13  ;;  %v14653_v31 = vld [vmem:[%s20658_s1 + $0x904] ss:$12 sps:$4 sm:$0xff]   ;;  %v17199_v0 = vcombine.high %v330_v56, %v342_v21 }
 0x27c   :  { %7152 = vmatpush1.bf16.msra.mxu0 %v14643_v27 }
 0x27d   :  { %7153 = vmatprep.subr.bf16.mxu0 %v14648_v50  ;;  %v12575_v39 = vpop.f32.mrb[196].mxu1  ;;  %v378_v50 = vld [vmem:[%s20659_s0 + $0xb60] sm:$0xff] }
 0x27e   :  { %v12576_v35 = vpop.f32.mrb[197].mxu1 }
 0x27f   :  { %v12577_v40 = vadd.f32 %v12576_v35, %v12575_v39  ;;  %v12578_v44 = vpop.f32.mrb[198].mxu1 }
 0x280   :  { %7154 = vmatpush1.bf16.msra.mxu0 %v14646_v41  ;;  %v12579_v63 = vpop.f32.mrb[199].mxu1 }
 0x281   :  { %7316 = vmatprep.subr.bf16.mxu0 %v14653_v31  ;;  %v17202_v51 = vadd.f32 %v12577_v40, %v16738_v29  ;;  %v12580_v26 = vadd.f32 %v12579_v63, %v12578_v44  ;;  %v366_v29 = vld [vmem:[%s20659_s0 + $0xb00] sm:$0xff]  ;;  %v19_v40 = vld [vmem:[%s20659_s0 + $0x28] sm:$0xff] }
 0x282   :  { %7043 = vmatmul.mubr.bf16.gmra.mrb[32].mxu0 %v17069_v54  ;;  %9247 = vmatmul.mubr.bf16.gmra.mrb[48].mxu1 %v17197_v3  ;;  %v17217_v54 = vcombine.low %v330_v56, %v342_v21 }
 0x283   :  { %7052 = vmatprep.mubr.bf16.mxu0 %v17071_v62  ;;  %v17208_v33 = vadd.f32 %v12580_v26, %v16744_v12  ;;  %9254 = vmatprep.mubr.bf16.mxu1 %v17199_v0  ;;  %v17219_v62 = vcombine.high %v354_v10, %v366_v29 }
 0x285   :  { %v12581_v23 = vpop.f32.mrb[200].mxu1 }
 0x286   :  { %v12582_v16 = vpop.f32.mrb[201].mxu1 }
 0x287   :  { %v12583_v4 = vadd.f32 %v12582_v16, %v12581_v23  ;;  %v12584_v28 = vpop.f32.mrb[202].mxu1 }
 0x288   :  { %v12585_v12 = vpop.f32.mrb[203].mxu1 }
 0x289   :  { %v17222_v6 = vadd.f32 %v12583_v4, %v16758_v20  ;;  %v12586_v27 = vadd.f32 %v12585_v12, %v12584_v28  ;;  %v390_v20 = vld [vmem:[%s20659_s0 + $0xbc0] sm:$0xff]  ;;  %v43_v4 = vld [vmem:[%s20659_s0 + $0xe8] sm:$0xff] }
 0x28a   :  { %7053 = vmatmul.mubr.bf16.gmra.mrb[36].mxu0 %v17101_v19  ;;  %9255 = vmatmul.mubr.bf16.gmra.mrb[52].mxu1 %v17217_v54  ;;  %v17237_v19 = vcombine.low %v354_v10, %v366_v29 }
 0x28b   :  { %7062 = vmatprep.mubr.bf16.mxu0 %v17103_v14  ;;  %v17228_v25 = vadd.f32 %v12586_v27, %v16764_v2  ;;  %9262 = vmatprep.mubr.bf16.mxu1 %v17219_v62  ;;  %v17239_v14 = vcombine.high %v378_v50, %v390_v20 }
 0x28d   :  { %v12587_v9 = vpop.f32.mrb[204].mxu1 }
 0x28e   :  { %v12588_v41 = vpop.f32.mrb[205].mxu1 }
 0x28f   :  { %v12589_v56 = vadd.f32 %v12588_v41, %v12587_v9  ;;  %v12590_v21 = vpop.f32.mrb[206].mxu1  ;;  %v14657_v9 = vld [vmem:[%s20658_s1 + $0x9e0] ss:$12 sps:$4 sm:$0xff]  }
 0x290   :  { %v12591_v2 = vpop.f32.mrb[207].mxu1 }
 0x291   :  { %v17242_v31 = vadd.f32 %v12589_v56, %v16778_v61  ;;  %v12592_v39 = vadd.f32 %v12591_v2, %v12590_v21  ;;  %v31_v61 = vld [vmem:[%s20659_s0 + $0x88] sm:$0xff] }
 0x292   :  { %7063 = vmatmul.mubr.bf16.gmra.mrb[40].mxu0 %v17133_v53  ;;  %9263 = vmatmul.mubr.bf16.gmra.mrb[56].mxu1 %v17237_v19  ;;  %v17257_v53 = vcombine.low %v378_v50, %v390_v20  ;;  %v14658_v2 = vld [vmem:[%s20658_s1 + $0x920] ss:$12 sps:$4 sm:$0xff]  }
 0x293   :  { %7072 = vmatprep.mubr.bf16.mxu0 %v17135_v38  ;;  %v17248_v35 = vadd.f32 %v12592_v39, %v16784_v52  ;;  %9270 = vmatprep.mubr.bf16.mxu1 %v17239_v14  ;;  %v17259_v38 = vcombine.high %v19_v40, %v31_v61 }
 0x295   :  { %v12593_v44 = vpop.f32.mrb[208].mxu1 }
 0x296   :  { %v12594_v63 = vpop.f32.mrb[209].mxu1 }
 0x297   :  { %v12595_v26 = vadd.f32 %v12594_v63, %v12593_v44  ;;  %v12596_v10 = vpop.f32.mrb[210].mxu1 }
 0x298   :  { %v12597_v52 = vpop.f32.mrb[211].mxu1 }
 0x299   :  { %v17262_v29 = vadd.f32 %v12595_v26, %v16798_v18  ;;  %v12598_v23 = vadd.f32 %v12597_v52, %v12596_v10  ;;  %v55_v18 = vld [vmem:[%s20659_s0 + $0x148] sm:$0xff]  ;;  %v14666_v26 = vld [vmem:[%s20658_s1 + $0x938] ss:$12 sps:$4 sm:$0xff]   ;;  %v14673_v52 = vld [vmem:[%s20658_s1 + $0xa10] ss:$12 sps:$4 sm:$0xff]  }
 0x29a   :  { %7073 = vmatmul.mubr.bf16.gmra.mrb[44].mxu0 %v17165_v24  ;;  %9271 = vmatmul.mubr.bf16.gmra.mrb[60].mxu1 %v17257_v53  ;;  %v17277_v24 = vcombine.low %v19_v40, %v31_v61  ;;  %v17309_v40 = vcombine.low %v43_v4, %v55_v18 }
 0x29b   :  { %7082 = vmatprep.mubr.bf16.mxu0 %v17167_v13  ;;  %v17268_v16 = vadd.f32 %v12598_v23, %v16804_v59  ;;  %9311 = vmatprep.mubr.bf16.mxu1 %v17259_v38  ;;  %v17279_v13 = vcombine.high %v43_v4, %v55_v18  ;;  %v14650_v59 = vld [vmem:[%s20658_s1 + $0x908] ss:$12 sps:$4 sm:$0xff]  }
 0x29d   :  { %v12599_v28 = vpop.f32.mrb[212].mxu1 }
 0x29e   :  { %v12600_v12 = vpop.f32.mrb[213].mxu1 }
 0x29f   :  { %v12601_v27 = vadd.f32 %v12600_v12, %v12599_v28  ;;  %v12602_v50 = vpop.f32.mrb[214].mxu1  ;;  %v14674_v28 = vld [vmem:[%s20658_s1 + $0x950] ss:$12 sps:$4 sm:$0xff]  }
 0x2a0   :  { %v12603_v20 = vpop.f32.mrb[215].mxu1 }
 0x2a1   :  { %v17288_v41 = vadd.f32 %v12601_v27, %v16824_v34  ;;  %v12604_v56 = vadd.f32 %v12603_v20, %v12602_v50  ;;  %v67_v34 = vld [vmem:[%s20659_s0 + $0x1a8] sm:$0xff] }
 0x2a2   :  { %7083 = vmatmul.mubr.bf16.gmra.mrb[48].mxu0 %v17197_v3  ;;  %9312 = vmatmul.mubr.bf16.vlgmr.msra.gmra.mrb[64].mxu1 %v17277_v24  ;;  %v79_v3 = vld [vmem:[%s20659_s0 + $0x208] sm:$0xff] }
 0x2a3   :  { %7092 = vmatprep.mubr.bf16.mxu0 %v17199_v0  ;;  %v17294_v21 = vadd.f32 %v12604_v56, %v16830_v36  ;;  %9319 = vmatprep.mubr.bf16.mxu1 %v17279_v13  ;;  %v14665_v36 = vld [vmem:[%s20658_s1 + $0x9f8] ss:$12 sps:$4 sm:$0xff]   ;;  %v17311_v63 = vcombine.high %v67_v34, %v79_v3  ;;  %v17341_v27 = vcombine.low %v67_v34, %v79_v3 }
 0x2a4   :  { %12890 = vmatpush3.bf16.msra.mxu1 %v14650_v59 }
 0x2a5   :  { %12891 = vmatprep.subr.bf16.mxu1 %v14657_v9  ;;  %v12605_v0 = vpop.f32.mrb[216].mxu1  ;;  %v14682_v9 = vld [vmem:[%s20658_s1 + $0x968] ss:$12 sps:$4 sm:$0xff]  }
 0x2a6   :  { %v12606_v39 = vpop.f32.mrb[217].mxu1 }
 0x2a7   :  { %v12607_v61 = vadd.f32 %v12606_v39, %v12605_v0  ;;  %v12608_v44 = vpop.f32.mrb[218].mxu1  ;;  %v14690_v0 = vld [vmem:[%s20658_s1 + $0x980] ss:$12 sps:$4 sm:$0xff]  }
 0x2a8   :  { %12892 = vmatpush3.bf16.msra.mxu1 %v14658_v2  ;;  %v12609_v10 = vpop.f32.mrb[219].mxu1  ;;  %v14689_v2 = vld [vmem:[%s20658_s1 + $0xa40] ss:$12 sps:$4 sm:$0xff]  }
 0x2a9   :  { %12893 = vmatprep.subr.bf16.mxu1 %v14665_v36  ;;  %v17320_v23 = vadd.f32 %v12607_v61, %v16856_v22  ;;  %v12610_v4 = vadd.f32 %v12609_v10, %v12608_v44  ;;  %v91_v22 = vld [vmem:[%s20659_s0 + $0x268] sm:$0xff] }
 0x2aa   :  { %7093 = vmatmul.mubr.bf16.gmra.mrb[52].mxu0 %v17217_v54  ;;  %9320 = vmatmul.mubr.bf16.gmra.mrb[68].mxu1 %v17309_v40  ;;  %v103_v54 = vld [vmem:[%s20659_s0 + $0x2c8] sm:$0xff] }
 0x2ab   :  { %7102 = vmatprep.mubr.bf16.mxu0 %v17219_v62  ;;  %v17326_v18 = vadd.f32 %v12610_v4, %v16862_v17  ;;  %9327 = vmatprep.mubr.bf16.mxu1 %v17311_v63  ;;  %v14681_v17 = vld [vmem:[%s20658_s1 + $0xa28] ss:$12 sps:$4 sm:$0xff]   ;;  %v17343_v20 = vcombine.high %v91_v22, %v103_v54  ;;  %v17373_v61 = vcombine.low %v91_v22, %v103_v54 }
 0x2ac   :  { %12894 = vmatpush3.bf16.msra.mxu1 %v14666_v26 }
 0x2ad   :  { %12895 = vmatprep.subr.bf16.mxu1 %v14673_v52  ;;  %v12611_v62 = vpop.f32.mrb[220].mxu1  ;;  %v14698_v52 = vld [vmem:[%s20658_s1 + $0x998] ss:$12 sps:$4 sm:$0xff]  }
 0x2ae   :  { %v12612_v12 = vpop.f32.mrb[221].mxu1 }
 0x2af   :  { %v12613_v50 = vadd.f32 %v12612_v12, %v12611_v62  ;;  %v12614_v59 = vpop.f32.mrb[222].mxu1  ;;  %v14700_v62 = vld [vmem:[%s20658_s1 + $0x9b0] ss:$12 sps:$4 sm:$0xff]  }
 0x2b0   :  { %12896 = vmatpush3.bf16.msra.mxu1 %v14674_v28  ;;  %v12615_v56 = vpop.f32.mrb[223].mxu1  ;;  %v14699_v28 = vld [vmem:[%s20658_s1 + $0xa70] ss:$12 sps:$4 sm:$0xff]  }
 0x2b1   :  { %12897 = vmatprep.subr.bf16.mxu1 %v14681_v17  ;;  %v17352_v36 = vadd.f32 %v12613_v50, %v16888_v46  ;;  %v12616_v34 = vadd.f32 %v12615_v56, %v12614_v59  ;;  %v115_v46 = vld [vmem:[%s20659_s0 + $0x328] sm:$0xff] }
 0x2b2   :  { %7103 = vmatmul.mubr.bf16.gmra.mrb[56].mxu0 %v17237_v19  ;;  %9328 = vmatmul.mubr.bf16.gmra.mrb[72].mxu1 %v17341_v27  ;;  %v127_v19 = vld [vmem:[%s20659_s0 + $0x388] sm:$0xff] }
 0x2b3   :  { %7112 = vmatprep.mubr.bf16.mxu0 %v17239_v14  ;;  %v17358_v3 = vadd.f32 %v12616_v34, %v16894_v32  ;;  %9335 = vmatprep.mubr.bf16.mxu1 %v17343_v20  ;;  %v14697_v32 = vld [vmem:[%s20658_s1 + $0xa58] ss:$12 sps:$4 sm:$0xff]   ;;  %v17375_v10 = vcombine.high %v115_v46, %v127_v19  ;;  %v14651_v50 = vld [vmem:[%s20658_s1 + $0x900] ss:$12 sps:$4 sm:$0xff]   ;;  %v14656_v34 = vld [vmem:[%s20658_s1 + $0x91c] ss:$12 sps:$4 sm:$0xff]  }
 0x2b4   :  { %12898 = vmatpush3.bf16.msra.mxu1 %v14682_v9 }
 0x2b5   :  { %12899 = vmatprep.subr.bf16.mxu1 %v14689_v2  ;;  %v12617_v14 = vpop.f32.mrb[224].mxu1 }
 0x2b6   :  { %v12618_v39 = vpop.f32.mrb[225].mxu1 }
 0x2b7   :  { %v12619_v44 = vadd.f32 %v12618_v39, %v12617_v14  ;;  %v12620_v26 = vpop.f32.mrb[226].mxu1  ;;  %v175_v39 = vld [vmem:[%s20659_s0 + $0x508] sm:$0xff] }
 0x2b8   :  { %12900 = vmatpush3.bf16.msra.mxu1 %v14690_v0  ;;  %v12621_v4 = vpop.f32.mrb[227].mxu1 }
 0x2b9   :  { %12901 = vmatprep.subr.bf16.mxu1 %v14697_v32  ;;  %v17384_v17 = vadd.f32 %v12619_v44, %v16920_v47  ;;  %v12622_v22 = vadd.f32 %v12621_v4, %v12620_v26  ;;  %v139_v47 = vld [vmem:[%s20659_s0 + $0x3e8] sm:$0xff] }
 0x2ba   :  { %7113 = vmatmul.mubr.bf16.gmra.mrb[60].mxu0 %v17257_v53  ;;  %9336 = vmatmul.mubr.bf16.gmra.mrb[76].mxu1 %v17373_v61  ;;  %v151_v53 = vld [vmem:[%s20659_s0 + $0x448] sm:$0xff] }
 0x2bb   :  { %7155 = vmatprep.mubr.bf16.mxu0 %v17259_v38  ;;  %v17390_v54 = vadd.f32 %v12622_v22, %v16926_v60  ;;  %9343 = vmatprep.mubr.bf16.mxu1 %v17375_v10  ;;  %v17402_v60 = vcombine.low %v115_v46, %v127_v19  ;;  %v17407_v56 = vcombine.high %v139_v47, %v151_v53  ;;  %v14713_v46 = vld [vmem:[%s20658_s1 + $0xb48] ss:$12 sps:$4 sm:$0xff]   ;;  %v14654_v19 = vld [vmem:[%s20658_s1 + $0x918] ss:$12 sps:$4 sm:$0xff]  }
 0x2bc   :  { %12902 = vmatpush3.bf16.msra.mxu1 %v14698_v52  ;;  %v17437_v26 = vcombine.low %v139_v47, %v151_v53 }
 0x2bd   :  { %12903 = vmatprep.subr.bf16.mxu1 %v14699_v28  ;;  %v12623_v38 = vpop.f32.mrb[228].mxu1  ;;  %v14659_v28 = vld [vmem:[%s20658_s1 + $0x930] ss:$12 sps:$4 sm:$0xff]  }
 0x2be   :  { %v12624_v12 = vpop.f32.mrb[229].mxu1 }
 0x2bf   :  { %v12625_v59 = vadd.f32 %v12624_v12, %v12623_v38  ;;  %v12626_v9 = vpop.f32.mrb[230].mxu1  ;;  %v14662_v12 = vld [vmem:[%s20658_s1 + $0x948] ss:$12 sps:$4 sm:$0xff]  }
 0x2c0   :  { %12904 = vmatpush3.bf16.msra.mxu1 %v14700_v62  ;;  %v12627_v2 = vpop.f32.mrb[231].mxu1  ;;  %v14664_v62 = vld [vmem:[%s20658_s1 + $0x94c] ss:$12 sps:$4 sm:$0xff]  }
 0x2c1   :  { %v17413_v0 = vadd.f32 %v12625_v59, %v16949_v42  ;;  %v12628_v32 = vadd.f32 %v12627_v2, %v12626_v9  ;;  %v14661_v42 = vld [vmem:[%s20658_s1 + $0x934] ss:$12 sps:$4 sm:$0xff]   ;;  %13001 = vmatprep.subr.bf16.mxu1 %v14713_v46 }
 0x2c2   :  { %7156 = vmatmul.mubr.bf16.vlgmr.msra.gmra.mrb[0].mxu0 %v17277_v24  ;;  %9344 = vmatmul.mubr.bf16.gmra.mrb[80].mxu1 %v17402_v60  ;;  %v163_v24 = vld [vmem:[%s20659_s0 + $0x4a8] sm:$0xff] }
 0x2c3   :  { %7317 = vmatpush1.bf16.msra.mxu0 %v14651_v50  ;;  %v17424_v14 = vadd.f32 %v12628_v32, %v16960_v48  ;;  %7165 = vmatprep.mubr.bf16.mxu0 %v17279_v13  ;;  %v17439_v4 = vcombine.high %v163_v24, %v175_v39  ;;  %v17469_v59 = vcombine.low %v163_v24, %v175_v39  ;;  %v14667_v32 = vld [vmem:[%s20658_s1 + $0x960] ss:$12 sps:$4 sm:$0xff]  }
 0x2c4   :  { %9351 = vmatprep.mubr.bf16.mxu1 %v17407_v56  ;;  %7318 = vmatprep.subr.bf16.mxu0 %v14656_v34 }
 0x2c5   :  { %v12629_v48 = vpop.f32.mrb[232].mxu1 }
 0x2c6   :  { %v12630_v44 = vpop.f32.mrb[233].mxu1 }
 0x2c7   :  { %7319 = vmatpush1.bf16.msra.mxu0 %v14654_v19  ;;  %v12631_v13 = vadd.f32 %v12630_v44, %v12629_v48  ;;  %v12632_v52 = vpop.f32.mrb[234].mxu1  ;;  %v14672_v19 = vld [vmem:[%s20658_s1 + $0x97c] ss:$12 sps:$4 sm:$0xff]   ;;  %v14670_v48 = vld [vmem:[%s20658_s1 + $0x978] ss:$12 sps:$4 sm:$0xff]  }
 0x2c8   :  { %7320 = vmatprep.subr.bf16.mxu0 %v14661_v42  ;;  %v12633_v22 = vpop.f32.mrb[235].mxu1 }
 0x2c9   :  { %v17448_v38 = vadd.f32 %v12631_v13, %v16984_v57  ;;  %v12634_v47 = vadd.f32 %v12633_v22, %v12632_v52  ;;  %v187_v57 = vld [vmem:[%s20659_s0 + $0x568] sm:$0xff] }
 0x2ca   :  { %7166 = vmatmul.mubr.bf16.gmra.mrb[4].mxu0 %v17309_v40  ;;  %9352 = vmatmul.mubr.bf16.gmra.mrb[84].mxu1 %v17437_v26  ;;  %v199_v40 = vld [vmem:[%s20659_s0 + $0x5c8] sm:$0xff] }
 0x2cb   :  { %7175 = vmatprep.mubr.bf16.mxu0 %v17311_v63  ;;  %v17454_v53 = vadd.f32 %v12634_v47, %v16990_v30  ;;  %9359 = vmatprep.mubr.bf16.mxu1 %v17439_v4  ;;  %v14669_v30 = vld [vmem:[%s20658_s1 + $0x964] ss:$12 sps:$4 sm:$0xff]   ;;  %v17471_v34 = vcombine.high %v187_v57, %v199_v40  ;;  %v17501_v13 = vcombine.low %v187_v57, %v199_v40 }
 0x2cc   :  { %7321 = vmatpush1.bf16.msra.mxu0 %v14659_v28 }
 0x2cd   :  { %7322 = vmatprep.subr.bf16.mxu0 %v14664_v62  ;;  %v12635_v63 = vpop.f32.mrb[236].mxu1  ;;  %v14675_v62 = vld [vmem:[%s20658_s1 + $0x990] ss:$12 sps:$4 sm:$0xff]  }
 0x2ce   :  { %v12636_v50 = vpop.f32.mrb[237].mxu1 }
 0x2cf   :  { %v12637_v9 = vadd.f32 %v12636_v50, %v12635_v63  ;;  %v12638_v2 = vpop.f32.mrb[238].mxu1  ;;  %v14678_v63 = vld [vmem:[%s20658_s1 + $0x9a8] ss:$12 sps:$4 sm:$0xff]  }
 0x2d0   :  { %7323 = vmatpush1.bf16.msra.mxu0 %v14662_v12  ;;  %v12639_v46 = vpop.f32.mrb[239].mxu1  ;;  %v14680_v12 = vld [vmem:[%s20658_s1 + $0x9ac] ss:$12 sps:$4 sm:$0xff]  }
 0x2d1   :  { %7324 = vmatprep.subr.bf16.mxu0 %v14669_v30  ;;  %v17480_v42 = vadd.f32 %v12637_v9, %v17016_v45  ;;  %v12640_v24 = vadd.f32 %v12639_v46, %v12638_v2  ;;  %v211_v45 = vld [vmem:[%s20659_s0 + $0x628] sm:$0xff] }
 0x2d2   :  { %7176 = vmatmul.mubr.bf16.gmra.mrb[8].mxu0 %v17341_v27  ;;  %9360 = vmatmul.mubr.bf16.gmra.mrb[88].mxu1 %v17469_v59  ;;  %v223_v27 = vld [vmem:[%s20659_s0 + $0x688] sm:$0xff] }
 0x2d3   :  { %7185 = vmatprep.mubr.bf16.mxu0 %v17343_v20  ;;  %v17486_v39 = vadd.f32 %v12640_v24, %v17022_v11  ;;  %9367 = vmatprep.mubr.bf16.mxu1 %v17471_v34  ;;  %v14677_v11 = vld [vmem:[%s20658_s1 + $0x994] ss:$12 sps:$4 sm:$0xff]   ;;  %v17503_v22 = vcombine.high %v211_v45, %v223_v27  ;;  %v17533_v9 = vcombine.low %v211_v45, %v223_v27 }
 0x2d4   :  { %7325 = vmatpush1.bf16.msra.mxu0 %v14667_v32 }
 0x2d5   :  { %7326 = vmatprep.subr.bf16.mxu0 %v14672_v19  ;;  %v12641_v20 = vpop.f32.mrb[240].mxu1  ;;  %v14683_v19 = vld [vmem:[%s20658_s1 + $0x9c0] ss:$12 sps:$4 sm:$0xff]  }
 0x2d6   :  { %v12642_v44 = vpop.f32.mrb[241].mxu1 }
 0x2d7   :  { %v12643_v52 = vadd.f32 %v12642_v44, %v12641_v20  ;;  %v12644_v28 = vpop.f32.mrb[242].mxu1  ;;  %v14686_v20 = vld [vmem:[%s20658_s1 + $0x9d8] ss:$12 sps:$4 sm:$0xff]  }
 0x2d8   :  { %7327 = vmatpush1.bf16.msra.mxu0 %v14670_v48  ;;  %v12645_v47 = vpop.f32.mrb[243].mxu1  ;;  %v14688_v48 = vld [vmem:[%s20658_s1 + $0x9dc] ss:$12 sps:$4 sm:$0xff]  }
 0x2d9   :  { %7328 = vmatprep.subr.bf16.mxu0 %v14677_v11  ;;  %v17512_v30 = vadd.f32 %v12643_v52, %v17048_v55  ;;  %v12646_v57 = vadd.f32 %v12645_v47, %v12644_v28  ;;  %v235_v55 = vld [vmem:[%s20659_s0 + $0x6e8] sm:$0xff] }
 0x2da   :  { %7186 = vmatmul.mubr.bf16.gmra.mrb[12].mxu0 %v17373_v61  ;;  %9368 = vmatmul.mubr.bf16.gmra.mrb[92].mxu1 %v17501_v13  ;;  %v247_v61 = vld [vmem:[%s20659_s0 + $0x748] sm:$0xff] }
 0x2db   :  { %7195 = vmatprep.mubr.bf16.mxu0 %v17375_v10  ;;  %v17518_v40 = vadd.f32 %v12646_v57, %v17054_v43  ;;  %9375 = vmatprep.mubr.bf16.mxu1 %v17503_v22  ;;  %v14685_v43 = vld [vmem:[%s20658_s1 + $0x9c4] ss:$12 sps:$4 sm:$0xff]   ;;  %v17535_v46 = vcombine.high %v235_v55, %v247_v61  ;;  %v17565_v52 = vcombine.low %v235_v55, %v247_v61 }
 0x2dc   :  { %7329 = vmatpush1.bf16.msra.mxu0 %v14675_v62 }
 0x2dd   :  { %7330 = vmatprep.subr.bf16.mxu0 %v14680_v12  ;;  %v12647_v10 = vpop.f32.mrb[244].mxu1  ;;  %v14691_v12 = vld [vmem:[%s20658_s1 + $0x9f0] ss:$12 sps:$4 sm:$0xff]  }
 0x2de   :  { %v12648_v50 = vpop.f32.mrb[245].mxu1 }
 0x2df   :  { %v12649_v2 = vadd.f32 %v12648_v50, %v12647_v10  ;;  %v12650_v32 = vpop.f32.mrb[246].mxu1  ;;  %v14694_v10 = vld [vmem:[%s20658_s1 + $0xa08] ss:$12 sps:$4 sm:$0xff]  }
 0x2e0   :  { %7331 = vmatpush1.bf16.msra.mxu0 %v14678_v63  ;;  %v12651_v24 = vpop.f32.mrb[247].mxu1  ;;  %v14696_v63 = vld [vmem:[%s20658_s1 + $0xa0c] ss:$12 sps:$4 sm:$0xff]  }
 0x2e1   :  { %7332 = vmatprep.subr.bf16.mxu0 %v14685_v43  ;;  %v17544_v11 = vadd.f32 %v12649_v2, %v17080_v1  ;;  %v12652_v45 = vadd.f32 %v12651_v24, %v12650_v32  ;;  %v259_v1 = vld [vmem:[%s20659_s0 + $0x7a8] sm:$0xff] }
 0x2e2   :  { %7196 = vmatmul.mubr.bf16.gmra.mrb[16].mxu0 %v17402_v60  ;;  %9376 = vmatmul.mubr.bf16.gmra.mrb[96].mxu1 %v17533_v9  ;;  %v271_v60 = vld [vmem:[%s20659_s0 + $0x808] sm:$0xff] }
 0x2e3   :  { %7205 = vmatprep.mubr.bf16.mxu0 %v17407_v56  ;;  %v17550_v27 = vadd.f32 %v12652_v45, %v17086_v15  ;;  %9383 = vmatprep.mubr.bf16.mxu1 %v17535_v46  ;;  %v14693_v15 = vld [vmem:[%s20658_s1 + $0x9f4] ss:$12 sps:$4 sm:$0xff]   ;;  %v17567_v47 = vcombine.high %v259_v1, %v271_v60  ;;  %v17597_v2 = vcombine.low %v259_v1, %v271_v60 }
 0x2e4   :  { %7333 = vmatpush1.bf16.msra.mxu0 %v14683_v19 }
 0x2e5   :  { %7334 = vmatprep.subr.bf16.mxu0 %v14688_v48  ;;  %v12653_v56 = vpop.f32.mrb[248].mxu1  ;;  %v14701_v48 = vld [vmem:[%s20658_s1 + $0xa20] ss:$12 sps:$4 sm:$0xff]  }
 0x2e6   :  { %v12654_v44 = vpop.f32.mrb[249].mxu1 }
 0x2e7   :  { %v12655_v28 = vadd.f32 %v12654_v44, %v12653_v56  ;;  %v12656_v62 = vpop.f32.mrb[250].mxu1  ;;  %v14704_v56 = vld [vmem:[%s20658_s1 + $0xa38] ss:$12 sps:$4 sm:$0xff]  }
 0x2e8   :  { %7335 = vmatpush1.bf16.msra.mxu0 %v14686_v20  ;;  %v12657_v57 = vpop.f32.mrb[251].mxu1  ;;  %v14706_v20 = vld [vmem:[%s20658_s1 + $0xa3c] ss:$12 sps:$4 sm:$0xff]  }
 0x2e9   :  { %7336 = vmatprep.subr.bf16.mxu0 %v14693_v15  ;;  %v17576_v43 = vadd.f32 %v12655_v28, %v17112_v7  ;;  %v12658_v55 = vadd.f32 %v12657_v57, %v12656_v62  ;;  %v283_v7 = vld [vmem:[%s20659_s0 + $0x868] sm:$0xff] }
 0x2ea   :  { %7206 = vmatmul.mubr.bf16.gmra.mrb[20].mxu0 %v17437_v26  ;;  %9384 = vmatmul.mubr.bf16.gmra.mrb[100].mxu1 %v17565_v52  ;;  %v295_v26 = vld [vmem:[%s20659_s0 + $0x8c8] sm:$0xff] }
 0x2eb   :  { %7215 = vmatprep.mubr.bf16.mxu0 %v17439_v4  ;;  %v17582_v61 = vadd.f32 %v12658_v55, %v17118_v8  ;;  %9391 = vmatprep.mubr.bf16.mxu1 %v17567_v47  ;;  %v14703_v8 = vld [vmem:[%s20658_s1 + $0xa24] ss:$12 sps:$4 sm:$0xff]   ;;  %v17599_v24 = vcombine.high %v283_v7, %v295_v26  ;;  %v17629_v28 = vcombine.low %v283_v7, %v295_v26 }
 0x2ec   :  { %7337 = vmatpush1.bf16.msra.mxu0 %v14691_v12 }
 0x2ed   :  { %7338 = vmatprep.subr.bf16.mxu0 %v14696_v63  ;;  %v12659_v4 = vpop.f32.mrb[252].mxu1  ;;  %v14707_v63 = vld [vmem:[%s20658_s1 + $0xa50] ss:$12 sps:$4 sm:$0xff]  }
 0x2ee   :  { %v12660_v50 = vpop.f32.mrb[253].mxu1 }
 0x2ef   :  { %v12661_v32 = vadd.f32 %v12660_v50, %v12659_v4  ;;  %v12662_v19 = vpop.f32.mrb[254].mxu1  ;;  %v14710_v4 = vld [vmem:[%s20658_s1 + $0xa68] ss:$12 sps:$4 sm:$0xff]  }
 0x2f0   :  { %7339 = vmatpush1.bf16.msra.mxu0 %v14694_v10  ;;  %v12663_v45 = vpop.f32.mrb[255].mxu1  ;;  %v14712_v10 = vld [vmem:[%s20658_s1 + $0xa6c] ss:$12 sps:$4 sm:$0xff]  }
 0x2f1   :  { %7340 = vmatprep.subr.bf16.mxu0 %v14703_v8  ;;  %v17608_v15 = vadd.f32 %v12661_v32, %v17144_v49  ;;  %v12664_v1 = vadd.f32 %v12663_v45, %v12662_v19  ;;  %v307_v49 = vld [vmem:[%s20659_s0 + $0x928] sm:$0xff] }
 0x2f2   :  { %7216 = vmatmul.mubr.bf16.gmra.mrb[24].mxu0 %v17469_v59  ;;  %9392 = vmatmul.mubr.bf16.gmra.mrb[104].mxu1 %v17597_v2  ;;  %v319_v59 = vld [vmem:[%s20659_s0 + $0x988] sm:$0xff] }
 0x2f3   :  { %7225 = vmatprep.mubr.bf16.mxu0 %v17471_v34  ;;  %v17614_v60 = vadd.f32 %v12664_v1, %v17150_v58  ;;  %9399 = vmatprep.mubr.bf16.mxu1 %v17599_v24  ;;  %v14709_v58 = vld [vmem:[%s20658_s1 + $0xa54] ss:$12 sps:$4 sm:$0xff]   ;;  %v17631_v57 = vcombine.high %v307_v49, %v319_v59  ;;  %v17661_v32 = vcombine.low %v307_v49, %v319_v59  ;;  %v355_v59 = vld [vmem:[%s20659_s0 + $0xaa8] sm:$0xff] }
 0x2f4   :  { %7341 = vmatpush1.bf16.msra.mxu0 %v14701_v48 }
 0x2f5   :  { %7342 = vmatprep.subr.bf16.mxu0 %v14706_v20  ;;  %v12681_v34 = vpop.f32.mrb[0].mxu1 }
 0x2f6   :  { %v12682_v44 = vpop.f32.mrb[1].mxu1 }
 0x2f7   :  { %v12683_v62 = vadd.f32 %v12682_v44, %v12681_v34  ;;  %v12684_v12 = vpop.f32.mrb[2].mxu1 }
 0x2f8   :  { %7343 = vmatpush1.bf16.msra.mxu0 %v14704_v56  ;;  %v12685_v55 = vpop.f32.mrb[3].mxu1 }
 0x2f9   :  { %7344 = vmatprep.subr.bf16.mxu0 %v14709_v58  ;;  %v17640_v8 = vadd.f32 %v12683_v62, %v17176_v37  ;;  %v12686_v7 = vadd.f32 %v12685_v55, %v12684_v12  ;;  %v331_v37 = vld [vmem:[%s20659_s0 + $0x9e8] sm:$0xff] }
 0x2fa   :  { %7226 = vmatmul.mubr.bf16.gmra.mrb[28].mxu0 %v17501_v13  ;;  %9400 = vmatmul.mubr.bf16.gmra.mrb[108].mxu1 %v17629_v28  ;;  %v343_v13 = vld [vmem:[%s20659_s0 + $0xa48] sm:$0xff] }
 0x2fb   :  { %7235 = vmatprep.mubr.bf16.mxu0 %v17503_v22  ;;  %v17646_v26 = vadd.f32 %v12686_v7, %v17182_v5  ;;  %9407 = vmatprep.mubr.bf16.mxu1 %v17631_v57  ;;  %v14717_v5 = vld [vmem:[%s20658_s1 + $0xa84] ss:$12 sps:$4 sm:$0xff]   ;;  %v17663_v45 = vcombine.high %v331_v37, %v343_v13 }
 0x2fc   :  { %7345 = vmatpush1.bf16.msra.mxu0 %v14707_v63 }
 0x2fd   :  { %7346 = vmatprep.subr.bf16.mxu0 %v14712_v10  ;;  %v12687_v22 = vpop.f32.mrb[4].mxu1  ;;  %v379_v10 = vld [vmem:[%s20659_s0 + $0xb68] sm:$0xff] }
 0x2fe   :  { %v12688_v50 = vpop.f32.mrb[5].mxu1 }
 0x2ff   :  { %v12689_v19 = vadd.f32 %v12688_v50, %v12687_v22  ;;  %v12690_v48 = vpop.f32.mrb[6].mxu1 }
 0x300   :  { %7347 = vmatpush1.bf16.msra.mxu0 %v14710_v4  ;;  %v12691_v20 = vpop.f32.mrb[7].mxu1 }
 0x301   :  { %7509 = vmatprep.subr.bf16.mxu0 %v14717_v5  ;;  %v17666_v1 = vadd.f32 %v12689_v19, %v17202_v51  ;;  %v12692_v56 = vadd.f32 %v12691_v20, %v12690_v48  ;;  %v367_v51 = vld [vmem:[%s20659_s0 + $0xb08] sm:$0xff]  ;;  %v20_v19 = vld [vmem:[%s20659_s0 + $0x30] sm:$0xff] }
 0x302   :  { %7236 = vmatmul.mubr.bf16.gmra.mrb[32].mxu0 %v17533_v9  ;;  %9408 = vmatmul.mubr.bf16.gmra.mrb[112].mxu1 %v17661_v32  ;;  %v17681_v9 = vcombine.low %v331_v37, %v343_v13 }
 0x303   :  { %7245 = vmatprep.mubr.bf16.mxu0 %v17535_v46  ;;  %v17672_v49 = vadd.f32 %v12692_v56, %v17208_v33  ;;  %9415 = vmatprep.mubr.bf16.mxu1 %v17663_v45  ;;  %v17683_v46 = vcombine.high %v355_v59, %v367_v51 }
 0x305   :  { %v12693_v58 = vpop.f32.mrb[8].mxu1 }
 0x306   :  { %v12694_v34 = vpop.f32.mrb[9].mxu1 }
 0x307   :  { %v12695_v44 = vadd.f32 %v12694_v34, %v12693_v58  ;;  %v12696_v62 = vpop.f32.mrb[10].mxu1 }
 0x308   :  { %v12697_v33 = vpop.f32.mrb[11].mxu1 }
 0x309   :  { %v17686_v12 = vadd.f32 %v12695_v44, %v17222_v6  ;;  %v12698_v63 = vadd.f32 %v12697_v33, %v12696_v62  ;;  %v391_v6 = vld [vmem:[%s20659_s0 + $0xbc8] sm:$0xff]  ;;  %v44_v44 = vld [vmem:[%s20659_s0 + $0xf0] sm:$0xff] }
 0x30a   :  { %7246 = vmatmul.mubr.bf16.gmra.mrb[36].mxu0 %v17565_v52  ;;  %9416 = vmatmul.mubr.bf16.gmra.mrb[116].mxu1 %v17681_v9  ;;  %v17701_v52 = vcombine.low %v355_v59, %v367_v51 }
 0x30b   :  { %7255 = vmatprep.mubr.bf16.mxu0 %v17567_v47  ;;  %v17692_v55 = vadd.f32 %v12698_v63, %v17228_v25  ;;  %9423 = vmatprep.mubr.bf16.mxu1 %v17683_v46  ;;  %v17703_v47 = vcombine.high %v379_v10, %v391_v6 }
 0x30d   :  { %v12699_v7 = vpop.f32.mrb[12].mxu1 }
 0x30e   :  { %v12700_v4 = vpop.f32.mrb[13].mxu1 }
 0x30f   :  { %v12701_v37 = vadd.f32 %v12700_v4, %v12699_v7  ;;  %v12702_v13 = vpop.f32.mrb[14].mxu1  ;;  %v14721_v7 = vld [vmem:[%s20658_s1 + $0xb60] ss:$12 sps:$4 sm:$0xff]  }
 0x310   :  { %v12703_v25 = vpop.f32.mrb[15].mxu1 }
 0x311   :  { %v17706_v5 = vadd.f32 %v12701_v37, %v17242_v31  ;;  %v12704_v22 = vadd.f32 %v12703_v25, %v12702_v13  ;;  %v32_v31 = vld [vmem:[%s20659_s0 + $0x90] sm:$0xff]  ;;  %v14722_v25 = vld [vmem:[%s20658_s1 + $0xaa0] ss:$12 sps:$4 sm:$0xff]  }
 0x312   :  { %7256 = vmatmul.mubr.bf16.gmra.mrb[40].mxu0 %v17597_v2  ;;  %9424 = vmatmul.mubr.bf16.gmra.mrb[120].mxu1 %v17701_v52  ;;  %v17721_v2 = vcombine.low %v379_v10, %v391_v6 }
 0x313   :  { %7265 = vmatprep.mubr.bf16.mxu0 %v17599_v24  ;;  %v17712_v50 = vadd.f32 %v12704_v22, %v17248_v35  ;;  %9431 = vmatprep.mubr.bf16.mxu1 %v17703_v47  ;;  %v17723_v24 = vcombine.high %v20_v19, %v32_v31 }
 0x315   :  { %v12705_v48 = vpop.f32.mrb[16].mxu1 }
 0x316   :  { %v12706_v20 = vpop.f32.mrb[17].mxu1 }
 0x317   :  { %v12707_v56 = vadd.f32 %v12706_v20, %v12705_v48  ;;  %v12708_v59 = vpop.f32.mrb[18].mxu1 }
 0x318   :  { %v12709_v35 = vpop.f32.mrb[19].mxu1 }
 0x319   :  { %v17726_v51 = vadd.f32 %v12707_v56, %v17262_v29  ;;  %v12710_v58 = vadd.f32 %v12709_v35, %v12708_v59  ;;  %v56_v29 = vld [vmem:[%s20659_s0 + $0x150] sm:$0xff]  ;;  %v14730_v56 = vld [vmem:[%s20658_s1 + $0xab8] ss:$12 sps:$4 sm:$0xff]  }
 0x31a   :  { %7266 = vmatmul.mubr.bf16.gmra.mrb[44].mxu0 %v17629_v28  ;;  %9432 = vmatmul.mubr.bf16.gmra.mrb[124].mxu1 %v17721_v2  ;;  %v17741_v28 = vcombine.low %v20_v19, %v32_v31  ;;  %v17773_v19 = vcombine.low %v44_v44, %v56_v29  ;;  %v14737_v35 = vld [vmem:[%s20658_s1 + $0xb90] ss:$12 sps:$4 sm:$0xff]  }
 0x31b   :  { %7275 = vmatprep.mubr.bf16.mxu0 %v17631_v57  ;;  %v17732_v34 = vadd.f32 %v12710_v58, %v17268_v16  ;;  %9472 = vmatprep.mubr.bf16.mxu1 %v17723_v24  ;;  %v17743_v57 = vcombine.high %v44_v44, %v56_v29  ;;  %v14714_v16 = vld [vmem:[%s20658_s1 + $0xa88] ss:$12 sps:$4 sm:$0xff]  }
 0x31d   :  { %v12711_v62 = vpop.f32.mrb[20].mxu1 }
 0x31e   :  { %v12712_v33 = vpop.f32.mrb[21].mxu1 }
 0x31f   :  { %v12713_v63 = vadd.f32 %v12712_v33, %v12711_v62  ;;  %v12714_v10 = vpop.f32.mrb[22].mxu1  ;;  %v14738_v62 = vld [vmem:[%s20658_s1 + $0xad0] ss:$12 sps:$4 sm:$0xff]  }
 0x320   :  { %v12715_v6 = vpop.f32.mrb[23].mxu1 }
 0x321   :  { %v17752_v4 = vadd.f32 %v12713_v63, %v17288_v41  ;;  %v12716_v37 = vadd.f32 %v12715_v6, %v12714_v10  ;;  %v68_v41 = vld [vmem:[%s20659_s0 + $0x1b0] sm:$0xff] }
 0x322   :  { %7276 = vmatmul.mubr.bf16.gmra.mrb[48].mxu0 %v17661_v32  ;;  %9473 = vmatmul.mubr.bf16.vlgmr.msra.gmra.mrb[128].mxu1 %v17741_v28  ;;  %v80_v32 = vld [vmem:[%s20659_s0 + $0x210] sm:$0xff] }
 0x323   :  { %7285 = vmatprep.mubr.bf16.mxu0 %v17663_v45  ;;  %v17758_v13 = vadd.f32 %v12716_v37, %v17294_v21  ;;  %9480 = vmatprep.mubr.bf16.mxu1 %v17743_v57  ;;  %v14729_v21 = vld [vmem:[%s20658_s1 + $0xb78] ss:$12 sps:$4 sm:$0xff]   ;;  %v17775_v20 = vcombine.high %v68_v41, %v80_v32  ;;  %v17805_v63 = vcombine.low %v68_v41, %v80_v32 }
 0x324   :  { %13002 = vmatpush3.bf16.msra.mxu1 %v14714_v16 }
 0x325   :  { %13003 = vmatprep.subr.bf16.mxu1 %v14721_v7  ;;  %v12717_v45 = vpop.f32.mrb[24].mxu1  ;;  %v14746_v7 = vld [vmem:[%s20658_s1 + $0xae8] ss:$12 sps:$4 sm:$0xff]  }
 0x326   :  { %v12718_v22 = vpop.f32.mrb[25].mxu1 }
 0x327   :  { %v12719_v31 = vadd.f32 %v12718_v22, %v12717_v45  ;;  %v12720_v48 = vpop.f32.mrb[26].mxu1  ;;  %v14754_v45 = vld [vmem:[%s20658_s1 + $0xb00] ss:$12 sps:$4 sm:$0xff]  }
 0x328   :  { %13004 = vmatpush3.bf16.msra.mxu1 %v14722_v25  ;;  %v12721_v59 = vpop.f32.mrb[27].mxu1  ;;  %v14753_v25 = vld [vmem:[%s20658_s1 + $0xbc0] ss:$12 sps:$4 sm:$0xff]  }
 0x329   :  { %13005 = vmatprep.subr.bf16.mxu1 %v14729_v21  ;;  %v17784_v58 = vadd.f32 %v12719_v31, %v17320_v23  ;;  %v12722_v44 = vadd.f32 %v12721_v59, %v12720_v48  ;;  %v92_v23 = vld [vmem:[%s20659_s0 + $0x270] sm:$0xff] }
 0x32a   :  { %7286 = vmatmul.mubr.bf16.gmra.mrb[52].mxu0 %v17681_v9  ;;  %9481 = vmatmul.mubr.bf16.gmra.mrb[132].mxu1 %v17773_v19  ;;  %v104_v9 = vld [vmem:[%s20659_s0 + $0x2d0] sm:$0xff] }
 0x32b   :  { %7295 = vmatprep.mubr.bf16.mxu0 %v17683_v46  ;;  %v17790_v29 = vadd.f32 %v12722_v44, %v17326_v18  ;;  %9488 = vmatprep.mubr.bf16.mxu1 %v17775_v20  ;;  %v14745_v18 = vld [vmem:[%s20658_s1 + $0xba8] ss:$12 sps:$4 sm:$0xff]   ;;  %v17807_v6 = vcombine.high %v92_v23, %v104_v9  ;;  %v17837_v31 = vcombine.low %v92_v23, %v104_v9 }
 0x32c   :  { %13006 = vmatpush3.bf16.msra.mxu1 %v14730_v56 }
 0x32d   :  { %13007 = vmatprep.subr.bf16.mxu1 %v14737_v35  ;;  %v12723_v46 = vpop.f32.mrb[28].mxu1  ;;  %v14762_v35 = vld [vmem:[%s20658_s1 + $0xb18] ss:$12 sps:$4 sm:$0xff]  }
 0x32e   :  { %v12724_v33 = vpop.f32.mrb[29].mxu1 }
 0x32f   :  { %v12725_v10 = vadd.f32 %v12724_v33, %v12723_v46  ;;  %v12726_v16 = vpop.f32.mrb[30].mxu1  ;;  %v14764_v46 = vld [vmem:[%s20658_s1 + $0xb30] ss:$12 sps:$4 sm:$0xff]  }
 0x330   :  { %13008 = vmatpush3.bf16.msra.mxu1 %v14738_v62  ;;  %v12727_v37 = vpop.f32.mrb[31].mxu1  ;;  %v14763_v62 = vld [vmem:[%s20658_s1 + $0xbf0] ss:$12 sps:$4 sm:$0xff]  }
 0x331   :  { %13009 = vmatprep.subr.bf16.mxu1 %v14745_v18  ;;  %v17816_v21 = vadd.f32 %v12725_v10, %v17352_v36  ;;  %v12728_v41 = vadd.f32 %v12727_v37, %v12726_v16  ;;  %v116_v36 = vld [vmem:[%s20659_s0 + $0x330] sm:$0xff]  ;;  %v14715_v10 = vld [vmem:[%s20658_s1 + $0xa80] ss:$12 sps:$4 sm:$0xff]  }
 0x332   :  { %7296 = vmatmul.mubr.bf16.gmra.mrb[56].mxu0 %v17701_v52  ;;  %9489 = vmatmul.mubr.bf16.gmra.mrb[136].mxu1 %v17805_v63  ;;  %v128_v52 = vld [vmem:[%s20659_s0 + $0x390] sm:$0xff] }
 0x333   :  { %7305 = vmatprep.mubr.bf16.mxu0 %v17703_v47  ;;  %v17822_v32 = vadd.f32 %v12728_v41, %v17358_v3  ;;  %9496 = vmatprep.mubr.bf16.mxu1 %v17807_v6  ;;  %v14761_v3 = vld [vmem:[%s20658_s1 + $0xbd8] ss:$12 sps:$4 sm:$0xff]   ;;  %v17839_v59 = vcombine.high %v116_v36, %v128_v52  ;;  %v14720_v41 = vld [vmem:[%s20658_s1 + $0xa9c] ss:$12 sps:$4 sm:$0xff]  }
 0x334   :  { %13010 = vmatpush3.bf16.msra.mxu1 %v14746_v7 }
 0x335   :  { %13011 = vmatprep.subr.bf16.mxu1 %v14753_v25  ;;  %v12729_v47 = vpop.f32.mrb[32].mxu1 }
 0x336   :  { %v12730_v22 = vpop.f32.mrb[33].mxu1 }
 0x337   :  { %v12731_v48 = vadd.f32 %v12730_v22, %v12729_v47  ;;  %v12732_v56 = vpop.f32.mrb[34].mxu1  ;;  %v176_v22 = vld [vmem:[%s20659_s0 + $0x510] sm:$0xff] }
 0x338   :  { %13012 = vmatpush3.bf16.msra.mxu1 %v14754_v45  ;;  %v12733_v44 = vpop.f32.mrb[35].mxu1 }
 0x339   :  { %13013 = vmatprep.subr.bf16.mxu1 %v14761_v3  ;;  %v17848_v18 = vadd.f32 %v12731_v48, %v17384_v17  ;;  %v12734_v23 = vadd.f32 %v12733_v44, %v12732_v56  ;;  %v140_v17 = vld [vmem:[%s20659_s0 + $0x3f0] sm:$0xff] }
 0x33a   :  { %7306 = vmatmul.mubr.bf16.gmra.mrb[60].mxu0 %v17721_v2  ;;  %9497 = vmatmul.mubr.bf16.gmra.mrb[140].mxu1 %v17837_v31  ;;  %v152_v2 = vld [vmem:[%s20659_s0 + $0x450] sm:$0xff] }
 0x33b   :  { %7348 = vmatprep.mubr.bf16.mxu0 %v17723_v24  ;;  %v17854_v9 = vadd.f32 %v12734_v23, %v17390_v54  ;;  %9504 = vmatprep.mubr.bf16.mxu1 %v17839_v59  ;;  %v17866_v54 = vcombine.low %v116_v36, %v128_v52  ;;  %v17871_v37 = vcombine.high %v140_v17, %v152_v2  ;;  %v14777_v36 = vld [vmem:[%s20658_s1 + $0xcc8] ss:$12 sps:$4 sm:$0xff]   ;;  %v14718_v52 = vld [vmem:[%s20658_s1 + $0xa98] ss:$12 sps:$4 sm:$0xff]  }
 0x33c   :  { %13014 = vmatpush3.bf16.msra.mxu1 %v14762_v35  ;;  %v17901_v56 = vcombine.low %v140_v17, %v152_v2 }
 0x33d   :  { %13015 = vmatprep.subr.bf16.mxu1 %v14763_v62  ;;  %v12735_v24 = vpop.f32.mrb[36].mxu1  ;;  %v14723_v62 = vld [vmem:[%s20658_s1 + $0xab0] ss:$12 sps:$4 sm:$0xff]  }
 0x33e   :  { %v12736_v33 = vpop.f32.mrb[37].mxu1 }
 0x33f   :  { %v12737_v16 = vadd.f32 %v12736_v33, %v12735_v24  ;;  %v12738_v7 = vpop.f32.mrb[38].mxu1  ;;  %v14726_v33 = vld [vmem:[%s20658_s1 + $0xac8] ss:$12 sps:$4 sm:$0xff]  }
 0x340   :  { %13016 = vmatpush3.bf16.msra.mxu1 %v14764_v46  ;;  %v12739_v25 = vpop.f32.mrb[39].mxu1  ;;  %v14728_v46 = vld [vmem:[%s20658_s1 + $0xacc] ss:$12 sps:$4 sm:$0xff]  }
 0x341   :  { %v17877_v45 = vadd.f32 %v12737_v16, %v17413_v0  ;;  %v12740_v3 = vadd.f32 %v12739_v25, %v12738_v7  ;;  %v14725_v0 = vld [vmem:[%s20658_s1 + $0xab4] ss:$12 sps:$4 sm:$0xff]   ;;  %13113 = vmatprep.subr.bf16.mxu1 %v14777_v36 }
 0x342   :  { %7349 = vmatmul.mubr.bf16.vlgmr.msra.gmra.mrb[0].mxu0 %v17741_v28  ;;  %9505 = vmatmul.mubr.bf16.gmra.mrb[144].mxu1 %v17866_v54  ;;  %v164_v28 = vld [vmem:[%s20659_s0 + $0x4b0] sm:$0xff] }
 0x343   :  { %7510 = vmatpush1.bf16.msra.mxu0 %v14715_v10  ;;  %v17888_v47 = vadd.f32 %v12740_v3, %v17424_v14  ;;  %7358 = vmatprep.mubr.bf16.mxu0 %v17743_v57  ;;  %v17903_v44 = vcombine.high %v164_v28, %v176_v22  ;;  %v17933_v16 = vcombine.low %v164_v28, %v176_v22  ;;  %v14731_v3 = vld [vmem:[%s20658_s1 + $0xae0] ss:$12 sps:$4 sm:$0xff]  }
 0x344   :  { %9512 = vmatprep.mubr.bf16.mxu1 %v17871_v37  ;;  %7511 = vmatprep.subr.bf16.mxu0 %v14720_v41 }
 0x345   :  { %v12741_v14 = vpop.f32.mrb[40].mxu1 }
 0x346   :  { %v12742_v48 = vpop.f32.mrb[41].mxu1 }
 0x347   :  { %7512 = vmatpush1.bf16.msra.mxu0 %v14718_v52  ;;  %v12743_v57 = vadd.f32 %v12742_v48, %v12741_v14  ;;  %v12744_v35 = vpop.f32.mrb[42].mxu1  ;;  %v14736_v52 = vld [vmem:[%s20658_s1 + $0xafc] ss:$12 sps:$4 sm:$0xff]   ;;  %v14734_v14 = vld [vmem:[%s20658_s1 + $0xaf8] ss:$12 sps:$4 sm:$0xff]  }
 0x348   :  { %7513 = vmatprep.subr.bf16.mxu0 %v14725_v0  ;;  %v12745_v23 = vpop.f32.mrb[43].mxu1 }
 0x349   :  { %v17912_v24 = vadd.f32 %v12743_v57, %v17448_v38  ;;  %v12746_v17 = vadd.f32 %v12745_v23, %v12744_v35  ;;  %v188_v38 = vld [vmem:[%s20659_s0 + $0x570] sm:$0xff] }
 0x34a   :  { %7359 = vmatmul.mubr.bf16.gmra.mrb[4].mxu0 %v17773_v19  ;;  %9513 = vmatmul.mubr.bf16.gmra.mrb[148].mxu1 %v17901_v56  ;;  %v200_v19 = vld [vmem:[%s20659_s0 + $0x5d0] sm:$0xff] }
 0x34b   :  { %7368 = vmatprep.mubr.bf16.mxu0 %v17775_v20  ;;  %v17918_v2 = vadd.f32 %v12746_v17, %v17454_v53  ;;  %9520 = vmatprep.mubr.bf16.mxu1 %v17903_v44  ;;  %v14733_v53 = vld [vmem:[%s20658_s1 + $0xae4] ss:$12 sps:$4 sm:$0xff]   ;;  %v17935_v41 = vcombine.high %v188_v38, %v200_v19  ;;  %v17965_v57 = vcombine.low %v188_v38, %v200_v19 }
 0x34c   :  { %7514 = vmatpush1.bf16.msra.mxu0 %v14723_v62 }
 0x34d   :  { %7515 = vmatprep.subr.bf16.mxu0 %v14728_v46  ;;  %v12747_v20 = vpop.f32.mrb[44].mxu1  ;;  %v14739_v46 = vld [vmem:[%s20658_s1 + $0xb10] ss:$12 sps:$4 sm:$0xff]  }
 0x34e   :  { %v12748_v10 = vpop.f32.mrb[45].mxu1 }
 0x34f   :  { %v12749_v7 = vadd.f32 %v12748_v10, %v12747_v20  ;;  %v12750_v25 = vpop.f32.mrb[46].mxu1  ;;  %v14742_v20 = vld [vmem:[%s20658_s1 + $0xb28] ss:$12 sps:$4 sm:$0xff]  }
 0x350   :  { %7516 = vmatpush1.bf16.msra.mxu0 %v14726_v33  ;;  %v12751_v36 = vpop.f32.mrb[47].mxu1  ;;  %v14744_v33 = vld [vmem:[%s20658_s1 + $0xb2c] ss:$12 sps:$4 sm:$0xff]  }
 0x351   :  { %7517 = vmatprep.subr.bf16.mxu0 %v14733_v53  ;;  %v17944_v0 = vadd.f32 %v12749_v7, %v17480_v42  ;;  %v12752_v28 = vadd.f32 %v12751_v36, %v12750_v25  ;;  %v212_v42 = vld [vmem:[%s20659_s0 + $0x630] sm:$0xff] }
 0x352   :  { %7369 = vmatmul.mubr.bf16.gmra.mrb[8].mxu0 %v17805_v63  ;;  %9521 = vmatmul.mubr.bf16.gmra.mrb[152].mxu1 %v17933_v16  ;;  %v224_v63 = vld [vmem:[%s20659_s0 + $0x690] sm:$0xff] }
 0x353   :  { %7378 = vmatprep.mubr.bf16.mxu0 %v17807_v6  ;;  %v17950_v22 = vadd.f32 %v12752_v28, %v17486_v39  ;;  %9528 = vmatprep.mubr.bf16.mxu1 %v17935_v41  ;;  %v14741_v39 = vld [vmem:[%s20658_s1 + $0xb14] ss:$12 sps:$4 sm:$0xff]   ;;  %v17967_v23 = vcombine.high %v212_v42, %v224_v63  ;;  %v17997_v7 = vcombine.low %v212_v42, %v224_v63 }
 0x354   :  { %7518 = vmatpush1.bf16.msra.mxu0 %v14731_v3 }
 0x355   :  { %7519 = vmatprep.subr.bf16.mxu0 %v14736_v52  ;;  %v12753_v6 = vpop.f32.mrb[48].mxu1  ;;  %v14747_v52 = vld [vmem:[%s20658_s1 + $0xb40] ss:$12 sps:$4 sm:$0xff]  }
 0x356   :  { %v12754_v48 = vpop.f32.mrb[49].mxu1 }
 0x357   :  { %v12755_v35 = vadd.f32 %v12754_v48, %v12753_v6  ;;  %v12756_v62 = vpop.f32.mrb[50].mxu1  ;;  %v14750_v6 = vld [vmem:[%s20658_s1 + $0xb58] ss:$12 sps:$4 sm:$0xff]  }
 0x358   :  { %7520 = vmatpush1.bf16.msra.mxu0 %v14734_v14  ;;  %v12757_v17 = vpop.f32.mrb[51].mxu1  ;;  %v14752_v14 = vld [vmem:[%s20658_s1 + $0xb5c] ss:$12 sps:$4 sm:$0xff]  }
 0x359   :  { %7521 = vmatprep.subr.bf16.mxu0 %v14741_v39  ;;  %v17976_v53 = vadd.f32 %v12755_v35, %v17512_v30  ;;  %v12758_v38 = vadd.f32 %v12757_v17, %v12756_v62  ;;  %v236_v30 = vld [vmem:[%s20659_s0 + $0x6f0] sm:$0xff] }
 0x35a   :  { %7379 = vmatmul.mubr.bf16.gmra.mrb[12].mxu0 %v17837_v31  ;;  %9529 = vmatmul.mubr.bf16.gmra.mrb[156].mxu1 %v17965_v57  ;;  %v248_v31 = vld [vmem:[%s20659_s0 + $0x750] sm:$0xff] }
 0x35b   :  { %7388 = vmatprep.mubr.bf16.mxu0 %v17839_v59  ;;  %v17982_v19 = vadd.f32 %v12758_v38, %v17518_v40  ;;  %9536 = vmatprep.mubr.bf16.mxu1 %v17967_v23  ;;  %v14749_v40 = vld [vmem:[%s20658_s1 + $0xb44] ss:$12 sps:$4 sm:$0xff]   ;;  %v17999_v36 = vcombine.high %v236_v30, %v248_v31  ;;  %v18029_v35 = vcombine.low %v236_v30, %v248_v31 }
 0x35c   :  { %7522 = vmatpush1.bf16.msra.mxu0 %v14739_v46 }
 0x35d   :  { %7523 = vmatprep.subr.bf16.mxu0 %v14744_v33  ;;  %v12759_v59 = vpop.f32.mrb[52].mxu1  ;;  %v14755_v33 = vld [vmem:[%s20658_s1 + $0xb70] ss:$12 sps:$4 sm:$0xff]  }
 0x35e   :  { %v12760_v10 = vpop.f32.mrb[53].mxu1 }
 0x35f   :  { %v12761_v25 = vadd.f32 %v12760_v10, %v12759_v59  ;;  %v12762_v3 = vpop.f32.mrb[54].mxu1  ;;  %v14758_v59 = vld [vmem:[%s20658_s1 + $0xb88] ss:$12 sps:$4 sm:$0xff]  }
 0x360   :  { %7524 = vmatpush1.bf16.msra.mxu0 %v14742_v20  ;;  %v12763_v28 = vpop.f32.mrb[55].mxu1  ;;  %v14760_v20 = vld [vmem:[%s20658_s1 + $0xb8c] ss:$12 sps:$4 sm:$0xff]  }
 0x361   :  { %7525 = vmatprep.subr.bf16.mxu0 %v14749_v40  ;;  %v18008_v39 = vadd.f32 %v12761_v25, %v17544_v11  ;;  %v12764_v42 = vadd.f32 %v12763_v28, %v12762_v3  ;;  %v260_v11 = vld [vmem:[%s20659_s0 + $0x7b0] sm:$0xff] }
 0x362   :  { %7389 = vmatmul.mubr.bf16.gmra.mrb[16].mxu0 %v17866_v54  ;;  %9537 = vmatmul.mubr.bf16.gmra.mrb[160].mxu1 %v17997_v7  ;;  %v272_v54 = vld [vmem:[%s20659_s0 + $0x810] sm:$0xff] }
 0x363   :  { %7398 = vmatprep.mubr.bf16.mxu0 %v17871_v37  ;;  %v18014_v63 = vadd.f32 %v12764_v42, %v17550_v27  ;;  %9544 = vmatprep.mubr.bf16.mxu1 %v17999_v36  ;;  %v14757_v27 = vld [vmem:[%s20658_s1 + $0xb74] ss:$12 sps:$4 sm:$0xff]   ;;  %v18031_v17 = vcombine.high %v260_v11, %v272_v54  ;;  %v18061_v25 = vcombine.low %v260_v11, %v272_v54 }
 0x364   :  { %7526 = vmatpush1.bf16.msra.mxu0 %v14747_v52 }
 0x365   :  { %7527 = vmatprep.subr.bf16.mxu0 %v14752_v14  ;;  %v12765_v37 = vpop.f32.mrb[56].mxu1  ;;  %v14765_v14 = vld [vmem:[%s20658_s1 + $0xba0] ss:$12 sps:$4 sm:$0xff]  }
 0x366   :  { %v12766_v48 = vpop.f32.mrb[57].mxu1 }
 0x367   :  { %v12767_v62 = vadd.f32 %v12766_v48, %v12765_v37  ;;  %v12768_v46 = vpop.f32.mrb[58].mxu1  ;;  %v14768_v37 = vld [vmem:[%s20658_s1 + $0xbb8] ss:$12 sps:$4 sm:$0xff]  }
 0x368   :  { %7528 = vmatpush1.bf16.msra.mxu0 %v14750_v6  ;;  %v12769_v38 = vpop.f32.mrb[59].mxu1  ;;  %v14770_v6 = vld [vmem:[%s20658_s1 + $0xbbc] ss:$12 sps:$4 sm:$0xff]  }
 0x369   :  { %7529 = vmatprep.subr.bf16.mxu0 %v14757_v27  ;;  %v18040_v40 = vadd.f32 %v12767_v62, %v17576_v43  ;;  %v12770_v30 = vadd.f32 %v12769_v38, %v12768_v46  ;;  %v284_v43 = vld [vmem:[%s20659_s0 + $0x870] sm:$0xff] }
 0x36a   :  { %7399 = vmatmul.mubr.bf16.gmra.mrb[20].mxu0 %v17901_v56  ;;  %9545 = vmatmul.mubr.bf16.gmra.mrb[164].mxu1 %v18029_v35  ;;  %v296_v56 = vld [vmem:[%s20659_s0 + $0x8d0] sm:$0xff] }
 0x36b   :  { %7408 = vmatprep.mubr.bf16.mxu0 %v17903_v44  ;;  %v18046_v31 = vadd.f32 %v12770_v30, %v17582_v61  ;;  %9552 = vmatprep.mubr.bf16.mxu1 %v18031_v17  ;;  %v14767_v61 = vld [vmem:[%s20658_s1 + $0xba4] ss:$12 sps:$4 sm:$0xff]   ;;  %v18063_v28 = vcombine.high %v284_v43, %v296_v56  ;;  %v18093_v62 = vcombine.low %v284_v43, %v296_v56 }
 0x36c   :  { %7530 = vmatpush1.bf16.msra.mxu0 %v14755_v33 }
 0x36d   :  { %7531 = vmatprep.subr.bf16.mxu0 %v14760_v20  ;;  %v12771_v44 = vpop.f32.mrb[60].mxu1  ;;  %v14771_v20 = vld [vmem:[%s20658_s1 + $0xbd0] ss:$12 sps:$4 sm:$0xff]  }
 0x36e   :  { %v12772_v10 = vpop.f32.mrb[61].mxu1 }
 0x36f   :  { %v12773_v3 = vadd.f32 %v12772_v10, %v12771_v44  ;;  %v12774_v52 = vpop.f32.mrb[62].mxu1  ;;  %v14774_v44 = vld [vmem:[%s20658_s1 + $0xbe8] ss:$12 sps:$4 sm:$0xff]  }
 0x370   :  { %7532 = vmatpush1.bf16.msra.mxu0 %v14758_v59  ;;  %v12775_v42 = vpop.f32.mrb[63].mxu1  ;;  %v14776_v59 = vld [vmem:[%s20658_s1 + $0xbec] ss:$12 sps:$4 sm:$0xff]  }
 0x371   :  { %7533 = vmatprep.subr.bf16.mxu0 %v14767_v61  ;;  %v18072_v27 = vadd.f32 %v12773_v3, %v17608_v15  ;;  %v12776_v11 = vadd.f32 %v12775_v42, %v12774_v52  ;;  %v308_v15 = vld [vmem:[%s20659_s0 + $0x930] sm:$0xff] }
 0x372   :  { %7409 = vmatmul.mubr.bf16.gmra.mrb[24].mxu0 %v17933_v16  ;;  %9553 = vmatmul.mubr.bf16.gmra.mrb[168].mxu1 %v18061_v25  ;;  %v320_v16 = vld [vmem:[%s20659_s0 + $0x990] sm:$0xff] }
 0x373   :  { %7418 = vmatprep.mubr.bf16.mxu0 %v17935_v41  ;;  %v18078_v54 = vadd.f32 %v12776_v11, %v17614_v60  ;;  %9560 = vmatprep.mubr.bf16.mxu1 %v18063_v28  ;;  %v14773_v60 = vld [vmem:[%s20658_s1 + $0xbd4] ss:$12 sps:$4 sm:$0xff]   ;;  %v18095_v38 = vcombine.high %v308_v15, %v320_v16  ;;  %v18125_v3 = vcombine.low %v308_v15, %v320_v16 }
 0x374   :  { %7534 = vmatpush1.bf16.msra.mxu0 %v14765_v14  ;;  %v356_v16 = vld [vmem:[%s20659_s0 + $0xab0] sm:$0xff] }
 0x375   :  { %7535 = vmatprep.subr.bf16.mxu0 %v14770_v6  ;;  %v12793_v41 = vpop.f32.mrb[64].mxu1 }
 0x376   :  { %v12794_v48 = vpop.f32.mrb[65].mxu1 }
 0x377   :  { %v12795_v46 = vadd.f32 %v12794_v48, %v12793_v41  ;;  %v12796_v33 = vpop.f32.mrb[66].mxu1 }
 0x378   :  { %7536 = vmatpush1.bf16.msra.mxu0 %v14768_v37  ;;  %v12797_v30 = vpop.f32.mrb[67].mxu1 }
 0x379   :  { %7537 = vmatprep.subr.bf16.mxu0 %v14773_v60  ;;  %v18104_v61 = vadd.f32 %v12795_v46, %v17640_v8  ;;  %v12798_v43 = vadd.f32 %v12797_v30, %v12796_v33  ;;  %v332_v8 = vld [vmem:[%s20659_s0 + $0x9f0] sm:$0xff] }
 0x37a   :  { %7419 = vmatmul.mubr.bf16.gmra.mrb[28].mxu0 %v17965_v57  ;;  %9561 = vmatmul.mubr.bf16.gmra.mrb[172].mxu1 %v18093_v62  ;;  %v344_v57 = vld [vmem:[%s20659_s0 + $0xa50] sm:$0xff] }
 0x37b   :  { %7428 = vmatprep.mubr.bf16.mxu0 %v17967_v23  ;;  %v18110_v56 = vadd.f32 %v12798_v43, %v17646_v26  ;;  %9568 = vmatprep.mubr.bf16.mxu1 %v18095_v38  ;;  %v14781_v26 = vld [vmem:[%s20658_s1 + $0xc04] ss:$12 sps:$4 sm:$0xff]   ;;  %v18127_v42 = vcombine.high %v332_v8, %v344_v57 }
 0x37c   :  { %7538 = vmatpush1.bf16.msra.mxu0 %v14771_v20 }
 0x37d   :  { %7539 = vmatprep.subr.bf16.mxu0 %v14776_v59  ;;  %v12799_v23 = vpop.f32.mrb[68].mxu1  ;;  %v380_v59 = vld [vmem:[%s20659_s0 + $0xb70] sm:$0xff] }
 0x37e   :  { %v12800_v10 = vpop.f32.mrb[69].mxu1 }
 0x37f   :  { %v12801_v52 = vadd.f32 %v12800_v10, %v12799_v23  ;;  %v12802_v14 = vpop.f32.mrb[70].mxu1 }
 0x380   :  { %7540 = vmatpush1.bf16.msra.mxu0 %v14774_v44  ;;  %v12803_v6 = vpop.f32.mrb[71].mxu1 }
 0x381   :  { %7702 = vmatprep.subr.bf16.mxu0 %v14781_v26  ;;  %v18130_v11 = vadd.f32 %v12801_v52, %v17666_v1  ;;  %v12804_v37 = vadd.f32 %v12803_v6, %v12802_v14  ;;  %v368_v1 = vld [vmem:[%s20659_s0 + $0xb10] sm:$0xff]  ;;  %v21_v52 = vld [vmem:[%s20659_s0 + $0x38] sm:$0xff] }
 0x382   :  { %7429 = vmatmul.mubr.bf16.gmra.mrb[32].mxu0 %v17997_v7  ;;  %9569 = vmatmul.mubr.bf16.gmra.mrb[176].mxu1 %v18125_v3  ;;  %v18145_v7 = vcombine.low %v332_v8, %v344_v57 }
 0x383   :  { %7438 = vmatprep.mubr.bf16.mxu0 %v17999_v36  ;;  %v18136_v15 = vadd.f32 %v12804_v37, %v17672_v49  ;;  %9576 = vmatprep.mubr.bf16.mxu1 %v18127_v42  ;;  %v18147_v36 = vcombine.high %v356_v16, %v368_v1 }
 0x385   :  { %v12805_v60 = vpop.f32.mrb[72].mxu1 }
 0x386   :  { %v12806_v41 = vpop.f32.mrb[73].mxu1 }
 0x387   :  { %v12807_v48 = vadd.f32 %v12806_v41, %v12805_v60  ;;  %v12808_v46 = vpop.f32.mrb[74].mxu1 }
 0x388   :  { %v12809_v49 = vpop.f32.mrb[75].mxu1 }
 0x389   :  { %v18150_v33 = vadd.f32 %v12807_v48, %v17686_v12  ;;  %v12810_v20 = vadd.f32 %v12809_v49, %v12808_v46  ;;  %v392_v12 = vld [vmem:[%s20659_s0 + $0xbd0] sm:$0xff]  ;;  %v45_v48 = vld [vmem:[%s20659_s0 + $0xf8] sm:$0xff] }
 0x38a   :  { %7439 = vmatmul.mubr.bf16.gmra.mrb[36].mxu0 %v18029_v35  ;;  %9577 = vmatmul.mubr.bf16.gmra.mrb[180].mxu1 %v18145_v7  ;;  %v18165_v35 = vcombine.low %v356_v16, %v368_v1 }
 0x38b   :  { %7448 = vmatprep.mubr.bf16.mxu0 %v18031_v17  ;;  %v18156_v30 = vadd.f32 %v12810_v20, %v17692_v55  ;;  %9584 = vmatprep.mubr.bf16.mxu1 %v18147_v36  ;;  %v18167_v17 = vcombine.high %v380_v59, %v392_v12 }
 0x38d   :  { %v12811_v43 = vpop.f32.mrb[76].mxu1 }
 0x38e   :  { %v12812_v44 = vpop.f32.mrb[77].mxu1 }
 0x38f   :  { %v12813_v8 = vadd.f32 %v12812_v44, %v12811_v43  ;;  %v12814_v57 = vpop.f32.mrb[78].mxu1  ;;  %v14785_v43 = vld [vmem:[%s20658_s1 + $0xce0] ss:$12 sps:$4 sm:$0xff]  }
 0x390   :  { %v12815_v55 = vpop.f32.mrb[79].mxu1 }
 0x391   :  { %v18170_v26 = vadd.f32 %v12813_v8, %v17706_v5  ;;  %v12816_v23 = vadd.f32 %v12815_v55, %v12814_v57  ;;  %v33_v5 = vld [vmem:[%s20659_s0 + $0x98] sm:$0xff]  ;;  %v14786_v55 = vld [vmem:[%s20658_s1 + $0xc20] ss:$12 sps:$4 sm:$0xff]  }
 0x392   :  { %7449 = vmatmul.mubr.bf16.gmra.mrb[40].mxu0 %v18061_v25  ;;  %9585 = vmatmul.mubr.bf16.gmra.mrb[184].mxu1 %v18165_v35  ;;  %v18185_v25 = vcombine.low %v380_v59, %v392_v12 }
 0x393   :  { %7458 = vmatprep.mubr.bf16.mxu0 %v18063_v28  ;;  %v18176_v10 = vadd.f32 %v12816_v23, %v17712_v50  ;;  %9592 = vmatprep.mubr.bf16.mxu1 %v18167_v17  ;;  %v18187_v28 = vcombine.high %v21_v52, %v33_v5 }
 0x395   :  { %v12817_v14 = vpop.f32.mrb[80].mxu1 }
 0x396   :  { %v12818_v6 = vpop.f32.mrb[81].mxu1 }
 0x397   :  { %v12819_v37 = vadd.f32 %v12818_v6, %v12817_v14  ;;  %v12820_v16 = vpop.f32.mrb[82].mxu1 }
 0x398   :  { %v12821_v50 = vpop.f32.mrb[83].mxu1 }
 0x399   :  { %v18190_v1 = vadd.f32 %v12819_v37, %v17726_v51  ;;  %v12822_v60 = vadd.f32 %v12821_v50, %v12820_v16  ;;  %v57_v51 = vld [vmem:[%s20659_s0 + $0x158] sm:$0xff] }
 0x39a   :  { %7459 = vmatmul.mubr.bf16.gmra.mrb[44].mxu0 %v18093_v62  ;;  %9593 = vmatmul.mubr.bf16.gmra.mrb[188].mxu1 %v18185_v25  ;;  %v18205_v62 = vcombine.low %v21_v52, %v33_v5  ;;  %v18237_v52 = vcombine.low %v45_v48, %v57_v51  ;;  %v14794_v37 = vld [vmem:[%s20658_s1 + $0xc38] ss:$12 sps:$4 sm:$0xff]   ;;  %v14801_v50 = vld [vmem:[%s20658_s1 + $0xd10] ss:$12 sps:$4 sm:$0xff]  }
 0x39b   :  { %7468 = vmatprep.mubr.bf16.mxu0 %v18095_v38  ;;  %v18196_v41 = vadd.f32 %v12822_v60, %v17732_v34  ;;  %9633 = vmatprep.mubr.bf16.mxu1 %v18187_v28  ;;  %v18207_v38 = vcombine.high %v45_v48, %v57_v51  ;;  %v14778_v34 = vld [vmem:[%s20658_s1 + $0xc08] ss:$12 sps:$4 sm:$0xff]  }
 0x39d   :  { %v12823_v46 = vpop.f32.mrb[84].mxu1 }
 0x39e   :  { %v12824_v49 = vpop.f32.mrb[85].mxu1 }
 0x39f   :  { %v12825_v20 = vadd.f32 %v12824_v49, %v12823_v46  ;;  %v12826_v59 = vpop.f32.mrb[86].mxu1  ;;  %v14802_v46 = vld [vmem:[%s20658_s1 + $0xc50] ss:$12 sps:$4 sm:$0xff]  }
 0x3a0   :  { %v12827_v12 = vpop.f32.mrb[87].mxu1 }
 0x3a1   :  { %v18216_v44 = vadd.f32 %v12825_v20, %v17752_v4  ;;  %v12828_v8 = vadd.f32 %v12827_v12, %v12826_v59  ;;  %v69_v4 = vld [vmem:[%s20659_s0 + $0x1b8] sm:$0xff] }
 0x3a2   :  { %7469 = vmatmul.mubr.bf16.gmra.mrb[48].mxu0 %v18125_v3  ;;  %9634 = vmatmul.mubr.bf16.vlgmr.msra.gmra.mrb[192].mxu1 %v18205_v62  ;;  %v81_v3 = vld [vmem:[%s20659_s0 + $0x218] sm:$0xff] }
 0x3a3   :  { %7478 = vmatprep.mubr.bf16.mxu0 %v18127_v42  ;;  %v18222_v57 = vadd.f32 %v12828_v8, %v17758_v13  ;;  %9641 = vmatprep.mubr.bf16.mxu1 %v18207_v38  ;;  %v14793_v13 = vld [vmem:[%s20658_s1 + $0xcf8] ss:$12 sps:$4 sm:$0xff]   ;;  %v18239_v6 = vcombine.high %v69_v4, %v81_v3  ;;  %v18269_v20 = vcombine.low %v69_v4, %v81_v3 }
 0x3a4   :  { %13114 = vmatpush3.bf16.msra.mxu1 %v14778_v34 }
 0x3a5   :  { %13115 = vmatprep.subr.bf16.mxu1 %v14785_v43  ;;  %v12829_v42 = vpop.f32.mrb[88].mxu1  ;;  %v14810_v43 = vld [vmem:[%s20658_s1 + $0xc68] ss:$12 sps:$4 sm:$0xff]  }
 0x3a6   :  { %v12830_v23 = vpop.f32.mrb[89].mxu1 }
 0x3a7   :  { %v12831_v5 = vadd.f32 %v12830_v23, %v12829_v42  ;;  %v12832_v14 = vpop.f32.mrb[90].mxu1  ;;  %v14818_v42 = vld [vmem:[%s20658_s1 + $0xc80] ss:$12 sps:$4 sm:$0xff]  }
 0x3a8   :  { %13116 = vmatpush3.bf16.msra.mxu1 %v14786_v55  ;;  %v12833_v16 = vpop.f32.mrb[91].mxu1  ;;  %v14817_v55 = vld [vmem:[%s20658_s1 + $0xd40] ss:$12 sps:$4 sm:$0xff]  }
 0x3a9   :  { %13117 = vmatprep.subr.bf16.mxu1 %v14793_v13  ;;  %v18248_v60 = vadd.f32 %v12831_v5, %v17784_v58  ;;  %v12834_v48 = vadd.f32 %v12833_v16, %v12832_v14  ;;  %v93_v58 = vld [vmem:[%s20659_s0 + $0x278] sm:$0xff] }
 0x3aa   :  { %7479 = vmatmul.mubr.bf16.gmra.mrb[52].mxu0 %v18145_v7  ;;  %9642 = vmatmul.mubr.bf16.gmra.mrb[196].mxu1 %v18237_v52  ;;  %v105_v7 = vld [vmem:[%s20659_s0 + $0x2d8] sm:$0xff] }
 0x3ab   :  { %7488 = vmatprep.mubr.bf16.mxu0 %v18147_v36  ;;  %v18254_v51 = vadd.f32 %v12834_v48, %v17790_v29  ;;  %9649 = vmatprep.mubr.bf16.mxu1 %v18239_v6  ;;  %v14809_v29 = vld [vmem:[%s20658_s1 + $0xd28] ss:$12 sps:$4 sm:$0xff]   ;;  %v18271_v12 = vcombine.high %v93_v58, %v105_v7  ;;  %v18301_v5 = vcombine.low %v93_v58, %v105_v7 }
 0x3ac   :  { %13118 = vmatpush3.bf16.msra.mxu1 %v14794_v37 }
 0x3ad   :  { %13119 = vmatprep.subr.bf16.mxu1 %v14801_v50  ;;  %v12835_v36 = vpop.f32.mrb[92].mxu1  ;;  %v14826_v50 = vld [vmem:[%s20658_s1 + $0xc98] ss:$12 sps:$4 sm:$0xff]  }
 0x3ae   :  { %v12836_v49 = vpop.f32.mrb[93].mxu1 }
 0x3af   :  { %v12837_v59 = vadd.f32 %v12836_v49, %v12835_v36  ;;  %v12838_v34 = vpop.f32.mrb[94].mxu1  ;;  %v14828_v36 = vld [vmem:[%s20658_s1 + $0xcb0] ss:$12 sps:$4 sm:$0xff]  }
 0x3b0   :  { %13120 = vmatpush3.bf16.msra.mxu1 %v14802_v46  ;;  %v12839_v8 = vpop.f32.mrb[95].mxu1  ;;  %v14827_v46 = vld [vmem:[%s20658_s1 + $0xd70] ss:$12 sps:$4 sm:$0xff]  }
 0x3b1   :  { %13121 = vmatprep.subr.bf16.mxu1 %v14809_v29  ;;  %v18280_v13 = vadd.f32 %v12837_v59, %v17816_v21  ;;  %v12840_v4 = vadd.f32 %v12839_v8, %v12838_v34  ;;  %v117_v21 = vld [vmem:[%s20659_s0 + $0x338] sm:$0xff]  ;;  %v14779_v59 = vld [vmem:[%s20658_s1 + $0xc00] ss:$12 sps:$4 sm:$0xff]  }
 0x3b2   :  { %7489 = vmatmul.mubr.bf16.gmra.mrb[56].mxu0 %v18165_v35  ;;  %9650 = vmatmul.mubr.bf16.gmra.mrb[200].mxu1 %v18269_v20  ;;  %v129_v35 = vld [vmem:[%s20659_s0 + $0x398] sm:$0xff] }
 0x3b3   :  { %7498 = vmatprep.mubr.bf16.mxu0 %v18167_v17  ;;  %v18286_v3 = vadd.f32 %v12840_v4, %v17822_v32  ;;  %9657 = vmatprep.mubr.bf16.mxu1 %v18271_v12  ;;  %v14825_v32 = vld [vmem:[%s20658_s1 + $0xd58] ss:$12 sps:$4 sm:$0xff]   ;;  %v18303_v16 = vcombine.high %v117_v21, %v129_v35  ;;  %v14784_v4 = vld [vmem:[%s20658_s1 + $0xc1c] ss:$12 sps:$4 sm:$0xff]  }
 0x3b4   :  { %13122 = vmatpush3.bf16.msra.mxu1 %v14810_v43 }
 0x3b5   :  { %13123 = vmatprep.subr.bf16.mxu1 %v14817_v55  ;;  %v12841_v17 = vpop.f32.mrb[96].mxu1 }
 0x3b6   :  { %v12842_v23 = vpop.f32.mrb[97].mxu1 }
 0x3b7   :  { %v12843_v14 = vadd.f32 %v12842_v23, %v12841_v17  ;;  %v12844_v37 = vpop.f32.mrb[98].mxu1  ;;  %v177_v23 = vld [vmem:[%s20659_s0 + $0x518] sm:$0xff] }
 0x3b8   :  { %13124 = vmatpush3.bf16.msra.mxu1 %v14818_v42  ;;  %v12845_v48 = vpop.f32.mrb[99].mxu1 }
 0x3b9   :  { %13125 = vmatprep.subr.bf16.mxu1 %v14825_v32  ;;  %v18312_v29 = vadd.f32 %v12843_v14, %v17848_v18  ;;  %v12846_v58 = vadd.f32 %v12845_v48, %v12844_v37  ;;  %v141_v18 = vld [vmem:[%s20659_s0 + $0x3f8] sm:$0xff] }
 0x3ba   :  { %7499 = vmatmul.mubr.bf16.gmra.mrb[60].mxu0 %v18185_v25  ;;  %9658 = vmatmul.mubr.bf16.gmra.mrb[204].mxu1 %v18301_v5  ;;  %v153_v25 = vld [vmem:[%s20659_s0 + $0x458] sm:$0xff] }
 0x3bb   :  { %7541 = vmatprep.mubr.bf16.mxu0 %v18187_v28  ;;  %v18318_v7 = vadd.f32 %v12846_v58, %v17854_v9  ;;  %9665 = vmatprep.mubr.bf16.mxu1 %v18303_v16  ;;  %v18330_v9 = vcombine.low %v117_v21, %v129_v35  ;;  %v18335_v8 = vcombine.high %v141_v18, %v153_v25  ;;  %v14841_v21 = vld [vmem:[%s20658_s1 + $0xe48] ss:$12 sps:$4 sm:$0xff]   ;;  %v14782_v35 = vld [vmem:[%s20658_s1 + $0xc18] ss:$12 sps:$4 sm:$0xff]  }
 0x3bc   :  { %13126 = vmatpush3.bf16.msra.mxu1 %v14826_v50  ;;  %v18365_v37 = vcombine.low %v141_v18, %v153_v25 }
 0x3bd   :  { %13127 = vmatprep.subr.bf16.mxu1 %v14827_v46  ;;  %v12847_v28 = vpop.f32.mrb[100].mxu1  ;;  %v14787_v46 = vld [vmem:[%s20658_s1 + $0xc30] ss:$12 sps:$4 sm:$0xff]  }
 0x3be   :  { %v12848_v49 = vpop.f32.mrb[101].mxu1 }
 0x3bf   :  { %v12849_v34 = vadd.f32 %v12848_v49, %v12847_v28  ;;  %v12850_v43 = vpop.f32.mrb[102].mxu1  ;;  %v14790_v49 = vld [vmem:[%s20658_s1 + $0xc48] ss:$12 sps:$4 sm:$0xff]  }
 0x3c0   :  { %13128 = vmatpush3.bf16.msra.mxu1 %v14828_v36  ;;  %v12851_v55 = vpop.f32.mrb[103].mxu1  ;;  %v14792_v36 = vld [vmem:[%s20658_s1 + $0xc4c] ss:$12 sps:$4 sm:$0xff]  }
 0x3c1   :  { %v18341_v42 = vadd.f32 %v12849_v34, %v17877_v45  ;;  %v12852_v32 = vadd.f32 %v12851_v55, %v12850_v43  ;;  %v14789_v45 = vld [vmem:[%s20658_s1 + $0xc34] ss:$12 sps:$4 sm:$0xff]   ;;  %13225 = vmatprep.subr.bf16.mxu1 %v14841_v21 }
 0x3c2   :  { %7542 = vmatmul.mubr.bf16.vlgmr.msra.gmra.mrb[0].mxu0 %v18205_v62  ;;  %9666 = vmatmul.mubr.bf16.gmra.mrb[208].mxu1 %v18330_v9  ;;  %v165_v62 = vld [vmem:[%s20659_s0 + $0x4b8] sm:$0xff] }
 0x3c3   :  { %7703 = vmatpush1.bf16.msra.mxu0 %v14779_v59  ;;  %v18352_v17 = vadd.f32 %v12852_v32, %v17888_v47  ;;  %7551 = vmatprep.mubr.bf16.mxu0 %v18207_v38  ;;  %v18367_v48 = vcombine.high %v165_v62, %v177_v23  ;;  %v18397_v34 = vcombine.low %v165_v62, %v177_v23  ;;  %v14795_v32 = vld [vmem:[%s20658_s1 + $0xc60] ss:$12 sps:$4 sm:$0xff]  }
 0x3c4   :  { %9673 = vmatprep.mubr.bf16.mxu1 %v18335_v8  ;;  %7704 = vmatprep.subr.bf16.mxu0 %v14784_v4 }
 0x3c5   :  { %v12853_v47 = vpop.f32.mrb[104].mxu1 }
 0x3c6   :  { %v12854_v14 = vpop.f32.mrb[105].mxu1 }
 0x3c7   :  { %7705 = vmatpush1.bf16.msra.mxu0 %v14782_v35  ;;  %v12855_v38 = vadd.f32 %v12854_v14, %v12853_v47  ;;  %v12856_v50 = vpop.f32.mrb[106].mxu1  ;;  %v14800_v35 = vld [vmem:[%s20658_s1 + $0xc7c] ss:$12 sps:$4 sm:$0xff]   ;;  %v14798_v47 = vld [vmem:[%s20658_s1 + $0xc78] ss:$12 sps:$4 sm:$0xff]  }
 0x3c8   :  { %7706 = vmatprep.subr.bf16.mxu0 %v14789_v45  ;;  %v12857_v58 = vpop.f32.mrb[107].mxu1 }
 0x3c9   :  { %v18376_v28 = vadd.f32 %v12855_v38, %v17912_v24  ;;  %v12858_v18 = vadd.f32 %v12857_v58, %v12856_v50  ;;  %v189_v24 = vld [vmem:[%s20659_s0 + $0x578] sm:$0xff] }
 0x3ca   :  { %7552 = vmatmul.mubr.bf16.gmra.mrb[4].mxu0 %v18237_v52  ;;  %9674 = vmatmul.mubr.bf16.gmra.mrb[212].mxu1 %v18365_v37  ;;  %v201_v52 = vld [vmem:[%s20659_s0 + $0x5d8] sm:$0xff] }
 0x3cb   :  { %7561 = vmatprep.mubr.bf16.mxu0 %v18239_v6  ;;  %v18382_v25 = vadd.f32 %v12858_v18, %v17918_v2  ;;  %9681 = vmatprep.mubr.bf16.mxu1 %v18367_v48  ;;  %v14797_v2 = vld [vmem:[%s20658_s1 + $0xc64] ss:$12 sps:$4 sm:$0xff]   ;;  %v18399_v4 = vcombine.high %v189_v24, %v201_v52  ;;  %v18429_v38 = vcombine.low %v189_v24, %v201_v52 }
 0x3cc   :  { %7707 = vmatpush1.bf16.msra.mxu0 %v14787_v46 }
 0x3cd   :  { %7708 = vmatprep.subr.bf16.mxu0 %v14792_v36  ;;  %v12859_v6 = vpop.f32.mrb[108].mxu1  ;;  %v14803_v36 = vld [vmem:[%s20658_s1 + $0xc90] ss:$12 sps:$4 sm:$0xff]  }
 0x3ce   :  { %v12860_v59 = vpop.f32.mrb[109].mxu1 }
 0x3cf   :  { %v12861_v43 = vadd.f32 %v12860_v59, %v12859_v6  ;;  %v12862_v55 = vpop.f32.mrb[110].mxu1  ;;  %v14806_v6 = vld [vmem:[%s20658_s1 + $0xca8] ss:$12 sps:$4 sm:$0xff]  }
 0x3d0   :  { %7709 = vmatpush1.bf16.msra.mxu0 %v14790_v49  ;;  %v12863_v21 = vpop.f32.mrb[111].mxu1  ;;  %v14808_v49 = vld [vmem:[%s20658_s1 + $0xcac] ss:$12 sps:$4 sm:$0xff]  }
 0x3d1   :  { %7710 = vmatprep.subr.bf16.mxu0 %v14797_v2  ;;  %v18408_v45 = vadd.f32 %v12861_v43, %v17944_v0  ;;  %v12864_v62 = vadd.f32 %v12863_v21, %v12862_v55  ;;  %v213_v0 = vld [vmem:[%s20659_s0 + $0x638] sm:$0xff] }
 0x3d2   :  { %7562 = vmatmul.mubr.bf16.gmra.mrb[8].mxu0 %v18269_v20  ;;  %9682 = vmatmul.mubr.bf16.gmra.mrb[216].mxu1 %v18397_v34  ;;  %v225_v20 = vld [vmem:[%s20659_s0 + $0x698] sm:$0xff] }
 0x3d3   :  { %7571 = vmatprep.mubr.bf16.mxu0 %v18271_v12  ;;  %v18414_v23 = vadd.f32 %v12864_v62, %v17950_v22  ;;  %9689 = vmatprep.mubr.bf16.mxu1 %v18399_v4  ;;  %v14805_v22 = vld [vmem:[%s20658_s1 + $0xc94] ss:$12 sps:$4 sm:$0xff]   ;;  %v18431_v58 = vcombine.high %v213_v0, %v225_v20  ;;  %v18461_v43 = vcombine.low %v213_v0, %v225_v20 }
 0x3d4   :  { %7711 = vmatpush1.bf16.msra.mxu0 %v14795_v32 }
 0x3d5   :  { %7712 = vmatprep.subr.bf16.mxu0 %v14800_v35  ;;  %v12865_v12 = vpop.f32.mrb[112].mxu1  ;;  %v14811_v35 = vld [vmem:[%s20658_s1 + $0xcc0] ss:$12 sps:$4 sm:$0xff]  }
 0x3d6   :  { %v12866_v14 = vpop.f32.mrb[113].mxu1 }
 0x3d7   :  { %v12867_v50 = vadd.f32 %v12866_v14, %v12865_v12  ;;  %v12868_v46 = vpop.f32.mrb[114].mxu1  ;;  %v14814_v12 = vld [vmem:[%s20658_s1 + $0xcd8] ss:$12 sps:$4 sm:$0xff]  }
 0x3d8   :  { %7713 = vmatpush1.bf16.msra.mxu0 %v14798_v47  ;;  %v12869_v18 = vpop.f32.mrb[115].mxu1  ;;  %v14816_v47 = vld [vmem:[%s20658_s1 + $0xcdc] ss:$12 sps:$4 sm:$0xff]  }
 0x3d9   :  { %7714 = vmatprep.subr.bf16.mxu0 %v14805_v22  ;;  %v18440_v2 = vadd.f32 %v12867_v50, %v17976_v53  ;;  %v12870_v24 = vadd.f32 %v12869_v18, %v12868_v46  ;;  %v237_v53 = vld [vmem:[%s20659_s0 + $0x6f8] sm:$0xff] }
 0x3da   :  { %7572 = vmatmul.mubr.bf16.gmra.mrb[12].mxu0 %v18301_v5  ;;  %9690 = vmatmul.mubr.bf16.gmra.mrb[220].mxu1 %v18429_v38  ;;  %v249_v5 = vld [vmem:[%s20659_s0 + $0x758] sm:$0xff] }
 0x3db   :  { %7581 = vmatprep.mubr.bf16.mxu0 %v18303_v16  ;;  %v18446_v52 = vadd.f32 %v12870_v24, %v17982_v19  ;;  %9697 = vmatprep.mubr.bf16.mxu1 %v18431_v58  ;;  %v14813_v19 = vld [vmem:[%s20658_s1 + $0xcc4] ss:$12 sps:$4 sm:$0xff]   ;;  %v18463_v21 = vcombine.high %v237_v53, %v249_v5  ;;  %v18493_v50 = vcombine.low %v237_v53, %v249_v5 }
 0x3dc   :  { %7715 = vmatpush1.bf16.msra.mxu0 %v14803_v36 }
 0x3dd   :  { %7716 = vmatprep.subr.bf16.mxu0 %v14808_v49  ;;  %v12871_v16 = vpop.f32.mrb[116].mxu1  ;;  %v14819_v49 = vld [vmem:[%s20658_s1 + $0xcf0] ss:$12 sps:$4 sm:$0xff]  }
 0x3de   :  { %v12872_v59 = vpop.f32.mrb[117].mxu1 }
 0x3df   :  { %v12873_v55 = vadd.f32 %v12872_v59, %v12871_v16  ;;  %v12874_v32 = vpop.f32.mrb[118].mxu1  ;;  %v14822_v16 = vld [vmem:[%s20658_s1 + $0xd08] ss:$12 sps:$4 sm:$0xff]  }
 0x3e0   :  { %7717 = vmatpush1.bf16.msra.mxu0 %v14806_v6  ;;  %v12875_v62 = vpop.f32.mrb[119].mxu1  ;;  %v14824_v6 = vld [vmem:[%s20658_s1 + $0xd0c] ss:$12 sps:$4 sm:$0xff]  }
 0x3e1   :  { %7718 = vmatprep.subr.bf16.mxu0 %v14813_v19  ;;  %v18472_v22 = vadd.f32 %v12873_v55, %v18008_v39  ;;  %v12876_v0 = vadd.f32 %v12875_v62, %v12874_v32  ;;  %v261_v39 = vld [vmem:[%s20659_s0 + $0x7b8] sm:$0xff] }
 0x3e2   :  { %7582 = vmatmul.mubr.bf16.gmra.mrb[16].mxu0 %v18330_v9  ;;  %9698 = vmatmul.mubr.bf16.gmra.mrb[224].mxu1 %v18461_v43  ;;  %v273_v9 = vld [vmem:[%s20659_s0 + $0x818] sm:$0xff] }
 0x3e3   :  { %7591 = vmatprep.mubr.bf16.mxu0 %v18335_v8  ;;  %v18478_v20 = vadd.f32 %v12876_v0, %v18014_v63  ;;  %9705 = vmatprep.mubr.bf16.mxu1 %v18463_v21  ;;  %v14821_v63 = vld [vmem:[%s20658_s1 + $0xcf4] ss:$12 sps:$4 sm:$0xff]   ;;  %v18495_v18 = vcombine.high %v261_v39, %v273_v9  ;;  %v18525_v55 = vcombine.low %v261_v39, %v273_v9 }
 0x3e4   :  { %7719 = vmatpush1.bf16.msra.mxu0 %v14811_v35 }
 0x3e5   :  { %7720 = vmatprep.subr.bf16.mxu0 %v14816_v47  ;;  %v12877_v8 = vpop.f32.mrb[120].mxu1  ;;  %v14829_v47 = vld [vmem:[%s20658_s1 + $0xd20] ss:$12 sps:$4 sm:$0xff]  }
 0x3e6   :  { %v12878_v14 = vpop.f32.mrb[121].mxu1 }
 0x3e7   :  { %v12879_v46 = vadd.f32 %v12878_v14, %v12877_v8  ;;  %v12880_v36 = vpop.f32.mrb[122].mxu1  ;;  %v14832_v8 = vld [vmem:[%s20658_s1 + $0xd38] ss:$12 sps:$4 sm:$0xff]  }
 0x3e8   :  { %7721 = vmatpush1.bf16.msra.mxu0 %v14814_v12  ;;  %v12881_v24 = vpop.f32.mrb[123].mxu1  ;;  %v14834_v12 = vld [vmem:[%s20658_s1 + $0xd3c] ss:$12 sps:$4 sm:$0xff]  }
 0x3e9   :  { %7722 = vmatprep.subr.bf16.mxu0 %v14821_v63  ;;  %v18504_v19 = vadd.f32 %v12879_v46, %v18040_v40  ;;  %v12882_v53 = vadd.f32 %v12881_v24, %v12880_v36  ;;  %v285_v40 = vld [vmem:[%s20659_s0 + $0x878] sm:$0xff] }
 0x3ea   :  { %7592 = vmatmul.mubr.bf16.gmra.mrb[20].mxu0 %v18365_v37  ;;  %9706 = vmatmul.mubr.bf16.gmra.mrb[228].mxu1 %v18493_v50  ;;  %v297_v37 = vld [vmem:[%s20659_s0 + $0x8d8] sm:$0xff] }
 0x3eb   :  { %7601 = vmatprep.mubr.bf16.mxu0 %v18367_v48  ;;  %v18510_v5 = vadd.f32 %v12882_v53, %v18046_v31  ;;  %9713 = vmatprep.mubr.bf16.mxu1 %v18495_v18  ;;  %v14831_v31 = vld [vmem:[%s20658_s1 + $0xd24] ss:$12 sps:$4 sm:$0xff]   ;;  %v18527_v62 = vcombine.high %v285_v40, %v297_v37  ;;  %v18557_v46 = vcombine.low %v285_v40, %v297_v37 }
 0x3ec   :  { %7723 = vmatpush1.bf16.msra.mxu0 %v14819_v49 }
 0x3ed   :  { %7724 = vmatprep.subr.bf16.mxu0 %v14824_v6  ;;  %v12883_v48 = vpop.f32.mrb[124].mxu1  ;;  %v14835_v6 = vld [vmem:[%s20658_s1 + $0xd50] ss:$12 sps:$4 sm:$0xff]  }
 0x3ee   :  { %v12884_v59 = vpop.f32.mrb[125].mxu1 }
 0x3ef   :  { %v12885_v32 = vadd.f32 %v12884_v59, %v12883_v48  ;;  %v12886_v35 = vpop.f32.mrb[126].mxu1  ;;  %v14838_v48 = vld [vmem:[%s20658_s1 + $0xd68] ss:$12 sps:$4 sm:$0xff]  }
 0x3f0   :  { %7725 = vmatpush1.bf16.msra.mxu0 %v14822_v16  ;;  %v12887_v0 = vpop.f32.mrb[127].mxu1  ;;  %v14840_v16 = vld [vmem:[%s20658_s1 + $0xd6c] ss:$12 sps:$4 sm:$0xff]  }
 0x3f1   :  { %7726 = vmatprep.subr.bf16.mxu0 %v14831_v31  ;;  %v18536_v63 = vadd.f32 %v12885_v32, %v18072_v27  ;;  %v12888_v39 = vadd.f32 %v12887_v0, %v12886_v35  ;;  %v309_v27 = vld [vmem:[%s20659_s0 + $0x938] sm:$0xff] }
 0x3f2   :  { %7602 = vmatmul.mubr.bf16.gmra.mrb[24].mxu0 %v18397_v34  ;;  %9714 = vmatmul.mubr.bf16.gmra.mrb[232].mxu1 %v18525_v55  ;;  %v321_v34 = vld [vmem:[%s20659_s0 + $0x998] sm:$0xff] }
 0x3f3   :  { %7611 = vmatprep.mubr.bf16.mxu0 %v18399_v4  ;;  %v18542_v9 = vadd.f32 %v12888_v39, %v18078_v54  ;;  %9721 = vmatprep.mubr.bf16.mxu1 %v18527_v62  ;;  %v14837_v54 = vld [vmem:[%s20658_s1 + $0xd54] ss:$12 sps:$4 sm:$0xff]   ;;  %v18559_v24 = vcombine.high %v309_v27, %v321_v34  ;;  %v18589_v32 = vcombine.low %v309_v27, %v321_v34  ;;  %v357_v34 = vld [vmem:[%s20659_s0 + $0xab8] sm:$0xff] }
 0x3f4   :  { %7727 = vmatpush1.bf16.msra.mxu0 %v14829_v47 }
 0x3f5   :  { %7728 = vmatprep.subr.bf16.mxu0 %v14834_v12  ;;  %v12905_v4 = vpop.f32.mrb[128].mxu1 }
 0x3f6   :  { %v12906_v14 = vpop.f32.mrb[129].mxu1 }
 0x3f7   :  { %v12907_v36 = vadd.f32 %v12906_v14, %v12905_v4  ;;  %v12908_v49 = vpop.f32.mrb[130].mxu1 }
 0x3f8   :  { %7729 = vmatpush1.bf16.msra.mxu0 %v14832_v8  ;;  %v12909_v53 = vpop.f32.mrb[131].mxu1 }
 0x3f9   :  { %7730 = vmatprep.subr.bf16.mxu0 %v14837_v54  ;;  %v18568_v31 = vadd.f32 %v12907_v36, %v18104_v61  ;;  %v12910_v40 = vadd.f32 %v12909_v53, %v12908_v49  ;;  %v333_v61 = vld [vmem:[%s20659_s0 + $0x9f8] sm:$0xff] }
 0x3fa   :  { %7612 = vmatmul.mubr.bf16.gmra.mrb[28].mxu0 %v18429_v38  ;;  %9722 = vmatmul.mubr.bf16.gmra.mrb[236].mxu1 %v18557_v46  ;;  %v345_v38 = vld [vmem:[%s20659_s0 + $0xa58] sm:$0xff] }
 0x3fb   :  { %7621 = vmatprep.mubr.bf16.mxu0 %v18431_v58  ;;  %v18574_v37 = vadd.f32 %v12910_v40, %v18110_v56  ;;  %9729 = vmatprep.mubr.bf16.mxu1 %v18559_v24  ;;  %v14845_v56 = vld [vmem:[%s20658_s1 + $0xd84] ss:$12 sps:$4 sm:$0xff]   ;;  %v18591_v0 = vcombine.high %v333_v61, %v345_v38 }
 0x3fc   :  { %7731 = vmatpush1.bf16.msra.mxu0 %v14835_v6 }
 0x3fd   :  { %7732 = vmatprep.subr.bf16.mxu0 %v14840_v16  ;;  %v12911_v58 = vpop.f32.mrb[132].mxu1  ;;  %v381_v16 = vld [vmem:[%s20659_s0 + $0xb78] sm:$0xff] }
 0x3fe   :  { %v12912_v59 = vpop.f32.mrb[133].mxu1 }
 0x3ff   :  { %v12913_v35 = vadd.f32 %v12912_v59, %v12911_v58  ;;  %v12914_v47 = vpop.f32.mrb[134].mxu1 }
 0x400   :  { %7733 = vmatpush1.bf16.msra.mxu0 %v14838_v48  ;;  %v12915_v12 = vpop.f32.mrb[135].mxu1 }
 0x401   :  { %7895 = vmatprep.subr.bf16.mxu0 %v14845_v56  ;;  %v18594_v39 = vadd.f32 %v12913_v35, %v18130_v11  ;;  %v12916_v8 = vadd.f32 %v12915_v12, %v12914_v47  ;;  %v369_v11 = vld [vmem:[%s20659_s0 + $0xb18] sm:$0xff]  ;;  %v22_v35 = vld [vmem:[%s20659_s0 + $0x40] sm:$0xff] }
 0x402   :  { %7622 = vmatmul.mubr.bf16.gmra.mrb[32].mxu0 %v18461_v43  ;;  %9730 = vmatmul.mubr.bf16.gmra.mrb[240].mxu1 %v18589_v32  ;;  %v18609_v43 = vcombine.low %v333_v61, %v345_v38 }
 0x403   :  { %7631 = vmatprep.mubr.bf16.mxu0 %v18463_v21  ;;  %v18600_v27 = vadd.f32 %v12916_v8, %v18136_v15  ;;  %9737 = vmatprep.mubr.bf16.mxu1 %v18591_v0  ;;  %v18611_v21 = vcombine.high %v357_v34, %v369_v11 }
 0x405   :  { %v12917_v54 = vpop.f32.mrb[136].mxu1 }
 0x406   :  { %v12918_v4 = vpop.f32.mrb[137].mxu1 }
 0x407   :  { %v12919_v14 = vadd.f32 %v12918_v4, %v12917_v54  ;;  %v12920_v36 = vpop.f32.mrb[138].mxu1 }
 0x408   :  { %v12921_v15 = vpop.f32.mrb[139].mxu1 }
 0x409   :  { %v18614_v49 = vadd.f32 %v12919_v14, %v18150_v33  ;;  %v12922_v6 = vadd.f32 %v12921_v15, %v12920_v36  ;;  %v393_v33 = vld [vmem:[%s20659_s0 + $0xbd8] sm:$0xff]  ;;  %v46_v14 = vld [vmem:[%s20659_s0 + $0x100] sm:$0xff] }
 0x40a   :  { %7632 = vmatmul.mubr.bf16.gmra.mrb[36].mxu0 %v18493_v50  ;;  %9738 = vmatmul.mubr.bf16.gmra.mrb[244].mxu1 %v18609_v43  ;;  %v18629_v50 = vcombine.low %v357_v34, %v369_v11 }
 0x40b   :  { %7641 = vmatprep.mubr.bf16.mxu0 %v18495_v18  ;;  %v18620_v53 = vadd.f32 %v12922_v6, %v18156_v30  ;;  %9745 = vmatprep.mubr.bf16.mxu1 %v18611_v21  ;;  %v18631_v18 = vcombine.high %v381_v16, %v393_v33 }
 0x40d   :  { %v12923_v40 = vpop.f32.mrb[140].mxu1 }
 0x40e   :  { %v12924_v48 = vpop.f32.mrb[141].mxu1 }
 0x40f   :  { %v12925_v61 = vadd.f32 %v12924_v48, %v12923_v40  ;;  %v12926_v38 = vpop.f32.mrb[142].mxu1  ;;  %v14849_v40 = vld [vmem:[%s20658_s1 + $0xe60] ss:$12 sps:$4 sm:$0xff]  }
 0x410   :  { %v12927_v30 = vpop.f32.mrb[143].mxu1 }
 0x411   :  { %v18634_v56 = vadd.f32 %v12925_v61, %v18170_v26  ;;  %v12928_v58 = vadd.f32 %v12927_v30, %v12926_v38  ;;  %v34_v26 = vld [vmem:[%s20659_s0 + $0xa0] sm:$0xff] }
 0x412   :  { %7642 = vmatmul.mubr.bf16.gmra.mrb[40].mxu0 %v18525_v55  ;;  %9746 = vmatmul.mubr.bf16.gmra.mrb[248].mxu1 %v18629_v50  ;;  %v18649_v55 = vcombine.low %v381_v16, %v393_v33  ;;  %v14850_v30 = vld [vmem:[%s20658_s1 + $0xda0] ss:$12 sps:$4 sm:$0xff]  }
 0x413   :  { %7651 = vmatprep.mubr.bf16.mxu0 %v18527_v62  ;;  %v18640_v59 = vadd.f32 %v12928_v58, %v18176_v10  ;;  %9753 = vmatprep.mubr.bf16.mxu1 %v18631_v18  ;;  %v18651_v62 = vcombine.high %v22_v35, %v34_v26 }
 0x415   :  { %v12929_v47 = vpop.f32.mrb[144].mxu1 }
 0x416   :  { %v12930_v12 = vpop.f32.mrb[145].mxu1 }
 0x417   :  { %v12931_v8 = vadd.f32 %v12930_v12, %v12929_v47  ;;  %v12932_v34 = vpop.f32.mrb[146].mxu1 }
 0x418   :  { %v12933_v10 = vpop.f32.mrb[147].mxu1 }
 0x419   :  { %v18654_v11 = vadd.f32 %v12931_v8, %v18190_v1  ;;  %v12934_v54 = vadd.f32 %v12933_v10, %v12932_v34  ;;  %v58_v1 = vld [vmem:[%s20659_s0 + $0x160] sm:$0xff]  ;;  %v14865_v10 = vld [vmem:[%s20658_s1 + $0xe90] ss:$12 sps:$4 sm:$0xff]  }
 0x41a   :  { %7652 = vmatmul.mubr.bf16.gmra.mrb[44].mxu0 %v18557_v46  ;;  %9754 = vmatmul.mubr.bf16.gmra.mrb[252].mxu1 %v18649_v55  ;;  %v18669_v46 = vcombine.low %v22_v35, %v34_v26  ;;  %v18701_v35 = vcombine.low %v46_v14, %v58_v1  ;;  %v14858_v8 = vld [vmem:[%s20658_s1 + $0xdb8] ss:$12 sps:$4 sm:$0xff]  }
 0x41b   :  { %7661 = vmatprep.mubr.bf16.mxu0 %v18559_v24  ;;  %v18660_v4 = vadd.f32 %v12934_v54, %v18196_v41  ;;  %9794 = vmatprep.mubr.bf16.mxu1 %v18651_v62  ;;  %v18671_v24 = vcombine.high %v46_v14, %v58_v1  ;;  %v14842_v41 = vld [vmem:[%s20658_s1 + $0xd88] ss:$12 sps:$4 sm:$0xff]  }
 0x41d   :  { %v12935_v36 = vpop.f32.mrb[148].mxu1 }
 0x41e   :  { %v12936_v15 = vpop.f32.mrb[149].mxu1 }
 0x41f   :  { %v12937_v6 = vadd.f32 %v12936_v15, %v12935_v36  ;;  %v12938_v16 = vpop.f32.mrb[150].mxu1  ;;  %v14866_v36 = vld [vmem:[%s20658_s1 + $0xdd0] ss:$12 sps:$4 sm:$0xff]  }
 0x420   :  { %v12939_v33 = vpop.f32.mrb[151].mxu1 }
 0x421   :  { %v18680_v48 = vadd.f32 %v12937_v6, %v18216_v44  ;;  %v12940_v61 = vadd.f32 %v12939_v33, %v12938_v16  ;;  %v70_v44 = vld [vmem:[%s20659_s0 + $0x1c0] sm:$0xff] }
 0x422   :  { %7662 = vmatmul.mubr.bf16.gmra.mrb[48].mxu0 %v18589_v32  ;;  %9795 = vmatmul.mubr.bf16.vlgmr.msra.gmra.mrb[0].mxu1 %v18669_v46  ;;  %v82_v32 = vld [vmem:[%s20659_s0 + $0x220] sm:$0xff] }
 0x423   :  { %7671 = vmatprep.mubr.bf16.mxu0 %v18591_v0  ;;  %v18686_v38 = vadd.f32 %v12940_v61, %v18222_v57  ;;  %9802 = vmatprep.mubr.bf16.mxu1 %v18671_v24  ;;  %v14857_v57 = vld [vmem:[%s20658_s1 + $0xe78] ss:$12 sps:$4 sm:$0xff]   ;;  %v18703_v12 = vcombine.high %v70_v44, %v82_v32  ;;  %v18733_v6 = vcombine.low %v70_v44, %v82_v32 }
 0x424   :  { %13226 = vmatpush3.bf16.msra.mxu1 %v14842_v41 }
 0x425   :  { %13227 = vmatprep.subr.bf16.mxu1 %v14849_v40  ;;  %v12941_v0 = vpop.f32.mrb[152].mxu1  ;;  %v14874_v40 = vld [vmem:[%s20658_s1 + $0xde8] ss:$12 sps:$4 sm:$0xff]  }
 0x426   :  { %v12942_v58 = vpop.f32.mrb[153].mxu1 }
 0x427   :  { %v12943_v26 = vadd.f32 %v12942_v58, %v12941_v0  ;;  %v12944_v47 = vpop.f32.mrb[154].mxu1  ;;  %v14882_v0 = vld [vmem:[%s20658_s1 + $0xe00] ss:$12 sps:$4 sm:$0xff]  }
 0x428   :  { %13228 = vmatpush3.bf16.msra.mxu1 %v14850_v30  ;;  %v12945_v34 = vpop.f32.mrb[155].mxu1  ;;  %v14881_v30 = vld [vmem:[%s20658_s1 + $0xec0] ss:$12 sps:$4 sm:$0xff]  }
 0x429   :  { %13229 = vmatprep.subr.bf16.mxu1 %v14857_v57  ;;  %v18712_v54 = vadd.f32 %v12943_v26, %v18248_v60  ;;  %v12946_v14 = vadd.f32 %v12945_v34, %v12944_v47  ;;  %v94_v60 = vld [vmem:[%s20659_s0 + $0x280] sm:$0xff] }
 0x42a   :  { %7672 = vmatmul.mubr.bf16.gmra.mrb[52].mxu0 %v18609_v43  ;;  %9803 = vmatmul.mubr.bf16.gmra.mrb[4].mxu1 %v18701_v35  ;;  %v106_v43 = vld [vmem:[%s20659_s0 + $0x2e0] sm:$0xff] }
 0x42b   :  { %7681 = vmatprep.mubr.bf16.mxu0 %v18611_v21  ;;  %v18718_v1 = vadd.f32 %v12946_v14, %v18254_v51  ;;  %9810 = vmatprep.mubr.bf16.mxu1 %v18703_v12  ;;  %v14873_v51 = vld [vmem:[%s20658_s1 + $0xea8] ss:$12 sps:$4 sm:$0xff]   ;;  %v18735_v33 = vcombine.high %v94_v60, %v106_v43  ;;  %v18765_v26 = vcombine.low %v94_v60, %v106_v43 }
 0x42c   :  { %13230 = vmatpush3.bf16.msra.mxu1 %v14858_v8 }
 0x42d   :  { %13231 = vmatprep.subr.bf16.mxu1 %v14865_v10  ;;  %v12947_v21 = vpop.f32.mrb[156].mxu1  ;;  %v14890_v10 = vld [vmem:[%s20658_s1 + $0xe18] ss:$12 sps:$4 sm:$0xff]  }
 0x42e   :  { %v12948_v15 = vpop.f32.mrb[157].mxu1 }
 0x42f   :  { %v12949_v16 = vadd.f32 %v12948_v15, %v12947_v21  ;;  %v12950_v41 = vpop.f32.mrb[158].mxu1  ;;  %v14892_v21 = vld [vmem:[%s20658_s1 + $0xe30] ss:$12 sps:$4 sm:$0xff]  }
 0x430   :  { %13232 = vmatpush3.bf16.msra.mxu1 %v14866_v36  ;;  %v12951_v61 = vpop.f32.mrb[159].mxu1  ;;  %v14891_v36 = vld [vmem:[%s20658_s1 + $0xef0] ss:$12 sps:$4 sm:$0xff]  }
 0x431   :  { %13233 = vmatprep.subr.bf16.mxu1 %v14873_v51  ;;  %v18744_v57 = vadd.f32 %v12949_v16, %v18280_v13  ;;  %v12952_v44 = vadd.f32 %v12951_v61, %v12950_v41  ;;  %v118_v13 = vld [vmem:[%s20659_s0 + $0x340] sm:$0xff] }
 0x432   :  { %7682 = vmatmul.mubr.bf16.gmra.mrb[56].mxu0 %v18629_v50  ;;  %9811 = vmatmul.mubr.bf16.gmra.mrb[8].mxu1 %v18733_v6  ;;  %v130_v50 = vld [vmem:[%s20659_s0 + $0x3a0] sm:$0xff] }
 0x433   :  { %7691 = vmatprep.mubr.bf16.mxu0 %v18631_v18  ;;  %v18750_v32 = vadd.f32 %v12952_v44, %v18286_v3  ;;  %9818 = vmatprep.mubr.bf16.mxu1 %v18735_v33  ;;  %v14889_v3 = vld [vmem:[%s20658_s1 + $0xed8] ss:$12 sps:$4 sm:$0xff]   ;;  %v18767_v34 = vcombine.high %v118_v13, %v130_v50  ;;  %v14843_v16 = vld [vmem:[%s20658_s1 + $0xd80] ss:$12 sps:$4 sm:$0xff]  }
 0x434   :  { %13234 = vmatpush3.bf16.msra.mxu1 %v14874_v40 }
 0x435   :  { %13235 = vmatprep.subr.bf16.mxu1 %v14881_v30  ;;  %v12953_v18 = vpop.f32.mrb[160].mxu1  ;;  %v14905_v30 = vld [vmem:[%s20658_s1 + $0xfc8] ss:$12 sps:$4 sm:$0xff]  }
 0x436   :  { %v12954_v58 = vpop.f32.mrb[161].mxu1 }
 0x437   :  { %v12955_v47 = vadd.f32 %v12954_v58, %v12953_v18  ;;  %v12956_v8 = vpop.f32.mrb[162].mxu1  ;;  %v178_v58 = vld [vmem:[%s20659_s0 + $0x520] sm:$0xff] }
 0x438   :  { %13236 = vmatpush3.bf16.msra.mxu1 %v14882_v0  ;;  %v12957_v14 = vpop.f32.mrb[163].mxu1  ;;  %v14848_v0 = vld [vmem:[%s20658_s1 + $0xd9c] ss:$12 sps:$4 sm:$0xff]  }
 0x439   :  { %13237 = vmatprep.subr.bf16.mxu1 %v14889_v3  ;;  %v18776_v51 = vadd.f32 %v12955_v47, %v18312_v29  ;;  %v12958_v60 = vadd.f32 %v12957_v14, %v12956_v8  ;;  %v142_v29 = vld [vmem:[%s20659_s0 + $0x400] sm:$0xff] }
 0x43a   :  { %7692 = vmatmul.mubr.bf16.gmra.mrb[60].mxu0 %v18649_v55  ;;  %9819 = vmatmul.mubr.bf16.gmra.mrb[12].mxu1 %v18765_v26  ;;  %v154_v55 = vld [vmem:[%s20659_s0 + $0x460] sm:$0xff] }
 0x43b   :  { %7734 = vmatprep.mubr.bf16.mxu0 %v18651_v62  ;;  %v18782_v43 = vadd.f32 %v12958_v60, %v18318_v7  ;;  %9826 = vmatprep.mubr.bf16.mxu1 %v18767_v34  ;;  %v18794_v7 = vcombine.low %v118_v13, %v130_v50  ;;  %v18799_v61 = vcombine.high %v142_v29, %v154_v55  ;;  %v14846_v3 = vld [vmem:[%s20658_s1 + $0xd98] ss:$12 sps:$4 sm:$0xff]  }
 0x43c   :  { %13238 = vmatpush3.bf16.msra.mxu1 %v14890_v10  ;;  %v18829_v8 = vcombine.low %v142_v29, %v154_v55 }
 0x43d   :  { %13239 = vmatprep.subr.bf16.mxu1 %v14891_v36  ;;  %v12959_v62 = vpop.f32.mrb[164].mxu1  ;;  %v14851_v36 = vld [vmem:[%s20658_s1 + $0xdb0] ss:$12 sps:$4 sm:$0xff]  }
 0x43e   :  { %v12960_v15 = vpop.f32.mrb[165].mxu1 }
 0x43f   :  { %v12961_v41 = vadd.f32 %v12960_v15, %v12959_v62  ;;  %v12962_v40 = vpop.f32.mrb[166].mxu1  ;;  %v14854_v15 = vld [vmem:[%s20658_s1 + $0xdc8] ss:$12 sps:$4 sm:$0xff]  }
 0x440   :  { %13240 = vmatpush3.bf16.msra.mxu1 %v14892_v21  ;;  %v12963_v44 = vpop.f32.mrb[167].mxu1  ;;  %v14856_v21 = vld [vmem:[%s20658_s1 + $0xdcc] ss:$12 sps:$4 sm:$0xff]  }
 0x441   :  { %v18808_v13 = vadd.f32 %v12961_v41, %v18341_v42  ;;  %v12964_v50 = vadd.f32 %v12963_v44, %v12962_v40  ;;  %13337 = vmatprep.subr.bf16.mxu1 %v14905_v30  ;;  %v14853_v42 = vld [vmem:[%s20658_s1 + $0xdb4] ss:$12 sps:$4 sm:$0xff]  }
 0x442   :  { %7735 = vmatmul.mubr.bf16.vlgmr.msra.gmra.mrb[0].mxu0 %v18669_v46  ;;  %9827 = vmatmul.mubr.bf16.gmra.mrb[16].mxu1 %v18794_v7  ;;  %v166_v46 = vld [vmem:[%s20659_s0 + $0x4c0] sm:$0xff] }
 0x443   :  { %7896 = vmatpush1.bf16.msra.mxu0 %v14843_v16  ;;  %v18816_v18 = vadd.f32 %v12964_v50, %v18352_v17  ;;  %7744 = vmatprep.mubr.bf16.mxu0 %v18671_v24  ;;  %v18831_v14 = vcombine.high %v166_v46, %v178_v58  ;;  %v18861_v41 = vcombine.low %v166_v46, %v178_v58 }
 0x444   :  { %9834 = vmatprep.mubr.bf16.mxu1 %v18799_v61  ;;  %7897 = vmatprep.subr.bf16.mxu0 %v14848_v0  ;;  %v14859_v0 = vld [vmem:[%s20658_s1 + $0xde0] ss:$12 sps:$4 sm:$0xff]  }
 0x445   :  { %v12965_v47 = vpop.f32.mrb[168].mxu1 }
 0x446   :  { %v12966_v17 = vpop.f32.mrb[169].mxu1 }
 0x447   :  { %7898 = vmatpush1.bf16.msra.mxu0 %v14846_v3  ;;  %v12967_v24 = vadd.f32 %v12966_v17, %v12965_v47  ;;  %v12968_v10 = vpop.f32.mrb[170].mxu1  ;;  %v14864_v3 = vld [vmem:[%s20658_s1 + $0xdfc] ss:$12 sps:$4 sm:$0xff]   ;;  %v14862_v47 = vld [vmem:[%s20658_s1 + $0xdf8] ss:$12 sps:$4 sm:$0xff]  }
 0x448   :  { %7899 = vmatprep.subr.bf16.mxu0 %v14853_v42  ;;  %v12969_v60 = vpop.f32.mrb[171].mxu1 }
 0x449   :  { %v18840_v62 = vadd.f32 %v12967_v24, %v18376_v28  ;;  %v12970_v29 = vadd.f32 %v12969_v60, %v12968_v10  ;;  %v190_v28 = vld [vmem:[%s20659_s0 + $0x580] sm:$0xff] }
 0x44a   :  { %7745 = vmatmul.mubr.bf16.gmra.mrb[4].mxu0 %v18701_v35  ;;  %9835 = vmatmul.mubr.bf16.gmra.mrb[20].mxu1 %v18829_v8  ;;  %v202_v35 = vld [vmem:[%s20659_s0 + $0x5e0] sm:$0xff] }
 0x44b   :  { %7754 = vmatprep.mubr.bf16.mxu0 %v18703_v12  ;;  %v18846_v55 = vadd.f32 %v12970_v29, %v18382_v25  ;;  %9842 = vmatprep.mubr.bf16.mxu1 %v18831_v14  ;;  %v14861_v25 = vld [vmem:[%s20658_s1 + $0xde4] ss:$12 sps:$4 sm:$0xff]   ;;  %v18863_v44 = vcombine.high %v190_v28, %v202_v35  ;;  %v18893_v24 = vcombine.low %v190_v28, %v202_v35 }
 0x44c   :  { %7900 = vmatpush1.bf16.msra.mxu0 %v14851_v36 }
 0x44d   :  { %7901 = vmatprep.subr.bf16.mxu0 %v14856_v21  ;;  %v12971_v12 = vpop.f32.mrb[172].mxu1  ;;  %v14867_v21 = vld [vmem:[%s20658_s1 + $0xe10] ss:$12 sps:$4 sm:$0xff]  }
 0x44e   :  { %v12972_v16 = vpop.f32.mrb[173].mxu1 }
 0x44f   :  { %v12973_v40 = vadd.f32 %v12972_v16, %v12971_v12  ;;  %v12974_v30 = vpop.f32.mrb[174].mxu1  ;;  %v14870_v12 = vld [vmem:[%s20658_s1 + $0xe28] ss:$12 sps:$4 sm:$0xff]  }
 0x450   :  { %7902 = vmatpush1.bf16.msra.mxu0 %v14854_v15  ;;  %v12975_v50 = vpop.f32.mrb[175].mxu1  ;;  %v14872_v15 = vld [vmem:[%s20658_s1 + $0xe2c] ss:$12 sps:$4 sm:$0xff]  }
 0x451   :  { %7903 = vmatprep.subr.bf16.mxu0 %v14861_v25  ;;  %v18872_v42 = vadd.f32 %v12973_v40, %v18408_v45  ;;  %v12976_v46 = vadd.f32 %v12975_v50, %v12974_v30  ;;  %v214_v45 = vld [vmem:[%s20659_s0 + $0x640] sm:$0xff] }
 0x452   :  { %7755 = vmatmul.mubr.bf16.gmra.mrb[8].mxu0 %v18733_v6  ;;  %9843 = vmatmul.mubr.bf16.gmra.mrb[24].mxu1 %v18861_v41  ;;  %v226_v6 = vld [vmem:[%s20659_s0 + $0x6a0] sm:$0xff] }
 0x453   :  { %7764 = vmatprep.mubr.bf16.mxu0 %v18735_v33  ;;  %v18878_v58 = vadd.f32 %v12976_v46, %v18414_v23  ;;  %9850 = vmatprep.mubr.bf16.mxu1 %v18863_v44  ;;  %v14869_v23 = vld [vmem:[%s20658_s1 + $0xe14] ss:$12 sps:$4 sm:$0xff]   ;;  %v18895_v60 = vcombine.high %v214_v45, %v226_v6  ;;  %v18925_v40 = vcombine.low %v214_v45, %v226_v6 }
 0x454   :  { %7904 = vmatpush1.bf16.msra.mxu0 %v14859_v0 }
 0x455   :  { %7905 = vmatprep.subr.bf16.mxu0 %v14864_v3  ;;  %v12977_v33 = vpop.f32.mrb[176].mxu1  ;;  %v14875_v3 = vld [vmem:[%s20658_s1 + $0xe40] ss:$12 sps:$4 sm:$0xff]  }
 0x456   :  { %v12978_v17 = vpop.f32.mrb[177].mxu1 }
 0x457   :  { %v12979_v10 = vadd.f32 %v12978_v17, %v12977_v33  ;;  %v12980_v36 = vpop.f32.mrb[178].mxu1  ;;  %v14878_v33 = vld [vmem:[%s20658_s1 + $0xe58] ss:$12 sps:$4 sm:$0xff]  }
 0x458   :  { %7906 = vmatpush1.bf16.msra.mxu0 %v14862_v47  ;;  %v12981_v29 = vpop.f32.mrb[179].mxu1  ;;  %v14880_v47 = vld [vmem:[%s20658_s1 + $0xe5c] ss:$12 sps:$4 sm:$0xff]  }
 0x459   :  { %7907 = vmatprep.subr.bf16.mxu0 %v14869_v23  ;;  %v18904_v25 = vadd.f32 %v12979_v10, %v18440_v2  ;;  %v12982_v28 = vadd.f32 %v12981_v29, %v12980_v36  ;;  %v238_v2 = vld [vmem:[%s20659_s0 + $0x700] sm:$0xff] }
 0x45a   :  { %7765 = vmatmul.mubr.bf16.gmra.mrb[12].mxu0 %v18765_v26  ;;  %9851 = vmatmul.mubr.bf16.gmra.mrb[28].mxu1 %v18893_v24  ;;  %v250_v26 = vld [vmem:[%s20659_s0 + $0x760] sm:$0xff] }
 0x45b   :  { %7774 = vmatprep.mubr.bf16.mxu0 %v18767_v34  ;;  %v18910_v35 = vadd.f32 %v12982_v28, %v18446_v52  ;;  %9858 = vmatprep.mubr.bf16.mxu1 %v18895_v60  ;;  %v14877_v52 = vld [vmem:[%s20658_s1 + $0xe44] ss:$12 sps:$4 sm:$0xff]   ;;  %v18927_v50 = vcombine.high %v238_v2, %v250_v26  ;;  %v18957_v10 = vcombine.low %v238_v2, %v250_v26 }
 0x45c   :  { %7908 = vmatpush1.bf16.msra.mxu0 %v14867_v21 }
 0x45d   :  { %7909 = vmatprep.subr.bf16.mxu0 %v14872_v15  ;;  %v12983_v34 = vpop.f32.mrb[180].mxu1  ;;  %v14883_v15 = vld [vmem:[%s20658_s1 + $0xe70] ss:$12 sps:$4 sm:$0xff]  }
 0x45e   :  { %v12984_v16 = vpop.f32.mrb[181].mxu1 }
 0x45f   :  { %v12985_v30 = vadd.f32 %v12984_v16, %v12983_v34  ;;  %v12986_v0 = vpop.f32.mrb[182].mxu1  ;;  %v14886_v34 = vld [vmem:[%s20658_s1 + $0xe88] ss:$12 sps:$4 sm:$0xff]  }
 0x460   :  { %7910 = vmatpush1.bf16.msra.mxu0 %v14870_v12  ;;  %v12987_v46 = vpop.f32.mrb[183].mxu1  ;;  %v14888_v12 = vld [vmem:[%s20658_s1 + $0xe8c] ss:$12 sps:$4 sm:$0xff]  }
 0x461   :  { %7911 = vmatprep.subr.bf16.mxu0 %v14877_v52  ;;  %v18936_v23 = vadd.f32 %v12985_v30, %v18472_v22  ;;  %v12988_v45 = vadd.f32 %v12987_v46, %v12986_v0  ;;  %v262_v22 = vld [vmem:[%s20659_s0 + $0x7c0] sm:$0xff] }
 0x462   :  { %7775 = vmatmul.mubr.bf16.gmra.mrb[16].mxu0 %v18794_v7  ;;  %9859 = vmatmul.mubr.bf16.gmra.mrb[32].mxu1 %v18925_v40  ;;  %v274_v7 = vld [vmem:[%s20659_s0 + $0x820] sm:$0xff] }
 0x463   :  { %7784 = vmatprep.mubr.bf16.mxu0 %v18799_v61  ;;  %v18942_v6 = vadd.f32 %v12988_v45, %v18478_v20  ;;  %9866 = vmatprep.mubr.bf16.mxu1 %v18927_v50  ;;  %v14885_v20 = vld [vmem:[%s20658_s1 + $0xe74] ss:$12 sps:$4 sm:$0xff]   ;;  %v18959_v29 = vcombine.high %v262_v22, %v274_v7  ;;  %v18989_v30 = vcombine.low %v262_v22, %v274_v7 }
 0x464   :  { %7912 = vmatpush1.bf16.msra.mxu0 %v14875_v3 }
 0x465   :  { %7913 = vmatprep.subr.bf16.mxu0 %v14880_v47  ;;  %v12989_v61 = vpop.f32.mrb[184].mxu1  ;;  %v14893_v47 = vld [vmem:[%s20658_s1 + $0xea0] ss:$12 sps:$4 sm:$0xff]  }
 0x466   :  { %v12990_v17 = vpop.f32.mrb[185].mxu1 }
 0x467   :  { %v12991_v36 = vadd.f32 %v12990_v17, %v12989_v61  ;;  %v12992_v21 = vpop.f32.mrb[186].mxu1  ;;  %v14896_v61 = vld [vmem:[%s20658_s1 + $0xeb8] ss:$12 sps:$4 sm:$0xff]  }
 0x468   :  { %7914 = vmatpush1.bf16.msra.mxu0 %v14878_v33  ;;  %v12993_v28 = vpop.f32.mrb[187].mxu1  ;;  %v14898_v33 = vld [vmem:[%s20658_s1 + $0xebc] ss:$12 sps:$4 sm:$0xff]  }
 0x469   :  { %7915 = vmatprep.subr.bf16.mxu0 %v14885_v20  ;;  %v18968_v52 = vadd.f32 %v12991_v36, %v18504_v19  ;;  %v12994_v2 = vadd.f32 %v12993_v28, %v12992_v21  ;;  %v286_v19 = vld [vmem:[%s20659_s0 + $0x880] sm:$0xff] }
 0x46a   :  { %7785 = vmatmul.mubr.bf16.gmra.mrb[20].mxu0 %v18829_v8  ;;  %9867 = vmatmul.mubr.bf16.gmra.mrb[36].mxu1 %v18957_v10  ;;  %v298_v8 = vld [vmem:[%s20659_s0 + $0x8e0] sm:$0xff] }
 0x46b   :  { %7794 = vmatprep.mubr.bf16.mxu0 %v18831_v14  ;;  %v18974_v26 = vadd.f32 %v12994_v2, %v18510_v5  ;;  %9874 = vmatprep.mubr.bf16.mxu1 %v18959_v29  ;;  %v14895_v5 = vld [vmem:[%s20658_s1 + $0xea4] ss:$12 sps:$4 sm:$0xff]   ;;  %v18991_v46 = vcombine.high %v286_v19, %v298_v8  ;;  %v19021_v36 = vcombine.low %v286_v19, %v298_v8  ;;  %v14902_v8 = vld [vmem:[%s20658_s1 + $0xee8] ss:$12 sps:$4 sm:$0xff]  }
 0x46c   :  { %7916 = vmatpush1.bf16.msra.mxu0 %v14883_v15 }
 0x46d   :  { %7917 = vmatprep.subr.bf16.mxu0 %v14888_v12  ;;  %v12995_v14 = vpop.f32.mrb[188].mxu1  ;;  %v14899_v12 = vld [vmem:[%s20658_s1 + $0xed0] ss:$12 sps:$4 sm:$0xff]  }
 0x46e   :  { %v12996_v16 = vpop.f32.mrb[189].mxu1 }
 0x46f   :  { %v12997_v0 = vadd.f32 %v12996_v16, %v12995_v14  ;;  %v12998_v3 = vpop.f32.mrb[190].mxu1 }
 0x470   :  { %7918 = vmatpush1.bf16.msra.mxu0 %v14886_v34  ;;  %v12999_v45 = vpop.f32.mrb[191].mxu1  ;;  %v14904_v34 = vld [vmem:[%s20658_s1 + $0xeec] ss:$12 sps:$4 sm:$0xff]  }
 0x471   :  { %7919 = vmatprep.subr.bf16.mxu0 %v14895_v5  ;;  %v19000_v20 = vadd.f32 %v12997_v0, %v18536_v63  ;;  %v13000_v22 = vadd.f32 %v12999_v45, %v12998_v3  ;;  %v310_v63 = vld [vmem:[%s20659_s0 + $0x940] sm:$0xff] }
 0x472   :  { %7795 = vmatmul.mubr.bf16.gmra.mrb[24].mxu0 %v18861_v41  ;;  %9875 = vmatmul.mubr.bf16.gmra.mrb[40].mxu1 %v18989_v30  ;;  %v322_v41 = vld [vmem:[%s20659_s0 + $0x9a0] sm:$0xff] }
 0x473   :  { %7804 = vmatprep.mubr.bf16.mxu0 %v18863_v44  ;;  %v19006_v7 = vadd.f32 %v13000_v22, %v18542_v9  ;;  %9882 = vmatprep.mubr.bf16.mxu1 %v18991_v46  ;;  %v14901_v9 = vld [vmem:[%s20658_s1 + $0xed4] ss:$12 sps:$4 sm:$0xff]   ;;  %v19023_v28 = vcombine.high %v310_v63, %v322_v41  ;;  %v19053_v3 = vcombine.low %v310_v63, %v322_v41 }
 0x474   :  { %7920 = vmatpush1.bf16.msra.mxu0 %v14893_v47  ;;  %v358_v41 = vld [vmem:[%s20659_s0 + $0xac0] sm:$0xff] }
 0x475   :  { %7921 = vmatprep.subr.bf16.mxu0 %v14898_v33  ;;  %v13017_v44 = vpop.f32.mrb[192].mxu1 }
 0x476   :  { %v13018_v17 = vpop.f32.mrb[193].mxu1 }
 0x477   :  { %v13019_v21 = vadd.f32 %v13018_v17, %v13017_v44  ;;  %v13020_v15 = vpop.f32.mrb[194].mxu1 }
 0x478   :  { %7922 = vmatpush1.bf16.msra.mxu0 %v14896_v61  ;;  %v13021_v2 = vpop.f32.mrb[195].mxu1 }
 0x479   :  { %7923 = vmatprep.subr.bf16.mxu0 %v14901_v9  ;;  %v13022_v5 = vadd.f32 %v13021_v2, %v13020_v15  ;;  %v19033_v19 = vadd.f32 %v13019_v21, %v18568_v31  ;;  %v346_v31 = vld [vmem:[%s20659_s0 + $0xa60] sm:$0xff] }
 0x47a   :  { %7805 = vmatmul.mubr.bf16.gmra.mrb[28].mxu0 %v18893_v24  ;;  %9883 = vmatmul.mubr.bf16.gmra.mrb[44].mxu1 %v19021_v36  ;;  %v334_v24 = vld [vmem:[%s20659_s0 + $0xa00] sm:$0xff] }
 0x47b   :  { %7814 = vmatprep.mubr.bf16.mxu0 %v18895_v60  ;;  %9890 = vmatprep.mubr.bf16.mxu1 %v19023_v28  ;;  %v19042_v14 = vadd.f32 %v13022_v5, %v18574_v37  ;;  %v14909_v60 = vld [vmem:[%s20658_s1 + $0xf04] ss:$12 sps:$4 sm:$0xff]   ;;  %v19055_v45 = vcombine.high %v334_v24, %v346_v31  ;;  %v19073_v44 = vcombine.low %v334_v24, %v346_v31 }
 0x47c   :  { %7924 = vmatpush1.bf16.msra.mxu0 %v14899_v12 }
 0x47d   :  { %7925 = vmatprep.subr.bf16.mxu0 %v14904_v34  ;;  %v13023_v16 = vpop.f32.mrb[196].mxu1  ;;  %v382_v34 = vld [vmem:[%s20659_s0 + $0xb80] sm:$0xff] }
 0x47e   :  { %v13024_v0 = vpop.f32.mrb[197].mxu1 }
 0x47f   :  { %v13025_v47 = vadd.f32 %v13024_v0, %v13023_v16  ;;  %v13026_v37 = vpop.f32.mrb[198].mxu1 }
 0x480   :  { %7926 = vmatpush1.bf16.msra.mxu0 %v14902_v8  ;;  %v13027_v33 = vpop.f32.mrb[199].mxu1 }
 0x481   :  { %8088 = vmatprep.subr.bf16.mxu0 %v14909_v60  ;;  %v13028_v22 = vadd.f32 %v13027_v33, %v13026_v37  ;;  %v19059_v61 = vadd.f32 %v13025_v47, %v18594_v39  ;;  %v23_v47 = vld [vmem:[%s20659_s0 + $0x48] sm:$0xff] }
 0x482   :  { %7815 = vmatmul.mubr.bf16.gmra.mrb[32].mxu0 %v18925_v40  ;;  %9891 = vmatmul.mubr.bf16.gmra.mrb[48].mxu1 %v19053_v3  ;;  %v370_v40 = vld [vmem:[%s20659_s0 + $0xb20] sm:$0xff] }
 0x483   :  { %7824 = vmatprep.mubr.bf16.mxu0 %v18927_v50  ;;  %9898 = vmatprep.mubr.bf16.mxu1 %v19055_v45  ;;  %v19065_v63 = vadd.f32 %v13028_v22, %v18600_v27  ;;  %v19075_v50 = vcombine.high %v358_v41, %v370_v40  ;;  %v19093_v8 = vcombine.low %v358_v41, %v370_v40 }
 0x485   :  { %v13029_v9 = vpop.f32.mrb[200].mxu1 }
 0x486   :  { %v13030_v39 = vpop.f32.mrb[201].mxu1 }
 0x487   :  { %v13031_v17 = vadd.f32 %v13030_v39, %v13029_v9  ;;  %v13032_v21 = vpop.f32.mrb[202].mxu1 }
 0x488   :  { %v13033_v15 = vpop.f32.mrb[203].mxu1 }
 0x489   :  { %v13034_v12 = vadd.f32 %v13033_v15, %v13032_v21  ;;  %v19079_v27 = vadd.f32 %v13031_v17, %v18614_v49  ;;  %v47_v17 = vld [vmem:[%s20659_s0 + $0x108] sm:$0xff] }
 0x48a   :  { %7825 = vmatmul.mubr.bf16.gmra.mrb[36].mxu0 %v18957_v10  ;;  %9899 = vmatmul.mubr.bf16.gmra.mrb[52].mxu1 %v19073_v44  ;;  %v394_v10 = vld [vmem:[%s20659_s0 + $0xbe0] sm:$0xff] }
 0x48b   :  { %7834 = vmatprep.mubr.bf16.mxu0 %v18959_v29  ;;  %9906 = vmatprep.mubr.bf16.mxu1 %v19075_v50  ;;  %v19085_v2 = vadd.f32 %v13034_v12, %v18620_v53  ;;  %v19095_v29 = vcombine.high %v382_v34, %v394_v10  ;;  %v19113_v33 = vcombine.low %v382_v34, %v394_v10 }
 0x48d   :  { %v13035_v5 = vpop.f32.mrb[204].mxu1 }
 0x48e   :  { %v13036_v49 = vpop.f32.mrb[205].mxu1 }
 0x48f   :  { %v13037_v24 = vadd.f32 %v13036_v49, %v13035_v5  ;;  %v13038_v31 = vpop.f32.mrb[206].mxu1  ;;  %v14913_v5 = vld [vmem:[%s20658_s1 + $0xfe0] ss:$12 sps:$4 sm:$0xff]  }
 0x490   :  { %v13039_v60 = vpop.f32.mrb[207].mxu1 }
 0x491   :  { %v13040_v16 = vadd.f32 %v13039_v60, %v13038_v31  ;;  %v19099_v53 = vadd.f32 %v13037_v24, %v18634_v56  ;;  %v14914_v31 = vld [vmem:[%s20658_s1 + $0xf20] ss:$12 sps:$4 sm:$0xff]  }
 0x492   :  { %7835 = vmatmul.mubr.bf16.gmra.mrb[40].mxu0 %v18989_v30  ;;  %9907 = vmatmul.mubr.bf16.gmra.mrb[56].mxu1 %v19093_v8  ;;  %v35_v30 = vld [vmem:[%s20659_s0 + $0xa8] sm:$0xff] }
 0x493   :  { %7844 = vmatprep.mubr.bf16.mxu0 %v18991_v46  ;;  %9914 = vmatprep.mubr.bf16.mxu1 %v19095_v29  ;;  %v19105_v0 = vadd.f32 %v13040_v16, %v18640_v59  ;;  %v19115_v46 = vcombine.high %v23_v47, %v35_v30  ;;  %v19133_v15 = vcombine.low %v23_v47, %v35_v30 }
 0x495   :  { %v13041_v37 = vpop.f32.mrb[208].mxu1 }
 0x496   :  { %v13042_v56 = vpop.f32.mrb[209].mxu1 }
 0x497   :  { %v13043_v22 = vadd.f32 %v13042_v56, %v13041_v37  ;;  %v13044_v41 = vpop.f32.mrb[210].mxu1 }
 0x498   :  { %v13045_v40 = vpop.f32.mrb[211].mxu1 }
 0x499   :  { %v13046_v9 = vadd.f32 %v13045_v40, %v13044_v41  ;;  %v19119_v59 = vadd.f32 %v13043_v22, %v18654_v11  ;;  %v14922_v22 = vld [vmem:[%s20658_s1 + $0xf38] ss:$12 sps:$4 sm:$0xff]   ;;  %v14929_v40 = vld [vmem:[%s20658_s1 + $0x1010] ss:$12 sps:$4 sm:$0xff]  }
 0x49a   :  { %7845 = vmatmul.mubr.bf16.gmra.mrb[44].mxu0 %v19021_v36  ;;  %9915 = vmatmul.mubr.bf16.gmra.mrb[60].mxu1 %v19113_v33  ;;  %v59_v36 = vld [vmem:[%s20659_s0 + $0x168] sm:$0xff] }
 0x49b   :  { %7854 = vmatprep.mubr.bf16.mxu0 %v19023_v28  ;;  %9955 = vmatprep.mubr.bf16.mxu1 %v19115_v46  ;;  %v19125_v39 = vadd.f32 %v13046_v9, %v18660_v4  ;;  %v19135_v28 = vcombine.high %v47_v17, %v59_v36  ;;  %v14906_v4 = vld [vmem:[%s20658_s1 + $0xf08] ss:$12 sps:$4 sm:$0xff]   ;;  %v19165_v30 = vcombine.low %v47_v17, %v59_v36  ;;  %v14930_v36 = vld [vmem:[%s20658_s1 + $0xf50] ss:$12 sps:$4 sm:$0xff]  }
 0x49d   :  { %v13047_v21 = vpop.f32.mrb[212].mxu1 }
 0x49e   :  { %v13048_v11 = vpop.f32.mrb[213].mxu1 }
 0x49f   :  { %v13049_v12 = vadd.f32 %v13048_v11, %v13047_v21  ;;  %v13050_v34 = vpop.f32.mrb[214].mxu1 }
 0x4a0   :  { %v13051_v10 = vpop.f32.mrb[215].mxu1 }
 0x4a1   :  { %v13052_v49 = vadd.f32 %v13051_v10, %v13050_v34  ;;  %v19145_v24 = vadd.f32 %v13049_v12, %v18680_v48  ;;  %v83_v48 = vld [vmem:[%s20659_s0 + $0x228] sm:$0xff] }
 0x4a2   :  { %7855 = vmatmul.mubr.bf16.gmra.mrb[48].mxu0 %v19053_v3  ;;  %9956 = vmatmul.mubr.bf16.vlgmr.msra.gmra.mrb[64].mxu1 %v19133_v15  ;;  %v71_v3 = vld [vmem:[%s20659_s0 + $0x1c8] sm:$0xff] }
 0x4a3   :  { %7864 = vmatprep.mubr.bf16.mxu0 %v19055_v45  ;;  %9963 = vmatprep.mubr.bf16.mxu1 %v19135_v28  ;;  %v19154_v60 = vadd.f32 %v13052_v49, %v18686_v38  ;;  %v14921_v45 = vld [vmem:[%s20658_s1 + $0xff8] ss:$12 sps:$4 sm:$0xff]   ;;  %v19167_v56 = vcombine.high %v71_v3, %v83_v48  ;;  %v19197_v34 = vcombine.low %v71_v3, %v83_v48  ;;  %v14946_v48 = vld [vmem:[%s20658_s1 + $0xf80] ss:$12 sps:$4 sm:$0xff]  }
 0x4a4   :  { %13338 = vmatpush3.bf16.msra.mxu1 %v14906_v4 }
 0x4a5   :  { %13339 = vmatprep.subr.bf16.mxu1 %v14913_v5  ;;  %v13053_v16 = vpop.f32.mrb[216].mxu1  ;;  %v14938_v5 = vld [vmem:[%s20658_s1 + $0xf68] ss:$12 sps:$4 sm:$0xff]  }
 0x4a6   :  { %v13054_v47 = vpop.f32.mrb[217].mxu1 }
 0x4a7   :  { %v13055_v37 = vadd.f32 %v13054_v47, %v13053_v16  ;;  %v13056_v38 = vpop.f32.mrb[218].mxu1 }
 0x4a8   :  { %13340 = vmatpush3.bf16.msra.mxu1 %v14914_v31  ;;  %v13057_v41 = vpop.f32.mrb[219].mxu1  ;;  %v14945_v31 = vld [vmem:[%s20658_s1 + $0x1040] ss:$12 sps:$4 sm:$0xff]  }
 0x4a9   :  { %13341 = vmatprep.subr.bf16.mxu1 %v14921_v45  ;;  %v13058_v9 = vadd.f32 %v13057_v41, %v13056_v38  ;;  %v19177_v17 = vadd.f32 %v13055_v37, %v18712_v54  ;;  %v107_v54 = vld [vmem:[%s20659_s0 + $0x2e8] sm:$0xff] }
 0x4aa   :  { %7865 = vmatmul.mubr.bf16.gmra.mrb[52].mxu0 %v19073_v44  ;;  %9964 = vmatmul.mubr.bf16.gmra.mrb[68].mxu1 %v19165_v30  ;;  %v95_v44 = vld [vmem:[%s20659_s0 + $0x288] sm:$0xff] }
 0x4ab   :  { %7874 = vmatprep.mubr.bf16.mxu0 %v19075_v50  ;;  %9971 = vmatprep.mubr.bf16.mxu1 %v19167_v56  ;;  %v19186_v21 = vadd.f32 %v13058_v9, %v18718_v1  ;;  %v14937_v50 = vld [vmem:[%s20658_s1 + $0x1028] ss:$12 sps:$4 sm:$0xff]   ;;  %v19199_v10 = vcombine.high %v95_v44, %v107_v54  ;;  %v19229_v38 = vcombine.low %v95_v44, %v107_v54  ;;  %v14956_v54 = vld [vmem:[%s20658_s1 + $0xfb0] ss:$12 sps:$4 sm:$0xff]  }
 0x4ac   :  { %13342 = vmatpush3.bf16.msra.mxu1 %v14922_v22 }
 0x4ad   :  { %13343 = vmatprep.subr.bf16.mxu1 %v14929_v40  ;;  %v13059_v11 = vpop.f32.mrb[220].mxu1  ;;  %v14954_v40 = vld [vmem:[%s20658_s1 + $0xf98] ss:$12 sps:$4 sm:$0xff]  }
 0x4ae   :  { %v13060_v12 = vpop.f32.mrb[221].mxu1 }
 0x4af   :  { %v13061_v4 = vadd.f32 %v13060_v12, %v13059_v11  ;;  %v13062_v1 = vpop.f32.mrb[222].mxu1 }
 0x4b0   :  { %13344 = vmatpush3.bf16.msra.mxu1 %v14930_v36  ;;  %v13063_v49 = vpop.f32.mrb[223].mxu1  ;;  %v14955_v36 = vld [vmem:[%s20658_s1 + $0x1070] ss:$12 sps:$4 sm:$0xff]  }
 0x4b1   :  { %13345 = vmatprep.subr.bf16.mxu1 %v14937_v50  ;;  %v13064_v45 = vadd.f32 %v13063_v49, %v13062_v1  ;;  %v19209_v3 = vadd.f32 %v13061_v4, %v18744_v57  ;;  %v131_v57 = vld [vmem:[%s20659_s0 + $0x3a8] sm:$0xff] }
 0x4b2   :  { %7875 = vmatmul.mubr.bf16.gmra.mrb[56].mxu0 %v19093_v8  ;;  %9972 = vmatmul.mubr.bf16.gmra.mrb[72].mxu1 %v19197_v34  ;;  %v119_v8 = vld [vmem:[%s20659_s0 + $0x348] sm:$0xff] }
 0x4b3   :  { %7884 = vmatprep.mubr.bf16.mxu0 %v19095_v29  ;;  %9979 = vmatprep.mubr.bf16.mxu1 %v19199_v10  ;;  %v19218_v16 = vadd.f32 %v13064_v45, %v18750_v32  ;;  %v14953_v29 = vld [vmem:[%s20658_s1 + $0x1058] ss:$12 sps:$4 sm:$0xff]   ;;  %v19231_v41 = vcombine.high %v119_v8, %v131_v57  ;;  %v19258_v4 = vcombine.low %v119_v8, %v131_v57  ;;  %v14907_v1 = vld [vmem:[%s20658_s1 + $0xf00] ss:$12 sps:$4 sm:$0xff]   ;;  %v14912_v45 = vld [vmem:[%s20658_s1 + $0xf1c] ss:$12 sps:$4 sm:$0xff]  }
 0x4b4   :  { %13346 = vmatpush3.bf16.msra.mxu1 %v14938_v5  ;;  %v14969_v57 = vld [vmem:[%s20658_s1 + $0x1148] ss:$12 sps:$4 sm:$0xff]  }
 0x4b5   :  { %13347 = vmatprep.subr.bf16.mxu1 %v14945_v31  ;;  %v13065_v47 = vpop.f32.mrb[224].mxu1 }
 0x4b6   :  { %v13066_v37 = vpop.f32.mrb[225].mxu1 }
 0x4b7   :  { %v13067_v22 = vadd.f32 %v13066_v37, %v13065_v47  ;;  %v13068_v32 = vpop.f32.mrb[226].mxu1  ;;  %v167_v47 = vld [vmem:[%s20659_s0 + $0x4c8] sm:$0xff] }
 0x4b8   :  { %13348 = vmatpush3.bf16.msra.mxu1 %v14946_v48  ;;  %v13069_v9 = vpop.f32.mrb[227].mxu1  ;;  %v179_v37 = vld [vmem:[%s20659_s0 + $0x528] sm:$0xff] }
 0x4b9   :  { %13349 = vmatprep.subr.bf16.mxu1 %v14953_v29  ;;  %v13070_v50 = vadd.f32 %v13069_v9, %v13068_v32  ;;  %v19241_v44 = vadd.f32 %v13067_v22, %v18776_v51  ;;  %v155_v51 = vld [vmem:[%s20659_s0 + $0x468] sm:$0xff]  ;;  %v14910_v29 = vld [vmem:[%s20658_s1 + $0xf18] ss:$12 sps:$4 sm:$0xff]  }
 0x4ba   :  { %7885 = vmatmul.mubr.bf16.gmra.mrb[60].mxu0 %v19113_v33  ;;  %9980 = vmatmul.mubr.bf16.gmra.mrb[76].mxu1 %v19229_v38  ;;  %v143_v33 = vld [vmem:[%s20659_s0 + $0x408] sm:$0xff] }
 0x4bb   :  { %7927 = vmatprep.mubr.bf16.mxu0 %v19115_v46  ;;  %9987 = vmatprep.mubr.bf16.mxu1 %v19231_v41  ;;  %v19250_v11 = vadd.f32 %v13070_v50, %v18782_v43  ;;  %v19263_v49 = vcombine.high %v143_v33, %v155_v51  ;;  %v19293_v32 = vcombine.low %v143_v33, %v155_v51  ;;  %v14918_v51 = vld [vmem:[%s20658_s1 + $0xf48] ss:$12 sps:$4 sm:$0xff]  }
 0x4bc   :  { %13350 = vmatpush3.bf16.msra.mxu1 %v14954_v40 }
 0x4bd   :  { %13351 = vmatprep.subr.bf16.mxu1 %v14955_v36  ;;  %v13071_v46 = vpop.f32.mrb[228].mxu1  ;;  %v19295_v36 = vcombine.high %v167_v47, %v179_v37 }
 0x4be   :  { %v13072_v12 = vpop.f32.mrb[229].mxu1 }
 0x4bf   :  { %v13073_v5 = vadd.f32 %v13072_v12, %v13071_v46  ;;  %v13074_v43 = vpop.f32.mrb[230].mxu1 }
 0x4c0   :  { %13352 = vmatpush3.bf16.msra.mxu1 %v14956_v54  ;;  %v13075_v31 = vpop.f32.mrb[231].mxu1  ;;  %v14920_v54 = vld [vmem:[%s20658_s1 + $0xf4c] ss:$12 sps:$4 sm:$0xff]  }
 0x4c1   :  { %v13076_v48 = vadd.f32 %v13075_v31, %v13074_v43  ;;  %v19270_v8 = vadd.f32 %v13073_v5, %v18808_v13  ;;  %v14917_v13 = vld [vmem:[%s20658_s1 + $0xf34] ss:$12 sps:$4 sm:$0xff]   ;;  %13449 = vmatprep.subr.bf16.mxu1 %v14969_v57  ;;  %v19325_v43 = vcombine.low %v167_v47, %v179_v37  ;;  %v14926_v37 = vld [vmem:[%s20658_s1 + $0xf78] ss:$12 sps:$4 sm:$0xff]  }
 0x4c2   :  { %7928 = vmatmul.mubr.bf16.vlgmr.msra.gmra.mrb[0].mxu0 %v19133_v15  ;;  %9988 = vmatmul.mubr.bf16.gmra.mrb[80].mxu1 %v19258_v4 }
 0x4c3   :  { %8089 = vmatpush1.bf16.msra.mxu0 %v14907_v1  ;;  %7937 = vmatprep.mubr.bf16.mxu0 %v19135_v28  ;;  %v19285_v15 = vadd.f32 %v13076_v48, %v18816_v18  ;;  %v14915_v18 = vld [vmem:[%s20658_s1 + $0xf30] ss:$12 sps:$4 sm:$0xff]   ;;  %v14923_v48 = vld [vmem:[%s20658_s1 + $0xf60] ss:$12 sps:$4 sm:$0xff]  }
 0x4c4   :  { %9995 = vmatprep.mubr.bf16.mxu1 %v19263_v49  ;;  %8090 = vmatprep.subr.bf16.mxu0 %v14912_v45 }
 0x4c5   :  { %v13077_v28 = vpop.f32.mrb[232].mxu1 }
 0x4c6   :  { %v13078_v22 = vpop.f32.mrb[233].mxu1 }
 0x4c7   :  { %8091 = vmatpush1.bf16.msra.mxu0 %v14910_v29  ;;  %v13079_v40 = vadd.f32 %v13078_v22, %v13077_v28  ;;  %v13080_v9 = vpop.f32.mrb[234].mxu1  ;;  %v14928_v29 = vld [vmem:[%s20658_s1 + $0xf7c] ss:$12 sps:$4 sm:$0xff]  }
 0x4c8   :  { %8092 = vmatprep.subr.bf16.mxu0 %v14917_v13  ;;  %v13081_v50 = vpop.f32.mrb[235].mxu1 }
 0x4c9   :  { %v13082_v46 = vadd.f32 %v13081_v50, %v13080_v9  ;;  %v19305_v33 = vadd.f32 %v13079_v40, %v18840_v62  ;;  %v203_v62 = vld [vmem:[%s20659_s0 + $0x5e8] sm:$0xff] }
 0x4ca   :  { %7938 = vmatmul.mubr.bf16.gmra.mrb[4].mxu0 %v19165_v30  ;;  %9996 = vmatmul.mubr.bf16.gmra.mrb[84].mxu1 %v19293_v32  ;;  %v191_v30 = vld [vmem:[%s20659_s0 + $0x588] sm:$0xff] }
 0x4cb   :  { %7947 = vmatprep.mubr.bf16.mxu0 %v19167_v56  ;;  %10003 = vmatprep.mubr.bf16.mxu1 %v19295_v36  ;;  %v19314_v12 = vadd.f32 %v13082_v46, %v18846_v55  ;;  %v14925_v56 = vld [vmem:[%s20658_s1 + $0xf64] ss:$12 sps:$4 sm:$0xff]   ;;  %v19327_v45 = vcombine.high %v191_v30, %v203_v62  ;;  %v19357_v9 = vcombine.low %v191_v30, %v203_v62  ;;  %v14934_v62 = vld [vmem:[%s20658_s1 + $0xfa8] ss:$12 sps:$4 sm:$0xff]  }
 0x4cc   :  { %8093 = vmatpush1.bf16.msra.mxu0 %v14915_v18 }
 0x4cd   :  { %8094 = vmatprep.subr.bf16.mxu0 %v14920_v54  ;;  %v13083_v1 = vpop.f32.mrb[236].mxu1  ;;  %v14931_v54 = vld [vmem:[%s20658_s1 + $0xf90] ss:$12 sps:$4 sm:$0xff]  }
 0x4ce   :  { %v13084_v5 = vpop.f32.mrb[237].mxu1 }
 0x4cf   :  { %v13085_v31 = vadd.f32 %v13084_v5, %v13083_v1  ;;  %v13086_v55 = vpop.f32.mrb[238].mxu1 }
 0x4d0   :  { %8095 = vmatpush1.bf16.msra.mxu0 %v14918_v51  ;;  %v13087_v57 = vpop.f32.mrb[239].mxu1  ;;  %v14936_v51 = vld [vmem:[%s20658_s1 + $0xfac] ss:$12 sps:$4 sm:$0xff]  }
 0x4d1   :  { %8096 = vmatprep.subr.bf16.mxu0 %v14925_v56  ;;  %v13088_v13 = vadd.f32 %v13087_v57, %v13086_v55  ;;  %v19337_v47 = vadd.f32 %v13085_v31, %v18872_v42  ;;  %v227_v42 = vld [vmem:[%s20659_s0 + $0x6a8] sm:$0xff] }
 0x4d2   :  { %7948 = vmatmul.mubr.bf16.gmra.mrb[8].mxu0 %v19197_v34  ;;  %10004 = vmatmul.mubr.bf16.gmra.mrb[88].mxu1 %v19325_v43  ;;  %v215_v34 = vld [vmem:[%s20659_s0 + $0x648] sm:$0xff] }
 0x4d3   :  { %7957 = vmatprep.mubr.bf16.mxu0 %v19199_v10  ;;  %10011 = vmatprep.mubr.bf16.mxu1 %v19327_v45  ;;  %v19346_v28 = vadd.f32 %v13088_v13, %v18878_v58  ;;  %v14933_v10 = vld [vmem:[%s20658_s1 + $0xf94] ss:$12 sps:$4 sm:$0xff]   ;;  %v19359_v50 = vcombine.high %v215_v34, %v227_v42  ;;  %v19389_v55 = vcombine.low %v215_v34, %v227_v42  ;;  %v14942_v42 = vld [vmem:[%s20658_s1 + $0xfd8] ss:$12 sps:$4 sm:$0xff]  }
 0x4d4   :  { %8097 = vmatpush1.bf16.msra.mxu0 %v14923_v48 }
 0x4d5   :  { %8098 = vmatprep.subr.bf16.mxu0 %v14928_v29  ;;  %v13089_v22 = vpop.f32.mrb[240].mxu1  ;;  %v14939_v29 = vld [vmem:[%s20658_s1 + $0xfc0] ss:$12 sps:$4 sm:$0xff]  }
 0x4d6   :  { %v13090_v40 = vpop.f32.mrb[241].mxu1 }
 0x4d7   :  { %v13091_v18 = vadd.f32 %v13090_v40, %v13089_v22  ;;  %v13092_v58 = vpop.f32.mrb[242].mxu1 }
 0x4d8   :  { %8099 = vmatpush1.bf16.msra.mxu0 %v14926_v37  ;;  %v13093_v46 = vpop.f32.mrb[243].mxu1  ;;  %v14944_v37 = vld [vmem:[%s20658_s1 + $0xfdc] ss:$12 sps:$4 sm:$0xff]  }
 0x4d9   :  { %8100 = vmatprep.subr.bf16.mxu0 %v14933_v10  ;;  %v13094_v56 = vadd.f32 %v13093_v46, %v13092_v58  ;;  %v19369_v30 = vadd.f32 %v13091_v18, %v18904_v25  ;;  %v251_v25 = vld [vmem:[%s20659_s0 + $0x768] sm:$0xff] }
 0x4da   :  { %7958 = vmatmul.mubr.bf16.gmra.mrb[12].mxu0 %v19229_v38  ;;  %10012 = vmatmul.mubr.bf16.gmra.mrb[92].mxu1 %v19357_v9  ;;  %v239_v38 = vld [vmem:[%s20659_s0 + $0x708] sm:$0xff] }
 0x4db   :  { %7967 = vmatprep.mubr.bf16.mxu0 %v19231_v41  ;;  %10019 = vmatprep.mubr.bf16.mxu1 %v19359_v50  ;;  %v19378_v1 = vadd.f32 %v13094_v56, %v18910_v35  ;;  %v14941_v41 = vld [vmem:[%s20658_s1 + $0xfc4] ss:$12 sps:$4 sm:$0xff]   ;;  %v19391_v57 = vcombine.high %v239_v38, %v251_v25  ;;  %v19421_v58 = vcombine.low %v239_v38, %v251_v25  ;;  %v14950_v25 = vld [vmem:[%s20658_s1 + $0x1008] ss:$12 sps:$4 sm:$0xff]  }
 0x4dc   :  { %8101 = vmatpush1.bf16.msra.mxu0 %v14931_v54 }
 0x4dd   :  { %8102 = vmatprep.subr.bf16.mxu0 %v14936_v51  ;;  %v13095_v5 = vpop.f32.mrb[244].mxu1  ;;  %v14947_v51 = vld [vmem:[%s20658_s1 + $0xff0] ss:$12 sps:$4 sm:$0xff]  }
 0x4de   :  { %v13096_v31 = vpop.f32.mrb[245].mxu1 }
 0x4df   :  { %v13097_v48 = vadd.f32 %v13096_v31, %v13095_v5  ;;  %v13098_v35 = vpop.f32.mrb[246].mxu1 }
 0x4e0   :  { %8103 = vmatpush1.bf16.msra.mxu0 %v14934_v62  ;;  %v13099_v13 = vpop.f32.mrb[247].mxu1  ;;  %v14952_v62 = vld [vmem:[%s20658_s1 + $0x100c] ss:$12 sps:$4 sm:$0xff]  }
 0x4e1   :  { %8104 = vmatprep.subr.bf16.mxu0 %v14941_v41  ;;  %v13100_v10 = vadd.f32 %v13099_v13, %v13098_v35  ;;  %v19401_v34 = vadd.f32 %v13097_v48, %v18936_v23  ;;  %v275_v23 = vld [vmem:[%s20659_s0 + $0x828] sm:$0xff] }
 0x4e2   :  { %7968 = vmatmul.mubr.bf16.gmra.mrb[16].mxu0 %v19258_v4  ;;  %10020 = vmatmul.mubr.bf16.gmra.mrb[96].mxu1 %v19389_v55  ;;  %v263_v4 = vld [vmem:[%s20659_s0 + $0x7c8] sm:$0xff] }
 0x4e3   :  { %7977 = vmatprep.mubr.bf16.mxu0 %v19263_v49  ;;  %10027 = vmatprep.mubr.bf16.mxu1 %v19391_v57  ;;  %v19410_v22 = vadd.f32 %v13100_v10, %v18942_v6  ;;  %v14949_v49 = vld [vmem:[%s20658_s1 + $0xff4] ss:$12 sps:$4 sm:$0xff]   ;;  %v19423_v46 = vcombine.high %v263_v4, %v275_v23  ;;  %v19453_v35 = vcombine.low %v263_v4, %v275_v23  ;;  %v14960_v23 = vld [vmem:[%s20658_s1 + $0x1038] ss:$12 sps:$4 sm:$0xff]  }
 0x4e4   :  { %8105 = vmatpush1.bf16.msra.mxu0 %v14939_v29 }
 0x4e5   :  { %8106 = vmatprep.subr.bf16.mxu0 %v14944_v37  ;;  %v13101_v40 = vpop.f32.mrb[248].mxu1  ;;  %v14957_v37 = vld [vmem:[%s20658_s1 + $0x1020] ss:$12 sps:$4 sm:$0xff]  }
 0x4e6   :  { %v13102_v18 = vpop.f32.mrb[249].mxu1 }
 0x4e7   :  { %v13103_v54 = vadd.f32 %v13102_v18, %v13101_v40  ;;  %v13104_v6 = vpop.f32.mrb[250].mxu1 }
 0x4e8   :  { %8107 = vmatpush1.bf16.msra.mxu0 %v14942_v42  ;;  %v13105_v56 = vpop.f32.mrb[251].mxu1  ;;  %v14962_v42 = vld [vmem:[%s20658_s1 + $0x103c] ss:$12 sps:$4 sm:$0xff]  }
 0x4e9   :  { %8108 = vmatprep.subr.bf16.mxu0 %v14949_v49  ;;  %v13106_v41 = vadd.f32 %v13105_v56, %v13104_v6  ;;  %v19433_v38 = vadd.f32 %v13103_v54, %v18968_v52  ;;  %v299_v52 = vld [vmem:[%s20659_s0 + $0x8e8] sm:$0xff] }
 0x4ea   :  { %7978 = vmatmul.mubr.bf16.gmra.mrb[20].mxu0 %v19293_v32  ;;  %10028 = vmatmul.mubr.bf16.gmra.mrb[100].mxu1 %v19421_v58  ;;  %v287_v32 = vld [vmem:[%s20659_s0 + $0x888] sm:$0xff] }
 0x4eb   :  { %7987 = vmatprep.mubr.bf16.mxu0 %v19295_v36  ;;  %10035 = vmatprep.mubr.bf16.mxu1 %v19423_v46  ;;  %v19442_v5 = vadd.f32 %v13106_v41, %v18974_v26  ;;  %v14959_v36 = vld [vmem:[%s20658_s1 + $0x1024] ss:$12 sps:$4 sm:$0xff]   ;;  %v19455_v13 = vcombine.high %v287_v32, %v299_v52  ;;  %v19485_v6 = vcombine.low %v287_v32, %v299_v52 }
 0x4ec   :  { %8109 = vmatpush1.bf16.msra.mxu0 %v14947_v51 }
 0x4ed   :  { %8110 = vmatprep.subr.bf16.mxu0 %v14952_v62  ;;  %v13107_v31 = vpop.f32.mrb[252].mxu1  ;;  %v14963_v62 = vld [vmem:[%s20658_s1 + $0x1050] ss:$12 sps:$4 sm:$0xff]  }
 0x4ee   :  { %v13108_v48 = vpop.f32.mrb[253].mxu1 }
 0x4ef   :  { %v13109_v29 = vadd.f32 %v13108_v48, %v13107_v31  ;;  %v13110_v26 = vpop.f32.mrb[254].mxu1  ;;  %v14966_v31 = vld [vmem:[%s20658_s1 + $0x1068] ss:$12 sps:$4 sm:$0xff]  }
 0x4f0   :  { %8111 = vmatpush1.bf16.msra.mxu0 %v14950_v25  ;;  %v13111_v10 = vpop.f32.mrb[255].mxu1  ;;  %v14968_v25 = vld [vmem:[%s20658_s1 + $0x106c] ss:$12 sps:$4 sm:$0xff]  }
 0x4f1   :  { %8112 = vmatprep.subr.bf16.mxu0 %v14959_v36  ;;  %v13112_v49 = vadd.f32 %v13111_v10, %v13110_v26  ;;  %v19465_v4 = vadd.f32 %v13109_v29, %v19000_v20  ;;  %v323_v20 = vld [vmem:[%s20659_s0 + $0x9a8] sm:$0xff] }
 0x4f2   :  { %7988 = vmatmul.mubr.bf16.gmra.mrb[24].mxu0 %v19325_v43  ;;  %10036 = vmatmul.mubr.bf16.gmra.mrb[104].mxu1 %v19453_v35  ;;  %v311_v43 = vld [vmem:[%s20659_s0 + $0x948] sm:$0xff] }
 0x4f3   :  { %7997 = vmatprep.mubr.bf16.mxu0 %v19327_v45  ;;  %10043 = vmatprep.mubr.bf16.mxu1 %v19455_v13  ;;  %v19474_v40 = vadd.f32 %v13112_v49, %v19006_v7  ;;  %v14965_v45 = vld [vmem:[%s20658_s1 + $0x1054] ss:$12 sps:$4 sm:$0xff]   ;;  %v19487_v56 = vcombine.high %v311_v43, %v323_v20  ;;  %v19517_v29 = vcombine.low %v311_v43, %v323_v20  ;;  %v359_v20 = vld [vmem:[%s20659_s0 + $0xac8] sm:$0xff] }
 0x4f4   :  { %8113 = vmatpush1.bf16.msra.mxu0 %v14957_v37 }
 0x4f5   :  { %8114 = vmatprep.subr.bf16.mxu0 %v14962_v42  ;;  %v13129_v18 = vpop.f32.mrb[0].mxu1 }
 0x4f6   :  { %v13130_v54 = vpop.f32.mrb[1].mxu1 }
 0x4f7   :  { %v13131_v51 = vadd.f32 %v13130_v54, %v13129_v18  ;;  %v13132_v7 = vpop.f32.mrb[2].mxu1 }
 0x4f8   :  { %8115 = vmatpush1.bf16.msra.mxu0 %v14960_v23  ;;  %v13133_v41 = vpop.f32.mrb[3].mxu1 }
 0x4f9   :  { %8116 = vmatprep.subr.bf16.mxu0 %v14965_v45  ;;  %v19496_v36 = vadd.f32 %v13131_v51, %v19033_v19  ;;  %v13134_v32 = vadd.f32 %v13133_v41, %v13132_v7  ;;  %v335_v19 = vld [vmem:[%s20659_s0 + $0xa08] sm:$0xff] }
 0x4fa   :  { %7998 = vmatmul.mubr.bf16.gmra.mrb[28].mxu0 %v19357_v9  ;;  %10044 = vmatmul.mubr.bf16.gmra.mrb[108].mxu1 %v19485_v6  ;;  %v347_v9 = vld [vmem:[%s20659_s0 + $0xa68] sm:$0xff] }
 0x4fb   :  { %8007 = vmatprep.mubr.bf16.mxu0 %v19359_v50  ;;  %v19502_v52 = vadd.f32 %v13134_v32, %v19042_v14  ;;  %10051 = vmatprep.mubr.bf16.mxu1 %v19487_v56  ;;  %v14973_v14 = vld [vmem:[%s20658_s1 + $0x1084] ss:$12 sps:$4 sm:$0xff]   ;;  %v19519_v10 = vcombine.high %v335_v19, %v347_v9 }
 0x4fc   :  { %8117 = vmatpush1.bf16.msra.mxu0 %v14963_v62 }
 0x4fd   :  { %8118 = vmatprep.subr.bf16.mxu0 %v14968_v25  ;;  %v13135_v50 = vpop.f32.mrb[4].mxu1  ;;  %v383_v25 = vld [vmem:[%s20659_s0 + $0xb88] sm:$0xff] }
 0x4fe   :  { %v13136_v48 = vpop.f32.mrb[5].mxu1 }
 0x4ff   :  { %v13137_v26 = vadd.f32 %v13136_v48, %v13135_v50  ;;  %v13138_v37 = vpop.f32.mrb[6].mxu1 }
 0x500   :  { %8119 = vmatpush1.bf16.msra.mxu0 %v14966_v31  ;;  %v13139_v42 = vpop.f32.mrb[7].mxu1 }
 0x501   :  { %8281 = vmatprep.subr.bf16.mxu0 %v14973_v14  ;;  %v19522_v49 = vadd.f32 %v13137_v26, %v19059_v61  ;;  %v13140_v23 = vadd.f32 %v13139_v42, %v13138_v37  ;;  %v371_v61 = vld [vmem:[%s20659_s0 + $0xb28] sm:$0xff]  ;;  %v24_v26 = vld [vmem:[%s20659_s0 + $0x50] sm:$0xff] }
 0x502   :  { %8008 = vmatmul.mubr.bf16.gmra.mrb[32].mxu0 %v19389_v55  ;;  %10052 = vmatmul.mubr.bf16.gmra.mrb[112].mxu1 %v19517_v29  ;;  %v19537_v55 = vcombine.low %v335_v19, %v347_v9 }
 0x503   :  { %8017 = vmatprep.mubr.bf16.mxu0 %v19391_v57  ;;  %v19528_v43 = vadd.f32 %v13140_v23, %v19065_v63  ;;  %10059 = vmatprep.mubr.bf16.mxu1 %v19519_v10  ;;  %v19539_v57 = vcombine.high %v359_v20, %v371_v61 }
 0x505   :  { %v13141_v45 = vpop.f32.mrb[8].mxu1 }
 0x506   :  { %v13142_v18 = vpop.f32.mrb[9].mxu1 }
 0x507   :  { %v13143_v54 = vadd.f32 %v13142_v18, %v13141_v45  ;;  %v13144_v51 = vpop.f32.mrb[10].mxu1 }
 0x508   :  { %v13145_v63 = vpop.f32.mrb[11].mxu1 }
 0x509   :  { %v19542_v7 = vadd.f32 %v13143_v54, %v19079_v27  ;;  %v13146_v62 = vadd.f32 %v13145_v63, %v13144_v51  ;;  %v395_v27 = vld [vmem:[%s20659_s0 + $0xbe8] sm:$0xff]  ;;  %v48_v54 = vld [vmem:[%s20659_s0 + $0x110] sm:$0xff] }
 0x50a   :  { %8018 = vmatmul.mubr.bf16.gmra.mrb[36].mxu0 %v19421_v58  ;;  %10060 = vmatmul.mubr.bf16.gmra.mrb[116].mxu1 %v19537_v55  ;;  %v19557_v58 = vcombine.low %v359_v20, %v371_v61 }
 0x50b   :  { %8027 = vmatprep.mubr.bf16.mxu0 %v19423_v46  ;;  %v19548_v41 = vadd.f32 %v13146_v62, %v19085_v2  ;;  %10067 = vmatprep.mubr.bf16.mxu1 %v19539_v57  ;;  %v19559_v46 = vcombine.high %v383_v25, %v395_v27 }
 0x50d   :  { %v13147_v32 = vpop.f32.mrb[12].mxu1 }
 0x50e   :  { %v13148_v31 = vpop.f32.mrb[13].mxu1 }
 0x50f   :  { %v13149_v19 = vadd.f32 %v13148_v31, %v13147_v32  ;;  %v13150_v9 = vpop.f32.mrb[14].mxu1  ;;  %v14977_v32 = vld [vmem:[%s20658_s1 + $0x1160] ss:$12 sps:$4 sm:$0xff]  }
 0x510   :  { %v13151_v2 = vpop.f32.mrb[15].mxu1 }
 0x511   :  { %v19562_v14 = vadd.f32 %v13149_v19, %v19099_v53  ;;  %v13152_v50 = vadd.f32 %v13151_v2, %v13150_v9  ;;  %v36_v53 = vld [vmem:[%s20659_s0 + $0xb0] sm:$0xff]  ;;  %v14978_v2 = vld [vmem:[%s20658_s1 + $0x10a0] ss:$12 sps:$4 sm:$0xff]  }
 0x512   :  { %8028 = vmatmul.mubr.bf16.gmra.mrb[40].mxu0 %v19453_v35  ;;  %10068 = vmatmul.mubr.bf16.gmra.mrb[120].mxu1 %v19557_v58  ;;  %v19577_v35 = vcombine.low %v383_v25, %v395_v27 }
 0x513   :  { %8037 = vmatprep.mubr.bf16.mxu0 %v19455_v13  ;;  %v19568_v48 = vadd.f32 %v13152_v50, %v19105_v0  ;;  %10075 = vmatprep.mubr.bf16.mxu1 %v19559_v46  ;;  %v19579_v13 = vcombine.high %v24_v26, %v36_v53 }
 0x515   :  { %v13153_v37 = vpop.f32.mrb[16].mxu1 }
 0x516   :  { %v13154_v42 = vpop.f32.mrb[17].mxu1 }
 0x517   :  { %v13155_v23 = vadd.f32 %v13154_v42, %v13153_v37  ;;  %v13156_v20 = vpop.f32.mrb[18].mxu1 }
 0x518   :  { %v13157_v0 = vpop.f32.mrb[19].mxu1 }
 0x519   :  { %v19582_v61 = vadd.f32 %v13155_v23, %v19119_v59  ;;  %v13158_v45 = vadd.f32 %v13157_v0, %v13156_v20  ;;  %v60_v59 = vld [vmem:[%s20659_s0 + $0x170] sm:$0xff]  ;;  %v14986_v23 = vld [vmem:[%s20658_s1 + $0x10b8] ss:$12 sps:$4 sm:$0xff]  }
 0x51a   :  { %8038 = vmatmul.mubr.bf16.gmra.mrb[44].mxu0 %v19485_v6  ;;  %10076 = vmatmul.mubr.bf16.gmra.mrb[124].mxu1 %v19577_v35  ;;  %v19597_v6 = vcombine.low %v24_v26, %v36_v53  ;;  %v19629_v26 = vcombine.low %v48_v54, %v60_v59  ;;  %v14993_v0 = vld [vmem:[%s20658_s1 + $0x1190] ss:$12 sps:$4 sm:$0xff]  }
 0x51b   :  { %8047 = vmatprep.mubr.bf16.mxu0 %v19487_v56  ;;  %v19588_v18 = vadd.f32 %v13158_v45, %v19125_v39  ;;  %10116 = vmatprep.mubr.bf16.mxu1 %v19579_v13  ;;  %v19599_v56 = vcombine.high %v48_v54, %v60_v59  ;;  %v14970_v39 = vld [vmem:[%s20658_s1 + $0x1088] ss:$12 sps:$4 sm:$0xff]  }
 0x51d   :  { %v13159_v51 = vpop.f32.mrb[20].mxu1 }
 0x51e   :  { %v13160_v63 = vpop.f32.mrb[21].mxu1 }
 0x51f   :  { %v13161_v62 = vadd.f32 %v13160_v63, %v13159_v51  ;;  %v13162_v25 = vpop.f32.mrb[22].mxu1  ;;  %v14994_v51 = vld [vmem:[%s20658_s1 + $0x10d0] ss:$12 sps:$4 sm:$0xff]  }
 0x520   :  { %v13163_v27 = vpop.f32.mrb[23].mxu1 }
 0x521   :  { %v19608_v31 = vadd.f32 %v13161_v62, %v19145_v24  ;;  %v13164_v19 = vadd.f32 %v13163_v27, %v13162_v25  ;;  %v72_v24 = vld [vmem:[%s20659_s0 + $0x1d0] sm:$0xff] }
 0x522   :  { %8048 = vmatmul.mubr.bf16.gmra.mrb[48].mxu0 %v19517_v29  ;;  %10117 = vmatmul.mubr.bf16.vlgmr.msra.gmra.mrb[128].mxu1 %v19597_v6  ;;  %v84_v29 = vld [vmem:[%s20659_s0 + $0x230] sm:$0xff] }
 0x523   :  { %8057 = vmatprep.mubr.bf16.mxu0 %v19519_v10  ;;  %v19614_v9 = vadd.f32 %v13164_v19, %v19154_v60  ;;  %10124 = vmatprep.mubr.bf16.mxu1 %v19599_v56  ;;  %v14985_v60 = vld [vmem:[%s20658_s1 + $0x1178] ss:$12 sps:$4 sm:$0xff]   ;;  %v19631_v42 = vcombine.high %v72_v24, %v84_v29  ;;  %v19661_v62 = vcombine.low %v72_v24, %v84_v29 }
 0x524   :  { %13450 = vmatpush3.bf16.msra.mxu1 %v14970_v39 }
 0x525   :  { %13451 = vmatprep.subr.bf16.mxu1 %v14977_v32  ;;  %v13165_v10 = vpop.f32.mrb[24].mxu1  ;;  %v15002_v32 = vld [vmem:[%s20658_s1 + $0x10e8] ss:$12 sps:$4 sm:$0xff]  }
 0x526   :  { %v13166_v50 = vpop.f32.mrb[25].mxu1 }
 0x527   :  { %v13167_v53 = vadd.f32 %v13166_v50, %v13165_v10  ;;  %v13168_v37 = vpop.f32.mrb[26].mxu1  ;;  %v15010_v10 = vld [vmem:[%s20658_s1 + $0x1100] ss:$12 sps:$4 sm:$0xff]  }
 0x528   :  { %13452 = vmatpush3.bf16.msra.mxu1 %v14978_v2  ;;  %v13169_v20 = vpop.f32.mrb[27].mxu1  ;;  %v15009_v2 = vld [vmem:[%s20658_s1 + $0x11c0] ss:$12 sps:$4 sm:$0xff]  }
 0x529   :  { %13453 = vmatprep.subr.bf16.mxu1 %v14985_v60  ;;  %v19640_v45 = vadd.f32 %v13167_v53, %v19177_v17  ;;  %v13170_v54 = vadd.f32 %v13169_v20, %v13168_v37  ;;  %v96_v17 = vld [vmem:[%s20659_s0 + $0x290] sm:$0xff] }
 0x52a   :  { %8058 = vmatmul.mubr.bf16.gmra.mrb[52].mxu0 %v19537_v55  ;;  %10125 = vmatmul.mubr.bf16.gmra.mrb[132].mxu1 %v19629_v26  ;;  %v108_v55 = vld [vmem:[%s20659_s0 + $0x2f0] sm:$0xff] }
 0x52b   :  { %8067 = vmatprep.mubr.bf16.mxu0 %v19539_v57  ;;  %v19646_v59 = vadd.f32 %v13170_v54, %v19186_v21  ;;  %10132 = vmatprep.mubr.bf16.mxu1 %v19631_v42  ;;  %v15001_v21 = vld [vmem:[%s20658_s1 + $0x11a8] ss:$12 sps:$4 sm:$0xff]   ;;  %v19663_v27 = vcombine.high %v96_v17, %v108_v55  ;;  %v19693_v53 = vcombine.low %v96_v17, %v108_v55 }
 0x52c   :  { %13454 = vmatpush3.bf16.msra.mxu1 %v14986_v23 }
 0x52d   :  { %13455 = vmatprep.subr.bf16.mxu1 %v14993_v0  ;;  %v13171_v57 = vpop.f32.mrb[28].mxu1  ;;  %v15018_v0 = vld [vmem:[%s20658_s1 + $0x1118] ss:$12 sps:$4 sm:$0xff]  }
 0x52e   :  { %v13172_v63 = vpop.f32.mrb[29].mxu1 }
 0x52f   :  { %v13173_v25 = vadd.f32 %v13172_v63, %v13171_v57  ;;  %v13174_v39 = vpop.f32.mrb[30].mxu1  ;;  %v15020_v57 = vld [vmem:[%s20658_s1 + $0x1130] ss:$12 sps:$4 sm:$0xff]  }
 0x530   :  { %13456 = vmatpush3.bf16.msra.mxu1 %v14994_v51  ;;  %v13175_v19 = vpop.f32.mrb[31].mxu1  ;;  %v15019_v51 = vld [vmem:[%s20658_s1 + $0x11f0] ss:$12 sps:$4 sm:$0xff]  }
 0x531   :  { %13457 = vmatprep.subr.bf16.mxu1 %v15001_v21  ;;  %v19672_v60 = vadd.f32 %v13173_v25, %v19209_v3  ;;  %v13176_v24 = vadd.f32 %v13175_v19, %v13174_v39  ;;  %v120_v3 = vld [vmem:[%s20659_s0 + $0x350] sm:$0xff]  ;;  %v14971_v25 = vld [vmem:[%s20658_s1 + $0x1080] ss:$12 sps:$4 sm:$0xff]  }
 0x532   :  { %8068 = vmatmul.mubr.bf16.gmra.mrb[56].mxu0 %v19557_v58  ;;  %10133 = vmatmul.mubr.bf16.gmra.mrb[136].mxu1 %v19661_v62  ;;  %v132_v58 = vld [vmem:[%s20659_s0 + $0x3b0] sm:$0xff] }
 0x533   :  { %8077 = vmatprep.mubr.bf16.mxu0 %v19559_v46  ;;  %v19678_v29 = vadd.f32 %v13176_v24, %v19218_v16  ;;  %10140 = vmatprep.mubr.bf16.mxu1 %v19663_v27  ;;  %v15017_v16 = vld [vmem:[%s20658_s1 + $0x11d8] ss:$12 sps:$4 sm:$0xff]   ;;  %v19695_v20 = vcombine.high %v120_v3, %v132_v58  ;;  %v14976_v24 = vld [vmem:[%s20658_s1 + $0x109c] ss:$12 sps:$4 sm:$0xff]  }
 0x534   :  { %13458 = vmatpush3.bf16.msra.mxu1 %v15002_v32 }
 0x535   :  { %13459 = vmatprep.subr.bf16.mxu1 %v15009_v2  ;;  %v13177_v46 = vpop.f32.mrb[32].mxu1 }
 0x536   :  { %v13178_v50 = vpop.f32.mrb[33].mxu1 }
 0x537   :  { %v13179_v37 = vadd.f32 %v13178_v50, %v13177_v46  ;;  %v13180_v23 = vpop.f32.mrb[34].mxu1  ;;  %v180_v46 = vld [vmem:[%s20659_s0 + $0x530] sm:$0xff] }
 0x538   :  { %13460 = vmatpush3.bf16.msra.mxu1 %v15010_v10  ;;  %v13181_v54 = vpop.f32.mrb[35].mxu1 }
 0x539   :  { %13461 = vmatprep.subr.bf16.mxu1 %v15017_v16  ;;  %v19704_v21 = vadd.f32 %v13179_v37, %v19241_v44  ;;  %v13182_v17 = vadd.f32 %v13181_v54, %v13180_v23  ;;  %v144_v44 = vld [vmem:[%s20659_s0 + $0x410] sm:$0xff] }
 0x53a   :  { %8078 = vmatmul.mubr.bf16.gmra.mrb[60].mxu0 %v19577_v35  ;;  %10141 = vmatmul.mubr.bf16.gmra.mrb[140].mxu1 %v19693_v53  ;;  %v156_v35 = vld [vmem:[%s20659_s0 + $0x470] sm:$0xff] }
 0x53b   :  { %8120 = vmatprep.mubr.bf16.mxu0 %v19579_v13  ;;  %v19710_v55 = vadd.f32 %v13182_v17, %v19250_v11  ;;  %10148 = vmatprep.mubr.bf16.mxu1 %v19695_v20  ;;  %v19722_v11 = vcombine.low %v120_v3, %v132_v58  ;;  %v19727_v19 = vcombine.high %v144_v44, %v156_v35  ;;  %v14974_v3 = vld [vmem:[%s20658_s1 + $0x1098] ss:$12 sps:$4 sm:$0xff]   ;;  %v14979_v54 = vld [vmem:[%s20658_s1 + $0x10b0] ss:$12 sps:$4 sm:$0xff]  }
 0x53c   :  { %13462 = vmatpush3.bf16.msra.mxu1 %v15018_v0  ;;  %v19754_v37 = vcombine.low %v144_v44, %v156_v35  ;;  %v14984_v17 = vld [vmem:[%s20658_s1 + $0x10cc] ss:$12 sps:$4 sm:$0xff]  }
 0x53d   :  { %13463 = vmatprep.subr.bf16.mxu1 %v15019_v51  ;;  %v13183_v13 = vpop.f32.mrb[36].mxu1 }
 0x53e   :  { %v13184_v63 = vpop.f32.mrb[37].mxu1 }
 0x53f   :  { %v13185_v39 = vadd.f32 %v13184_v63, %v13183_v13  ;;  %v13186_v32 = vpop.f32.mrb[38].mxu1  ;;  %v14982_v13 = vld [vmem:[%s20658_s1 + $0x10c8] ss:$12 sps:$4 sm:$0xff]  }
 0x540   :  { %13464 = vmatpush3.bf16.msra.mxu1 %v15020_v57  ;;  %v13187_v2 = vpop.f32.mrb[39].mxu1 }
 0x541   :  { %v19733_v10 = vadd.f32 %v13185_v39, %v19270_v8  ;;  %v13188_v16 = vadd.f32 %v13187_v2, %v13186_v32  ;;  %v14981_v8 = vld [vmem:[%s20658_s1 + $0x10b4] ss:$12 sps:$4 sm:$0xff]  }
 0x542   :  { %8121 = vmatmul.mubr.bf16.vlgmr.msra.gmra.mrb[0].mxu0 %v19597_v6  ;;  %10149 = vmatmul.mubr.bf16.gmra.mrb[144].mxu1 %v19722_v11  ;;  %v168_v6 = vld [vmem:[%s20659_s0 + $0x4d0] sm:$0xff] }
 0x543   :  { %8282 = vmatpush1.bf16.msra.mxu0 %v14971_v25  ;;  %v19741_v58 = vadd.f32 %v13188_v16, %v19285_v15  ;;  %8130 = vmatprep.mubr.bf16.mxu0 %v19599_v56  ;;  %v19756_v0 = vcombine.high %v168_v6, %v180_v46  ;;  %v19786_v25 = vcombine.low %v168_v6, %v180_v46 }
 0x544   :  { %10156 = vmatprep.mubr.bf16.mxu1 %v19727_v19  ;;  %8283 = vmatprep.subr.bf16.mxu0 %v14976_v24  ;;  %v14987_v24 = vld [vmem:[%s20658_s1 + $0x10e0] ss:$12 sps:$4 sm:$0xff]  }
 0x545   :  { %v13189_v50 = vpop.f32.mrb[40].mxu1 }
 0x546   :  { %v13190_v15 = vpop.f32.mrb[41].mxu1 }
 0x547   :  { %8284 = vmatpush1.bf16.msra.mxu0 %v14974_v3  ;;  %v13191_v56 = vadd.f32 %v13190_v15, %v13189_v50  ;;  %v13192_v23 = vpop.f32.mrb[42].mxu1  ;;  %v14992_v3 = vld [vmem:[%s20658_s1 + $0x10fc] ss:$12 sps:$4 sm:$0xff]   ;;  %v14990_v50 = vld [vmem:[%s20658_s1 + $0x10f8] ss:$12 sps:$4 sm:$0xff]  }
 0x548   :  { %8285 = vmatprep.subr.bf16.mxu0 %v14981_v8  ;;  %v13193_v51 = vpop.f32.mrb[43].mxu1 }
 0x549   :  { %v19765_v57 = vadd.f32 %v13191_v56, %v19305_v33  ;;  %v13194_v44 = vadd.f32 %v13193_v51, %v13192_v23  ;;  %v192_v33 = vld [vmem:[%s20659_s0 + $0x590] sm:$0xff] }
 0x54a   :  { %8131 = vmatmul.mubr.bf16.gmra.mrb[4].mxu0 %v19629_v26  ;;  %10157 = vmatmul.mubr.bf16.gmra.mrb[148].mxu1 %v19754_v37  ;;  %v204_v26 = vld [vmem:[%s20659_s0 + $0x5f0] sm:$0xff] }
 0x54b   :  { %8140 = vmatprep.mubr.bf16.mxu0 %v19631_v42  ;;  %v19771_v35 = vadd.f32 %v13194_v44, %v19314_v12  ;;  %10164 = vmatprep.mubr.bf16.mxu1 %v19756_v0  ;;  %v14989_v12 = vld [vmem:[%s20658_s1 + $0x10e4] ss:$12 sps:$4 sm:$0xff]   ;;  %v19788_v2 = vcombine.high %v192_v33, %v204_v26  ;;  %v19818_v56 = vcombine.low %v192_v33, %v204_v26 }
 0x54c   :  { %8286 = vmatpush1.bf16.msra.mxu0 %v14979_v54 }
 0x54d   :  { %8287 = vmatprep.subr.bf16.mxu0 %v14984_v17  ;;  %v13195_v42 = vpop.f32.mrb[44].mxu1  ;;  %v14995_v17 = vld [vmem:[%s20658_s1 + $0x1110] ss:$12 sps:$4 sm:$0xff]  }
 0x54e   :  { %v13196_v63 = vpop.f32.mrb[45].mxu1 }
 0x54f   :  { %v13197_v39 = vadd.f32 %v13196_v63, %v13195_v42  ;;  %v13198_v32 = vpop.f32.mrb[46].mxu1  ;;  %v14998_v42 = vld [vmem:[%s20658_s1 + $0x1128] ss:$12 sps:$4 sm:$0xff]  }
 0x550   :  { %8288 = vmatpush1.bf16.msra.mxu0 %v14982_v13  ;;  %v13199_v16 = vpop.f32.mrb[47].mxu1  ;;  %v15000_v13 = vld [vmem:[%s20658_s1 + $0x112c] ss:$12 sps:$4 sm:$0xff]  }
 0x551   :  { %8289 = vmatprep.subr.bf16.mxu0 %v14989_v12  ;;  %v19797_v8 = vadd.f32 %v13197_v39, %v19337_v47  ;;  %v13200_v6 = vadd.f32 %v13199_v16, %v13198_v32  ;;  %v216_v47 = vld [vmem:[%s20659_s0 + $0x650] sm:$0xff] }
 0x552   :  { %8141 = vmatmul.mubr.bf16.gmra.mrb[8].mxu0 %v19661_v62  ;;  %10165 = vmatmul.mubr.bf16.gmra.mrb[152].mxu1 %v19786_v25  ;;  %v228_v62 = vld [vmem:[%s20659_s0 + $0x6b0] sm:$0xff] }
 0x553   :  { %8150 = vmatprep.mubr.bf16.mxu0 %v19663_v27  ;;  %v19803_v46 = vadd.f32 %v13200_v6, %v19346_v28  ;;  %10172 = vmatprep.mubr.bf16.mxu1 %v19788_v2  ;;  %v14997_v28 = vld [vmem:[%s20658_s1 + $0x1114] ss:$12 sps:$4 sm:$0xff]   ;;  %v19820_v51 = vcombine.high %v216_v47, %v228_v62  ;;  %v19850_v39 = vcombine.low %v216_v47, %v228_v62 }
 0x554   :  { %8290 = vmatpush1.bf16.msra.mxu0 %v14987_v24 }
 0x555   :  { %8291 = vmatprep.subr.bf16.mxu0 %v14992_v3  ;;  %v13201_v27 = vpop.f32.mrb[48].mxu1  ;;  %v15003_v3 = vld [vmem:[%s20658_s1 + $0x1140] ss:$12 sps:$4 sm:$0xff]  }
 0x556   :  { %v13202_v15 = vpop.f32.mrb[49].mxu1 }
 0x557   :  { %v13203_v23 = vadd.f32 %v13202_v15, %v13201_v27  ;;  %v13204_v54 = vpop.f32.mrb[50].mxu1  ;;  %v15006_v27 = vld [vmem:[%s20658_s1 + $0x1158] ss:$12 sps:$4 sm:$0xff]  }
 0x558   :  { %8292 = vmatpush1.bf16.msra.mxu0 %v14990_v50  ;;  %v13205_v44 = vpop.f32.mrb[51].mxu1  ;;  %v15008_v50 = vld [vmem:[%s20658_s1 + $0x115c] ss:$12 sps:$4 sm:$0xff]  }
 0x559   :  { %8293 = vmatprep.subr.bf16.mxu0 %v14997_v28  ;;  %v19829_v12 = vadd.f32 %v13203_v23, %v19369_v30  ;;  %v13206_v33 = vadd.f32 %v13205_v44, %v13204_v54  ;;  %v240_v30 = vld [vmem:[%s20659_s0 + $0x710] sm:$0xff] }
 0x55a   :  { %8151 = vmatmul.mubr.bf16.gmra.mrb[12].mxu0 %v19693_v53  ;;  %10173 = vmatmul.mubr.bf16.gmra.mrb[156].mxu1 %v19818_v56  ;;  %v252_v53 = vld [vmem:[%s20659_s0 + $0x770] sm:$0xff] }
 0x55b   :  { %8160 = vmatprep.mubr.bf16.mxu0 %v19695_v20  ;;  %v19835_v26 = vadd.f32 %v13206_v33, %v19378_v1  ;;  %10180 = vmatprep.mubr.bf16.mxu1 %v19820_v51  ;;  %v15005_v1 = vld [vmem:[%s20658_s1 + $0x1144] ss:$12 sps:$4 sm:$0xff]   ;;  %v19852_v16 = vcombine.high %v240_v30, %v252_v53  ;;  %v19882_v23 = vcombine.low %v240_v30, %v252_v53 }
 0x55c   :  { %8294 = vmatpush1.bf16.msra.mxu0 %v14995_v17 }
 0x55d   :  { %8295 = vmatprep.subr.bf16.mxu0 %v15000_v13  ;;  %v13207_v20 = vpop.f32.mrb[52].mxu1  ;;  %v15011_v13 = vld [vmem:[%s20658_s1 + $0x1170] ss:$12 sps:$4 sm:$0xff]  }
 0x55e   :  { %v13208_v63 = vpop.f32.mrb[53].mxu1 }
 0x55f   :  { %v13209_v32 = vadd.f32 %v13208_v63, %v13207_v20  ;;  %v13210_v24 = vpop.f32.mrb[54].mxu1  ;;  %v15014_v20 = vld [vmem:[%s20658_s1 + $0x1188] ss:$12 sps:$4 sm:$0xff]  }
 0x560   :  { %8296 = vmatpush1.bf16.msra.mxu0 %v14998_v42  ;;  %v13211_v6 = vpop.f32.mrb[55].mxu1  ;;  %v15016_v42 = vld [vmem:[%s20658_s1 + $0x118c] ss:$12 sps:$4 sm:$0xff]  }
 0x561   :  { %8297 = vmatprep.subr.bf16.mxu0 %v15005_v1  ;;  %v19861_v28 = vadd.f32 %v13209_v32, %v19401_v34  ;;  %v13212_v47 = vadd.f32 %v13211_v6, %v13210_v24  ;;  %v264_v34 = vld [vmem:[%s20659_s0 + $0x7d0] sm:$0xff] }
 0x562   :  { %8161 = vmatmul.mubr.bf16.gmra.mrb[16].mxu0 %v19722_v11  ;;  %10181 = vmatmul.mubr.bf16.gmra.mrb[160].mxu1 %v19850_v39  ;;  %v276_v11 = vld [vmem:[%s20659_s0 + $0x830] sm:$0xff] }
 0x563   :  { %8170 = vmatprep.mubr.bf16.mxu0 %v19727_v19  ;;  %v19867_v62 = vadd.f32 %v13212_v47, %v19410_v22  ;;  %10188 = vmatprep.mubr.bf16.mxu1 %v19852_v16  ;;  %v15013_v22 = vld [vmem:[%s20658_s1 + $0x1174] ss:$12 sps:$4 sm:$0xff]   ;;  %v19884_v44 = vcombine.high %v264_v34, %v276_v11  ;;  %v19914_v32 = vcombine.low %v264_v34, %v276_v11 }
 0x564   :  { %8298 = vmatpush1.bf16.msra.mxu0 %v15003_v3 }
 0x565   :  { %8299 = vmatprep.subr.bf16.mxu0 %v15008_v50  ;;  %v13213_v19 = vpop.f32.mrb[56].mxu1  ;;  %v15021_v50 = vld [vmem:[%s20658_s1 + $0x11a0] ss:$12 sps:$4 sm:$0xff]  }
 0x566   :  { %v13214_v15 = vpop.f32.mrb[57].mxu1 }
 0x567   :  { %v13215_v54 = vadd.f32 %v13214_v15, %v13213_v19  ;;  %v13216_v17 = vpop.f32.mrb[58].mxu1  ;;  %v15024_v19 = vld [vmem:[%s20658_s1 + $0x11b8] ss:$12 sps:$4 sm:$0xff]  }
 0x568   :  { %8300 = vmatpush1.bf16.msra.mxu0 %v15006_v27  ;;  %v13217_v33 = vpop.f32.mrb[59].mxu1  ;;  %v15026_v27 = vld [vmem:[%s20658_s1 + $0x11bc] ss:$12 sps:$4 sm:$0xff]  }
 0x569   :  { %8301 = vmatprep.subr.bf16.mxu0 %v15013_v22  ;;  %v19893_v1 = vadd.f32 %v13215_v54, %v19433_v38  ;;  %v13218_v30 = vadd.f32 %v13217_v33, %v13216_v17  ;;  %v288_v38 = vld [vmem:[%s20659_s0 + $0x890] sm:$0xff] }
 0x56a   :  { %8171 = vmatmul.mubr.bf16.gmra.mrb[20].mxu0 %v19754_v37  ;;  %10189 = vmatmul.mubr.bf16.gmra.mrb[164].mxu1 %v19882_v23  ;;  %v300_v37 = vld [vmem:[%s20659_s0 + $0x8f0] sm:$0xff] }
 0x56b   :  { %8180 = vmatprep.mubr.bf16.mxu0 %v19756_v0  ;;  %v19899_v53 = vadd.f32 %v13218_v30, %v19442_v5  ;;  %10196 = vmatprep.mubr.bf16.mxu1 %v19884_v44  ;;  %v15023_v5 = vld [vmem:[%s20658_s1 + $0x11a4] ss:$12 sps:$4 sm:$0xff]   ;;  %v19916_v6 = vcombine.high %v288_v38, %v300_v37  ;;  %v19946_v54 = vcombine.low %v288_v38, %v300_v37 }
 0x56c   :  { %8302 = vmatpush1.bf16.msra.mxu0 %v15011_v13 }
 0x56d   :  { %8303 = vmatprep.subr.bf16.mxu0 %v15016_v42  ;;  %v13219_v0 = vpop.f32.mrb[60].mxu1  ;;  %v15027_v42 = vld [vmem:[%s20658_s1 + $0x11d0] ss:$12 sps:$4 sm:$0xff]  }
 0x56e   :  { %v13220_v63 = vpop.f32.mrb[61].mxu1 }
 0x56f   :  { %v13221_v24 = vadd.f32 %v13220_v63, %v13219_v0  ;;  %v13222_v3 = vpop.f32.mrb[62].mxu1  ;;  %v15030_v0 = vld [vmem:[%s20658_s1 + $0x11e8] ss:$12 sps:$4 sm:$0xff]  }
 0x570   :  { %8304 = vmatpush1.bf16.msra.mxu0 %v15014_v20  ;;  %v13223_v47 = vpop.f32.mrb[63].mxu1  ;;  %v15032_v20 = vld [vmem:[%s20658_s1 + $0x11ec] ss:$12 sps:$4 sm:$0xff]  }
 0x571   :  { %8305 = vmatprep.subr.bf16.mxu0 %v15023_v5  ;;  %v19925_v22 = vadd.f32 %v13221_v24, %v19465_v4  ;;  %v13224_v34 = vadd.f32 %v13223_v47, %v13222_v3  ;;  %v312_v4 = vld [vmem:[%s20659_s0 + $0x950] sm:$0xff] }
 0x572   :  { %8181 = vmatmul.mubr.bf16.gmra.mrb[24].mxu0 %v19786_v25  ;;  %10197 = vmatmul.mubr.bf16.gmra.mrb[168].mxu1 %v19914_v32  ;;  %v324_v25 = vld [vmem:[%s20659_s0 + $0x9b0] sm:$0xff] }
 0x573   :  { %8190 = vmatprep.mubr.bf16.mxu0 %v19788_v2  ;;  %v19931_v11 = vadd.f32 %v13224_v34, %v19474_v40  ;;  %10204 = vmatprep.mubr.bf16.mxu1 %v19916_v6  ;;  %v15029_v40 = vld [vmem:[%s20658_s1 + $0x11d4] ss:$12 sps:$4 sm:$0xff]   ;;  %v19948_v33 = vcombine.high %v312_v4, %v324_v25 }
 0x574   :  { %8306 = vmatpush1.bf16.msra.mxu0 %v15021_v50 }
 0x575   :  { %8307 = vmatprep.subr.bf16.mxu0 %v15026_v27  ;;  %v13241_v2 = vpop.f32.mrb[64].mxu1 }
 0x576   :  { %v13242_v15 = vpop.f32.mrb[65].mxu1 }
 0x577   :  { %v13243_v17 = vadd.f32 %v13242_v15, %v13241_v2  ;;  %v13244_v13 = vpop.f32.mrb[66].mxu1 }
 0x578   :  { %8308 = vmatpush1.bf16.msra.mxu0 %v15024_v19  ;;  %v13245_v30 = vpop.f32.mrb[67].mxu1 }
 0x579   :  { %8309 = vmatprep.subr.bf16.mxu0 %v15029_v40  ;;  %v19957_v5 = vadd.f32 %v13243_v17, %v19496_v36  ;;  %v13246_v38 = vadd.f32 %v13245_v30, %v13244_v13  ;;  %v336_v36 = vld [vmem:[%s20659_s0 + $0xa10] sm:$0xff] }
 0x57a   :  { %8191 = vmatmul.mubr.bf16.gmra.mrb[28].mxu0 %v19818_v56  ;;  %10205 = vmatmul.mubr.bf16.gmra.mrb[172].mxu1 %v19946_v54  ;;  %v348_v56 = vld [vmem:[%s20659_s0 + $0xa70] sm:$0xff] }
 0x57b   :  { %8200 = vmatprep.mubr.bf16.mxu0 %v19820_v51  ;;  %v19963_v37 = vadd.f32 %v13246_v38, %v19502_v52  ;;  %10212 = vmatprep.mubr.bf16.mxu1 %v19948_v33  ;;  %v19975_v52 = vcombine.low %v312_v4, %v324_v25  ;;  %v19977_v50 = vcombine.high %v336_v36, %v348_v56  ;;  %v360_v4 = vld [vmem:[%s20659_s0 + $0xad0] sm:$0xff] }
 0x57c   :  { %8310 = vmatpush1.bf16.msra.mxu0 %v15027_v42  ;;  %v384_v30 = vld [vmem:[%s20659_s0 + $0xb90] sm:$0xff] }
 0x57d   :  { %8311 = vmatprep.subr.bf16.mxu0 %v15032_v20  ;;  %v13247_v51 = vpop.f32.mrb[68].mxu1 }
 0x57e   :  { %v13248_v63 = vpop.f32.mrb[69].mxu1 }
 0x57f   :  { %v13249_v24 = vadd.f32 %v13248_v63, %v13247_v51  ;;  %v13250_v3 = vpop.f32.mrb[70].mxu1 }
 0x580   :  { %8312 = vmatpush1.bf16.msra.mxu0 %v15030_v0  ;;  %v13251_v47 = vpop.f32.mrb[71].mxu1 }
 0x581   :  { %v19980_v27 = vadd.f32 %v13249_v24, %v19522_v49  ;;  %v13252_v34 = vadd.f32 %v13251_v47, %v13250_v3  ;;  %v372_v49 = vld [vmem:[%s20659_s0 + $0xb30] sm:$0xff]  ;;  %v25_v24 = vld [vmem:[%s20659_s0 + $0x58] sm:$0xff] }
 0x582   :  { %8201 = vmatmul.mubr.bf16.gmra.mrb[32].mxu0 %v19850_v39  ;;  %10213 = vmatmul.mubr.bf16.gmra.mrb[176].mxu1 %v19975_v52  ;;  %v19995_v39 = vcombine.low %v336_v36, %v348_v56 }
 0x583   :  { %8210 = vmatprep.mubr.bf16.mxu0 %v19852_v16  ;;  %v19986_v19 = vadd.f32 %v13252_v34, %v19528_v43  ;;  %10220 = vmatprep.mubr.bf16.mxu1 %v19977_v50  ;;  %v19997_v16 = vcombine.high %v360_v4, %v372_v49 }
 0x585   :  { %v13253_v25 = vpop.f32.mrb[72].mxu1 }
 0x586   :  { %v13254_v40 = vpop.f32.mrb[73].mxu1 }
 0x587   :  { %v13255_v2 = vadd.f32 %v13254_v40, %v13253_v25  ;;  %v13256_v15 = vpop.f32.mrb[74].mxu1 }
 0x588   :  { %v13257_v43 = vpop.f32.mrb[75].mxu1 }
 0x589   :  { %v20000_v17 = vadd.f32 %v13255_v2, %v19542_v7  ;;  %v13258_v13 = vadd.f32 %v13257_v43, %v13256_v15  ;;  %v396_v7 = vld [vmem:[%s20659_s0 + $0xbf0] sm:$0xff]  ;;  %v49_v2 = vld [vmem:[%s20659_s0 + $0x118] sm:$0xff] }
 0x58a   :  { %8211 = vmatmul.mubr.bf16.gmra.mrb[36].mxu0 %v19882_v23  ;;  %10221 = vmatmul.mubr.bf16.gmra.mrb[180].mxu1 %v19995_v39  ;;  %v20015_v23 = vcombine.low %v360_v4, %v372_v49 }
 0x58b   :  { %8220 = vmatprep.mubr.bf16.mxu0 %v19884_v44  ;;  %v20006_v42 = vadd.f32 %v13258_v13, %v19548_v41  ;;  %10228 = vmatprep.mubr.bf16.mxu1 %v19997_v16  ;;  %v20017_v44 = vcombine.high %v384_v30, %v396_v7 }
 0x58d   :  { %v13259_v20 = vpop.f32.mrb[76].mxu1 }
 0x58e   :  { %v13260_v38 = vpop.f32.mrb[77].mxu1 }
 0x58f   :  { %v13261_v0 = vadd.f32 %v13260_v38, %v13259_v20  ;;  %v13262_v36 = vpop.f32.mrb[78].mxu1 }
 0x590   :  { %v13263_v41 = vpop.f32.mrb[79].mxu1 }
 0x591   :  { %v20020_v56 = vadd.f32 %v13261_v0, %v19562_v14  ;;  %v13264_v51 = vadd.f32 %v13263_v41, %v13262_v36  ;;  %v37_v14 = vld [vmem:[%s20659_s0 + $0xb8] sm:$0xff] }
 0x592   :  { %8221 = vmatmul.mubr.bf16.gmra.mrb[40].mxu0 %v19914_v32  ;;  %10229 = vmatmul.mubr.bf16.gmra.mrb[184].mxu1 %v20015_v23  ;;  %v20035_v32 = vcombine.low %v384_v30, %v396_v7  ;;  %v73_v0 = vld [vmem:[%s20659_s0 + $0x1d8] sm:$0xff] }
 0x593   :  { %8230 = vmatprep.mubr.bf16.mxu0 %v19916_v6  ;;  %v20026_v63 = vadd.f32 %v13264_v51, %v19568_v48  ;;  %10236 = vmatprep.mubr.bf16.mxu1 %v20017_v44  ;;  %v20037_v6 = vcombine.high %v25_v24, %v37_v14 }
 0x595   :  { %v13265_v3 = vpop.f32.mrb[80].mxu1 }
 0x596   :  { %v13266_v47 = vpop.f32.mrb[81].mxu1 }
 0x597   :  { %v13267_v34 = vadd.f32 %v13266_v47, %v13265_v3  ;;  %v13268_v4 = vpop.f32.mrb[82].mxu1 }
 0x598   :  { %v13269_v48 = vpop.f32.mrb[83].mxu1 }
 0x599   :  { %v20040_v49 = vadd.f32 %v13267_v34, %v19582_v61  ;;  %v13270_v25 = vadd.f32 %v13269_v48, %v13268_v4  ;;  %v61_v61 = vld [vmem:[%s20659_s0 + $0x178] sm:$0xff] }
 0x59a   :  { %8231 = vmatmul.mubr.bf16.gmra.mrb[44].mxu0 %v19946_v54  ;;  %10237 = vmatmul.mubr.bf16.gmra.mrb[188].mxu1 %v20035_v32  ;;  %v20055_v54 = vcombine.low %v25_v24, %v37_v14  ;;  %v97_v34 = vld [vmem:[%s20659_s0 + $0x298] sm:$0xff] }
 0x59b   :  { %8240 = vmatprep.mubr.bf16.mxu0 %v19948_v33  ;;  %v20046_v40 = vadd.f32 %v13270_v25, %v19588_v18  ;;  %10277 = vmatprep.mubr.bf16.mxu1 %v20037_v6  ;;  %v20057_v33 = vcombine.high %v49_v2, %v61_v61 }
 0x59d   :  { %v13271_v15 = vpop.f32.mrb[84].mxu1 }
 0x59e   :  { %v13272_v43 = vpop.f32.mrb[85].mxu1 }
 0x59f   :  { %v13273_v13 = vadd.f32 %v13272_v43, %v13271_v15  ;;  %v13274_v30 = vpop.f32.mrb[86].mxu1 }
 0x5a0   :  { %v13275_v18 = vpop.f32.mrb[87].mxu1 }
 0x5a1   :  { %v20060_v7 = vadd.f32 %v13273_v13, %v19608_v31  ;;  %v13276_v20 = vadd.f32 %v13275_v18, %v13274_v30  ;;  %v85_v31 = vld [vmem:[%s20659_s0 + $0x238] sm:$0xff] }
 0x5a2   :  { %8241 = vmatmul.mubr.bf16.gmra.mrb[48].mxu0 %v19975_v52  ;;  %10278 = vmatmul.mubr.bf16.vlgmr.msra.gmra.mrb[192].mxu1 %v20055_v54  ;;  %v20075_v52 = vcombine.low %v49_v2, %v61_v61  ;;  %v121_v13 = vld [vmem:[%s20659_s0 + $0x358] sm:$0xff] }
 0x5a3   :  { %8250 = vmatprep.mubr.bf16.mxu0 %v19977_v50  ;;  %v20066_v38 = vadd.f32 %v13276_v20, %v19614_v9  ;;  %10285 = vmatprep.mubr.bf16.mxu1 %v20057_v33  ;;  %v20077_v50 = vcombine.high %v73_v0, %v85_v31 }
 0x5a5   :  { %v13277_v36 = vpop.f32.mrb[88].mxu1 }
 0x5a6   :  { %v13278_v41 = vpop.f32.mrb[89].mxu1 }
 0x5a7   :  { %v13279_v51 = vadd.f32 %v13278_v41, %v13277_v36  ;;  %v13280_v24 = vpop.f32.mrb[90].mxu1 }
 0x5a8   :  { %v13281_v9 = vpop.f32.mrb[91].mxu1 }
 0x5a9   :  { %v20080_v14 = vadd.f32 %v13279_v51, %v19640_v45  ;;  %v13282_v3 = vadd.f32 %v13281_v9, %v13280_v24  ;;  %v109_v45 = vld [vmem:[%s20659_s0 + $0x2f8] sm:$0xff] }
 0x5aa   :  { %8251 = vmatmul.mubr.bf16.gmra.mrb[52].mxu0 %v19995_v39  ;;  %10286 = vmatmul.mubr.bf16.gmra.mrb[196].mxu1 %v20075_v52  ;;  %v20095_v39 = vcombine.low %v73_v0, %v85_v31  ;;  %v145_v51 = vld [vmem:[%s20659_s0 + $0x418] sm:$0xff] }
 0x5ab   :  { %8260 = vmatprep.mubr.bf16.mxu0 %v19997_v16  ;;  %v20086_v47 = vadd.f32 %v13282_v3, %v19646_v59  ;;  %10293 = vmatprep.mubr.bf16.mxu1 %v20077_v50  ;;  %v20097_v16 = vcombine.high %v97_v34, %v109_v45 }
 0x5ad   :  { %v13283_v4 = vpop.f32.mrb[92].mxu1 }
 0x5ae   :  { %v13284_v48 = vpop.f32.mrb[93].mxu1 }
 0x5af   :  { %v13285_v25 = vadd.f32 %v13284_v48, %v13283_v4  ;;  %v13286_v2 = vpop.f32.mrb[94].mxu1 }
 0x5b0   :  { %v13287_v59 = vpop.f32.mrb[95].mxu1 }
 0x5b1   :  { %v20100_v61 = vadd.f32 %v13285_v25, %v19672_v60  ;;  %v13288_v15 = vadd.f32 %v13287_v59, %v13286_v2  ;;  %v133_v60 = vld [vmem:[%s20659_s0 + $0x3b8] sm:$0xff] }
 0x5b2   :  { %8261 = vmatmul.mubr.bf16.gmra.mrb[56].mxu0 %v20015_v23  ;;  %10294 = vmatmul.mubr.bf16.gmra.mrb[200].mxu1 %v20095_v39  ;;  %v20115_v23 = vcombine.low %v97_v34, %v109_v45  ;;  %v169_v25 = vld [vmem:[%s20659_s0 + $0x4d8] sm:$0xff] }
 0x5b3   :  { %8270 = vmatprep.mubr.bf16.mxu0 %v20017_v44  ;;  %v20106_v43 = vadd.f32 %v13288_v15, %v19678_v29  ;;  %10301 = vmatprep.mubr.bf16.mxu1 %v20097_v16  ;;  %v20117_v44 = vcombine.high %v121_v13, %v133_v60 }
 0x5b5   :  { %v13289_v30 = vpop.f32.mrb[96].mxu1 }
 0x5b6   :  { %v13290_v18 = vpop.f32.mrb[97].mxu1 }
 0x5b7   :  { %v13291_v20 = vadd.f32 %v13290_v18, %v13289_v30  ;;  %v13292_v0 = vpop.f32.mrb[98].mxu1 }
 0x5b8   :  { %v13293_v29 = vpop.f32.mrb[99].mxu1 }
 0x5b9   :  { %v20120_v31 = vadd.f32 %v13291_v20, %v19704_v21  ;;  %v13294_v36 = vadd.f32 %v13293_v29, %v13292_v0  ;;  %v157_v21 = vld [vmem:[%s20659_s0 + $0x478] sm:$0xff] }
 0x5ba   :  { %8271 = vmatmul.mubr.bf16.gmra.mrb[60].mxu0 %v20035_v32  ;;  %10302 = vmatmul.mubr.bf16.gmra.mrb[204].mxu1 %v20115_v23  ;;  %v20135_v32 = vcombine.low %v121_v13, %v133_v60  ;;  %v193_v20 = vld [vmem:[%s20659_s0 + $0x598] sm:$0xff] }
 0x5bb   :  { %8313 = vmatprep.mubr.bf16.mxu0 %v20037_v6  ;;  %v20126_v41 = vadd.f32 %v13294_v36, %v19710_v55  ;;  %10309 = vmatprep.mubr.bf16.mxu1 %v20117_v44  ;;  %v20137_v6 = vcombine.high %v145_v51, %v157_v21 }
 0x5bd   :  { %v13295_v24 = vpop.f32.mrb[100].mxu1 }
 0x5be   :  { %v13296_v9 = vpop.f32.mrb[101].mxu1 }
 0x5bf   :  { %v13297_v3 = vadd.f32 %v13296_v9, %v13295_v24  ;;  %v13298_v34 = vpop.f32.mrb[102].mxu1 }
 0x5c0   :  { %v13299_v55 = vpop.f32.mrb[103].mxu1 }
 0x5c1   :  { %v20140_v45 = vadd.f32 %v13297_v3, %v19733_v10  ;;  %v13300_v4 = vadd.f32 %v13299_v55, %v13298_v34  ;;  %v181_v10 = vld [vmem:[%s20659_s0 + $0x538] sm:$0xff] }
 0x5c2   :  { %8314 = vmatmul.mubr.bf16.vlgmr.msra.gmra.mrb[0].mxu0 %v20055_v54  ;;  %10310 = vmatmul.mubr.bf16.gmra.mrb[208].mxu1 %v20135_v32  ;;  %v20155_v54 = vcombine.low %v145_v51, %v157_v21  ;;  %v217_v3 = vld [vmem:[%s20659_s0 + $0x658] sm:$0xff] }
 0x5c3   :  { %8323 = vmatprep.mubr.bf16.mxu0 %v20057_v33  ;;  %v20146_v48 = vadd.f32 %v13300_v4, %v19741_v58  ;;  %10317 = vmatprep.mubr.bf16.mxu1 %v20137_v6  ;;  %v20157_v33 = vcombine.high %v169_v25, %v181_v10 }
 0x5c5   :  { %v13301_v2 = vpop.f32.mrb[104].mxu1 }
 0x5c6   :  { %v13302_v59 = vpop.f32.mrb[105].mxu1 }
 0x5c7   :  { %v13303_v15 = vadd.f32 %v13302_v59, %v13301_v2  ;;  %v13304_v13 = vpop.f32.mrb[106].mxu1 }
 0x5c8   :  { %v13305_v58 = vpop.f32.mrb[107].mxu1 }
 0x5c9   :  { %v20160_v60 = vadd.f32 %v13303_v15, %v19765_v57  ;;  %v13306_v30 = vadd.f32 %v13305_v58, %v13304_v13  ;;  %v205_v57 = vld [vmem:[%s20659_s0 + $0x5f8] sm:$0xff] }
 0x5ca   :  { %8324 = vmatmul.mubr.bf16.gmra.mrb[4].mxu0 %v20075_v52  ;;  %10318 = vmatmul.mubr.bf16.gmra.mrb[212].mxu1 %v20155_v54  ;;  %v20175_v52 = vcombine.low %v169_v25, %v181_v10  ;;  %v241_v15 = vld [vmem:[%s20659_s0 + $0x718] sm:$0xff] }
 0x5cb   :  { %8333 = vmatprep.mubr.bf16.mxu0 %v20077_v50  ;;  %v20166_v18 = vadd.f32 %v13306_v30, %v19771_v35  ;;  %10325 = vmatprep.mubr.bf16.mxu1 %v20157_v33  ;;  %v20177_v50 = vcombine.high %v193_v20, %v205_v57 }
 0x5cd   :  { %v13307_v0 = vpop.f32.mrb[108].mxu1 }
 0x5ce   :  { %v13308_v29 = vpop.f32.mrb[109].mxu1 }
 0x5cf   :  { %v13309_v36 = vadd.f32 %v13308_v29, %v13307_v0  ;;  %v13310_v51 = vpop.f32.mrb[110].mxu1 }
 0x5d0   :  { %v13311_v35 = vpop.f32.mrb[111].mxu1 }
 0x5d1   :  { %v20180_v21 = vadd.f32 %v13309_v36, %v19797_v8  ;;  %v13312_v24 = vadd.f32 %v13311_v35, %v13310_v51  ;;  %v229_v8 = vld [vmem:[%s20659_s0 + $0x6b8] sm:$0xff] }
 0x5d2   :  { %8334 = vmatmul.mubr.bf16.gmra.mrb[8].mxu0 %v20095_v39  ;;  %10326 = vmatmul.mubr.bf16.gmra.mrb[216].mxu1 %v20175_v52  ;;  %v20195_v39 = vcombine.low %v193_v20, %v205_v57  ;;  %v265_v36 = vld [vmem:[%s20659_s0 + $0x7d8] sm:$0xff] }
 0x5d3   :  { %8343 = vmatprep.mubr.bf16.mxu0 %v20097_v16  ;;  %v20186_v9 = vadd.f32 %v13312_v24, %v19803_v46  ;;  %10333 = vmatprep.mubr.bf16.mxu1 %v20177_v50  ;;  %v20197_v16 = vcombine.high %v217_v3, %v229_v8 }
 0x5d5   :  { %v13313_v34 = vpop.f32.mrb[112].mxu1 }
 0x5d6   :  { %v13314_v55 = vpop.f32.mrb[113].mxu1 }
 0x5d7   :  { %v13315_v4 = vadd.f32 %v13314_v55, %v13313_v34  ;;  %v13316_v25 = vpop.f32.mrb[114].mxu1 }
 0x5d8   :  { %v13317_v46 = vpop.f32.mrb[115].mxu1 }
 0x5d9   :  { %v20200_v10 = vadd.f32 %v13315_v4, %v19829_v12  ;;  %v13318_v2 = vadd.f32 %v13317_v46, %v13316_v25  ;;  %v253_v12 = vld [vmem:[%s20659_s0 + $0x778] sm:$0xff] }
 0x5da   :  { %8344 = vmatmul.mubr.bf16.gmra.mrb[12].mxu0 %v20115_v23  ;;  %10334 = vmatmul.mubr.bf16.gmra.mrb[220].mxu1 %v20195_v39  ;;  %v20215_v23 = vcombine.low %v217_v3, %v229_v8  ;;  %v289_v4 = vld [vmem:[%s20659_s0 + $0x898] sm:$0xff] }
 0x5db   :  { %8353 = vmatprep.mubr.bf16.mxu0 %v20117_v44  ;;  %v20206_v59 = vadd.f32 %v13318_v2, %v19835_v26  ;;  %10341 = vmatprep.mubr.bf16.mxu1 %v20197_v16  ;;  %v20217_v44 = vcombine.high %v241_v15, %v253_v12 }
 0x5dd   :  { %v13319_v13 = vpop.f32.mrb[116].mxu1 }
 0x5de   :  { %v13320_v58 = vpop.f32.mrb[117].mxu1 }
 0x5df   :  { %v13321_v30 = vadd.f32 %v13320_v58, %v13319_v13  ;;  %v13322_v20 = vpop.f32.mrb[118].mxu1 }
 0x5e0   :  { %v13323_v26 = vpop.f32.mrb[119].mxu1 }
 0x5e1   :  { %v20220_v57 = vadd.f32 %v13321_v30, %v19861_v28  ;;  %v13324_v0 = vadd.f32 %v13323_v26, %v13322_v20  ;;  %v277_v28 = vld [vmem:[%s20659_s0 + $0x838] sm:$0xff] }
 0x5e2   :  { %8354 = vmatmul.mubr.bf16.gmra.mrb[16].mxu0 %v20135_v32  ;;  %10342 = vmatmul.mubr.bf16.gmra.mrb[224].mxu1 %v20215_v23  ;;  %v20235_v32 = vcombine.low %v241_v15, %v253_v12  ;;  %v313_v30 = vld [vmem:[%s20659_s0 + $0x958] sm:$0xff] }
 0x5e3   :  { %8363 = vmatprep.mubr.bf16.mxu0 %v20137_v6  ;;  %v20226_v29 = vadd.f32 %v13324_v0, %v19867_v62  ;;  %10349 = vmatprep.mubr.bf16.mxu1 %v20217_v44  ;;  %v20237_v6 = vcombine.high %v265_v36, %v277_v28 }
 0x5e5   :  { %v13325_v51 = vpop.f32.mrb[120].mxu1 }
 0x5e6   :  { %v13326_v35 = vpop.f32.mrb[121].mxu1 }
 0x5e7   :  { %v13327_v24 = vadd.f32 %v13326_v35, %v13325_v51  ;;  %v13328_v3 = vpop.f32.mrb[122].mxu1 }
 0x5e8   :  { %v13329_v62 = vpop.f32.mrb[123].mxu1 }
 0x5e9   :  { %v20240_v8 = vadd.f32 %v13327_v24, %v19893_v1  ;;  %v13330_v34 = vadd.f32 %v13329_v62, %v13328_v3  ;;  %v301_v1 = vld [vmem:[%s20659_s0 + $0x8f8] sm:$0xff] }
 0x5ea   :  { %8364 = vmatmul.mubr.bf16.gmra.mrb[20].mxu0 %v20155_v54  ;;  %10350 = vmatmul.mubr.bf16.gmra.mrb[228].mxu1 %v20235_v32  ;;  %v20255_v54 = vcombine.low %v265_v36, %v277_v28  ;;  %v337_v24 = vld [vmem:[%s20659_s0 + $0xa18] sm:$0xff] }
 0x5eb   :  { %8373 = vmatprep.mubr.bf16.mxu0 %v20157_v33  ;;  %v20246_v55 = vadd.f32 %v13330_v34, %v19899_v53  ;;  %10357 = vmatprep.mubr.bf16.mxu1 %v20237_v6  ;;  %v20257_v33 = vcombine.high %v289_v4, %v301_v1 }
 0x5ed   :  { %v13331_v25 = vpop.f32.mrb[124].mxu1 }
 0x5ee   :  { %v13332_v46 = vpop.f32.mrb[125].mxu1 }
 0x5ef   :  { %v13333_v2 = vadd.f32 %v13332_v46, %v13331_v25  ;;  %v13334_v15 = vpop.f32.mrb[126].mxu1 }
 0x5f0   :  { %v13335_v53 = vpop.f32.mrb[127].mxu1 }
 0x5f1   :  { %v20260_v12 = vadd.f32 %v13333_v2, %v19925_v22  ;;  %v13336_v13 = vadd.f32 %v13335_v53, %v13334_v15  ;;  %v325_v22 = vld [vmem:[%s20659_s0 + $0x9b8] sm:$0xff] }
 0x5f2   :  { %8374 = vmatmul.mubr.bf16.gmra.mrb[24].mxu0 %v20175_v52  ;;  %10358 = vmatmul.mubr.bf16.gmra.mrb[232].mxu1 %v20255_v54  ;;  %v20275_v52 = vcombine.low %v289_v4, %v301_v1  ;;  %v361_v2 = vld [vmem:[%s20659_s0 + $0xad8] sm:$0xff] }
 0x5f3   :  { %8383 = vmatprep.mubr.bf16.mxu0 %v20177_v50  ;;  %v20266_v58 = vadd.f32 %v13336_v13, %v19931_v11  ;;  %10365 = vmatprep.mubr.bf16.mxu1 %v20257_v33  ;;  %v20277_v50 = vcombine.high %v313_v30, %v325_v22 }
 0x5f5   :  { %v13353_v20 = vpop.f32.mrb[128].mxu1 }
 0x5f6   :  { %v13354_v26 = vpop.f32.mrb[129].mxu1 }
 0x5f7   :  { %v13355_v0 = vadd.f32 %v13354_v26, %v13353_v20  ;;  %v13356_v36 = vpop.f32.mrb[130].mxu1 }
 0x5f8   :  { %v13357_v11 = vpop.f32.mrb[131].mxu1 }
 0x5f9   :  { %v20280_v28 = vadd.f32 %v13355_v0, %v19957_v5  ;;  %v13358_v51 = vadd.f32 %v13357_v11, %v13356_v36  ;;  %v349_v5 = vld [vmem:[%s20659_s0 + $0xa78] sm:$0xff] }
 0x5fa   :  { %8384 = vmatmul.mubr.bf16.gmra.mrb[28].mxu0 %v20195_v39  ;;  %10366 = vmatmul.mubr.bf16.gmra.mrb[236].mxu1 %v20275_v52  ;;  %v20295_v39 = vcombine.low %v313_v30, %v325_v22  ;;  %v11463_v13 = vcombine.low %v337_v24, %v349_v5  ;;  %v385_v0 = vld [vmem:[%s20659_s0 + $0xb98] sm:$0xff] }
 0x5fb   :  { %8393 = vmatprep.mubr.bf16.mxu0 %v20197_v16  ;;  %v20286_v35 = vadd.f32 %v13358_v51, %v19963_v37  ;;  %10373 = vmatprep.mubr.bf16.mxu1 %v20277_v50  ;;  %v11464_v16 = vcombine.high %v337_v24, %v349_v5  ;;  %v397_v36 = vld [vmem:[%s20659_s0 + $0xbf8] sm:$0xff] }
 0x5fc   :  { %v11512_v5 = vcombine.high %v385_v0, %v397_v36 }
 0x5fd   :  { %v13359_v3 = vpop.f32.mrb[132].mxu1 }
 0x5fe   :  { %v13360_v62 = vpop.f32.mrb[133].mxu1 }
 0x5ff   :  { %v13361_v34 = vadd.f32 %v13360_v62, %v13359_v3  ;;  %v13362_v4 = vpop.f32.mrb[134].mxu1 }
 0x600   :  { %v13363_v1 = vpop.f32.mrb[135].mxu1 }
 0x601   :  { %v20298_v37 = vadd.f32 %v13361_v34, %v19980_v27  ;;  %v13364_v25 = vadd.f32 %v13363_v1, %v13362_v4  ;;  %v373_v27 = vld [vmem:[%s20659_s0 + $0xb38] sm:$0xff]  ;;  %v11511_v1 = vcombine.low %v385_v0, %v397_v36 }
 0x602   :  { %8394 = vmatmul.mubr.bf16.gmra.mrb[32].mxu0 %v20215_v23  ;;  %10374 = vmatmul.mubr.bf16.gmra.mrb[240].mxu1 %v20295_v39  ;;  %v11488_v22 = vcombine.high %v361_v2, %v373_v27  ;;  %v11487_v51 = vcombine.low %v361_v2, %v373_v27 }
 0x603   :  { %8403 = vmatprep.mubr.bf16.mxu0 %v20217_v44  ;;  %v20304_v46 = vadd.f32 %v13364_v25, %v19986_v19  ;;  %10381 = vmatprep.mubr.bf16.mxu1 %v11464_v16 }
 0x605   :  { %v13365_v15 = vpop.f32.mrb[136].mxu1 }
 0x606   :  { %v13366_v53 = vpop.f32.mrb[137].mxu1 }
 0x607   :  { %v13367_v23 = vadd.f32 %v13366_v53, %v13365_v15  ;;  %v13368_v30 = vpop.f32.mrb[138].mxu1 }
 0x608   :  { %v13369_v20 = vpop.f32.mrb[139].mxu1 }
 0x609   :  { %v20313_v44 = vadd.f32 %v13367_v23, %v20000_v17  ;;  %v13370_v19 = vadd.f32 %v13369_v20, %v13368_v30 }
 0x60a   :  { %8404 = vmatmul.mubr.bf16.gmra.mrb[36].mxu0 %v20235_v32  ;;  %10382 = vmatmul.mubr.bf16.gmra.mrb[244].mxu1 %v11463_v13 }
 0x60b   :  { %8413 = vmatprep.mubr.bf16.mxu0 %v20237_v6  ;;  %v20318_v26 = vadd.f32 %v13370_v19, %v20006_v42  ;;  %10389 = vmatprep.mubr.bf16.mxu1 %v11488_v22 }
 0x60d   :  { %v13371_v17 = vpop.f32.mrb[140].mxu1 }
 0x60e   :  { %v13372_v11 = vpop.f32.mrb[141].mxu1 }
 0x60f   :  { %v13373_v24 = vadd.f32 %v13372_v11, %v13371_v17  ;;  %v13374_v32 = vpop.f32.mrb[142].mxu1 }
 0x610   :  { %v13375_v3 = vpop.f32.mrb[143].mxu1 }
 0x611   :  { %v20327_v6 = vadd.f32 %v13373_v24, %v20020_v56  ;;  %v13376_v42 = vadd.f32 %v13375_v3, %v13374_v32 }
 0x612   :  { %8414 = vmatmul.mubr.bf16.gmra.mrb[40].mxu0 %v20255_v54  ;;  %10390 = vmatmul.mubr.bf16.gmra.mrb[248].mxu1 %v11487_v51 }
 0x613   :  { %8423 = vmatprep.mubr.bf16.mxu0 %v20257_v33  ;;  %v20332_v62 = vadd.f32 %v13376_v42, %v20026_v63  ;;  %10397 = vmatprep.mubr.bf16.mxu1 %v11512_v5 }
 0x615   :  { %v13377_v34 = vpop.f32.mrb[144].mxu1 }
 0x616   :  { %v13378_v4 = vpop.f32.mrb[145].mxu1 }
 0x617   :  { %v13379_v25 = vadd.f32 %v13378_v4, %v13377_v34  ;;  %v13380_v2 = vpop.f32.mrb[146].mxu1 }
 0x618   :  { %v13381_v27 = vpop.f32.mrb[147].mxu1 }
 0x619   :  { %v20335_v15 = vadd.f32 %v13379_v25, %v20040_v49  ;;  %v13382_v56 = vadd.f32 %v13381_v27, %v13380_v2 }
 0x61a   :  { %8424 = vmatmul.mubr.bf16.gmra.mrb[44].mxu0 %v20275_v52  ;;  %10398 = vmatmul.mubr.bf16.gmra.mrb[252].mxu1 %v11511_v1 }
 0x61b   :  { %8433 = vmatprep.mubr.bf16.mxu0 %v20277_v50  ;;  %v20340_v54 = vadd.f32 %v13382_v56, %v20046_v40 }
 0x61d   :  { %v13383_v63 = vpop.f32.mrb[148].mxu1 }
 0x61e   :  { %v13384_v33 = vpop.f32.mrb[149].mxu1 }
 0x61f   :  { %v13385_v53 = vadd.f32 %v13384_v33, %v13383_v63  ;;  %v13386_v23 = vpop.f32.mrb[150].mxu1 }
 0x620   :  { %v13387_v30 = vpop.f32.mrb[151].mxu1 }
 0x621   :  { %v20343_v20 = vadd.f32 %v13385_v53, %v20060_v7  ;;  %v13388_v19 = vadd.f32 %v13387_v30, %v13386_v23 }
 0x622   :  { %8434 = vmatmul.mubr.bf16.gmra.mrb[48].mxu0 %v20295_v39 }
 0x623   :  { %8443 = vmatprep.mubr.bf16.mxu0 %v11464_v16  ;;  %v20347_v49 = vadd.f32 %v13388_v19, %v20066_v38 }
 0x625   :  { %v13389_v52 = vpop.f32.mrb[152].mxu1 }
 0x626   :  { %v13390_v50 = vpop.f32.mrb[153].mxu1 }
 0x627   :  { %v13391_v0 = vadd.f32 %v13390_v50, %v13389_v52  ;;  %v13392_v40 = vpop.f32.mrb[154].mxu1 }
 0x628   :  { %v13393_v36 = vpop.f32.mrb[155].mxu1 }
 0x629   :  { %v20350_v17 = vadd.f32 %v13391_v0, %v20080_v14  ;;  %v13394_v11 = vadd.f32 %v13393_v36, %v13392_v40 }
 0x62a   :  { %8444 = vmatmul.mubr.bf16.gmra.mrb[52].mxu0 %v11463_v13 }
 0x62b   :  { %8453 = vmatprep.mubr.bf16.mxu0 %v11488_v22  ;;  %v20353_v7 = vadd.f32 %v13394_v11, %v20086_v47 }
 0x62d   :  { %v13395_v24 = vpop.f32.mrb[156].mxu1 }
 0x62e   :  { %v13396_v39 = vpop.f32.mrb[157].mxu1 }
 0x62f   :  { %v13397_v16 = vadd.f32 %v13396_v39, %v13395_v24  ;;  %v13398_v32 = vpop.f32.mrb[158].mxu1 }
 0x630   :  { %v13399_v38 = vpop.f32.mrb[159].mxu1 }
 0x631   :  { %v20356_v3 = vadd.f32 %v13397_v16, %v20100_v61  ;;  %v13400_v42 = vadd.f32 %v13399_v38, %v13398_v32 }
 0x632   :  { %8454 = vmatmul.mubr.bf16.gmra.mrb[56].mxu0 %v11487_v51 }
 0x633   :  { %8463 = vmatprep.mubr.bf16.mxu0 %v11512_v5  ;;  %v20359_v14 = vadd.f32 %v13400_v42, %v20106_v43 }
 0x635   :  { %v13401_v34 = vpop.f32.mrb[160].mxu1 }
 0x636   :  { %v13402_v13 = vpop.f32.mrb[161].mxu1 }
 0x637   :  { %v13403_v22 = vadd.f32 %v13402_v13, %v13401_v34  ;;  %v13404_v4 = vpop.f32.mrb[162].mxu1 }
 0x638   :  { %v13405_v47 = vpop.f32.mrb[163].mxu1 }
 0x639   :  { %v20362_v25 = vadd.f32 %v13403_v22, %v20120_v31  ;;  %v13406_v2 = vadd.f32 %v13405_v47, %v13404_v4 }
 0x63a   :  { %8464 = vmatmul.mubr.bf16.gmra.mrb[60].mxu0 %v11511_v1 }
 0x63b   :  { %v20365_v27 = vadd.f32 %v13406_v2, %v20126_v41 }
 0x63d   :  { %v13407_v61 = vpop.f32.mrb[164].mxu1 }
 0x63e   :  { %v13408_v56 = vpop.f32.mrb[165].mxu1 }
 0x63f   :  { %v13409_v51 = vadd.f32 %v13408_v56, %v13407_v61  ;;  %v13410_v5 = vpop.f32.mrb[166].mxu1 }
 0x640   :  { %v13411_v63 = vpop.f32.mrb[167].mxu1 }
 0x641   :  { %v20368_v43 = vadd.f32 %v13409_v51, %v20140_v45  ;;  %v13412_v33 = vadd.f32 %v13411_v63, %v13410_v5 }
 0x643   :  { %v20371_v53 = vadd.f32 %v13412_v33, %v20146_v48 }
 0x645   :  { %v13413_v23 = vpop.f32.mrb[168].mxu1 }
 0x646   :  { %v13414_v31 = vpop.f32.mrb[169].mxu1 }
 0x647   :  { %v13415_v30 = vadd.f32 %v13414_v31, %v13413_v23  ;;  %v13416_v19 = vpop.f32.mrb[170].mxu1 }
 0x648   :  { %v13417_v1 = vpop.f32.mrb[171].mxu1 }
 0x649   :  { %v20374_v41 = vadd.f32 %v13415_v30, %v20160_v60  ;;  %v13418_v52 = vadd.f32 %v13417_v1, %v13416_v19 }
 0x64b   :  { %v20377_v50 = vadd.f32 %v13418_v52, %v20166_v18 }
 0x64d   :  { %v13419_v0 = vpop.f32.mrb[172].mxu1 }
 0x64e   :  { %v13420_v40 = vpop.f32.mrb[173].mxu1 }
 0x64f   :  { %v13421_v45 = vadd.f32 %v13420_v40, %v13419_v0  ;;  %v13422_v36 = vpop.f32.mrb[174].mxu1 }
 0x650   :  { %v13423_v11 = vpop.f32.mrb[175].mxu1 }
 0x651   :  { %v20380_v48 = vadd.f32 %v13421_v45, %v20180_v21  ;;  %v13424_v24 = vadd.f32 %v13423_v11, %v13422_v36 }
 0x653   :  { %v20383_v39 = vadd.f32 %v13424_v24, %v20186_v9 }
 0x655   :  { %v13425_v16 = vpop.f32.mrb[176].mxu1 }
 0x656   :  { %v13426_v32 = vpop.f32.mrb[177].mxu1 }
 0x657   :  { %v13427_v60 = vadd.f32 %v13426_v32, %v13425_v16  ;;  %v13428_v38 = vpop.f32.mrb[178].mxu1 }
 0x658   :  { %v13429_v42 = vpop.f32.mrb[179].mxu1 }
 0x659   :  { %v20386_v18 = vadd.f32 %v13427_v60, %v20200_v10  ;;  %v13430_v34 = vadd.f32 %v13429_v42, %v13428_v38 }
 0x65b   :  { %v20389_v13 = vadd.f32 %v13430_v34, %v20206_v59 }
 0x65d   :  { %v13431_v22 = vpop.f32.mrb[180].mxu1 }
 0x65e   :  { %v13432_v4 = vpop.f32.mrb[181].mxu1 }
 0x65f   :  { %v13433_v21 = vadd.f32 %v13432_v4, %v13431_v22  ;;  %v13434_v47 = vpop.f32.mrb[182].mxu1 }
 0x660   :  { %v13435_v2 = vpop.f32.mrb[183].mxu1 }
 0x661   :  { %v20392_v9 = vadd.f32 %v13433_v21, %v20220_v57  ;;  %v13436_v61 = vadd.f32 %v13435_v2, %v13434_v47 }
 0x663   :  { %v20395_v56 = vadd.f32 %v13436_v61, %v20226_v29 }
 0x665   :  { %v13437_v51 = vpop.f32.mrb[184].mxu1 }
 0x666   :  { %v13438_v5 = vpop.f32.mrb[185].mxu1 }
 0x667   :  { %v13439_v10 = vadd.f32 %v13438_v5, %v13437_v51  ;;  %v13440_v63 = vpop.f32.mrb[186].mxu1 }
 0x668   :  { %v13441_v33 = vpop.f32.mrb[187].mxu1 }
 0x669   :  { %v20398_v59 = vadd.f32 %v13439_v10, %v20240_v8  ;;  %v13442_v23 = vadd.f32 %v13441_v33, %v13440_v63 }
 0x66b   :  { %v20401_v31 = vadd.f32 %v13442_v23, %v20246_v55 }
 0x66d   :  { %v13443_v30 = vpop.f32.mrb[188].mxu1 }
 0x66e   :  { %v13444_v19 = vpop.f32.mrb[189].mxu1 }
 0x66f   :  { %v13445_v57 = vadd.f32 %v13444_v19, %v13443_v30  ;;  %v13446_v1 = vpop.f32.mrb[190].mxu1 }
 0x670   :  { %v13447_v52 = vpop.f32.mrb[191].mxu1 }
 0x671   :  { %v20404_v29 = vadd.f32 %v13445_v57, %v20260_v12  ;;  %v13448_v0 = vadd.f32 %v13447_v52, %v13446_v1 }
 0x673   :  { %v20407_v40 = vadd.f32 %v13448_v0, %v20266_v58 }
 0x675   :  { %v13465_v45 = vpop.f32.mrb[192].mxu1 }
 0x676   :  { %v13466_v36 = vpop.f32.mrb[193].mxu1 }
 0x677   :  { %v13467_v8 = vadd.f32 %v13466_v36, %v13465_v45  ;;  %v13468_v11 = vpop.f32.mrb[194].mxu1 }
 0x678   :  { %v13469_v24 = vpop.f32.mrb[195].mxu1 }
 0x679   :  { %v10280_v55 = vadd.f32 %v13467_v8, %v20280_v28  ;;  %v13470_v16 = vadd.f32 %v13469_v24, %v13468_v11 }
 0x67b   :  { %v12154_v32 = vpack.c.bf16 %v10280_v55, %v10280_v55  ;;  %v10283_v60 = vadd.f32 %v13470_v16, %v20286_v35  ;;  %v10903_v12 = vmul.f32 %v10280_v55, %v10280_v55 }
 0x67d   :  { %10727 = vst [vmem:[%s20660_s2 + $0x8] sm:$0xf] %v12154_v32  ;;  %v12156_v38 = vpack.c.bf16 %v10283_v60, %v10283_v60  ;;  %v10864_v42 = vadd.f32 %v10283_v60, %v10280_v55  ;;  %v10906_v58 = vmul.f32 %v10283_v60, %v10283_v60  ;;  %v13471_v34 = vpop.f32.mrb[196].mxu1 }
 0x67e   :  { %v13472_v22 = vpop.f32.mrb[197].mxu1 }
 0x67f   :  { %10729 = vst [vmem:[%s20660_s2 + $0x14] sm:$0xf] %v12156_v38  ;;  %v11071_v4 = vadd.f32 %v10906_v58, %v10903_v12  ;;  %v13473_v28 = vadd.f32 %v13472_v22, %v13471_v34  ;;  %v13474_v21 = vpop.f32.mrb[198].mxu1 }
 0x680   :  { %v13475_v47 = vpop.f32.mrb[199].mxu1 }
 0x681   :  { %v10288_v35 = vadd.f32 %v13473_v28, %v20298_v37  ;;  %v13476_v2 = vadd.f32 %v13475_v47, %v13474_v21 }
 0x683   :  { %v12158_v61 = vpack.c.bf16 %v10288_v35, %v10288_v35  ;;  %v10865_v51 = vadd.f32 %v10864_v42, %v10288_v35  ;;  %v10909_v5 = vmul.f32 %v10288_v35, %v10288_v35  ;;  %v10291_v10 = vadd.f32 %v13476_v2, %v20304_v46 }
 0x685   :  { %10731 = vst [vmem:[%s20660_s2 + $0x20] sm:$0xf] %v12158_v61  ;;  %v11072_v63 = vadd.f32 %v11071_v4, %v10909_v5  ;;  %v12160_v33 = vpack.c.bf16 %v10291_v10, %v10291_v10  ;;  %v10866_v23 = vadd.f32 %v10865_v51, %v10291_v10  ;;  %v10912_v30 = vmul.f32 %v10291_v10, %v10291_v10  ;;  %v13477_v19 = vpop.f32.mrb[200].mxu1 }
 0x686   :  { %v13478_v57 = vpop.f32.mrb[201].mxu1 }
 0x687   :  { %10733 = vst [vmem:[%s20660_s2 + $0x2c] sm:$0xf] %v12160_v33  ;;  %v11073_v37 = vadd.f32 %v11072_v63, %v10912_v30  ;;  %v13479_v1 = vadd.f32 %v13478_v57, %v13477_v19  ;;  %v13480_v52 = vpop.f32.mrb[202].mxu1 }
 0x688   :  { %v13481_v0 = vpop.f32.mrb[203].mxu1 }
 0x689   :  { %v10296_v46 = vadd.f32 %v13479_v1, %v20313_v44  ;;  %v13482_v45 = vadd.f32 %v13481_v0, %v13480_v52 }
 0x68b   :  { %v12162_v36 = vpack.c.bf16 %v10296_v46, %v10296_v46  ;;  %v10867_v8 = vadd.f32 %v10866_v23, %v10296_v46  ;;  %v10915_v11 = vmul.f32 %v10296_v46, %v10296_v46  ;;  %v10299_v24 = vadd.f32 %v13482_v45, %v20318_v26 }
 0x68d   :  { %10735 = vst [vmem:[%s20660_s2 + $0x38] sm:$0xf] %v12162_v36  ;;  %v11074_v55 = vadd.f32 %v11073_v37, %v10915_v11  ;;  %v12164_v16 = vpack.c.bf16 %v10299_v24, %v10299_v24  ;;  %v10868_v32 = vadd.f32 %v10867_v8, %v10299_v24  ;;  %v10918_v60 = vmul.f32 %v10299_v24, %v10299_v24  ;;  %v13483_v12 = vpop.f32.mrb[204].mxu1 }
 0x68e   :  { %v13484_v38 = vpop.f32.mrb[205].mxu1 }
 0x68f   :  { %10737 = vst [vmem:[%s20660_s2 + $0x44] sm:$0xf] %v12164_v16  ;;  %v11075_v44 = vadd.f32 %v11074_v55, %v10918_v60  ;;  %v13485_v42 = vadd.f32 %v13484_v38, %v13483_v12  ;;  %v13486_v58 = vpop.f32.mrb[206].mxu1 }
 0x690   :  { %v13487_v34 = vpop.f32.mrb[207].mxu1 }
 0x691   :  { %v10304_v26 = vadd.f32 %v13485_v42, %v20327_v6  ;;  %v13488_v22 = vadd.f32 %v13487_v34, %v13486_v58 }
 0x693   :  { %v12166_v4 = vpack.c.bf16 %v10304_v26, %v10304_v26  ;;  %v10869_v28 = vadd.f32 %v10868_v32, %v10304_v26  ;;  %v10921_v21 = vmul.f32 %v10304_v26, %v10304_v26  ;;  %v10307_v47 = vadd.f32 %v13488_v22, %v20332_v62 }
 0x695   :  { %v8315_v35 = vpop.f32.mrb[0].mxu0  ;;  %10739 = vst [vmem:[%s20660_s2 + $0x50] sm:$0xf] %v12166_v4  ;;  %v11076_v2 = vadd.f32 %v11075_v44, %v10921_v21  ;;  %v12168_v61 = vpack.c.bf16 %v10307_v47, %v10307_v47  ;;  %v10870_v51 = vadd.f32 %v10869_v28, %v10307_v47  ;;  %v10924_v5 = vmul.f32 %v10307_v47, %v10307_v47  ;;  %v13489_v10 = vpop.f32.mrb[208].mxu1 }
 0x696   :  { %v8317_v63 = vpop.f32.mrb[1].mxu0  ;;  %v10901_v33 = vmul.f32 %v8315_v35, %v8315_v35  ;;  %v13490_v6 = vpop.f32.mrb[209].mxu1 }
 0x697   :  { %v12153_v23 = vpack.c.bf16 %v8317_v63, %v8315_v35  ;;  %v8319_v30 = vpop.f32.mrb[2].mxu0  ;;  %10741 = vst [vmem:[%s20660_s2 + $0x5c] sm:$0xf] %v12168_v61  ;;  %v11077_v62 = vadd.f32 %v11076_v2, %v10924_v5  ;;  %v13491_v19 = vadd.f32 %v13490_v6, %v13489_v10  ;;  %v13492_v1 = vpop.f32.mrb[210].mxu1  ;;  %v10902_v0 = vmul.f32 %v8317_v63, %v8317_v63 }
 0x698   :  { %v10790_v57 = vadd.f32 %v8319_v30, %v8315_v35  ;;  %v10904_v37 = vmul.f32 %v8319_v30, %v8319_v30  ;;  %v8321_v52 = vpop.f32.mrb[3].mxu0  ;;  %v13493_v8 = vpop.f32.mrb[211].mxu1 }
 0x699   :  { %10726 = vst [vmem:[%s20660_s2] sm:$0xff] %v12153_v23  ;;  %v12155_v46 = vpack.c.bf16 %v8321_v52, %v8319_v30  ;;  %v10827_v45 = vadd.f32 %v8321_v52, %v8317_v63  ;;  %v10905_v36 = vmul.f32 %v8321_v52, %v8321_v52  ;;  %v10312_v11 = vadd.f32 %v13491_v19, %v20335_v15 }
 0x69a   :  { %v10997_v24 = vadd.f32 %v10904_v37, %v10901_v33  ;;  %v13494_v55 = vadd.f32 %v13493_v8, %v13492_v1 }
 0x69b   :  { %10728 = vst [vmem:[%s20660_s2 + $0xc] sm:$0xff] %v12155_v46  ;;  %v11034_v16 = vadd.f32 %v10905_v36, %v10902_v0  ;;  %v12170_v32 = vpack.c.bf16 %v10312_v11, %v10312_v11  ;;  %v10871_v60 = vadd.f32 %v10870_v51, %v10312_v11  ;;  %v10927_v12 = vmul.f32 %v10312_v11, %v10312_v11 }
 0x69c   :  { %v10315_v38 = vadd.f32 %v13494_v55, %v20340_v54 }
 0x69d   :  { %v8325_v44 = vpop.f32.mrb[4].mxu0  ;;  %10743 = vst [vmem:[%s20660_s2 + $0x68] sm:$0xf] %v12170_v32  ;;  %v11078_v42 = vadd.f32 %v11077_v62, %v10927_v12  ;;  %v13495_v26 = vpop.f32.mrb[212].mxu1 }
 0x69e   :  { %v12172_v58 = vpack.c.bf16 %v10315_v38, %v10315_v38  ;;  %v10872_v15 = vadd.f32 %v10871_v60, %v10315_v38  ;;  %v10930_v34 = vmul.f32 %v10315_v38, %v10315_v38  ;;  %v8327_v22 = vpop.f32.mrb[5].mxu0  ;;  %v10791_v4 = vadd.f32 %v10790_v57, %v8325_v44  ;;  %v13496_v35 = vpop.f32.mrb[213].mxu1 }
 0x69f   :  { %v10907_v28 = vmul.f32 %v8325_v44, %v8325_v44  ;;  %v12157_v21 = vpack.c.bf16 %v8327_v22, %v8325_v44  ;;  %v10828_v47 = vadd.f32 %v10827_v45, %v8327_v22  ;;  %v8329_v2 = vpop.f32.mrb[6].mxu0  ;;  %v10908_v61 = vmul.f32 %v8327_v22, %v8327_v22  ;;  %v13498_v10 = vpop.f32.mrb[214].mxu1 }
 0x6a0   :  { %10745 = vst [vmem:[%s20660_s2 + $0x74] sm:$0xf] %v12172_v58  ;;  %v11079_v54 = vadd.f32 %v11078_v42, %v10930_v34  ;;  %v13497_v51 = vadd.f32 %v13496_v35, %v13495_v26  ;;  %v10910_v5 = vmul.f32 %v8329_v2, %v8329_v2  ;;  %v8331_v63 = vpop.f32.mrb[7].mxu0  ;;  %v10792_v23 = vadd.f32 %v10791_v4, %v8329_v2  ;;  %v13499_v62 = vpop.f32.mrb[215].mxu1 }
 0x6a1   :  { %v10998_v33 = vadd.f32 %v10997_v24, %v10907_v28  ;;  %10730 = vst [vmem:[%s20660_s2 + $0x18] sm:$0xff] %v12157_v21  ;;  %v12159_v6 = vpack.c.bf16 %v8331_v63, %v8329_v2  ;;  %v10829_v30 = vadd.f32 %v10828_v47, %v8331_v63  ;;  %v11035_v19 = vadd.f32 %v11034_v16, %v10908_v61 }
 0x6a2   :  { %v10320_v57 = vadd.f32 %v13497_v51, %v20343_v20  ;;  %v10911_v37 = vmul.f32 %v8331_v63, %v8331_v63  ;;  %v13500_v1 = vadd.f32 %v13499_v62, %v13498_v10 }
 0x6a3   :  { %v10999_v52 = vadd.f32 %v10998_v33, %v10910_v5  ;;  %10732 = vst [vmem:[%s20660_s2 + $0x24] sm:$0xff] %v12159_v6 }
 0x6a4   :  { %v12174_v0 = vpack.c.bf16 %v10320_v57, %v10320_v57  ;;  %v10873_v46 = vadd.f32 %v10872_v15, %v10320_v57  ;;  %v10933_v45 = vmul.f32 %v10320_v57, %v10320_v57  ;;  %v11036_v36 = vadd.f32 %v11035_v19, %v10911_v37 }
 0x6a5   :  { %v10323_v8 = vadd.f32 %v13500_v1, %v20347_v49  ;;  %v8335_v11 = vpop.f32.mrb[8].mxu0  ;;  %v13501_v16 = vpop.f32.mrb[216].mxu1 }
 0x6a6   :  { %10747 = vst [vmem:[%s20660_s2 + $0x80] sm:$0xf] %v12174_v0  ;;  %v11080_v24 = vadd.f32 %v11079_v54, %v10933_v45  ;;  %v10793_v20 = vadd.f32 %v10792_v23, %v8335_v11  ;;  %v10913_v55 = vmul.f32 %v8335_v11, %v8335_v11  ;;  %v8337_v32 = vpop.f32.mrb[9].mxu0  ;;  %v13502_v42 = vpop.f32.mrb[217].mxu1 }
 0x6a7   :  { %v12176_v60 = vpack.c.bf16 %v10323_v8, %v10323_v8  ;;  %v10874_v12 = vadd.f32 %v10873_v46, %v10323_v8  ;;  %v10936_v38 = vmul.f32 %v10323_v8, %v10323_v8  ;;  %v12161_v44 = vpack.c.bf16 %v8337_v32, %v8335_v11  ;;  %v8339_v58 = vpop.f32.mrb[10].mxu0  ;;  %v13504_v22 = vpop.f32.mrb[218].mxu1 }
 0x6a8   :  { %v11000_v15 = vadd.f32 %v10999_v52, %v10913_v55  ;;  %v10830_v34 = vadd.f32 %v10829_v30, %v8337_v32  ;;  %v10914_v26 = vmul.f32 %v8337_v32, %v8337_v32  ;;  %v13503_v49 = vadd.f32 %v13502_v42, %v13501_v16  ;;  %v8341_v4 = vpop.f32.mrb[11].mxu0  ;;  %v13505_v2 = vpop.f32.mrb[219].mxu1 }
 0x6a9   :  { %10749 = vst [vmem:[%s20660_s2 + $0x8c] sm:$0xf] %v12176_v60  ;;  %v11081_v28 = vadd.f32 %v11080_v24, %v10936_v38  ;;  %10734 = vst [vmem:[%s20660_s2 + $0x30] sm:$0xff] %v12161_v44  ;;  %v10794_v21 = vadd.f32 %v10793_v20, %v8339_v58  ;;  %v10916_v47 = vmul.f32 %v8339_v58, %v8339_v58 }
 0x6aa   :  { %v12163_v35 = vpack.c.bf16 %v8341_v4, %v8339_v58  ;;  %v11037_v54 = vadd.f32 %v11036_v36, %v10914_v26  ;;  %v10328_v61 = vadd.f32 %v13503_v49, %v20350_v17  ;;  %v10831_v51 = vadd.f32 %v10830_v34, %v8341_v4 }
 0x6ab   :  { %v10917_v5 = vmul.f32 %v8341_v4, %v8341_v4  ;;  %v11001_v10 = vadd.f32 %v11000_v15, %v10916_v47  ;;  %v13506_v63 = vadd.f32 %v13505_v2, %v13504_v22 }
 0x6ac   :  { %10736 = vst [vmem:[%s20660_s2 + $0x3c] sm:$0xff] %v12163_v35  ;;  %v12178_v33 = vpack.c.bf16 %v10328_v61, %v10328_v61  ;;  %v10875_v23 = vadd.f32 %v10874_v12, %v10328_v61  ;;  %v10939_v6 = vmul.f32 %v10328_v61, %v10328_v61 }
 0x6ad   :  { %v11038_v30 = vadd.f32 %v11037_v54, %v10917_v5  ;;  %v10331_v62 = vadd.f32 %v13506_v63, %v20353_v7  ;;  %v8345_v19 = vpop.f32.mrb[12].mxu0  ;;  %v13507_v1 = vpop.f32.mrb[220].mxu1 }
 0x6ae   :  { %10751 = vst [vmem:[%s20660_s2 + $0x98] sm:$0xf] %v12178_v33  ;;  %v11082_v17 = vadd.f32 %v11081_v28, %v10939_v6  ;;  %v10795_v57 = vadd.f32 %v10794_v21, %v8345_v19  ;;  %v10919_v37 = vmul.f32 %v8345_v19, %v8345_v19  ;;  %v8347_v52 = vpop.f32.mrb[13].mxu0  ;;  %v13508_v8 = vpop.f32.mrb[221].mxu1 }
 0x6af   :  { %v12180_v0 = vpack.c.bf16 %v10331_v62, %v10331_v62  ;;  %v10876_v46 = vadd.f32 %v10875_v23, %v10331_v62  ;;  %v10942_v45 = vmul.f32 %v10331_v62, %v10331_v62  ;;  %v12165_v36 = vpack.c.bf16 %v8347_v52, %v8345_v19  ;;  %v8349_v11 = vpop.f32.mrb[14].mxu0  ;;  %v13510_v16 = vpop.f32.mrb[222].mxu1 }
 0x6b0   :  { %v11002_v24 = vadd.f32 %v11001_v10, %v10919_v37  ;;  %v10832_v20 = vadd.f32 %v10831_v51, %v8347_v52  ;;  %v10920_v55 = vmul.f32 %v8347_v52, %v8347_v52  ;;  %v13509_v7 = vadd.f32 %v13508_v8, %v13507_v1  ;;  %v8351_v32 = vpop.f32.mrb[15].mxu0  ;;  %v13511_v42 = vpop.f32.mrb[223].mxu1 }
 0x6b1   :  { %10753 = vst [vmem:[%s20660_s2 + $0xa4] sm:$0xf] %v12180_v0  ;;  %v11083_v60 = vadd.f32 %v11082_v17, %v10942_v45  ;;  %10738 = vst [vmem:[%s20660_s2 + $0x48] sm:$0xff] %v12165_v36  ;;  %v10796_v12 = vadd.f32 %v10795_v57, %v8349_v11  ;;  %v10922_v38 = vmul.f32 %v8349_v11, %v8349_v11 }
 0x6b2   :  { %v12167_v44 = vpack.c.bf16 %v8351_v32, %v8349_v11  ;;  %v11039_v58 = vadd.f32 %v11038_v30, %v10920_v55  ;;  %v10336_v15 = vadd.f32 %v13509_v7, %v20356_v3  ;;  %v10833_v34 = vadd.f32 %v10832_v20, %v8351_v32 }
 0x6b3   :  { %v10923_v26 = vmul.f32 %v8351_v32, %v8351_v32  ;;  %v11003_v49 = vadd.f32 %v11002_v24, %v10922_v38  ;;  %v13512_v22 = vadd.f32 %v13511_v42, %v13510_v16 }
 0x6b4   :  { %10740 = vst [vmem:[%s20660_s2 + $0x54] sm:$0xff] %v12167_v44  ;;  %v12182_v4 = vpack.c.bf16 %v10336_v15, %v10336_v15  ;;  %v10877_v28 = vadd.f32 %v10876_v46, %v10336_v15  ;;  %v10945_v21 = vmul.f32 %v10336_v15, %v10336_v15 }
 0x6b5   :  { %v11040_v47 = vadd.f32 %v11039_v58, %v10923_v26  ;;  %v10339_v35 = vadd.f32 %v13512_v22, %v20359_v14  ;;  %v8355_v2 = vpop.f32.mrb[16].mxu0  ;;  %v13513_v51 = vpop.f32.mrb[224].mxu1 }
 0x6b6   :  { %10755 = vst [vmem:[%s20660_s2 + $0xb0] sm:$0xf] %v12182_v4  ;;  %v11084_v3 = vadd.f32 %v11083_v60, %v10945_v21  ;;  %v10797_v54 = vadd.f32 %v10796_v12, %v8355_v2  ;;  %v10925_v61 = vmul.f32 %v8355_v2, %v8355_v2  ;;  %v8357_v5 = vpop.f32.mrb[17].mxu0  ;;  %v13514_v6 = vpop.f32.mrb[225].mxu1 }
 0x6b7   :  { %v12184_v10 = vpack.c.bf16 %v10339_v35, %v10339_v35  ;;  %v10878_v63 = vadd.f32 %v10877_v28, %v10339_v35  ;;  %v10948_v33 = vmul.f32 %v10339_v35, %v10339_v35  ;;  %v12169_v23 = vpack.c.bf16 %v8357_v5, %v8355_v2  ;;  %v8359_v30 = vpop.f32.mrb[18].mxu0  ;;  %v13516_v57 = vpop.f32.mrb[226].mxu1 }
 0x6b8   :  { %v11004_v62 = vadd.f32 %v11003_v49, %v10925_v61  ;;  %v10834_v19 = vadd.f32 %v10833_v34, %v8357_v5  ;;  %v10926_v17 = vmul.f32 %v8357_v5, %v8357_v5  ;;  %v13515_v14 = vadd.f32 %v13514_v6, %v13513_v51  ;;  %v8361_v37 = vpop.f32.mrb[19].mxu0  ;;  %v13517_v45 = vpop.f32.mrb[227].mxu1 }
 0x6b9   :  { %10757 = vst [vmem:[%s20660_s2 + $0xbc] sm:$0xf] %v12184_v10  ;;  %v11085_v1 = vadd.f32 %v11084_v3, %v10948_v33  ;;  %10742 = vst [vmem:[%s20660_s2 + $0x60] sm:$0xff] %v12169_v23  ;;  %v10798_v52 = vadd.f32 %v10797_v54, %v8359_v30  ;;  %v10928_v0 = vmul.f32 %v8359_v30, %v8359_v30 }
 0x6ba   :  { %v12171_v46 = vpack.c.bf16 %v8361_v37, %v8359_v30  ;;  %v11041_v36 = vadd.f32 %v11040_v47, %v10926_v17  ;;  %v10344_v8 = vadd.f32 %v13515_v14, %v20362_v25  ;;  %v10835_v11 = vadd.f32 %v10834_v19, %v8361_v37 }
 0x6bb   :  { %v10929_v24 = vmul.f32 %v8361_v37, %v8361_v37  ;;  %v11005_v20 = vadd.f32 %v11004_v62, %v10928_v0  ;;  %v13518_v55 = vadd.f32 %v13517_v45, %v13516_v57 }
 0x6bc   :  { %10744 = vst [vmem:[%s20660_s2 + $0x6c] sm:$0xff] %v12171_v46  ;;  %v12186_v7 = vpack.c.bf16 %v10344_v8, %v10344_v8  ;;  %v10879_v16 = vadd.f32 %v10878_v63, %v10344_v8  ;;  %v10951_v32 = vmul.f32 %v10344_v8, %v10344_v8 }
 0x6bd   :  { %v11042_v60 = vadd.f32 %v11041_v36, %v10929_v24  ;;  %v10347_v12 = vadd.f32 %v13518_v55, %v20365_v27  ;;  %v8365_v38 = vpop.f32.mrb[20].mxu0  ;;  %v13519_v58 = vpop.f32.mrb[228].mxu1 }
 0x6be   :  { %10759 = vst [vmem:[%s20660_s2 + $0xc8] sm:$0xf] %v12186_v7  ;;  %v11086_v25 = vadd.f32 %v11085_v1, %v10951_v32  ;;  %v10799_v44 = vadd.f32 %v10798_v52, %v8365_v38  ;;  %v10931_v42 = vmul.f32 %v8365_v38, %v8365_v38  ;;  %v8367_v15 = vpop.f32.mrb[21].mxu0  ;;  %v13520_v4 = vpop.f32.mrb[229].mxu1 }
 0x6bf   :  { %v12188_v34 = vpack.c.bf16 %v10347_v12, %v10347_v12  ;;  %v10880_v26 = vadd.f32 %v10879_v16, %v10347_v12  ;;  %v10954_v49 = vmul.f32 %v10347_v12, %v10347_v12  ;;  %v12173_v22 = vpack.c.bf16 %v8367_v15, %v8365_v38  ;;  %v8369_v28 = vpop.f32.mrb[22].mxu0  ;;  %v13522_v2 = vpop.f32.mrb[230].mxu1 }
 0x6c0   :  { %v11006_v21 = vadd.f32 %v11005_v20, %v10931_v42  ;;  %v10836_v47 = vadd.f32 %v10835_v11, %v8367_v15  ;;  %v10932_v35 = vmul.f32 %v8367_v15, %v8367_v15  ;;  %v13521_v27 = vadd.f32 %v13520_v4, %v13519_v58  ;;  %v8371_v3 = vpop.f32.mrb[23].mxu0  ;;  %v13523_v10 = vpop.f32.mrb[231].mxu1 }
 0x6c1   :  { %10761 = vst [vmem:[%s20660_s2 + $0xd4] sm:$0xf] %v12188_v34  ;;  %v11087_v54 = vadd.f32 %v11086_v25, %v10954_v49  ;;  %10746 = vst [vmem:[%s20660_s2 + $0x78] sm:$0xff] %v12173_v22  ;;  %v10800_v61 = vadd.f32 %v10799_v44, %v8369_v28  ;;  %v10934_v51 = vmul.f32 %v8369_v28, %v8369_v28 }
 0x6c2   :  { %v12175_v5 = vpack.c.bf16 %v8371_v3, %v8369_v28  ;;  %v11043_v63 = vadd.f32 %v11042_v60, %v10932_v35  ;;  %v10352_v33 = vadd.f32 %v13521_v27, %v20368_v43  ;;  %v10837_v23 = vadd.f32 %v10836_v47, %v8371_v3 }
 0x6c3   :  { %v10935_v6 = vmul.f32 %v8371_v3, %v8371_v3  ;;  %v11007_v30 = vadd.f32 %v11006_v21, %v10934_v51  ;;  %v13524_v62 = vadd.f32 %v13523_v10, %v13522_v2 }
 0x6c4   :  { %10748 = vst [vmem:[%s20660_s2 + $0x84] sm:$0xff] %v12175_v5  ;;  %v12190_v19 = vpack.c.bf16 %v10352_v33, %v10352_v33  ;;  %v10881_v17 = vadd.f32 %v10880_v26, %v10352_v33  ;;  %v10957_v14 = vmul.f32 %v10352_v33, %v10352_v33 }
 0x6c5   :  { %v11044_v57 = vadd.f32 %v11043_v63, %v10935_v6  ;;  %v10355_v37 = vadd.f32 %v13524_v62, %v20371_v53  ;;  %v8375_v1 = vpop.f32.mrb[24].mxu0  ;;  %v13525_v46 = vpop.f32.mrb[232].mxu1 }
 0x6c6   :  { %10763 = vst [vmem:[%s20660_s2 + $0xe0] sm:$0xf] %v12190_v19  ;;  %v11088_v43 = vadd.f32 %v11087_v54, %v10957_v14  ;;  %v10801_v52 = vadd.f32 %v10800_v61, %v8375_v1  ;;  %v10937_v0 = vmul.f32 %v8375_v1, %v8375_v1  ;;  %v8377_v45 = vpop.f32.mrb[25].mxu0  ;;  %v13526_v20 = vpop.f32.mrb[233].mxu1 }
 0x6c7   :  { %v12192_v36 = vpack.c.bf16 %v10355_v37, %v10355_v37  ;;  %v10882_v8 = vadd.f32 %v10881_v17, %v10355_v37  ;;  %v10960_v11 = vmul.f32 %v10355_v37, %v10355_v37  ;;  %v12177_v24 = vpack.c.bf16 %v8377_v45, %v8375_v1  ;;  %v8379_v55 = vpop.f32.mrb[26].mxu0  ;;  %v13528_v60 = vpop.f32.mrb[234].mxu1 }
 0x6c8   :  { %v11008_v7 = vadd.f32 %v11007_v30, %v10937_v0  ;;  %v10838_v16 = vadd.f32 %v10837_v23, %v8377_v45  ;;  %v10938_v32 = vmul.f32 %v8377_v45, %v8377_v45  ;;  %v13527_v53 = vadd.f32 %v13526_v20, %v13525_v46  ;;  %v8381_v12 = vpop.f32.mrb[27].mxu0  ;;  %v13529_v58 = vpop.f32.mrb[235].mxu1 }
 0x6c9   :  { %10765 = vst [vmem:[%s20660_s2 + $0xec] sm:$0xf] %v12192_v36  ;;  %v11089_v38 = vadd.f32 %v11088_v43, %v10960_v11  ;;  %10750 = vst [vmem:[%s20660_s2 + $0x90] sm:$0xff] %v12177_v24  ;;  %v10802_v25 = vadd.f32 %v10801_v52, %v8379_v55  ;;  %v10940_v44 = vmul.f32 %v8379_v55, %v8379_v55 }
 0x6ca   :  { %v12179_v42 = vpack.c.bf16 %v8381_v12, %v8379_v55  ;;  %v11045_v15 = vadd.f32 %v11044_v57, %v10938_v32  ;;  %v10360_v34 = vadd.f32 %v13527_v53, %v20374_v41  ;;  %v10839_v26 = vadd.f32 %v10838_v16, %v8381_v12 }
 0x6cb   :  { %v10941_v49 = vmul.f32 %v8381_v12, %v8381_v12  ;;  %v11009_v22 = vadd.f32 %v11008_v7, %v10940_v44  ;;  %v13530_v4 = vadd.f32 %v13529_v58, %v13528_v60 }
 0x6cc   :  { %10752 = vst [vmem:[%s20660_s2 + $0x9c] sm:$0xff] %v12179_v42  ;;  %v12194_v28 = vpack.c.bf16 %v10360_v34, %v10360_v34  ;;  %v10883_v21 = vadd.f32 %v10882_v8, %v10360_v34  ;;  %v10963_v47 = vmul.f32 %v10360_v34, %v10360_v34 }
 0x6cd   :  { %v11046_v35 = vadd.f32 %v11045_v15, %v10941_v49  ;;  %v10363_v27 = vadd.f32 %v13530_v4, %v20377_v50  ;;  %v8385_v2 = vpop.f32.mrb[28].mxu0  ;;  %v13531_v61 = vpop.f32.mrb[236].mxu1 }
 0x6ce   :  { %10767 = vst [vmem:[%s20660_s2 + $0xf8] sm:$0xf] %v12194_v28  ;;  %v11090_v41 = vadd.f32 %v11089_v38, %v10963_v47  ;;  %v10803_v3 = vadd.f32 %v10802_v25, %v8385_v2  ;;  %v10943_v54 = vmul.f32 %v8385_v2, %v8385_v2  ;;  %v8387_v51 = vpop.f32.mrb[29].mxu0  ;;  %v13532_v23 = vpop.f32.mrb[237].mxu1 }
 0x6cf   :  { %v12196_v5 = vpack.c.bf16 %v10363_v27, %v10363_v27  ;;  %v10884_v10 = vadd.f32 %v10883_v21, %v10363_v27  ;;  %v10966_v63 = vmul.f32 %v10363_v27, %v10363_v27  ;;  %v12181_v33 = vpack.c.bf16 %v8387_v51, %v8385_v2  ;;  %v8389_v6 = vpop.f32.mrb[30].mxu0  ;;  %v13534_v17 = vpop.f32.mrb[238].mxu1 }
 0x6d0   :  { %v11010_v30 = vadd.f32 %v11009_v22, %v10943_v54  ;;  %v10840_v62 = vadd.f32 %v10839_v26, %v8387_v51  ;;  %v10944_v19 = vmul.f32 %v8387_v51, %v8387_v51  ;;  %v13533_v50 = vadd.f32 %v13532_v23, %v13531_v61  ;;  %v8391_v14 = vpop.f32.mrb[31].mxu0  ;;  %v13535_v52 = vpop.f32.mrb[239].mxu1 }
 0x6d1   :  { %10769 = vst [vmem:[%s20660_s2 + $0x104] sm:$0xf] %v12196_v5  ;;  %v11091_v57 = vadd.f32 %v11090_v41, %v10966_v63  ;;  %10754 = vst [vmem:[%s20660_s2 + $0xa8] sm:$0xff] %v12181_v33  ;;  %v10804_v37 = vadd.f32 %v10803_v3, %v8389_v6  ;;  %v10946_v1 = vmul.f32 %v8389_v6, %v8389_v6 }
 0x6d2   :  { %v12183_v43 = vpack.c.bf16 %v8391_v14, %v8389_v6  ;;  %v11047_v0 = vadd.f32 %v11046_v35, %v10944_v19  ;;  %v10368_v46 = vadd.f32 %v13533_v50, %v20380_v48  ;;  %v10841_v45 = vadd.f32 %v10840_v62, %v8391_v14 }
 0x6d3   :  { %v10947_v36 = vmul.f32 %v8391_v14, %v8391_v14  ;;  %v11011_v8 = vadd.f32 %v11010_v30, %v10946_v1  ;;  %v13536_v11 = vadd.f32 %v13535_v52, %v13534_v17 }
 0x6d4   :  { %10756 = vst [vmem:[%s20660_s2 + $0xb4] sm:$0xff] %v12183_v43  ;;  %v12198_v24 = vpack.c.bf16 %v10368_v46, %v10368_v46  ;;  %v10885_v20 = vadd.f32 %v10884_v10, %v10368_v46  ;;  %v10969_v55 = vmul.f32 %v10368_v46, %v10368_v46 }
 0x6d5   :  { %v11048_v7 = vadd.f32 %v11047_v0, %v10947_v36  ;;  %v10371_v16 = vadd.f32 %v13536_v11, %v20383_v39  ;;  %v8395_v32 = vpop.f32.mrb[32].mxu0  ;;  %v13537_v12 = vpop.f32.mrb[240].mxu1 }
 0x6d6   :  { %10771 = vst [vmem:[%s20660_s2 + $0x110] sm:$0xf] %v12198_v24  ;;  %v11092_v48 = vadd.f32 %v11091_v57, %v10969_v55  ;;  %v10805_v53 = vadd.f32 %v10804_v37, %v8395_v32  ;;  %v10949_v60 = vmul.f32 %v8395_v32, %v8395_v32  ;;  %v8397_v38 = vpop.f32.mrb[33].mxu0  ;;  %v13538_v15 = vpop.f32.mrb[241].mxu1 }
 0x6d7   :  { %v12200_v25 = vpack.c.bf16 %v10371_v16, %v10371_v16  ;;  %v10886_v44 = vadd.f32 %v10885_v20, %v10371_v16  ;;  %v10972_v42 = vmul.f32 %v10371_v16, %v10371_v16  ;;  %v12185_v58 = vpack.c.bf16 %v8397_v38, %v8395_v32  ;;  %v8399_v34 = vpop.f32.mrb[34].mxu0  ;;  %v13540_v4 = vpop.f32.mrb[242].mxu1 }
 0x6d8   :  { %v11012_v26 = vadd.f32 %v11011_v8, %v10949_v60  ;;  %v10842_v49 = vadd.f32 %v10841_v45, %v8397_v38  ;;  %v10950_v22 = vmul.f32 %v8397_v38, %v8397_v38  ;;  %v13539_v39 = vadd.f32 %v13538_v15, %v13537_v12  ;;  %v8401_v28 = vpop.f32.mrb[35].mxu0  ;;  %v13541_v2 = vpop.f32.mrb[243].mxu1 }
 0x6d9   :  { %10773 = vst [vmem:[%s20660_s2 + $0x11c] sm:$0xf] %v12200_v25  ;;  %v11093_v21 = vadd.f32 %v11092_v48, %v10972_v42  ;;  %10758 = vst [vmem:[%s20660_s2 + $0xc0] sm:$0xff] %v12185_v58  ;;  %v10806_v47 = vadd.f32 %v10805_v53, %v8399_v34  ;;  %v10952_v35 = vmul.f32 %v8399_v34, %v8399_v34 }
 0x6da   :  { %v12187_v27 = vpack.c.bf16 %v8401_v28, %v8399_v34  ;;  %v11049_v41 = vadd.f32 %v11048_v7, %v10950_v22  ;;  %v10376_v3 = vadd.f32 %v13539_v39, %v20386_v18  ;;  %v10843_v54 = vadd.f32 %v10842_v49, %v8401_v28 }
 0x6db   :  { %v10953_v61 = vmul.f32 %v8401_v28, %v8401_v28  ;;  %v11013_v51 = vadd.f32 %v11012_v26, %v10952_v35  ;;  %v13542_v5 = vadd.f32 %v13541_v2, %v13540_v4 }
 0x6dc   :  { %10760 = vst [vmem:[%s20660_s2 + $0xcc] sm:$0xff] %v12187_v27  ;;  %v12202_v10 = vpack.c.bf16 %v10376_v3, %v10376_v3  ;;  %v10887_v63 = vadd.f32 %v10886_v44, %v10376_v3  ;;  %v10975_v33 = vmul.f32 %v10376_v3, %v10376_v3 }
 0x6dd   :  { %v11050_v23 = vadd.f32 %v11049_v41, %v10953_v61  ;;  %v10379_v6 = vadd.f32 %v13542_v5, %v20389_v13  ;;  %v8405_v30 = vpop.f32.mrb[36].mxu0  ;;  %v13543_v50 = vpop.f32.mrb[244].mxu1 }
 0x6de   :  { %10775 = vst [vmem:[%s20660_s2 + $0x128] sm:$0xf] %v12202_v10  ;;  %v11094_v18 = vadd.f32 %v11093_v21, %v10975_v33  ;;  %v10807_v62 = vadd.f32 %v10806_v47, %v8405_v30  ;;  %v10955_v19 = vmul.f32 %v8405_v30, %v8405_v30  ;;  %v8407_v17 = vpop.f32.mrb[37].mxu0  ;;  %v13544_v43 = vpop.f32.mrb[245].mxu1 }
 0x6df   :  { %v12204_v14 = vpack.c.bf16 %v10379_v6, %v10379_v6  ;;  %v10888_v57 = vadd.f32 %v10887_v63, %v10379_v6  ;;  %v10978_v37 = vmul.f32 %v10379_v6, %v10379_v6  ;;  %v12189_v1 = vpack.c.bf16 %v8407_v17, %v8405_v30  ;;  %v8409_v52 = vpop.f32.mrb[38].mxu0  ;;  %v13546_v36 = vpop.f32.mrb[246].mxu1 }
 0x6e0   :  { %v11014_v0 = vadd.f32 %v11013_v51, %v10955_v19  ;;  %v10844_v46 = vadd.f32 %v10843_v54, %v8407_v17  ;;  %v10956_v45 = vmul.f32 %v8407_v17, %v8407_v17  ;;  %v13545_v13 = vadd.f32 %v13544_v43, %v13543_v50  ;;  %v8411_v8 = vpop.f32.mrb[39].mxu0  ;;  %v13547_v7 = vpop.f32.mrb[247].mxu1 }
 0x6e1   :  { %10777 = vst [vmem:[%s20660_s2 + $0x134] sm:$0xf] %v12204_v14  ;;  %v11095_v11 = vadd.f32 %v11094_v18, %v10978_v37  ;;  %10762 = vst [vmem:[%s20660_s2 + $0xd8] sm:$0xff] %v12189_v1  ;;  %v10808_v24 = vadd.f32 %v10807_v62, %v8409_v52  ;;  %v10958_v20 = vmul.f32 %v8409_v52, %v8409_v52 }
 0x6e2   :  { %v12191_v55 = vpack.c.bf16 %v8411_v8, %v8409_v52  ;;  %v11051_v16 = vadd.f32 %v11050_v23, %v10956_v45  ;;  %v10384_v32 = vadd.f32 %v13545_v13, %v20392_v9  ;;  %v10845_v48 = vadd.f32 %v10844_v46, %v8411_v8 }
 0x6e3   :  { %v10959_v53 = vmul.f32 %v8411_v8, %v8411_v8  ;;  %v11015_v60 = vadd.f32 %v11014_v0, %v10958_v20  ;;  %v13548_v12 = vadd.f32 %v13547_v7, %v13546_v36 }
 0x6e4   :  { %10764 = vst [vmem:[%s20660_s2 + $0xe4] sm:$0xff] %v12191_v55  ;;  %v12206_v38 = vpack.c.bf16 %v10384_v32, %v10384_v32  ;;  %v10889_v25 = vadd.f32 %v10888_v57, %v10384_v32  ;;  %v10981_v44 = vmul.f32 %v10384_v32, %v10384_v32 }
 0x6e5   :  { %v11052_v42 = vadd.f32 %v11051_v16, %v10959_v53  ;;  %v10387_v58 = vadd.f32 %v13548_v12, %v20395_v56  ;;  %v8415_v15 = vpop.f32.mrb[40].mxu0  ;;  %v13549_v49 = vpop.f32.mrb[248].mxu1 }
 0x6e6   :  { %10779 = vst [vmem:[%s20660_s2 + $0x140] sm:$0xf] %v12206_v38  ;;  %v11096_v9 = vadd.f32 %v11095_v11, %v10981_v44  ;;  %v10809_v34 = vadd.f32 %v10808_v24, %v8415_v15  ;;  %v10961_v26 = vmul.f32 %v8415_v15, %v8415_v15  ;;  %v8417_v22 = vpop.f32.mrb[41].mxu0  ;;  %v13550_v47 = vpop.f32.mrb[249].mxu1 }
 0x6e7   :  { %v12208_v39 = vpack.c.bf16 %v10387_v58, %v10387_v58  ;;  %v10890_v4 = vadd.f32 %v10889_v25, %v10387_v58  ;;  %v10984_v28 = vmul.f32 %v10387_v58, %v10387_v58  ;;  %v12193_v21 = vpack.c.bf16 %v8417_v22, %v8415_v15  ;;  %v8419_v35 = vpop.f32.mrb[42].mxu0  ;;  %v13552_v3 = vpop.f32.mrb[250].mxu1 }
 0x6e8   :  { %v11016_v27 = vadd.f32 %v11015_v60, %v10961_v26  ;;  %v10846_v2 = vadd.f32 %v10845_v48, %v8417_v22  ;;  %v10962_v41 = vmul.f32 %v8417_v22, %v8417_v22  ;;  %v13551_v56 = vadd.f32 %v13550_v47, %v13549_v49  ;;  %v8421_v54 = vpop.f32.mrb[43].mxu0  ;;  %v13553_v63 = vpop.f32.mrb[251].mxu1 }
 0x6e9   :  { %10781 = vst [vmem:[%s20660_s2 + $0x14c] sm:$0xf] %v12208_v39  ;;  %v11097_v61 = vadd.f32 %v11096_v9, %v10984_v28  ;;  %10766 = vst [vmem:[%s20660_s2 + $0xf0] sm:$0xff] %v12193_v21  ;;  %v10810_v51 = vadd.f32 %v10809_v34, %v8419_v35  ;;  %v10964_v5 = vmul.f32 %v8419_v35, %v8419_v35 }
 0x6ea   :  { %v12195_v10 = vpack.c.bf16 %v8421_v54, %v8419_v35  ;;  %v11053_v33 = vadd.f32 %v11052_v42, %v10962_v41  ;;  %v10392_v23 = vadd.f32 %v13551_v56, %v20398_v59  ;;  %v10847_v6 = vadd.f32 %v10846_v2, %v8421_v54 }
 0x6eb   :  { %v10965_v30 = vmul.f32 %v8421_v54, %v8421_v54  ;;  %v11017_v18 = vadd.f32 %v11016_v27, %v10964_v5  ;;  %v13554_v62 = vadd.f32 %v13553_v63, %v13552_v3 }
 0x6ec   :  { %10768 = vst [vmem:[%s20660_s2 + $0xfc] sm:$0xff] %v12195_v10  ;;  %v12210_v19 = vpack.c.bf16 %v10392_v23, %v10392_v23  ;;  %v10891_v50 = vadd.f32 %v10890_v4, %v10392_v23  ;;  %v10987_v17 = vmul.f32 %v10392_v23, %v10392_v23 }
 0x6ed   :  { %v11054_v14 = vadd.f32 %v11053_v33, %v10965_v30  ;;  %v10395_v57 = vadd.f32 %v13554_v62, %v20401_v31  ;;  %v8425_v37 = vpop.f32.mrb[44].mxu0  ;;  %v13555_v52 = vpop.f32.mrb[252].mxu1  ;;  %v11108_v30 = vlaneseq }
 0x6ee   :  { %10783 = vst [vmem:[%s20660_s2 + $0x158] sm:$0xf] %v12210_v19  ;;  %v11098_v59 = vadd.f32 %v11097_v61, %v10987_v17  ;;  %v10811_v1 = vadd.f32 %v10810_v51, %v8425_v37  ;;  %v10967_v43 = vmul.f32 %v8425_v37, %v8425_v37  ;;  %v8427_v0 = vpop.f32.mrb[45].mxu0  ;;  %v13556_v8 = vpop.f32.mrb[253].mxu1 }
 0x6ef   :  { %v12212_v46 = vpack.c.bf16 %v10395_v57, %v10395_v57  ;;  %v10892_v45 = vadd.f32 %v10891_v50, %v10395_v57  ;;  %v10990_v13 = vmul.f32 %v10395_v57, %v10395_v57  ;;  %v12197_v36 = vpack.c.bf16 %v8427_v0, %v8425_v37  ;;  %v8429_v11 = vpop.f32.mrb[46].mxu0  ;;  %v13558_v7 = vpop.f32.mrb[254].mxu1 }
 0x6f0   :  { %v11018_v24 = vadd.f32 %v11017_v18, %v10967_v43  ;;  %v10848_v20 = vadd.f32 %v10847_v6, %v8427_v0  ;;  %v10968_v55 = vmul.f32 %v8427_v0, %v8427_v0  ;;  %v13557_v31 = vadd.f32 %v13556_v8, %v13555_v52  ;;  %v8431_v16 = vpop.f32.mrb[47].mxu0  ;;  %v13559_v12 = vpop.f32.mrb[255].mxu1 }
 0x6f1   :  { %10785 = vst [vmem:[%s20660_s2 + $0x164] sm:$0xf] %v12212_v46  ;;  %v11099_v32 = vadd.f32 %v11098_v59, %v10990_v13  ;;  %10770 = vst [vmem:[%s20660_s2 + $0x108] sm:$0xff] %v12197_v36  ;;  %v10812_v48 = vadd.f32 %v10811_v1, %v8429_v11  ;;  %v10970_v53 = vmul.f32 %v8429_v11, %v8429_v11  ;;  %v20615_v43 = vshrl.u32 %v11108_v30, 7 }
 0x6f2   :  { %v12199_v60 = vpack.c.bf16 %v8431_v16, %v8429_v11  ;;  %v11055_v38 = vadd.f32 %v11054_v14, %v10968_v55  ;;  %v10400_v25 = vadd.f32 %v13557_v31, %v20404_v29  ;;  %v10849_v44 = vadd.f32 %v10848_v20, %v8431_v16 }
 0x6f3   :  { %v10971_v42 = vmul.f32 %v8431_v16, %v8431_v16  ;;  %v11019_v58 = vadd.f32 %v11018_v24, %v10970_v53  ;;  %v13560_v15 = vadd.f32 %v13559_v12, %v13558_v7  ;;  %vm11111_vm0 = vcmp.eq.s32.totalorder %v20615_v43, 1 }
 0x6f4   :  { %10772 = vst [vmem:[%s20660_s2 + $0x114] sm:$0xff] %v12199_v60  ;;  %v12214_v9 = vpack.c.bf16 %v10400_v25, %v10400_v25  ;;  %v10893_v34 = vadd.f32 %v10892_v45, %v10400_v25  ;;  %v10993_v26 = vmul.f32 %v10400_v25, %v10400_v25  ;;  %vm11110_vm1 = vcmp.eq.s32.totalorder %v20615_v43, 0 }
 0x6f5   :  { %v11056_v49 = vadd.f32 %v11055_v38, %v10971_v42  ;;  %v10403_v22 = vadd.f32 %v13560_v15, %v20407_v40  ;;  %v8435_v39 = vpop.f32.mrb[48].mxu0 }
 0x6f6   :  { %10787 = vst [vmem:[%s20660_s2 + $0x170] sm:$0xf] %v12214_v9  ;;  %v11100_v29 = vadd.f32 %v11099_v32, %v10993_v26  ;;  %v10813_v4 = vadd.f32 %v10812_v48, %v8435_v39  ;;  %v10973_v28 = vmul.f32 %v8435_v39, %v8435_v39  ;;  %v8437_v21 = vpop.f32.mrb[49].mxu0 }
 0x6f7   :  { %v12216_v47 = vpack.c.bf16 %v10403_v22, %v10403_v22  ;;  %v10894_v35 = vadd.f32 %v10893_v34, %v10403_v22  ;;  %v10996_v27 = vmul.f32 %v10403_v22, %v10403_v22  ;;  %v12201_v2 = vpack.c.bf16 %v8437_v21, %v8435_v39  ;;  %v8439_v41 = vpop.f32.mrb[50].mxu0 }
 0x6f8   :  { %v11020_v56 = vadd.f32 %v11019_v58, %v10973_v28  ;;  %v10850_v3 = vadd.f32 %v10849_v44, %v8437_v21  ;;  %v10974_v54 = vmul.f32 %v8437_v21, %v8437_v21  ;;  %v10814_v61 = vadd.f32 %v10813_v4, %v8439_v41  ;;  %v8441_v51 = vpop.f32.mrb[51].mxu0 }
 0x6f9   :  { %10789 = vst [vmem:[%s20660_s2 + $0x17c] sm:$0xf] %v12216_v47  ;;  %v10895_v40 = vrot.slane %v10894_v35, 4  ;;  %v11101_v5 = vadd.f32 %v11100_v29, %v10996_v27  ;;  %10774 = vst [vmem:[%s20660_s2 + $0x120] sm:$0xff] %v12201_v2  ;;  %v10976_v10 = vmul.f32 %v8439_v41, %v8439_v41  ;;  %v12203_v63 = vpack.c.bf16 %v8441_v51, %v8439_v41 }
 0x6fa   :  { %v11057_v33 = vadd.f32 %v11056_v49, %v10974_v54  ;;  %v10851_v23 = vadd.f32 %v10850_v3, %v8441_v51  ;;  %v10977_v6 = vmul.f32 %v8441_v51, %v8441_v51 }
 0x6fb   :  { %v10896_v18 = vadd.f32 %v10895_v40, %v10894_v35  ;;  %v11102_v62 = vrot.slane %v11101_v5, 4  ;;  %v11021_v19 = vadd.f32 %v11020_v56, %v10976_v10  ;;  %10776 = vst [vmem:[%s20660_s2 + $0x12c] sm:$0xff] %v12203_v63 }
 0x6fc   :  { %v11058_v50 = vadd.f32 %v11057_v33, %v10977_v6 }
 0x6fd   :  { %v10897_v17 = vrot.slane %v10896_v18, 2  ;;  %v11103_v14 = vadd.f32 %v11102_v62, %v11101_v5  ;;  %v8445_v57 = vpop.f32.mrb[52].mxu0 }
 0x6fe   :  { %v10815_v37 = vadd.f32 %v10814_v61, %v8445_v57  ;;  %v10979_v59 = vmul.f32 %v8445_v57, %v8445_v57  ;;  %v8447_v1 = vpop.f32.mrb[53].mxu0 }
 0x6ff   :  { %v10898_v52 = vadd.f32 %v10897_v17, %v10896_v18  ;;  %v11104_v0 = vrot.slane %v11103_v14, 2  ;;  %v12205_v46 = vpack.c.bf16 %v8447_v1, %v8445_v57  ;;  %v10852_v45 = vadd.f32 %v10851_v23, %v8447_v1  ;;  %v8449_v13 = vpop.f32.mrb[54].mxu0 }
 0x700   :  { %v11022_v36 = vadd.f32 %v11021_v19, %v10979_v59  ;;  %v10980_v8 = vmul.f32 %v8447_v1, %v8447_v1  ;;  %v10816_v11 = vadd.f32 %v10815_v37, %v8449_v13  ;;  %v10982_v24 = vmul.f32 %v8449_v13, %v8449_v13  ;;  %v8451_v20 = vpop.f32.mrb[55].mxu0 }
 0x701   :  { %v11105_v55 = vadd.f32 %v11104_v0, %v11103_v14  ;;  %10778 = vst [vmem:[%s20660_s2 + $0x138] sm:$0xff] %v12205_v46  ;;  %v12207_v31 = vpack.c.bf16 %v8451_v20, %v8449_v13  ;;  %v10853_v7 = vadd.f32 %v10852_v45, %v8451_v20  ;;  %v10899_v16 = vrot.slane %v10898_v52, 1 }
 0x702   :  { %v11059_v32 = vadd.f32 %v11058_v50, %v10980_v8  ;;  %v11023_v48 = vadd.f32 %v11022_v36, %v10982_v24  ;;  %v10983_v53 = vmul.f32 %v8451_v20, %v8451_v20 }
 0x703   :  { %v11106_v60 = vrot.slane %v11105_v55, 1  ;;  %10780 = vst [vmem:[%s20660_s2 + $0x144] sm:$0xff] %v12207_v31  ;;  %v10900_v44 = vadd.f32 %v10899_v16, %v10898_v52 }
 0x704   :  { %v11060_v12 = vadd.f32 %v11059_v32, %v10983_v53 }
 0x705   :  { %v11107_v38 = vadd.f32 %v11106_v60, %v11105_v55  ;;  %v8455_v25 = vpop.f32.mrb[56].mxu0 }
 0x706   :  { %v10817_v42 = vadd.f32 %v10816_v11, %v8455_v25  ;;  %v10985_v58 = vmul.f32 %v8455_v25, %v8455_v25  ;;  %v8457_v15 = vpop.f32.mrb[57].mxu0 }
 0x707   :  { %v12209_v9 = vpack.c.bf16 %v8457_v15, %v8455_v25  ;;  %v10854_v34 = vadd.f32 %v10853_v7, %v8457_v15  ;;  %v10986_v26 = vmul.f32 %v8457_v15, %v8457_v15  ;;  %v8459_v49 = vpop.f32.mrb[58].mxu0  ;;  %v11114_v22 = vsel %vm11111_vm0, %v11107_v38, 0.0 }
 0x708   :  { %v11024_v39 = vadd.f32 %v11023_v48, %v10985_v58  ;;  %v10818_v29 = vadd.f32 %v10817_v42, %v8459_v49  ;;  %v10988_v4 = vmul.f32 %v8459_v49, %v8459_v49  ;;  %v8461_v28 = vpop.f32.mrb[59].mxu0  ;;  %v11117_v21 = vsel %vm11110_vm1, %v10900_v44, %v11114_v22 }
 0x709   :  { %10782 = vst [vmem:[%s20660_s2 + $0x150] sm:$0xff] %v12209_v9  ;;  %v11061_v47 = vadd.f32 %v11060_v12, %v10986_v26  ;;  %v12211_v35 = vpack.c.bf16 %v8461_v28, %v8459_v49  ;;  %v10855_v27 = vadd.f32 %v10854_v34, %v8461_v28  ;;  %v10989_v2 = vmul.f32 %v8461_v28, %v8461_v28 }
 0x70a   :  { %11120 = vst [vmem:[%s20661_s3 + $0x10] sm:$0xff] %v11117_v21  ;;  %v11025_v41 = vadd.f32 %v11024_v39, %v10988_v4 }
 0x70b   :  { %10784 = vst [vmem:[%s20660_s2 + $0x15c] sm:$0xff] %v12211_v35  ;;  %v11062_v56 = vadd.f32 %v11061_v47, %v10989_v2 }
 0x70d   :  { %v8465_v3 = vpop.f32.mrb[60].mxu0 }
 0x70e   :  { %v10819_v54 = vadd.f32 %v10818_v29, %v8465_v3  ;;  %v10991_v61 = vmul.f32 %v8465_v3, %v8465_v3  ;;  %v8467_v51 = vpop.f32.mrb[61].mxu0 }
 0x70f   :  { %v12213_v40 = vpack.c.bf16 %v8467_v51, %v8465_v3  ;;  %v10856_v5 = vadd.f32 %v10855_v27, %v8467_v51  ;;  %v10992_v10 = vmul.f32 %v8467_v51, %v8467_v51  ;;  %v8469_v63 = vpop.f32.mrb[62].mxu0 }
 0x710   :  { %v11026_v33 = vadd.f32 %v11025_v41, %v10991_v61  ;;  %v10820_v23 = vadd.f32 %v10819_v54, %v8469_v63  ;;  %v10994_v6 = vmul.f32 %v8469_v63, %v8469_v63  ;;  %v8471_v30 = vpop.f32.mrb[63].mxu0 }
 0x711   :  { %10786 = vst [vmem:[%s20660_s2 + $0x168] sm:$0xff] %v12213_v40  ;;  %v11063_v18 = vadd.f32 %v11062_v56, %v10992_v10  ;;  %v12215_v62 = vpack.c.bf16 %v8471_v30, %v8469_v63  ;;  %v10857_v19 = vadd.f32 %v10856_v5, %v8471_v30  ;;  %v10995_v50 = vmul.f32 %v8471_v30, %v8471_v30 }
 0x712   :  { %v10821_v17 = vrot.slane %v10820_v23, 4  ;;  %v11027_v14 = vadd.f32 %v11026_v33, %v10994_v6 }
 0x713   :  { %10788 = vst [vmem:[%s20660_s2 + $0x174] sm:$0xff] %v12215_v62  ;;  %v10858_v57 = vrot.slane %v10857_v19, 4  ;;  %v11064_v37 = vadd.f32 %v11063_v18, %v10995_v50 }
 0x714   :  { %v10822_v59 = vadd.f32 %v10821_v17, %v10820_v23  ;;  %v11028_v1 = vrot.slane %v11027_v14, 4 }
 0x715   :  { %v10859_v52 = vadd.f32 %v10858_v57, %v10857_v19  ;;  %v11065_v0 = vrot.slane %v11064_v37, 4 }
 0x716   :  { %v10823_v46 = vrot.slane %v10822_v59, 2  ;;  %v11029_v45 = vadd.f32 %v11028_v1, %v11027_v14 }
 0x717   :  { %v10860_v13 = vrot.slane %v10859_v52, 2  ;;  %v11066_v36 = vadd.f32 %v11065_v0, %v11064_v37 }
 0x718   :  { %v10824_v8 = vadd.f32 %v10823_v46, %v10822_v59  ;;  %v11030_v11 = vrot.slane %v11029_v45, 2 }
 0x719   :  { %v10861_v24 = vadd.f32 %v10860_v13, %v10859_v52  ;;  %v11067_v20 = vrot.slane %v11066_v36, 2 }
 0x71a   :  { %v11031_v55 = vadd.f32 %v11030_v11, %v11029_v45  ;;  %v10825_v31 = vrot.slane %v10824_v8, 1 }
 0x71b   :  { %v11068_v7 = vadd.f32 %v11067_v20, %v11066_v36  ;;  %v10862_v32 = vrot.slane %v10861_v24, 1 }
 0x71c   :  { %v11032_v16 = vrot.slane %v11031_v55, 1  ;;  %v10826_v60 = vadd.f32 %v10825_v31, %v10824_v8 }
 0x71d   :  { %v11069_v48 = vrot.slane %v11068_v7, 1  ;;  %v10863_v25 = vadd.f32 %v10862_v32, %v10861_v24 }
 0x71e   :  { %v11033_v53 = vadd.f32 %v11032_v16, %v11031_v55 }
 0x71f   :  { %v11070_v12 = vadd.f32 %v11069_v48, %v11068_v7 }
 0x720   :  { %v11112_v38 = vsel %vm11111_vm0, %v11033_v53, 0.0 }
 0x721   :  { %v11115_v44 = vsel %vm11110_vm1, %v10826_v60, %v11112_v38  ;;  %v11113_v42 = vsel %vm11111_vm0, %v11070_v12, 0.0 }
 0x722   :  { %11118 = vst [vmem:[%s20661_s3] sm:$0xff] %v11115_v44  ;;  %v11116_v58 = vsel %vm11110_vm1, %v10863_v25, %v11113_v42 }
 0x723   :  { %11119 = vst [vmem:[%s20661_s3 + $0x8] sm:$0xff] %v11116_v58 }

</bundles_post_ra>
